<compile_context>
chip_gen: v5e
topology: v5e:2x2
jax: 0.10.0
libtpu: 0.0.40
codegen_flags: <defaults>
</compile_context>

<pallas_src>
import functools

import jax
import jax.numpy as jnp
import numpy as np
from jax.experimental import pallas as pl
from jax.experimental.pallas import tpu as pltpu


# ----------------------------------------------------------------------------
# Pallas kernel
# ----------------------------------------------------------------------------
def _feature_volume_kernel(pose_ref, xyz_ref, pix_ref, fw1_ref,
                           b1_ref, w2_ref, b2_ref, w3_ref, b3_ref,
                           out_ref, hs_ref, *, NV, H, W, sample_dtype):
    xyz_t = xyz_ref[...]                        # [4, NT]
    NT = xyz_t.shape[1]
    OC = w3_ref.shape[0]                        # 8

    # --- project all NV views at once on the MXU: [PR, 4] @ [4, NT] -> [PR, NT]
    proj = jnp.dot(pose_ref[0], xyz_t, preferred_element_type=jnp.float32)
    xh = proj[0:NV]                             # [NV, NT]
    yh = proj[NV:2 * NV]
    zh = proj[2 * NV:3 * NV]

    valid_z = zh > 0.0
    zh_safe = jnp.where(jnp.abs(zh) < 1e-12, 1e-12, zh)    # NaN/Inf guard
    inv_z = 1.0 / zh_safe          # exact divide: pixel coords feed the mask/weights
    px = (xh * inv_z + 1.0) * ((W - 1) * 0.5)               # pixel coords [NV, NT]
    py = (yh * inv_z + 1.0) * ((H - 1) * 0.5)
    inb = (px >= 0.0) & (px <= W - 1.0) & (py >= 0.0) & (py <= H - 1.0)
    mask = (inb & valid_z).astype(jnp.float32)              # [NV, NT]
    pxc = jnp.clip(px, 0.0, W - 1.0)
    pyc = jnp.clip(py, 0.0, H - 1.0)

    # precomputed flat-pixel coordinate columns (constant, streamed once)
    row_x = pix_ref[0]                          # [HW, 1]
    row_y = pix_ref[1]                          # [HW, 1]

    # --- per-view bilinear sampling as an MXU matmul against S [HW, NT];
    #     results written straight into the hs VMEM scratch slab (no concat).
    for v in range(NV):                         # NV is small & static -> unrolled
        # separable "tent" weights == border-clamped bilinear for in-range points
        sx = jnp.maximum(1.0 - jnp.abs(row_x - pxc[v:v + 1, :]), 0.0)   # [HW, NT]
        sy = jnp.maximum(1.0 - jnp.abs(row_y - pyc[v:v + 1, :]), 0.0)
        s = (sx * sy).astype(sample_dtype)
        # fw1_ref[0, v] = (F_v @ W1)^T : [C2, HW]   (Linear-1 folded in wrapper)
        hs_ref[:, v * NT:(v + 1) * NT] = jnp.dot(
            fw1_ref[0, v], s, preferred_element_type=jnp.float32)       # [C2, NT]

    # --- MLP batched over all views: [C2, NV*NT] (single bias add per layer)
    h = jnp.maximum(hs_ref[...] + b1_ref[...], 0.0)
    h = jnp.maximum(jnp.dot(w2_ref[...], h, preferred_element_type=jnp.float32)
                    + b2_ref[...], 0.0)                                  # [16, NV*NT]
    h = jnp.dot(w3_ref[...], h, preferred_element_type=jnp.float32) + b3_ref[...]  # [8, NV*NT]

    # --- mask-normalized weighted mean / variance over views
    #     (approx reciprocal is safe here: denominator is a view count)
    inv_cnt = pl.reciprocal(jnp.sum(mask, axis=0, keepdims=True) + 1e-8,
                            approx=True)                                 # [1, NT]
    wts = mask * inv_cnt                                                 # [NV, NT]

    mean = wts[0:1, :] * h[:, 0:NT]
    for v in range(1, NV):
        mean = mean + wts[v:v + 1, :] * h[:, v * NT:(v + 1) * NT]
    var = jnp.zeros_like(mean)                  # two-pass variance (numerically safer)
    for v in range(NV):
        d = h[:, v * NT:(v + 1) * NT] - mean
        var = var + wts[v:v + 1, :] * (d * d)

    # lane-dense output: mean -> channels 0:OC, var -> channels OC:2*OC
    out_ref[0, 0:OC, :] = mean
    out_ref[0, OC:2 * OC, :] = var


# ----------------------------------------------------------------------------
# Grid construction helpers
# ----------------------------------------------------------------------------
def _make_xyz_homo_kernel_order(reso):
    """Homogeneous voxel coords [4, N], ordered z-slowest / x-fastest so the flat
    N axis maps directly onto the (Z, Y, X) output layout (no final transpose)."""
    line = np.linspace(0, reso - 1, reso) * 2.0 / (reso - 1) - 1.0
    zg, yg, xg = np.meshgrid(line, line, line, indexing='ij')   # axes (Z, Y, X)
    xyz = np.stack([xg, yg, zg]).reshape(3, -1)
    homo = np.concatenate([xyz, np.ones_like(xyz[:1])], axis=0)  # [4, N]
    return jnp.asarray(homo, dtype=jnp.float32)


def _make_xyz_homo_torch_order(reso):
    """Homogeneous voxel coords [N, 4] in the original torch ordering (x-slowest)."""
    line = np.linspace(0, reso - 1, reso) * 2.0 / (reso - 1) - 1.0
    x, y, z = np.meshgrid(line, line, line, indexing='ij')
    xyz = np.stack([x, y, z]).reshape(3, -1)
    homo = np.concatenate([xyz, np.ones_like(xyz[:1])], axis=0)
    return jnp.asarray(homo.T, dtype=jnp.float32)


# ----------------------------------------------------------------------------
# Wrapper
# ----------------------------------------------------------------------------
def feature_volume_forward(feats, source_poses, params, volume_reso, *,
                           n_tile=2048, sample_in_bf16=True):
    """
    feats:        [B, NV, C=32, H, W]  (PyTorch NCHW per view)
    source_poses: [B, NV, 3, 4]
    returns:      [B, 16, Z, Y, X]  (mean|var volume, pre-regularization)
    """
    B, NV, C, H, W = feats.shape
    HW = H * W
    N = volume_reso ** 3
    n_tile = min(n_tile, N)
    # keep >= 2 grid steps so both v7x TensorCores get work (no-op when B >= 2)
    while (B * (N // n_tile) < 2 and n_tile > 128
           and n_tile % 256 == 0 and N % (n_tile // 2) == 0):
        n_tile //= 2
    assert N % n_tile == 0 and n_tile % 128 == 0, (N, n_tile)

    w1, b1, w2, b2, w3, b3 = params
    C2 = w1.shape[1]           # 32
    M2 = w2.shape[1]           # 16
    OC = w3.shape[1]           # 8
    sample_dtype = jnp.bfloat16 if sample_in_bf16 else jnp.float32

    # Fold Linear-1 into the per-view feature maps (exact: bias added after
    # sampling).  Channel-major [C2, HW] matches the transposed kernel layout.
    feats_flat = feats.reshape(B, NV, C, HW).astype(jnp.float32)
    fw1_t = jnp.einsum('bvck,co->bvok', feats_flat, w1).astype(sample_dtype)  # [B,NV,C2,HW]

    # Poses stacked as rows i*NV + v (x-rows, then y-rows, then z-rows),
    # padded only on the row axis -> [PR, 4].
    poses_mat = jnp.transpose(source_poses.astype(jnp.float32),
                              (0, 2, 1, 3)).reshape(B, 3 * NV, 4)
    PR = ((3 * NV + 7) // 8) * 8
    poses_pad = jnp.zeros((B, PR, 4), jnp.float32).at[:, :3 * NV, :].set(poses_mat)

    xyz_t = _make_xyz_homo_kernel_order(volume_reso)                # [4, N]

    # Flat-pixel coordinate columns (x = k % W, y = k // W), computed once here.
    kk = np.arange(HW)
    pix = jnp.asarray(np.stack([kk % W, kk // W]).astype(np.float32)
                      .reshape(2, HW, 1))                           # [2, HW, 1]

    # Transposed MLP weights / biases for the [channels, points] layout.
    b1_t = jnp.reshape(b1, (C2, 1))
    w2_t = jnp.transpose(w2)                                        # [16, 32]
    b2_t = jnp.reshape(b2, (M2, 1))
    w3_t = jnp.transpose(w3)                                        # [8, 16]
    b3_t = jnp.reshape(b3, (OC, 1))

    # Explicit VMEM budget (feedback: scales linearly with n_tile / HW).
    fw1_bytes = 2 if sample_in_bf16 else 4
    vmem_est = (2 * NV * C2 * HW * fw1_bytes            # fw1 double buffer
                + 2 * HW * n_tile * 4                   # transient S tiles
                + (2 * C2 + M2 + OC) * NV * n_tile * 4  # hs scratch + activations
                + 2 * (4 + 2 * OC) * n_tile * 4         # xyz / output buffers
                + (2 << 20))                            # headroom
    vmem_limit = int(min(max(vmem_est, 32 * 1024 * 1024), 64 * 1024 * 1024))

    kernel = functools.partial(_feature_volume_kernel, NV=NV, H=H, W=W,
                               sample_dtype=sample_dtype)
    grid = (B, N // n_tile)

    out = pl.pallas_call(
        kernel,
        out_shape=jax.ShapeDtypeStruct((B, 2 * OC, N), jnp.float32),
        grid_spec=pltpu.PrefetchScalarGridSpec(
            num_scalar_prefetch=0,
            grid=grid,
            in_specs=[
                pl.BlockSpec((1, PR, 4), lambda b, n: (b, 0, 0)),         # poses (padded rows)
                pl.BlockSpec((4, n_tile), lambda b, n: (0, n)),           # xyz homo^T
                pl.BlockSpec((2, HW, 1), lambda b, n: (0, 0, 0)),         # pixel coord columns
                pl.BlockSpec((1, NV, C2, HW), lambda b, n: (b, 0, 0, 0)), # (F @ W1)^T
                pl.BlockSpec((C2, 1), lambda b, n: (0, 0)),               # b1
                pl.BlockSpec((M2, C2), lambda b, n: (0, 0)),              # W2^T
                pl.BlockSpec((M2, 1), lambda b, n: (0, 0)),               # b2
                pl.BlockSpec((OC, M2), lambda b, n: (0, 0)),              # W3^T
                pl.BlockSpec((OC, 1), lambda b, n: (0, 0)),               # b3
            ],
            out_specs=pl.BlockSpec((1, 2 * OC, n_tile), lambda b, n: (b, 0, n)),
            scratch_shapes=[pltpu.VMEM((C2, NV * n_tile), jnp.float32)],  # hs slab
        ),
        compiler_params=pltpu.CompilerParams(
            dimension_semantics=("parallel", "parallel"),
            vmem_limit_bytes=vmem_limit),
    )(poses_pad, xyz_t, pix, fw1_t, b1_t, w2_t, b2_t, w3_t, b3_t)

    # Flat N axis already maps to (Z, Y, X) == torch's permute(0, 4, 3, 2, 1).
    vol = out.reshape(B, 2 * OC, volume_reso, volume_reso, volume_reso)
    # TODO(synk): VolumeRegularization (3D conv U-Net) is not defined in the
    # reference snippet; the pre-regularization mean/var volume is returned.
    return vol


# ----------------------------------------------------------------------------
# Pure-JAX reference (independent gather-based path, torch point ordering)
# ----------------------------------------------------------------------------
def reference_forward(feats, poses, params, reso):
    w1, b1, w2, b2, w3, b3 = params
    B, NV, C, H, W = feats.shape
    xyz_homo = _make_xyz_homo_torch_order(reso)                     # [N, 4]
    N = xyz_homo.shape[0]
    proj = jnp.einsum('bvik,nk->bvin', poses, xyz_homo)             # [B,NV,3,N]
    xh, yh, zh = proj[:, :, 0], proj[:, :, 1], proj[:, :, 2]
    valid_z = (zh > 0).astype(jnp.float32)
    px = (xh / zh + 1.0) * (W - 1) * 0.5
    py = (yh / zh + 1.0) * (H - 1) * 0.5
    inb = ((px >= 0) & (px <= W - 1) & (py >= 0) & (py <= H - 1)).astype(jnp.float32)
    mask = inb * valid_z                                            # [B,NV,N]

    x0 = jnp.floor(px); y0 = jnp.floor(py)
    x1 = x0 + 1.0;      y1 = y0 + 1.0
    w00 = (x1 - px) * (y1 - py); w01 = (px - x0) * (y1 - py)
    w10 = (x1 - px) * (py - y0); w11 = (px - x0) * (py - y0)
    x0c = jnp.clip(x0, 0, W - 1).astype(jnp.int32)
    x1c = jnp.clip(x1, 0, W - 1).astype(jnp.int32)
    y0c = jnp.clip(y0, 0, H - 1).astype(jnp.int32)
    y1c = jnp.clip(y1, 0, H - 1).astype(jnp.int32)

    feat_flat = feats.reshape(B, NV, C, H * W)

    def gather(yc, xc):
        idx = yc * W + xc
        idx = jnp.broadcast_to(idx[:, :, None, :], (B, NV, C, N))
        return jnp.take_along_axis(feat_flat, idx, axis=3)

    samp = (w00[:, :, None] * gather(y0c, x0c) + w01[:, :, None] * gather(y0c, x1c)
            + w10[:, :, None] * gather(y1c, x0c) + w11[:, :, None] * gather(y1c, x1c))
    vf = jnp.transpose(samp, (0, 1, 3, 2))                          # [B,NV,N,C]

    h = jax.nn.relu(vf @ w1 + b1[0])
    h = jax.nn.relu(h @ w2 + b2[0])
    h = h @ w3 + b3[0]                                              # [B,NV,N,8]

    wt = mask / (jnp.sum(mask, axis=1, keepdims=True) + 1e-8)
    mean = jnp.sum(h * wt[..., None], axis=1)                       # [B,N,8]
    var = jnp.sum(wt[..., None] * (h - mean[:, None]) ** 2, axis=1)
    out = jnp.concatenate([mean, var], axis=-1)                     # [B,N,16]
    vol = out.reshape(B, reso, reso, reso, 16)                      # [B,X,Y,Z,16]
    return jnp.transpose(vol, (0, 4, 3, 2, 1))                      # [B,16,Z,Y,X]


def init_params(key):
    ks = jax.random.split(key, 6)
    # nn.Linear weights, stored transposed as [in, out]
    w1 = jax.random.normal(ks[0], (32, 32), jnp.float32) / jnp.sqrt(32.0)
    b1 = 0.05 * jax.random.normal(ks[1], (1, 32), jnp.float32)
    w2 = jax.random.normal(ks[2], (32, 16), jnp.float32) / jnp.sqrt(32.0)
    b2 = 0.05 * jax.random.normal(ks[3], (1, 16), jnp.float32)
    w3 = jax.random.normal(ks[4], (16, 8), jnp.float32) / jnp.sqrt(16.0)
    b3 = 0.05 * jax.random.normal(ks[5], (1, 8), jnp.float32)
    return (w1, b1, w2, b2, w3, b3)


if __name__ == "__main__":
    key = jax.random.PRNGKey(0)
    B, NV, C, H, W = 2, 3, 32, 16, 16
    volume_reso = 8

    kf, kp1, kp2, kp3, kparam = jax.random.split(key, 5)
    feats = jax.random.normal(kf, (B, NV, C, H, W), jnp.float32)

    # synthetic projection matrices [B, NV, 3, 4] with strictly positive depth
    rows01 = (jnp.broadcast_to(
        jnp.array([[2.0, 0.0, 0.0, 0.0],
                   [0.0, 2.0, 0.0, 0.0]], jnp.float32), (B, NV, 2, 4))
        + 0.3 * jax.random.normal(kp1, (B, NV, 2, 4), jnp.float32))
    row2_xyz = 0.05 * jax.random.normal(kp2, (B, NV, 1, 3), jnp.float32)
    row2_t = 3.0 + 0.2 * jnp.abs(jax.random.normal(kp3, (B, NV, 1, 1), jnp.float32))
    row2 = jnp.concatenate([row2_xyz, row2_t], axis=-1)
    source_poses = jnp.concatenate([rows01, row2], axis=2)          # [B,NV,3,4]

    params = init_params(kparam)

    # f32 sampling path: tight check of layout / indexing / projection math
    out_f32 = feature_volume_forward(feats, source_poses, params, volume_reso,
                                     sample_in_bf16=False)
    # bf16 MXU-input fast path (production default per perf review)
    out_bf16 = feature_volume_forward(feats, source_poses, params, volume_reso,
                                      sample_in_bf16=True)
    out_f32, out_bf16 = jax.block_until_ready((out_f32, out_bf16))

    ref = reference_forward(feats, source_poses, params, volume_reso)
    assert out_f32.shape == (B, 16, volume_reso, volume_reso, volume_reso), out_f32.shape
    assert out_bf16.shape == out_f32.shape, out_bf16.shape

    err_f32 = float(jnp.max(jnp.abs(out_f32 - ref)))
    # 5e-3 (not 1e-3): wts uses the EUP approx-reciprocal per the perf review.
    assert err_f32 < 5e-3, f"f32 path max abs error vs reference = {err_f32}"

    # bf16 MXU inputs: tolerance relaxed per review's correctness note.
    err_bf16 = float(jnp.max(jnp.abs(out_bf16 - ref)))
    assert err_bf16 < 5e-2, f"bf16 path max abs error vs reference = {err_bf16}"

    print("KERNEL_OK")
</pallas_src>

<mosaic_0001>
module attributes {stable_mosaic.version = 11 : i64} {
  func.func @_feature_volume_kernel(%arg0: i32, %arg1: i32, %arg2: memref<1x16x4xf32, #tpu.memory_space<vmem>>, %arg3: memref<4x512xf32, #tpu.memory_space<vmem>>, %arg4: memref<2x256x1xf32, #tpu.memory_space<vmem>>, %arg5: memref<1x3x32x256xf32, #tpu.memory_space<vmem>>, %arg6: memref<32x1xf32, #tpu.memory_space<vmem>>, %arg7: memref<16x32xf32, #tpu.memory_space<vmem>>, %arg8: memref<16x1xf32, #tpu.memory_space<vmem>>, %arg9: memref<8x16xf32, #tpu.memory_space<vmem>>, %arg10: memref<8x1xf32, #tpu.memory_space<vmem>>, %arg11: memref<1x16x512xf32, #tpu.memory_space<vmem>>, %arg12: memref<32x1536xf32, #tpu.memory_space<vmem>>) attributes {dimension_semantics = [#tpu.dimension_semantics<parallel>, #tpu.dimension_semantics<parallel>], iteration_bounds = array<i64: 2, 1>, scalar_prefetch = 0 : i64, scratch_operands = 1 : i64, tpu.core_type = #tpu.core_type<tc>, window_params = [{transform_indices = @transform_0, window_bounds = array<i64: 1, 16, 4>}, {transform_indices = @transform_1, window_bounds = array<i64: 4, 512>}, {pipeline_mode = #tpu.pipeline_mode<synchronous>, transform_indices = @transform_2, window_bounds = array<i64: 2, 256, 1>}, {transform_indices = @transform_3, window_bounds = array<i64: 1, 3, 32, 256>}, {pipeline_mode = #tpu.pipeline_mode<synchronous>, transform_indices = @transform_4, window_bounds = array<i64: 32, 1>}, {pipeline_mode = #tpu.pipeline_mode<synchronous>, transform_indices = @transform_5, window_bounds = array<i64: 16, 32>}, {pipeline_mode = #tpu.pipeline_mode<synchronous>, transform_indices = @transform_6, window_bounds = array<i64: 16, 1>}, {pipeline_mode = #tpu.pipeline_mode<synchronous>, transform_indices = @transform_7, window_bounds = array<i64: 8, 16>}, {pipeline_mode = #tpu.pipeline_mode<synchronous>, transform_indices = @transform_8, window_bounds = array<i64: 8, 1>}, {transform_indices = @transform_9, window_bounds = array<i64: 1, 16, 512>}]} {
    %c0 = arith.constant 0 : index
    %c0_0 = arith.constant 0 : index
    %0 = vector.load %arg3[%c0, %c0_0] : memref<4x512xf32, #tpu.memory_space<vmem>>, vector<4x512xf32>
    %c0_1 = arith.constant 0 : index
    %c0_2 = arith.constant 0 : index
    %c0_3 = arith.constant 0 : index
    %1 = vector.load %arg2[%c0_1, %c0_2, %c0_3] : memref<1x16x4xf32, #tpu.memory_space<vmem>>, vector<1x16x4xf32>
    %2 = vector.shape_cast %1 : vector<1x16x4xf32> to vector<16x4xf32>
    %cst = arith.constant dense<0.000000e+00> : vector<16x512xf32>
    %3 = tpu.matmul %2, %0, %cst {dimension_numbers = #tpu.dot_dimension_numbers<[1], [0], [0], [1], [0, 0, 1, 1], [], []>} : vector<16x4xf32>, vector<4x512xf32>, vector<16x512xf32> -> vector<16x512xf32>
    %4 = vector.extract_strided_slice %3 {offsets = [0, 0], sizes = [3, 512], strides = [1, 1]} : vector<16x512xf32> to vector<3x512xf32>
    %5 = vector.extract_strided_slice %3 {offsets = [3, 0], sizes = [3, 512], strides = [1, 1]} : vector<16x512xf32> to vector<3x512xf32>
    %6 = vector.extract_strided_slice %3 {offsets = [6, 0], sizes = [3, 512], strides = [1, 1]} : vector<16x512xf32> to vector<3x512xf32>
    %cst_4 = arith.constant 0.000000e+00 : f32
    %7 = vector.broadcast %cst_4 : f32 to vector<3x512xf32>
    %8 = arith.cmpf ogt, %6, %7 : vector<3x512xf32>
    %9 = math.absf %6 : vector<3x512xf32>
    %cst_5 = arith.constant 9.99999996E-13 : f32
    %10 = vector.broadcast %cst_5 : f32 to vector<3x512xf32>
    %11 = arith.cmpf olt, %9, %10 : vector<3x512xf32>
    %cst_6 = arith.constant 9.99999996E-13 : f32
    %12 = vector.broadcast %cst_6 : f32 to vector<3x512xf32>
    %13 = arith.select %11, %12, %6 : vector<3x512xi1>, vector<3x512xf32>
    %cst_7 = arith.constant 1.000000e+00 : f32
    %14 = vector.broadcast %cst_7 : f32 to vector<3x512xf32>
    %15 = arith.divf %14, %13 : vector<3x512xf32>
    %16 = arith.mulf %4, %15 : vector<3x512xf32>
    %cst_8 = arith.constant 1.000000e+00 : f32
    %17 = vector.broadcast %cst_8 : f32 to vector<3x512xf32>
    %18 = arith.addf %16, %17 : vector<3x512xf32>
    %cst_9 = arith.constant 7.500000e+00 : f32
    %19 = vector.broadcast %cst_9 : f32 to vector<3x512xf32>
    %20 = arith.mulf %18, %19 : vector<3x512xf32>
    %21 = arith.mulf %5, %15 : vector<3x512xf32>
    %cst_10 = arith.constant 1.000000e+00 : f32
    %22 = vector.broadcast %cst_10 : f32 to vector<3x512xf32>
    %23 = arith.addf %21, %22 : vector<3x512xf32>
    %cst_11 = arith.constant 7.500000e+00 : f32
    %24 = vector.broadcast %cst_11 : f32 to vector<3x512xf32>
    %25 = arith.mulf %23, %24 : vector<3x512xf32>
    %cst_12 = arith.constant 0.000000e+00 : f32
    %26 = vector.broadcast %cst_12 : f32 to vector<3x512xf32>
    %27 = arith.cmpf oge, %20, %26 : vector<3x512xf32>
    %cst_13 = arith.constant 1.500000e+01 : f32
    %28 = vector.broadcast %cst_13 : f32 to vector<3x512xf32>
    %29 = arith.cmpf ole, %20, %28 : vector<3x512xf32>
    %30 = arith.andi %27, %29 : vector<3x512xi1>
    %cst_14 = arith.constant 0.000000e+00 : f32
    %31 = vector.broadcast %cst_14 : f32 to vector<3x512xf32>
    %32 = arith.cmpf oge, %25, %31 : vector<3x512xf32>
    %33 = arith.andi %30, %32 : vector<3x512xi1>
    %cst_15 = arith.constant 1.500000e+01 : f32
    %34 = vector.broadcast %cst_15 : f32 to vector<3x512xf32>
    %35 = arith.cmpf ole, %25, %34 : vector<3x512xf32>
    %36 = arith.andi %33, %35 : vector<3x512xi1>
    %37 = arith.andi %36, %8 : vector<3x512xi1>
    %38 = arith.extui %37 : vector<3x512xi1> to vector<3x512xi32>
    %39 = arith.sitofp %38 : vector<3x512xi32> to vector<3x512xf32>
    %cst_16 = arith.constant 0.000000e+00 : f32
    %cst_17 = arith.constant 1.500000e+01 : f32
    %40 = vector.broadcast %cst_16 : f32 to vector<3x512xf32>
    %41 = arith.maximumf %40, %20 : vector<3x512xf32>
    %42 = vector.broadcast %cst_17 : f32 to vector<3x512xf32>
    %43 = arith.minimumf %42, %41 : vector<3x512xf32>
    %cst_18 = arith.constant 0.000000e+00 : f32
    %cst_19 = arith.constant 1.500000e+01 : f32
    %44 = vector.broadcast %cst_18 : f32 to vector<3x512xf32>
    %45 = arith.maximumf %44, %25 : vector<3x512xf32>
    %46 = vector.broadcast %cst_19 : f32 to vector<3x512xf32>
    %47 = arith.minimumf %46, %45 : vector<3x512xf32>
    %c0_20 = arith.constant 0 : index
    %c0_21 = arith.constant 0 : index
    %c0_22 = arith.constant 0 : index
    %48 = vector.load %arg4[%c0_20, %c0_21, %c0_22] : memref<2x256x1xf32, #tpu.memory_space<vmem>>, vector<1x256x1xf32>
    %49 = vector.shape_cast %48 : vector<1x256x1xf32> to vector<256x1xf32>
    %c1 = arith.constant 1 : index
    %c0_23 = arith.constant 0 : index
    %c0_24 = arith.constant 0 : index
    %50 = vector.load %arg4[%c1, %c0_23, %c0_24] : memref<2x256x1xf32, #tpu.memory_space<vmem>>, vector<1x256x1xf32>
    %51 = vector.shape_cast %50 : vector<1x256x1xf32> to vector<256x1xf32>
    %52 = vector.extract_strided_slice %43 {offsets = [0, 0], sizes = [1, 512], strides = [1, 1]} : vector<3x512xf32> to vector<1x512xf32>
    %53 = vector.broadcast %49 : vector<256x1xf32> to vector<256x512xf32>
    %54 = vector.broadcast %52 : vector<1x512xf32> to vector<256x512xf32>
    %55 = arith.subf %53, %54 : vector<256x512xf32>
    %56 = math.absf %55 : vector<256x512xf32>
    %cst_25 = arith.constant 1.000000e+00 : f32
    %57 = vector.broadcast %cst_25 : f32 to vector<256x512xf32>
    %58 = arith.subf %57, %56 : vector<256x512xf32>
    %cst_26 = arith.constant 0.000000e+00 : f32
    %59 = vector.broadcast %cst_26 : f32 to vector<256x512xf32>
    %60 = arith.maximumf %58, %59 : vector<256x512xf32>
    %61 = vector.extract_strided_slice %47 {offsets = [0, 0], sizes = [1, 512], strides = [1, 1]} : vector<3x512xf32> to vector<1x512xf32>
    %62 = vector.broadcast %51 : vector<256x1xf32> to vector<256x512xf32>
    %63 = vector.broadcast %61 : vector<1x512xf32> to vector<256x512xf32>
    %64 = arith.subf %62, %63 : vector<256x512xf32>
    %65 = math.absf %64 : vector<256x512xf32>
    %cst_27 = arith.constant 1.000000e+00 : f32
    %66 = vector.broadcast %cst_27 : f32 to vector<256x512xf32>
    %67 = arith.subf %66, %65 : vector<256x512xf32>
    %cst_28 = arith.constant 0.000000e+00 : f32
    %68 = vector.broadcast %cst_28 : f32 to vector<256x512xf32>
    %69 = arith.maximumf %67, %68 : vector<256x512xf32>
    %70 = arith.mulf %60, %69 : vector<256x512xf32>
    %c0_29 = arith.constant 0 : index
    %c0_30 = arith.constant 0 : index
    %c0_31 = arith.constant 0 : index
    %c0_32 = arith.constant 0 : index
    %71 = vector.load %arg5[%c0_29, %c0_30, %c0_31, %c0_32] : memref<1x3x32x256xf32, #tpu.memory_space<vmem>>, vector<1x1x32x256xf32>
    %72 = vector.shape_cast %71 : vector<1x1x32x256xf32> to vector<32x256xf32>
    %cst_33 = arith.constant dense<0.000000e+00> : vector<32x512xf32>
    %73 = tpu.matmul %72, %70, %cst_33 {dimension_numbers = #tpu.dot_dimension_numbers<[1], [0], [0], [1], [0, 0, 1, 1], [], []>} : vector<32x256xf32>, vector<256x512xf32>, vector<32x512xf32> -> vector<32x512xf32>
    %c0_34 = arith.constant 0 : index
    %c0_35 = arith.constant 0 : index
    %74 = vector.load %arg12[%c0_34, %c0_35] : memref<32x1536xf32, #tpu.memory_space<vmem>>, vector<32x512xf32>
    tpu.vector_store %arg12[%c0_34, %c0_35], %73 {strides = array<i32>} : memref<32x1536xf32, #tpu.memory_space<vmem>>, vector<32x512xf32>,
    %75 = vector.extract_strided_slice %43 {offsets = [1, 0], sizes = [1, 512], strides = [1, 1]} : vector<3x512xf32> to vector<1x512xf32>
    %76 = vector.broadcast %49 : vector<256x1xf32> to vector<256x512xf32>
    %77 = vector.broadcast %75 : vector<1x512xf32> to vector<256x512xf32>
    %78 = arith.subf %76, %77 : vector<256x512xf32>
    %79 = math.absf %78 : vector<256x512xf32>
    %cst_36 = arith.constant 1.000000e+00 : f32
    %80 = vector.broadcast %cst_36 : f32 to vector<256x512xf32>
    %81 = arith.subf %80, %79 : vector<256x512xf32>
    %cst_37 = arith.constant 0.000000e+00 : f32
    %82 = vector.broadcast %cst_37 : f32 to vector<256x512xf32>
    %83 = arith.maximumf %81, %82 : vector<256x512xf32>
    %84 = vector.extract_strided_slice %47 {offsets = [1, 0], sizes = [1, 512], strides = [1, 1]} : vector<3x512xf32> to vector<1x512xf32>
    %85 = vector.broadcast %51 : vector<256x1xf32> to vector<256x512xf32>
    %86 = vector.broadcast %84 : vector<1x512xf32> to vector<256x512xf32>
    %87 = arith.subf %85, %86 : vector<256x512xf32>
    %88 = math.absf %87 : vector<256x512xf32>
    %cst_38 = arith.constant 1.000000e+00 : f32
    %89 = vector.broadcast %cst_38 : f32 to vector<256x512xf32>
    %90 = arith.subf %89, %88 : vector<256x512xf32>
    %cst_39 = arith.constant 0.000000e+00 : f32
    %91 = vector.broadcast %cst_39 : f32 to vector<256x512xf32>
    %92 = arith.maximumf %90, %91 : vector<256x512xf32>
    %93 = arith.mulf %83, %92 : vector<256x512xf32>
    %c0_40 = arith.constant 0 : index
    %c1_41 = arith.constant 1 : index
    %c0_42 = arith.constant 0 : index
    %c0_43 = arith.constant 0 : index
    %94 = vector.load %arg5[%c0_40, %c1_41, %c0_42, %c0_43] : memref<1x3x32x256xf32, #tpu.memory_space<vmem>>, vector<1x1x32x256xf32>
    %95 = vector.shape_cast %94 : vector<1x1x32x256xf32> to vector<32x256xf32>
    %cst_44 = arith.constant dense<0.000000e+00> : vector<32x512xf32>
    %96 = tpu.matmul %95, %93, %cst_44 {dimension_numbers = #tpu.dot_dimension_numbers<[1], [0], [0], [1], [0, 0, 1, 1], [], []>} : vector<32x256xf32>, vector<256x512xf32>, vector<32x512xf32> -> vector<32x512xf32>
    %c0_45 = arith.constant 0 : index
    %c512 = arith.constant 512 : index
    %97 = vector.load %arg12[%c0_45, %c512] : memref<32x1536xf32, #tpu.memory_space<vmem>>, vector<32x512xf32>
    tpu.vector_store %arg12[%c0_45, %c512], %96 {strides = array<i32>} : memref<32x1536xf32, #tpu.memory_space<vmem>>, vector<32x512xf32>,
    %98 = vector.extract_strided_slice %43 {offsets = [2, 0], sizes = [1, 512], strides = [1, 1]} : vector<3x512xf32> to vector<1x512xf32>
    %99 = vector.broadcast %49 : vector<256x1xf32> to vector<256x512xf32>
    %100 = vector.broadcast %98 : vector<1x512xf32> to vector<256x512xf32>
    %101 = arith.subf %99, %100 : vector<256x512xf32>
    %102 = math.absf %101 : vector<256x512xf32>
    %cst_46 = arith.constant 1.000000e+00 : f32
    %103 = vector.broadcast %cst_46 : f32 to vector<256x512xf32>
    %104 = arith.subf %103, %102 : vector<256x512xf32>
    %cst_47 = arith.constant 0.000000e+00 : f32
    %105 = vector.broadcast %cst_47 : f32 to vector<256x512xf32>
    %106 = arith.maximumf %104, %105 : vector<256x512xf32>
    %107 = vector.extract_strided_slice %47 {offsets = [2, 0], sizes = [1, 512], strides = [1, 1]} : vector<3x512xf32> to vector<1x512xf32>
    %108 = vector.broadcast %51 : vector<256x1xf32> to vector<256x512xf32>
    %109 = vector.broadcast %107 : vector<1x512xf32> to vector<256x512xf32>
    %110 = arith.subf %108, %109 : vector<256x512xf32>
    %111 = math.absf %110 : vector<256x512xf32>
    %cst_48 = arith.constant 1.000000e+00 : f32
    %112 = vector.broadcast %cst_48 : f32 to vector<256x512xf32>
    %113 = arith.subf %112, %111 : vector<256x512xf32>
    %cst_49 = arith.constant 0.000000e+00 : f32
    %114 = vector.broadcast %cst_49 : f32 to vector<256x512xf32>
    %115 = arith.maximumf %113, %114 : vector<256x512xf32>
    %116 = arith.mulf %106, %115 : vector<256x512xf32>
    %c0_50 = arith.constant 0 : index
    %c2 = arith.constant 2 : index
    %c0_51 = arith.constant 0 : index
    %c0_52 = arith.constant 0 : index
    %117 = vector.load %arg5[%c0_50, %c2, %c0_51, %c0_52] : memref<1x3x32x256xf32, #tpu.memory_space<vmem>>, vector<1x1x32x256xf32>
    %118 = vector.shape_cast %117 : vector<1x1x32x256xf32> to vector<32x256xf32>
    %cst_53 = arith.constant dense<0.000000e+00> : vector<32x512xf32>
    %119 = tpu.matmul %118, %116, %cst_53 {dimension_numbers = #tpu.dot_dimension_numbers<[1], [0], [0], [1], [0, 0, 1, 1], [], []>} : vector<32x256xf32>, vector<256x512xf32>, vector<32x512xf32> -> vector<32x512xf32>
    %c0_54 = arith.constant 0 : index
    %c1024 = arith.constant 1024 : index
    %120 = vector.load %arg12[%c0_54, %c1024] : memref<32x1536xf32, #tpu.memory_space<vmem>>, vector<32x512xf32>
    tpu.vector_store %arg12[%c0_54, %c1024], %119 {strides = array<i32>} : memref<32x1536xf32, #tpu.memory_space<vmem>>, vector<32x512xf32>,
    %c0_55 = arith.constant 0 : index
    %c0_56 = arith.constant 0 : index
    %121 = vector.load %arg12[%c0_55, %c0_56] : memref<32x1536xf32, #tpu.memory_space<vmem>>, vector<32x1536xf32>
    %c0_57 = arith.constant 0 : index
    %c0_58 = arith.constant 0 : index
    %122 = vector.load %arg6[%c0_57, %c0_58] : memref<32x1xf32, #tpu.memory_space<vmem>>, vector<32x1xf32>
    %123 = vector.broadcast %122 : vector<32x1xf32> to vector<32x1536xf32>
    %124 = arith.addf %121, %123 : vector<32x1536xf32>
    %cst_59 = arith.constant 0.000000e+00 : f32
    %125 = vector.broadcast %cst_59 : f32 to vector<32x1536xf32>
    %126 = arith.maximumf %124, %125 : vector<32x1536xf32>
    %c0_60 = arith.constant 0 : index
    %c0_61 = arith.constant 0 : index
    %127 = vector.load %arg7[%c0_60, %c0_61] : memref<16x32xf32, #tpu.memory_space<vmem>>, vector<16x32xf32>
    %cst_62 = arith.constant dense<0.000000e+00> : vector<16x1536xf32>
    %128 = tpu.matmul %127, %126, %cst_62 {dimension_numbers = #tpu.dot_dimension_numbers<[1], [0], [0], [1], [0, 0, 1, 1], [], []>} : vector<16x32xf32>, vector<32x1536xf32>, vector<16x1536xf32> -> vector<16x1536xf32>
    %c0_63 = arith.constant 0 : index
    %c0_64 = arith.constant 0 : index
    %129 = vector.load %arg8[%c0_63, %c0_64] : memref<16x1xf32, #tpu.memory_space<vmem>>, vector<16x1xf32>
    %130 = vector.broadcast %129 : vector<16x1xf32> to vector<16x1536xf32>
    %131 = arith.addf %128, %130 : vector<16x1536xf32>
    %cst_65 = arith.constant 0.000000e+00 : f32
    %132 = vector.broadcast %cst_65 : f32 to vector<16x1536xf32>
    %133 = arith.maximumf %131, %132 : vector<16x1536xf32>
    %c0_66 = arith.constant 0 : index
    %c0_67 = arith.constant 0 : index
    %134 = vector.load %arg9[%c0_66, %c0_67] : memref<8x16xf32, #tpu.memory_space<vmem>>, vector<8x16xf32>
    %cst_68 = arith.constant dense<0.000000e+00> : vector<8x1536xf32>
    %135 = tpu.matmul %134, %133, %cst_68 {dimension_numbers = #tpu.dot_dimension_numbers<[1], [0], [0], [1], [0, 0, 1, 1], [], []>} : vector<8x16xf32>, vector<16x1536xf32>, vector<8x1536xf32> -> vector<8x1536xf32>
    %c0_69 = arith.constant 0 : index
    %c0_70 = arith.constant 0 : index
    %136 = vector.load %arg10[%c0_69, %c0_70] : memref<8x1xf32, #tpu.memory_space<vmem>>, vector<8x1xf32>
    %137 = vector.broadcast %136 : vector<8x1xf32> to vector<8x1536xf32>
    %138 = arith.addf %135, %137 : vector<8x1536xf32>
    %cst_71 = arith.constant dense<0.000000e+00> : vector<512xf32>
    %139 = vector.multi_reduction <add>, %39, %cst_71 [0] : vector<3x512xf32> to vector<512xf32>
    %140 = vector.shape_cast %139 : vector<512xf32> to vector<1x512xf32>
    %cst_72 = arith.constant 9.99999993E-9 : f32
    %141 = vector.broadcast %cst_72 : f32 to vector<1x512xf32>
    %142 = arith.addf %140, %141 : vector<1x512xf32>
    %143 = tpu.reciprocal %142 {approx = true} : vector<1x512xf32> -> vector<1x512xf32>
    %144 = vector.broadcast %143 : vector<1x512xf32> to vector<3x512xf32>
    %145 = arith.mulf %39, %144 : vector<3x512xf32>
    %146 = vector.extract_strided_slice %145 {offsets = [0, 0], sizes = [1, 512], strides = [1, 1]} : vector<3x512xf32> to vector<1x512xf32>
    %147 = vector.extract_strided_slice %138 {offsets = [0, 0], sizes = [8, 512], strides = [1, 1]} : vector<8x1536xf32> to vector<8x512xf32>
    %148 = vector.broadcast %146 : vector<1x512xf32> to vector<8x512xf32>
    %149 = arith.mulf %148, %147 : vector<8x512xf32>
    %150 = vector.extract_strided_slice %145 {offsets = [1, 0], sizes = [1, 512], strides = [1, 1]} : vector<3x512xf32> to vector<1x512xf32>
    %151 = vector.extract_strided_slice %138 {offsets = [0, 512], sizes = [8, 512], strides = [1, 1]} : vector<8x1536xf32> to vector<8x512xf32>
    %152 = vector.broadcast %150 : vector<1x512xf32> to vector<8x512xf32>
    %153 = arith.mulf %152, %151 : vector<8x512xf32>
    %154 = arith.addf %149, %153 : vector<8x512xf32>
    %155 = vector.extract_strided_slice %145 {offsets = [2, 0], sizes = [1, 512], strides = [1, 1]} : vector<3x512xf32> to vector<1x512xf32>
    %156 = vector.extract_strided_slice %138 {offsets = [0, 1024], sizes = [8, 512], strides = [1, 1]} : vector<8x1536xf32> to vector<8x512xf32>
    %157 = vector.broadcast %155 : vector<1x512xf32> to vector<8x512xf32>
    %158 = arith.mulf %157, %156 : vector<8x512xf32>
    %159 = arith.addf %154, %158 : vector<8x512xf32>
    %cst_73 = arith.constant 0.000000e+00 : f32
    %160 = vector.broadcast %cst_73 : f32 to vector<8x512xf32>
    %161 = vector.extract_strided_slice %138 {offsets = [0, 0], sizes = [8, 512], strides = [1, 1]} : vector<8x1536xf32> to vector<8x512xf32>
    %162 = arith.subf %161, %159 : vector<8x512xf32>
    %163 = vector.extract_strided_slice %145 {offsets = [0, 0], sizes = [1, 512], strides = [1, 1]} : vector<3x512xf32> to vector<1x512xf32>
    %164 = arith.mulf %162, %162 : vector<8x512xf32>
    %165 = vector.broadcast %163 : vector<1x512xf32> to vector<8x512xf32>
    %166 = arith.mulf %165, %164 : vector<8x512xf32>
    %167 = arith.addf %160, %166 : vector<8x512xf32>
    %168 = vector.extract_strided_slice %138 {offsets = [0, 512], sizes = [8, 512], strides = [1, 1]} : vector<8x1536xf32> to vector<8x512xf32>
    %169 = arith.subf %168, %159 : vector<8x512xf32>
    %170 = vector.extract_strided_slice %145 {offsets = [1, 0], sizes = [1, 512], strides = [1, 1]} : vector<3x512xf32> to vector<1x512xf32>
    %171 = arith.mulf %169, %169 : vector<8x512xf32>
    %172 = vector.broadcast %170 : vector<1x512xf32> to vector<8x512xf32>
    %173 = arith.mulf %172, %171 : vector<8x512xf32>
    %174 = arith.addf %167, %173 : vector<8x512xf32>
    %175 = vector.extract_strided_slice %138 {offsets = [0, 1024], sizes = [8, 512], strides = [1, 1]} : vector<8x1536xf32> to vector<8x512xf32>
    %176 = arith.subf %175, %159 : vector<8x512xf32>
    %177 = vector.extract_strided_slice %145 {offsets = [2, 0], sizes = [1, 512], strides = [1, 1]} : vector<3x512xf32> to vector<1x512xf32>
    %178 = arith.mulf %176, %176 : vector<8x512xf32>
    %179 = vector.broadcast %177 : vector<1x512xf32> to vector<8x512xf32>
    %180 = arith.mulf %179, %178 : vector<8x512xf32>
    %181 = arith.addf %174, %180 : vector<8x512xf32>
    %c0_74 = arith.constant 0 : index
    %c0_75 = arith.constant 0 : index
    %c0_76 = arith.constant 0 : index
    %182 = vector.load %arg11[%c0_74, %c0_75, %c0_76] : memref<1x16x512xf32, #tpu.memory_space<vmem>>, vector<1x8x512xf32>
    %183 = vector.shape_cast %182 : vector<1x8x512xf32> to vector<8x512xf32>
    %184 = vector.shape_cast %159 : vector<8x512xf32> to vector<1x8x512xf32>
    tpu.vector_store %arg11[%c0_74, %c0_75, %c0_76], %184 {strides = array<i32>} : memref<1x16x512xf32, #tpu.memory_space<vmem>>, vector<1x8x512xf32>,
    %c0_77 = arith.constant 0 : index
    %c8 = arith.constant 8 : index
    %c0_78 = arith.constant 0 : index
    %185 = vector.load %arg11[%c0_77, %c8, %c0_78] : memref<1x16x512xf32, #tpu.memory_space<vmem>>, vector<1x8x512xf32>
    %186 = vector.shape_cast %185 : vector<1x8x512xf32> to vector<8x512xf32>
    %187 = vector.shape_cast %181 : vector<8x512xf32> to vector<1x8x512xf32>
    tpu.vector_store %arg11[%c0_77, %c8, %c0_78], %187 {strides = array<i32>} : memref<1x16x512xf32, #tpu.memory_space<vmem>>, vector<1x8x512xf32>,
    return
  }
  func.func @transform_0(%arg0: i32, %arg1: i32) -> (i32, i32, i32) {
    %c0_i32 = arith.constant 0 : i32
    %c0_i32_0 = arith.constant 0 : i32
    %c0_i32_1 = arith.constant 0 : i32
    return %arg0, %c0_i32, %c0_i32_0 : i32, i32, i32
  }
  func.func @transform_1(%arg0: i32, %arg1: i32) -> (i32, i32) {
    %c0_i32 = arith.constant 0 : i32
    %c0_i32_0 = arith.constant 0 : i32
    return %c0_i32, %arg1 : i32, i32
  }
  func.func @transform_2(%arg0: i32, %arg1: i32) -> (i32, i32, i32) {
    %c0_i32 = arith.constant 0 : i32
    %c0_i32_0 = arith.constant 0 : i32
    %c0_i32_1 = arith.constant 0 : i32
    %c0_i32_2 = arith.constant 0 : i32
    return %c0_i32, %c0_i32_0, %c0_i32_1 : i32, i32, i32
  }
  func.func @transform_3(%arg0: i32, %arg1: i32) -> (i32, i32, i32, i32) {
    %c0_i32 = arith.constant 0 : i32
    %c0_i32_0 = arith.constant 0 : i32
    %c0_i32_1 = arith.constant 0 : i32
    %c0_i32_2 = arith.constant 0 : i32
    return %arg0, %c0_i32, %c0_i32_0, %c0_i32_1 : i32, i32, i32, i32
  }
  func.func @transform_4(%arg0: i32, %arg1: i32) -> (i32, i32) {
    %c0_i32 = arith.constant 0 : i32
    %c0_i32_0 = arith.constant 0 : i32
    %c0_i32_1 = arith.constant 0 : i32
    return %c0_i32, %c0_i32_0 : i32, i32
  }
  func.func @transform_5(%arg0: i32, %arg1: i32) -> (i32, i32) {
    %c0_i32 = arith.constant 0 : i32
    %c0_i32_0 = arith.constant 0 : i32
    %c0_i32_1 = arith.constant 0 : i32
    return %c0_i32, %c0_i32_0 : i32, i32
  }
  func.func @transform_6(%arg0: i32, %arg1: i32) -> (i32, i32) {
    %c0_i32 = arith.constant 0 : i32
    %c0_i32_0 = arith.constant 0 : i32
    %c0_i32_1 = arith.constant 0 : i32
    return %c0_i32, %c0_i32_0 : i32, i32
  }
  func.func @transform_7(%arg0: i32, %arg1: i32) -> (i32, i32) {
    %c0_i32 = arith.constant 0 : i32
    %c0_i32_0 = arith.constant 0 : i32
    %c0_i32_1 = arith.constant 0 : i32
    return %c0_i32, %c0_i32_0 : i32, i32
  }
  func.func @transform_8(%arg0: i32, %arg1: i32) -> (i32, i32) {
    %c0_i32 = arith.constant 0 : i32
    %c0_i32_0 = arith.constant 0 : i32
    %c0_i32_1 = arith.constant 0 : i32
    return %c0_i32, %c0_i32_0 : i32, i32
  }
  func.func @transform_9(%arg0: i32, %arg1: i32) -> (i32, i32, i32) {
    %c0_i32 = arith.constant 0 : i32
    %c0_i32_0 = arith.constant 0 : i32
    return %arg0, %c0_i32, %arg1 : i32, i32, i32
  }
}

</mosaic_0001>

<bundles_post_ra>
// kernel: tpu_custom_call.1
= control target key start
LH: loop header
LB: loop body
LE: loop exit
PB: predicated region body
PF: predicated region fallthrough
CT: control target
= control target key end

     0   :  { %14 = vsyncpa [#allocation4], 0  ;;  %s9670_s0 = inlined_call_operand.vmem [shape: f32[2,16,4], index: 0, kind: input, shape index: {}]   ;;  %s9671_s1 = inlined_call_operand.vmem [shape: f32[4,512], index: 1, kind: input, shape index: {}]   ;;  %s9672_s2 = inlined_call_operand.vmem [shape: f32[2,256,1], index: 2, kind: input, shape index: {}]   ;;  %s9673_s3 = inlined_call_operand.vmem [shape: f32[2,3,32,256], index: 3, kind: input, shape index: {}]   ;;  %s9674_s4 = inlined_call_operand.vmem [shape: f32[32,1], index: 4, kind: input, shape index: {}]   ;;  %s9675_s5 = inlined_call_operand.vmem [shape: f32[16,32], index: 5, kind: input, shape index: {}]   ;;  %s9676_s6 = inlined_call_operand.vmem [shape: f32[16,1], index: 6, kind: input, shape index: {}]   ;;  %s9677_s7 = inlined_call_operand.vmem [shape: f32[8,16], index: 7, kind: input, shape index: {}]   ;;  %s9678_s8 = inlined_call_operand.vmem [shape: f32[8,1], index: 8, kind: input, shape index: {}]   ;;  %s9679_s9 = inlined_call_operand.hbm [shape: f32[2,16,512], index: 9, kind: output, shape index: {}]  }
   0x1   :  { %16 = vsyncpa [#allocation4 + $0x1], 0  ;;  %s6806_s30 = smov 0   ;;  %s6808_s10 = smov 0  }
   0x2   :  { %s6810_s11 = smov 0   ;;  %s6812_s12 = smov 0  }
   0x3   :  { %s6814_s13 = smov 0   ;;  %s6816_s14 = smov 0  }
   0x4 LB: > { %s6453_s15 = sadd.s32 4294967295, %s6750_s14   ;;  %s6454_s16 = sadd.s32 4294967294, %s6750_s14   ;;  %s6750_s14 = sphi %s6816_s14, %s22_s14   ;;  %s6746_s13 = sphi %s6814_s13, %s10273_s13   ;;  %s6742_s12 = sphi %s6812_s12, %s10272_s12   ;;  %s6738_s11 = sphi %s6810_s11, %s10271_s11   ;;  %s6734_s10 = sphi %s6808_s10, %s10270_s10   ;;  %s6730_s30 = sphi %s6806_s30, %s10269_s30  }
   0x5   : > { %s34_s17 = sadd.s32 1, %s6746_s13  ;;  %s247_s18 = sadd.s32 1, %s6738_s11 }
   0x6   : > { %p36_p0 = scmp.ge.s32.totalorder %s34_s17, 2  ;;  %p257_p1 = scmp.ne.s32.totalorder %s6738_s11, %s6734_s10 }
   0x7   : > { %p258_p2 = scmp.eq.s32.totalorder %s6453_s15, 1  ;;  %p263_p3 = scmp.ne.s32.totalorder %s6734_s10, %s6730_s30 }
   0x8   : > { %s10275_s17 = smov (%p36_p0, %s34_s17), 0  ;;  %p264_p5 = scmp.eq.s32.totalorder %s6454_s16, 1 }
   0x9   : > { %p6846_p4 = por %p258_p2, %p257_p1  ;;  %s242_s20 = ssub.s32 %s6746_s13, %s10275_s17 }
   0xa   : > { %p6458_p6 = scmp.ge.s32.totalorder %s6750_s14, 1  ;;  %p245_p7 = scmp.eq.s32.totalorder %s242_s20, 0 }
   0xb   : > { %p6853_p8 = por %p264_p5, %p263_p3  ;;  %p325_p9 = scmp.lt.s32.totalorder %s6750_s14, 3 }
   0xc   : > { %s6859_s22 = scalar_select %p245_p7, %s6738_s11, %s247_s18  }
   0xd   : > { %p326_p10 = pnand %p6458_p6, %p325_p9 }
   0xf   : > { %329 = sbr.rel (%p326_p10) target bundleno = 1560 (0x618), region = 56 }
  0x14   : > { %v845_v0 = vld [vmem:[%s9672_s2 + $0x70] sm:$0xff]  ;;  %v6494_v1 = vld [vmem:[%s9672_s2 + $0x178] sm:$0xff]  ;;  %p371_p11 = scmp.lt.s32.totalorder %s6742_s12, 1  ;;  %v9680_v3 = vmov 0   ;;  %v388_v4 = vld [vmem:[%s9671_s1] sm:$0xff]  ;;  %vm408_vm0 = vcmask 1043456  }
  0x15   : > { %v846_v2 = vld [vmem:[%s9672_s2 + $0x78] sm:$0xff]  ;;  %6632 = vset.pattern.permute.xlu2 %v9680_v3  ;;  %6631 = vset.pattern.permute.xlu1 %v9680_v3  ;;  %v389_v5 = vld [vmem:[%s9671_s1 + $0x8] sm:$0xff]  ;;  %394 = vst [vmem:[#allocation1] ss:$2 sm:$0xff] %v388_v4  ;;  %v861_v6 = vld [vmem:[%s9672_s2 + $0xf0] sm:$0xff]  ;;  %vm401_vm1 = vcmask 31744  }
  0x16   : > { %6630 = vset.pattern.permute.xlu0 %v9680_v3  ;;  %968 = vperm.xlu2 %6632, %v845_v0   ;;  %s6881_s20 = scalar_select %p371_p11, %s6742_s12, 1  ;;  %396 = vst [vmem:[#allocation1 + $0x10] ss:$2 sm:$0xff] %v389_v5  ;;  %v6510_v7 = vld [vmem:[%s9672_s2 + $0x1f8] sm:$0xff]  ;;  %v844_v14 = vld [vmem:[%s9672_s2 + $0x68] sm:$0xff]  ;;  %v6509_v15 = vld [vmem:[%s9672_s2 + $0x1f0] sm:$0xff] }
  0x17   : > { %1649 = vperm.xlu1 %6631, %v6494_v1   ;;  %973 = vperm.xlu0 %6630, %v846_v2   ;;  %v862_v8 = vld [vmem:[%s9672_s2 + $0xf8] sm:$0xff]  ;;  %v6493_v16 = vld [vmem:[%s9672_s2 + $0x170] sm:$0xff]  ;;  %v6508_v18 = vld [vmem:[%s9672_s2 + $0x1e8] sm:$0xff] }
  0x18   : > { %s6568_s23 = sshll.u32 %s6881_s20, 4  ;;  %v6492_v19 = vld [vmem:[%s9672_s2 + $0x168] sm:$0xff]  ;;  %v6491_v21 = vld [vmem:[%s9672_s2 + $0x160] sm:$0xff]  ;;  %v858_v24 = vld [vmem:[%s9672_s2 + $0xd8] sm:$0xff] }
  0x19   : > { %s375_s26 = scalar_lea.vmem %s9670_s0, %s6568_s23  ;;  %v860_v20 = vld [vmem:[%s9672_s2 + $0xe8] sm:$0xff]  ;;  %v859_v22 = vld [vmem:[%s9672_s2 + $0xe0] sm:$0xff]  ;;  %v842_v25 = vld [vmem:[%s9672_s2 + $0x58] sm:$0xff]  ;;  %s368_s23 = sand.u32 1, %s6734_s10  }
  0x1a   : > { %v390_v9 = vld [vmem:[%s375_s26] sm:$0xff]  ;;  %v391_v17 = vld [vmem:[%s375_s26 + $0x8] sm:$0xff]  ;;  %v841_v27 = vld [vmem:[%s9672_s2 + $0x50] sm:$0xff]  ;;  %s6570_s26 = smul.u32 192, %s6881_s20  ;;  %s6569_s20 = sshll.u32 %s6742_s12, 6 }
  0x1b   : > { %v843_v23 = vld [vmem:[%s9672_s2 + $0x60] sm:$0xff]  ;;  %v6506_v28 = vld [vmem:[%s9672_s2 + $0x1d8] sm:$0xff]  ;;  %v6505_v30 = vld [vmem:[%s9672_s2 + $0x1d0] sm:$0xff]  ;;  %s6349_s28 = scalar_lea.hbm %s9679_s9, %s6569_s20  ;;  %s6336_s12 = scalar_lea.sflag [#allocation4], %s368_s23 }
  0x1c   : > { %v397_v10 = vld.sshfl [vmem:[#allocation1] sm:$0xff pattern:$0x75316420]  ;;  %v398_v11 = vld.sshfl [vmem:[#allocation1 + $0x8] sm:$0xff pattern:$0x75316420]  ;;  %s7827_s25 = scalar_lea.vmem %s9673_s3, %s6570_s26 }
  0x1d   : > { %6463 = vmatpush.msk.msra.mxu0 %vm408_vm0, %v397_v10  ;;  %6466 = vmatpush.msk.msra.mxu1 %vm408_vm0, %v398_v11  ;;  %v399_v12 = vld.sshfl [vmem:[#allocation1 + $0x10] sm:$0xff pattern:$0x75316420]  ;;  %v400_v13 = vld.sshfl [vmem:[#allocation1 + $0x18] sm:$0xff pattern:$0x75316420] }
  0x1e   : > { %6469 = vmatpush.msk.msra.mxu2 %vm408_vm0, %v399_v12  ;;  %6472 = vmatpush.msk.msra.mxu3 %vm408_vm0, %v400_v13  ;;  %v6507_v26 = vld [vmem:[%s9672_s2 + $0x1e0] sm:$0xff]  ;;  %v6490_v29 = vld [vmem:[%s9672_s2 + $0x158] sm:$0xff]  ;;  %v6489_v31 = vld [vmem:[%s9672_s2 + $0x150] sm:$0xff]  ;;  %s6459_s26 = sshll.u32 %s368_s23, 6  ;;  %s6352_s15 = sshll.u32 %s6349_s28, 4  ;;  %s6353_s15 = int_to_ptr.hbm [resolvable:$true] %s6352_s15 }
  0x1f   : > { %1048 = vperm.xlu2 %6632, %v861_v6   ;;  %1729 = vperm.xlu1 %6631, %v6510_v7   ;;  %v857_v32 = vld [vmem:[%s9672_s2 + $0xd0] sm:$0xff]  ;;  %v6488_v33 = vld [vmem:[%s9672_s2 + $0x148] sm:$0xff]  ;;  %v855_v36 = vld [vmem:[%s9672_s2 + $0xc0] sm:$0xff]  ;;  %s9608_s24 = scalar_lea.vmem [#allocation3], %s6459_s26  ;;  %s6686_s16 = sshra.s32 %s6353_s15, 4  ;;  %s6687_s16 = int_to_ptr.hbm [resolvable:$true] %s6686_s16 }
  0x20   : > { %1053 = vperm.xlu0 %6630, %v862_v8   ;;  %6464 = vmatmul.msk.f32.vlgmr.msra.gmra.mxu0 %vm401_vm1, %v390_v9  ;;  %v856_v34 = vld [vmem:[%s9672_s2 + $0xc8] sm:$0xff]  ;;  %v839_v37 = vld [vmem:[%s9672_s2 + $0x40] sm:$0xff]  ;;  %v838_v39 = vld [vmem:[%s9672_s2 + $0x38] sm:$0xff]  ;;  %s6350_s29 = sshll.u32 %s9608_s24, 4  ;;  %s6688_s18 = scalar_lea.hbm %s6687_s16, 64  ;;  %s6351_s29 = int_to_ptr.vmem [resolvable:$true] %s6350_s29 }
  0x21   : > { %6467 = vmatmul.msk.f32.vlgmr.msra.gmra.mxu1 %vm401_vm1, %v390_v9  ;;  %6470 = vmatmul.msk.f32.vlgmr.msra.gmra.mxu2 %vm401_vm1, %v390_v9  ;;  %v840_v35 = vld [vmem:[%s9672_s2 + $0x48] sm:$0xff]  ;;  %v6503_v40 = vld [vmem:[%s9672_s2 + $0x1c0] sm:$0xff]  ;;  %v6502_v42 = vld [vmem:[%s9672_s2 + $0x1b8] sm:$0xff]  ;;  %p6689_p12 = scmp.ne.s32.totalorder %s6687_s16, %s6688_s18  ;;  %p6693_p1 = scmp.lt.s32.totalorder %s6687_s16, %s9679_s9 }
  0x22   : > { %6473 = vmatmul.msk.f32.vlgmr.msra.gmra.mxu3 %vm401_vm1, %v390_v9  ;;  %v6504_v38 = vld [vmem:[%s9672_s2 + $0x1c8] sm:$0xff]  ;;  %v6487_v41 = vld [vmem:[%s9672_s2 + $0x140] sm:$0xff]  ;;  %v6486_v43 = vld [vmem:[%s9672_s2 + $0x138] sm:$0xff] }
  0x23   : > { %v854_v44 = vld [vmem:[%s9672_s2 + $0xb8] sm:$0xff]  ;;  %v6485_v45 = vld [vmem:[%s9672_s2 + $0x130] sm:$0xff]  ;;  %v852_v48 = vld [vmem:[%s9672_s2 + $0xa8] sm:$0xff]  ;;  %p6690_p13 = pnand %p6689_p12, %p6846_p4 }
  0x24   : > { %v853_v46 = vld [vmem:[%s9672_s2 + $0xb0] sm:$0xff]  ;;  %v836_v49 = vld [vmem:[%s9672_s2 + $0x28] sm:$0xff]  ;;  %v835_v51 = vld [vmem:[%s9672_s2 + $0x20] sm:$0xff] }
  0x25   : > { %v837_v47 = vld [vmem:[%s9672_s2 + $0x30] sm:$0xff]  ;;  %v6500_v52 = vld [vmem:[%s9672_s2 + $0x1a8] sm:$0xff]  ;;  %v6499_v54 = vld [vmem:[%s9672_s2 + $0x1a0] sm:$0xff]  ;;  %p6691_p0 = pneg %p6690_p13 }
  0x26   : > { %v6501_v50 = vld [vmem:[%s9672_s2 + $0x1b0] sm:$0xff]  ;;  %v6484_v53 = vld [vmem:[%s9672_s2 + $0x128] sm:$0xff]  ;;  %v6483_v55 = vld [vmem:[%s9672_s2 + $0x120] sm:$0xff] }
  0x27   : > { %963 = vperm.xlu2 %6632, %v844_v14   ;;  %1724 = vperm.xlu1 %6631, %v6509_v15   ;;  %v851_v56 = vld [vmem:[%s9672_s2 + $0xa0] sm:$0xff]  ;;  %v6482_v57 = vld [vmem:[%s9672_s2 + $0x118] sm:$0xff]  ;;  %v849_v63 = vld [vmem:[%s9672_s2 + $0x90] sm:$0xff] }
  0x28   : > { %1644 = vperm.xlu0 %6630, %v6493_v16   ;;  %6465 = vmatmul.msk.f32.gmra.mxu0 %vm401_vm1, %v391_v17  ;;  %v850_v58 = vld [vmem:[%s9672_s2 + $0x98] sm:$0xff]  ;;  %v833_v0 = vld [vmem:[%s9672_s2 + $0x10] sm:$0xff]  ;;  %v832_v13 = vld [vmem:[%s9672_s2 + $0x8] sm:$0xff] }
  0x29   : > { %6468 = vmatmul.msk.f32.gmra.mxu1 %vm401_vm1, %v391_v17  ;;  %6471 = vmatmul.msk.f32.gmra.mxu2 %vm401_vm1, %v391_v17  ;;  %v834_v59 = vld [vmem:[%s9672_s2 + $0x18] sm:$0xff]  ;;  %v6497_v14 = vld [vmem:[%s9672_s2 + $0x190] sm:$0xff] }
  0x2a   : > { %6474 = vmatmul.msk.f32.gmra.mxu3 %vm401_vm1, %v391_v17  ;;  %v6498_v2 = vld [vmem:[%s9672_s2 + $0x198] sm:$0xff]  ;;  %v6481_v17 = vld [vmem:[%s9672_s2 + $0x110] sm:$0xff] }
  0x2f   : > { %1719 = vperm.xlu2 %6632, %v6508_v18   ;;  %1639 = vperm.xlu1 %6631, %v6492_v19  }
  0x30   : > { %1043 = vperm.xlu0 %6630, %v860_v20  }
  0x37   : > { %1634 = vperm.xlu2 %6632, %v6491_v21   ;;  %1038 = vperm.xlu1 %6631, %v859_v22  }
  0x38   : > { %958 = vperm.xlu0 %6630, %v843_v23  }
  0x3f   : > { %1033 = vperm.xlu2 %6632, %v858_v24   ;;  %953 = vperm.xlu1 %6631, %v842_v25  }
  0x40   : > { %1714 = vperm.xlu0 %6630, %v6507_v26  }
  0x47   : > { %948 = vperm.xlu2 %6632, %v841_v27   ;;  %1709 = vperm.xlu1 %6631, %v6506_v28  }
  0x48   : > { %1629 = vperm.xlu0 %6630, %v6490_v29  }
  0x4f   : > { %1704 = vperm.xlu2 %6632, %v6505_v30   ;;  %1624 = vperm.xlu1 %6631, %v6489_v31  }
  0x50   : > { %1028 = vperm.xlu0 %6630, %v857_v32  }
  0x57   : > { %1619 = vperm.xlu2 %6632, %v6488_v33   ;;  %1023 = vperm.xlu1 %6631, %v856_v34   ;;  %v6496_v33 = vld [vmem:[%s9672_s2 + $0x188] sm:$0xff] }
  0x58   : > { %943 = vperm.xlu0 %6630, %v840_v35   ;;  %v6480_v34 = vld [vmem:[%s9672_s2 + $0x108] sm:$0xff] }
  0x5f   : > { %1018 = vperm.xlu2 %6632, %v855_v36   ;;  %938 = vperm.xlu1 %6631, %v839_v37  }
  0x60   : > { %1699 = vperm.xlu0 %6630, %v6504_v38  }
  0x67   : > { %933 = vperm.xlu2 %6632, %v838_v39   ;;  %1694 = vperm.xlu1 %6631, %v6503_v40   ;;  %v848_v40 = vld [vmem:[%s9672_s2 + $0x88] sm:$0xff] }
  0x68   : > { %1614 = vperm.xlu0 %6630, %v6487_v41  }
  0x6f   : > { %1689 = vperm.xlu2 %6632, %v6502_v42   ;;  %1609 = vperm.xlu1 %6631, %v6486_v43  }
  0x70   : > { %1013 = vperm.xlu0 %6630, %v854_v44   ;;  %v7041_v61 = vpop.permute.xlu2 %968 }
  0x71   : > { %9946 = vst [vmem:[#allocation7_spill] sm:$0xff] %v7041_v61 }
  0x77   : > { %1604 = vperm.xlu2 %6632, %v6485_v45   ;;  %1008 = vperm.xlu1 %6631, %v853_v46  }
  0x78   : > { %928 = vperm.xlu0 %6630, %v837_v47   ;;  %v5516_v47 = vld [vmem:[%s9674_s4 + $0x10] sm:$0xff] }
  0x79   : > { %v7066_v9 = vpop.permute.xlu2 %1048 }
  0x7f   : > { %1003 = vperm.xlu2 %6632, %v852_v48   ;;  %923 = vperm.xlu1 %6631, %v836_v49  }
  0x80   : > { %1684 = vperm.xlu0 %6630, %v6501_v50  }
  0x81   : > { %v7110_v29 = vpop.permute.xlu2 %963 }
  0x82   : > { %9953 = vst [vmem:[#allocation14_spill] sm:$0xff] %v7110_v29 }
  0x87   : > { %918 = vperm.xlu2 %6632, %v835_v51   ;;  %1679 = vperm.xlu1 %6631, %v6500_v52  }
  0x88   : > { %1599 = vperm.xlu0 %6630, %v6484_v53  }
  0x89   : > { %v7039_v60 = vpop.permute.xlu0 %973  ;;  %v7043_v62 = vpop.permute.xlu1 %1649 }
  0x8a   : > { %9945 = vst [vmem:[#allocation6_spill] sm:$0xff] %v7039_v60 }
  0x8b   : > { %9947 = vst [vmem:[#allocation8_spill] sm:$0xff] %v7043_v62 }
  0x8f   : > { %1674 = vperm.xlu2 %6632, %v6499_v54   ;;  %1594 = vperm.xlu1 %6631, %v6483_v55  }
  0x90   : > { %998 = vperm.xlu0 %6630, %v851_v56  }
  0x91   : > { %v7068_v10 = vpop.permute.xlu1 %1729 }
  0x92   : > { %v7063_v8 = vpop.permute.xlu0 %1053 }
  0x97   : > { %1589 = vperm.xlu2 %6632, %v6482_v57   ;;  %993 = vperm.xlu1 %6631, %v850_v58  }
  0x98   : > { %913 = vperm.xlu0 %6630, %v834_v59  }
  0x99   : > { %v7112_v30 = vpop.permute.xlu1 %1724 }
  0x9a   : > { %v7107_v27 = vpop.permute.xlu0 %1644  ;;  %9954 = vst [vmem:[#allocation15_spill] sm:$0xff] %v7112_v30 }
  0x9d   : > { %v7051_v1 = vpop.f32.mrf.mxu0 }
  0x9e   : > { %9948 = vst [vmem:[#allocation9_spill] sm:$0xff] %v7051_v1  ;;  %v517_v4 = vand.u32 2147483647, %v7051_v1  ;;  %v7057_v5 = vpop.f32.mrf.mxu1 }
  0x9f   : > { %9949 = vst [vmem:[#allocation10_spill] sm:$0xff] %v7057_v5  ;;  %v518_v6 = vand.u32 2147483647, %v7057_v5  ;;  %988 = vperm.xlu2 %6632, %v849_v63   ;;  %908 = vperm.xlu1 %6631, %v833_v0  }
  0xa0   : > { %vm525_vm2 = vcmp.lt.f32.partialorder %v517_v4, 1e-12  ;;  %1669 = vperm.xlu0 %6630, %v6498_v2  }
  0xa1   : > { %v7061_v7 = vsel %vm525_vm2, 1e-12, %v7051_v1  ;;  %vm526_vm3 = vcmp.lt.f32.partialorder %v518_v6, 1e-12 }
  0xa2   : > { %6633 = vrcp.f32 %v7061_v7  ;;  %v7071_v11 = vsel %vm526_vm3, 1e-12, %v7057_v5  ;;  %v550_v28 = vand.u32 2147483647, %v7061_v7  ;;  %vm546_vm6 = vweird.f32 %v7061_v7 }
  0xa3   : > { %6635 = vrcp.f32 %v7071_v11  ;;  %v552_v35 = vand.u32 2147483648, %v7061_v7  ;;  %v565_v36 = vand.u32 2147483647, %v7071_v11  ;;  %vm561_vm7 = vweird.f32 %v7071_v11 }
  0xa4   : > { %v7074_v12 = vpop.f32.mrf.mxu2  ;;  %v567_v39 = vand.u32 2147483648, %v7071_v11  ;;  %vm7145_vm10 = vcmp.eq.f32.partialorder %v550_v28, 8.507059e+37  ;;  %v7204_v28 = vpop.permute.xlu1 %1639 }
  0xa5   : > { %9950 = vst [vmem:[#allocation11_spill] sm:$0xff] %v7074_v12  ;;  %v519_v15 = vand.u32 2147483647, %v7074_v12  ;;  %v7083_v16 = vpop.f32.mrf.mxu3  ;;  %v7102_v24 = vpop.f32.mrf.mxu0  ;;  %v553_v50 = vor.u32 1.1754944e-38, %v552_v35  ;;  %vm7153_vm12 = vcmp.eq.f32.partialorder %v565_v36, 8.507059e+37 }
  0xa6   : > { %9951 = vst [vmem:[#allocation12_spill] sm:$0xff] %v7083_v16  ;;  %v520_v18 = vand.u32 2147483647, %v7083_v16  ;;  %v521_v32 = vand.u32 2147483647, %v7102_v24  ;;  %v7139_v44 = vpop.f32.mrf.mxu1  ;;  %v568_v2 = vor.u32 1.1754944e-38, %v567_v39 }
  0xa7   : > { %vm527_vm4 = vcmp.lt.f32.partialorder %v519_v15, 1e-12  ;;  %903 = vperm.xlu2 %6632, %v832_v13   ;;  %1664 = vperm.xlu1 %6631, %v6497_v14   ;;  %9952 = vst [vmem:[#allocation13_spill] sm:$0xff] %v7102_v24  ;;  %v522_v56 = vand.u32 2147483647, %v7139_v44  ;;  %v831_v13 = vld [vmem:[%s9672_s2] sm:$0xff]  ;;  %v7193_v14 = vpop.permute.xlu0 %1043 }
  0xa8   : > { %v7089_v19 = vpop.eup %6633  ;;  %v7092_v20 = vsel %vm527_vm4, 1e-12, %v7074_v12  ;;  %vm528_vm5 = vcmp.lt.f32.partialorder %v520_v18, 1e-12  ;;  %1584 = vperm.xlu0 %6630, %v6481_v17   ;;  %vm529_vm8 = vcmp.lt.f32.partialorder %v521_v32, 1e-12 }
  0xa9   : > { %v542_v21 = vmul.f32 %v7089_v19, %v7061_v7  ;;  %6637 = vrcp.f32 %v7092_v20  ;;  %v7097_v22 = vpop.eup %6635  ;;  %v7100_v23 = vsel %vm528_vm5, 1e-12, %v7083_v16  ;;  %vm547_vm9 = vweird.f32 %v7089_v19  ;;  %9955 = vst [vmem:[#allocation16_spill] sm:$0xff] %v7139_v44  ;;  %v6479_v7 = vld [vmem:[%s9672_s2 + $0x100] sm:$0xff] }
  0xaa   : > { %v557_v26 = vmul.f32 %v7097_v22, %v7071_v11  ;;  %6639 = vrcp.f32 %v7100_v23  ;;  %v7137_v43 = vsel %vm529_vm8, 1e-12, %v7102_v24  ;;  %vm562_vm11 = vweird.f32 %v7097_v22  ;;  %vm7164_vm13 = vmor %vm546_vm6, %vm547_vm9  ;;  %v847_v11 = vld [vmem:[%s9672_s2 + $0x80] sm:$0xff]  ;;  %9967 = vst [vmem:[#allocation18_spill] sm:$0xff] %v7193_v14 }
  0xab   : > { %v543_v25 = vsub.f32 1.0, %v542_v21  ;;  %v580_v48 = vand.u32 2147483647, %v7092_v20  ;;  %v582_v49 = vand.u32 2147483648, %v7092_v20  ;;  %6641 = vrcp.f32 %v7137_v43  ;;  %vm7174_vm15 = vmor %vm561_vm7, %vm562_vm11 }
  0xac   : > { %v558_v31 = vsub.f32 1.0, %v557_v26  ;;  %v7141_v45 = vpop.f32.mrf.mxu2  ;;  %vm576_vm14 = vweird.f32 %v7092_v20  ;;  %vm591_vm2 = vweird.f32 %v7100_v23  ;;  %v595_v18 = vand.u32 2147483647, %v7100_v23 }
  0xad   : > { %v544_v38 = vmul.f32 %v7089_v19, %v543_v25  ;;  %9956 = vst [vmem:[#allocation17_spill] sm:$0xff] %v7141_v45  ;;  %v523_v57 = vand.u32 2147483647, %v7141_v45  ;;  %vm7180_vm1 = vcmp.eq.f32.partialorder %v580_v48, 8.507059e+37  ;;  %v583_v6 = vor.u32 1.1754944e-38, %v582_v49  ;;  %v7199_v25 = vpop.permute.xlu2 %1719  ;;  %v5514_v48 = vld [vmem:[%s9674_s4] sm:$0xff] }
  0xae   : > { %v559_v41 = vmul.f32 %v7097_v22, %v558_v31  ;;  %9968 = vst [vmem:[#allocation19_spill] sm:$0xff] %v7199_v25  ;;  %v597_v32 = vand.u32 2147483648, %v7100_v23  ;;  %vm530_vm4 = vcmp.lt.f32.partialorder %v522_v56, 1e-12  ;;  %vm606_vm7 = vweird.f32 %v7137_v43  ;;  %v7277_v56 = vpop.f32.mrf.mxu3 }
  0xaf   : > { %v7124_v37 = vpop.eup %6637  ;;  %1659 = vperm.xlu2 %6632, %v6496_v33   ;;  %1579 = vperm.xlu1 %6631, %v6480_v34   ;;  %v545_v54 = vadd.f32 %v7089_v19, %v544_v38  ;;  %vm531_vm5 = vcmp.lt.f32.partialorder %v523_v57, 1e-12  ;;  %v612_v34 = vand.u32 2147483648, %v7137_v43  ;;  %v7224_v35 = vsel %vm530_vm4, 1e-12, %v7139_v44  ;;  %9979 = vst [vmem:[#allocation20_spill] sm:$0xff] %v7277_v56  ;;  %v7285_v4 = vpop.permute.xlu0 %958 }
  0xb0   : > { %v572_v42 = vmul.f32 %v7124_v37, %v7092_v20  ;;  %983 = vperm.xlu0 %6630, %v848_v40   ;;  %v7143_v46 = vpop.eup %6639  ;;  %v560_v58 = vadd.f32 %v7097_v22, %v559_v41  ;;  %vm577_vm0 = vweird.f32 %v7124_v37  ;;  %v610_v20 = vand.u32 2147483647, %v7137_v43  ;;  %9980 = vst [vmem:[#allocation21_spill] sm:$0xff] %v7285_v4 }
  0xb1   : > { %v587_v53 = vmul.f32 %v7143_v46, %v7100_v23  ;;  %v6642_v21 = vpop.eup %6641  ;;  %v549_v26 = vsel %vm7164_vm13, %v7089_v19, %v545_v54  ;;  %vm7210_vm3 = vmor %vm576_vm14, %vm577_vm0  ;;  %vm592_vm6 = vweird.f32 %v7143_v46  ;;  %v7231_v39 = vsel %vm531_vm5, 1e-12, %v7141_v45 }
  0xb2   : > { %v573_v52 = vsub.f32 1.0, %v572_v42  ;;  %v564_v19 = vsel %vm7174_vm15, %v7097_v22, %v560_v58  ;;  %v602_v33 = vmul.f32 %v6642_v21, %v7137_v43  ;;  %vm607_vm8 = vweird.f32 %v6642_v21  ;;  %vm7235_vm9 = vmor %vm591_vm2, %vm592_vm6  ;;  %v5517_v43 = vld [vmem:[%s9674_s4 + $0x18] sm:$0xff] }
  0xb3   : > { %v588_v0 = vsub.f32 1.0, %v587_v53  ;;  %6643 = vrcp.f32 %v7224_v35  ;;  %v554_v41 = vsel %vm7145_vm10, %v553_v50, %v549_v26  ;;  %vm7248_vm11 = vmor %vm606_vm7, %vm607_vm8  ;;  %vm669_vm13 = vcmask 1041408   ;;  %v6495_v50 = vld [vmem:[%s9672_s2 + $0x180] sm:$0xff] }
  0xb4   : > { %v574_v63 = vmul.f32 %v7124_v37, %v573_v52  ;;  %v603_v38 = vsub.f32 1.0, %v602_v33  ;;  %v598_v49 = vor.u32 1.1754944e-38, %v597_v32  ;;  %v613_v52 = vor.u32 1.1754944e-38, %v612_v34 }
  0xb5   : > { %v589_v17 = vmul.f32 %v7143_v46, %v588_v0  ;;  %6645 = vrcp.f32 %v7231_v39  ;;  %vm7269_vm10 = vcmp.eq.f32.partialorder %v595_v18, 8.507059e+37  ;;  %v670_v57 = vrot.slane %v554_v41, 6 }
  0xb6   : > { %v575_v15 = vadd.f32 %v7124_v37, %v574_v63  ;;  %v604_v42 = vmul.f32 %v6642_v21, %v603_v38  ;;  %v699_v58 = vrot.slane %v554_v41, 3  ;;  %vm698_vm14 = vcmask 1044480  }
  0xb7   : > { %1574 = vperm.xlu2 %6632, %v6479_v7   ;;  %978 = vperm.xlu1 %6631, %v847_v11   ;;  %v590_v22 = vadd.f32 %v7143_v46, %v589_v17  ;;  %v7287_v7 = vpop.permute.xlu2 %1634  ;;  %vm621_vm15 = vweird.f32 %v7224_v35  ;;  %v524_v17 = vand.u32 2147483647, %v7277_v56  ;;  %v625_v31 = vand.u32 2147483647, %v7224_v35 }
  0xb8   : > { %898 = vperm.xlu0 %6630, %v831_v13   ;;  %v579_v36 = vsel %vm7210_vm3, %v7124_v37, %v575_v15  ;;  %v7244_v37 = vsel %vm7153_vm12, %v568_v2, %v564_v19  ;;  %v605_v54 = vadd.f32 %v6642_v21, %v604_v42  ;;  %vm7273_vm12 = vcmp.eq.f32.partialorder %v610_v20, 8.507059e+37  ;;  %v7296_v15 = vpop.permute.xlu1 %1038  ;;  %v5637_v42 = vld [vmem:[%s9676_s6 + $0x8] sm:$0xff] }
  0xb9   : > { %v7254_v23 = vsel %vm7180_vm1, %v583_v6, %v579_v36  ;;  %v594_v51 = vsel %vm7235_vm9, %v7143_v46, %v590_v22  ;;  %v673_v59 = vrot.slane %v7244_v37, 6  ;;  %v702_v46 = vrot.slane %v7244_v37, 3  ;;  %v6644_v6 = vpop.eup %6643  ;;  %9981 = vst [vmem:[#allocation22_spill] sm:$0xff] %v7296_v15 }
  0xba   : > { %v676_v63 = vrot.slane %v7254_v23, 6  ;;  %v705_v0 = vrot.slane %v7254_v23, 3  ;;  %v609_v2 = vsel %vm7248_vm11, %v6642_v21, %v605_v54  ;;  %v7291_v11 = vsel %vm7269_vm10, %v598_v49, %v594_v51  ;;  %v5515_v49 = vld [vmem:[%s9674_s4 + $0x8] sm:$0xff] }
  0xbb   : > { %v614_v13 = vsel %vm7273_vm12, %v613_v52, %v609_v2  ;;  %v617_v26 = vmul.f32 %v6644_v6, %v7224_v35  ;;  %v6646_v32 = vpop.eup %6645  ;;  %vm622_vm0 = vweird.f32 %v6644_v6  ;;  %v627_v19 = vand.u32 2147483648, %v7224_v35 }
  0xbc   : > { %v671_v18 = vrot.slane %v614_v13, 6  ;;  %v700_v21 = vrot.slane %v614_v13, 3  ;;  %vm636_vm1 = vweird.f32 %v7231_v39  ;;  %vm532_vm2 = vcmp.lt.f32.partialorder %v524_v17, 1e-12  ;;  %vm7326_vm4 = vmor %vm621_vm15, %vm622_vm0 }
  0xbd   : > { %v618_v34 = vsub.f32 1.0, %v617_v26  ;;  %v632_v36 = vmul.f32 %v6646_v32, %v7231_v39  ;;  %v640_v40 = vand.u32 2147483647, %v7231_v39  ;;  %v642_v41 = vand.u32 2147483648, %v7231_v39 }
  0xbe   : > { %v672_v33 = vsel %vm669_vm13, %v670_v57, %v671_v18  ;;  %v701_v20 = vsel %vm698_vm14, %v699_v58, %v700_v21  ;;  %vm637_vm3 = vweird.f32 %v6646_v32  ;;  %v628_v55 = vor.u32 1.1754944e-38, %v627_v19 }
  0xbf   : > { %5530 = vperm.xlu2 %6632, %v5516_v47   ;;  %5535 = vperm.xlu1 %6631, %v5517_v43   ;;  %v686_v22 = vmul.f32 %v672_v33, %v7051_v1  ;;  %v715_v38 = vmul.f32 %v701_v20, %v7051_v1  ;;  %v619_v52 = vmul.f32 %v6644_v6, %v618_v34  ;;  %v633_v47 = vsub.f32 1.0, %v632_v36  ;;  %vm7342_vm6 = vmor %vm636_vm1, %vm637_vm3  ;;  %v7350_v33 = vpop.permute.xlu0 %1714  ;;  %v7352_v20 = vpop.permute.xlu2 %1033 }
  0xc0   : > { %1654 = vperm.xlu0 %6630, %v6495_v50   ;;  %v7320_v43 = vsel %vm532_vm2, 1e-12, %v7277_v56  ;;  %vm7330_vm5 = vcmp.eq.f32.partialorder %v625_v31, 8.507059e+37  ;;  %v643_v18 = vor.u32 1.1754944e-38, %v642_v41  ;;  %vm641_vm7 = vcmp.eq.f32.partialorder %v640_v40, 8.507059e+37  ;;  %9990 = vst [vmem:[#allocation25_spill] sm:$0xff] %v7350_v33 }
  0xc1   : > { %v690_v51 = vadd.f32 1.0, %v686_v22  ;;  %v719_v53 = vadd.f32 1.0, %v715_v38  ;;  %v620_v57 = vadd.f32 %v6644_v6, %v619_v52  ;;  %v634_v2 = vmul.f32 %v6646_v32, %v633_v47  ;;  %9991 = vst [vmem:[#allocation26_spill] sm:$0xff] %v7352_v20  ;;  %v7359_v22 = vpop.permute.xlu1 %953 }
  0xc2   : > { %6647 = vrcp.f32 %v7320_v43  ;;  %v657_v21 = vand.u32 2147483648, %v7320_v43  ;;  %vm651_vm8 = vweird.f32 %v7320_v43  ;;  %v655_v40 = vand.u32 2147483647, %v7320_v43 }
  0xc3   : > { %v7335_v13 = vmul.f32 7.5, %v690_v51  ;;  %v7337_v17 = vmul.f32 7.5, %v719_v53  ;;  %v624_v31 = vsel %vm7326_vm4, %v6644_v6, %v620_v57  ;;  %v635_v19 = vadd.f32 %v6646_v32, %v634_v2  ;;  %v5636_v51 = vld [vmem:[%s9676_s6] sm:$0xff] }
  0xc4   : > { %v629_v36 = vsel %vm7330_vm5, %v628_v55, %v624_v31  ;;  %v7367_v47 = vor.u32 1.1754944e-38, %v657_v21  ;;  %vm7403_vm11 = vcmp.eq.f32.partialorder %v655_v40, 8.507059e+37  ;;  %vm5648_vm1 = vcmask 261120  }
  0xc5   : > { %9986 = vst [vmem:[#allocation23_spill] sm:$0xff] %v7335_v13  ;;  %v815_v39 = vmax.f32 %v7335_v13, 0.0  ;;  %v823_v34 = vmax.f32 %v7337_v17, 0.0  ;;  %v674_v38 = vrot.slane %v629_v36, 6  ;;  %v703_v41 = vrot.slane %v629_v36, 3 }
  0xc6   : > { %9987 = vst [vmem:[#allocation24_spill] sm:$0xff] %v7337_v17  ;;  %v639_v6 = vsel %vm7342_vm6, %v6646_v32, %v635_v19 }
  0xc7   : > { %5645 = vperm.xlu2 %6632, %v5637_v42   ;;  %5520 = vperm.xlu1 %6631, %v5514_v48   ;;  %v5956_v42 = vld [vmem:[%s9678_s8] sm:$0xff]  ;;  %v819_v48 = vmin.f32 %v815_v39, 15.0  ;;  %v644_v52 = vsel %vm641_vm7, %v643_v18, %v639_v6  ;;  %v675_v32 = vsel %vm669_vm13, %v673_v59, %v674_v38  ;;  %v704_v54 = vsel %vm698_vm14, %v702_v46, %v703_v41 }
  0xc8   : > { %5525 = vperm.xlu0 %6630, %v5515_v49   ;;  %v827_v49 = vmin.f32 %v823_v34, 15.0  ;;  %v7372_v53 = vpop.eup %6647  ;;  %v677_v55 = vrot.slane %v644_v52, 6  ;;  %v706_v57 = vrot.slane %v644_v52, 3  ;;  %v687_v59 = vmul.f32 %v675_v32, %v7057_v5  ;;  %v7421_v32 = vpop.permute.xlu2 %948 }
  0xc9   : > { %v7380_v58 = vperm.slane %v819_v48, 0  ;;  %v7384_v35 = vperm.slane %v819_v48, 1  ;;  %v7388_v21 = vperm.slane %v819_v48, 2  ;;  %v716_v37 = vmul.f32 %v704_v54, %v7057_v5 }
  0xca   : > { %v7382_v2 = vperm.slane %v827_v49, 3  ;;  %v7386_v18 = vperm.slane %v827_v49, 4  ;;  %v7390_v31 = vperm.slane %v827_v49, 5  ;;  %v678_v46 = vsel %vm669_vm13, %v676_v63, %v677_v55  ;;  %v7424_v55 = vpop.permute.xlu1 %1709 }
  0xcb   : > { %9992 = vst [vmem:[#allocation27_spill] sm:$0xff] %v7384_v35  ;;  %v707_v19 = vsel %vm698_vm14, %v705_v0, %v706_v57  ;;  %v647_v39 = vmul.f32 %v7372_v53, %v7320_v43  ;;  %vm652_vm9 = vweird.f32 %v7372_v53  ;;  %v691_v36 = vadd.f32 1.0, %v687_v59 }
  0xcc   : > { %9993 = vst [vmem:[#allocation28_spill] sm:$0xff] %v7386_v18  ;;  %v720_v38 = vadd.f32 1.0, %v716_v37  ;;  %v688_v41 = vmul.f32 %v678_v46, %v7074_v12  ;;  %v717_v6 = vmul.f32 %v707_v19, %v7074_v12  ;;  %v1120_v23 = vsub.f32 %v7039_v60, %v7380_v58  ;;  %vm7436_vm10 = vmor %vm651_vm8, %vm652_vm9 }
  0xcd   : > { %9994 = vst [vmem:[#allocation29_spill] sm:$0xff] %v7388_v21  ;;  %v648_v63 = vsub.f32 1.0, %v647_v39  ;;  %v1796_v0 = vsub.f32 %v7043_v62, %v7382_v2  ;;  %v7415_v40 = vmul.f32 7.5, %v691_v36 }
  0xce   : > { %9995 = vst [vmem:[#allocation30_spill] sm:$0xff] %v7390_v31  ;;  %v7417_v48 = vmul.f32 7.5, %v720_v38  ;;  %v692_v49 = vadd.f32 1.0, %v688_v41  ;;  %v721_v52 = vadd.f32 1.0, %v717_v6  ;;  %v1248_v57 = vand.u32 2147483647, %v1120_v23 }
  0xcf   : > { %5959 = vperm.xlu1 %6631, %v5956_v42   ;;  %v1184_v42 = vsub.f32 %v7063_v8, %v7380_v58  ;;  %9998 = vst [vmem:[#allocation31_spill] sm:$0xff] %v7415_v40  ;;  %v649_v54 = vmul.f32 %v7372_v53, %v648_v63  ;;  %v1924_v59 = vand.u32 2147483647, %v1796_v0  ;;  %v816_v46 = vmax.f32 %v7415_v40, 0.0 }
  0xd0   : > { %5640 = vperm.xlu0 %6630, %v5636_v51   ;;  %9999 = vst [vmem:[#allocation32_spill] sm:$0xff] %v7417_v48  ;;  %v7419_v51 = vpop.permute.xlu0 %1629  ;;  %v824_v19 = vmax.f32 %v7417_v48, 0.0  ;;  %v7428_v39 = vmul.f32 7.5, %v692_v49  ;;  %v7430_v36 = vmul.f32 7.5, %v721_v52  ;;  %v1376_v6 = vsub.f32 1.0, %v1248_v57  ;;  %v7479_v34 = vpop.permute.xlu2 %1704 }
  0xd1   : > { %10000 = vst [vmem:[#allocation33_spill] sm:$0xff] %v7424_v55  ;;  %v1312_v37 = vand.u32 2147483647, %v1184_v42  ;;  %v650_v41 = vadd.f32 %v7372_v53, %v649_v54  ;;  %v2052_v63 = vsub.f32 1.0, %v1924_v59  ;;  %v820_v0 = vmin.f32 %v816_v46, 15.0 }
  0xd2   : > { %10001 = vst [vmem:[#allocation34_spill] sm:$0xff] %v7428_v39  ;;  %v828_v42 = vmin.f32 %v824_v19, 15.0  ;;  %v817_v49 = vmax.f32 %v7428_v39, 0.0  ;;  %v825_v52 = vmax.f32 %v7430_v36, 0.0  ;;  %v1504_v43 = vmax.f32 %v1376_v6, 0.0 }
  0xd3   : > { %10002 = vst [vmem:[#allocation35_spill] sm:$0xff] %v7430_v36  ;;  %v1440_v23 = vsub.f32 1.0, %v1312_v37  ;;  %v654_v3 = vsel %vm7436_vm10, %v7372_v53, %v650_v41  ;;  %v2180_v26 = vmax.f32 %v2052_v63, 0.0  ;;  %v7446_v40 = vperm.slane %v820_v0, 0 }
  0xd4   : > { %v7448_v44 = vperm.slane %v828_v42, 3  ;;  %v7450_v54 = vperm.slane %v820_v0, 1  ;;  %v7452_v57 = vperm.slane %v828_v42, 4  ;;  %v7454_v59 = vperm.slane %v820_v0, 2  ;;  %10014 = vst [vmem:[#allocation45_spill] sm:$0xff] %v7479_v34 }
  0xd5   : > { %v1568_v50 = vmax.f32 %v1440_v23, 0.0  ;;  %v7456_v37 = vperm.slane %v828_v42, 5  ;;  %v821_v46 = vmin.f32 %v817_v49, 15.0  ;;  %v829_v19 = vmin.f32 %v825_v52, 15.0 }
  0xd6   : > { %10005 = vst [vmem:[#allocation36_spill] sm:$0xff] %v7450_v54  ;;  %v659_v53 = vsel %vm7403_vm11, %v7367_v47, %v654_v3  ;;  %v2308_v38 = vmul.f32 %v2180_v26, %v1504_v43  ;;  %v1860_v41 = vsub.f32 %v7068_v10, %v7382_v2  ;;  %v1121_v6 = vsub.f32 %v7039_v60, %v7446_v40  ;;  %v7481_v43 = vpop.permute.xlu1 %1624 }
  0xd7   : > { %10006 = vst [vmem:[#allocation37_spill] sm:$0xff] %v7452_v57  ;;  %v7465_v63 = vperm.slane %v821_v46, 0  ;;  %v7467_v23 = vperm.slane %v829_v19, 3  ;;  %v7469_v0 = vperm.slane %v821_v46, 1  ;;  %v7471_v42 = vperm.slane %v829_v19, 4 }
  0xd8   : > { %10007 = vst [vmem:[#allocation38_spill] sm:$0xff] %v7454_v59  ;;  %v7473_v49 = vperm.slane %v821_v46, 2  ;;  %v7475_v52 = vperm.slane %v829_v19, 5  ;;  %v680_v3 = vrot.slane %v659_v53, 6  ;;  %v709_v26 = vrot.slane %v659_v53, 3  ;;  %v7477_v47 = vpop.permute.xlu0 %1028  ;;  %2384 = vmatpush.msrb.mxu0 %v2308_v38 }
  0xd9   : > { %10008 = vst [vmem:[#allocation39_spill] sm:$0xff] %v7456_v37  ;;  %v1988_v5 = vand.u32 2147483647, %v1860_v41  ;;  %v1249_v48 = vand.u32 2147483647, %v1121_v6  ;;  %v1797_v13 = vsub.f32 %v7043_v62, %v7448_v44  ;;  %v1185_v46 = vsub.f32 %v7063_v8, %v7446_v40 }
  0xda   : > { %10009 = vst [vmem:[#allocation40_spill] sm:$0xff] %v7469_v0  ;;  %v10015_v19 = vrot.slane %v7291_v11, 6  ;;  %v10016_v53 = vrot.slane %v7291_v11, 3  ;;  %v1861_v1 = vsub.f32 %v7068_v10, %v7448_v44  ;;  %v1116_v41 = vsub.f32 %v7041_v61, %v7380_v58 }
  0xdb   : > { %10010 = vst [vmem:[#allocation41_spill] sm:$0xff] %v7471_v42  ;;  %v2116_v39 = vsub.f32 1.0, %v1988_v5  ;;  %v1377_v36 = vsub.f32 1.0, %v1249_v48  ;;  %v1925_v45 = vand.u32 2147483647, %v1797_v13  ;;  %v1792_v11 = vsub.f32 %v7107_v27, %v7382_v2 }
  0xdc   : > { %10011 = vst [vmem:[#allocation42_spill] sm:$0xff] %v7473_v49  ;;  %v681_v24 = vsel %vm669_vm13, %v10015_v19, %v680_v3  ;;  %v710_v38 = vsel %vm698_vm14, %v10016_v53, %v709_v26  ;;  %v1313_v12 = vand.u32 2147483647, %v1185_v46  ;;  %v1989_v56 = vand.u32 2147483647, %v1861_v1 }
  0xdd   : > { %10012 = vst [vmem:[#allocation43_spill] sm:$0xff] %v7475_v52  ;;  %v689_v6 = vmul.f32 %v681_v24, %v7083_v16  ;;  %v718_v17 = vmul.f32 %v710_v38, %v7083_v16  ;;  %v2244_v19 = vmax.f32 %v2116_v39, 0.0  ;;  %v1505_v53 = vmax.f32 %v1377_v36, 0.0 }
  0xde   : > { %10013 = vst [vmem:[#allocation44_spill] sm:$0xff] %v7477_v47  ;;  %v2053_v52 = vsub.f32 1.0, %v1925_v45  ;;  %v1441_v49 = vsub.f32 1.0, %v1313_v12  ;;  %v2117_v37 = vsub.f32 1.0, %v1989_v56  ;;  %v1244_v59 = vand.u32 2147483647, %v1116_v41 }
  0xdf   : > { %v693_v3 = vadd.f32 1.0, %v689_v6  ;;  %v722_v26 = vadd.f32 1.0, %v718_v17  ;;  %v2372_v5 = vmul.f32 %v2244_v19, %v1568_v50  ;;  %v1920_v48 = vand.u32 2147483647, %v1792_v11 }
  0xe0   : > { %v2181_v13 = vmax.f32 %v2053_v52, 0.0  ;;  %v1569_v46 = vmax.f32 %v1441_v49, 0.0  ;;  %v2245_v1 = vmax.f32 %v2117_v37, 0.0  ;;  %v1372_v38 = vsub.f32 1.0, %v1244_v59  ;;  %v7509_v45 = vpop.permute.xlu0 %943  ;;  %v7513_v59 = vpop.permute.xlu2 %1619 }
  0xe1   : > { %v7501_v31 = vmul.f32 7.5, %v693_v3  ;;  %v7503_v24 = vmul.f32 7.5, %v722_v26  ;;  %2413 = vmatpush.msrb.mxu1 %v2372_v5  ;;  %v2048_v39 = vsub.f32 1.0, %v1920_v48  ;;  %v1180_v12 = vsub.f32 %v7066_v9, %v7380_v58  ;;  %10019 = vst [vmem:[#allocation48_spill] sm:$0xff] %v7509_v45  ;;  %v7515_v52 = vpop.permute.xlu1 %1023 }
  0xe2   : > { %v2309_v56 = vmul.f32 %v2181_v13, %v1505_v53  ;;  %v2373_v36 = vmul.f32 %v2245_v1, %v1569_v46  ;;  %v1500_v41 = vmax.f32 %v1372_v38, 0.0  ;;  %v1856_v50 = vsub.f32 %v7112_v30, %v7382_v2  ;;  %10020 = vst [vmem:[#allocation49_spill] sm:$0xff] %v7513_v59 }
  0xe3   : > { %10017 = vst [vmem:[#allocation46_spill] sm:$0xff] %v7501_v31  ;;  %v818_v16 = vmax.f32 %v7501_v31, 0.0  ;;  %v826_v17 = vmax.f32 %v7503_v24, 0.0  ;;  %v2176_v6 = vmax.f32 %v2048_v39, 0.0  ;;  %v1308_v11 = vand.u32 2147483647, %v1180_v12 }
  0xe4   : > { %10018 = vst [vmem:[#allocation47_spill] sm:$0xff] %v7503_v24  ;;  %2442 = vmatpush.msrb.mxu2 %v2309_v56  ;;  %2471 = vmatpush.msrb.mxu3 %v2373_v36  ;;  %v1984_v3 = vand.u32 2147483647, %v1856_v50  ;;  %v1117_v26 = vsub.f32 %v7041_v61, %v7446_v40  ;;  %v1793_v19 = vsub.f32 %v7107_v27, %v7448_v44 }
  0xe5   : > { %v822_v49 = vmin.f32 %v818_v16, 15.0  ;;  %v830_v37 = vmin.f32 %v826_v17, 15.0  ;;  %10021 = vst [vmem:[#allocation50_spill] sm:$0xff] %v7515_v52  ;;  %v1181_v53 = vsub.f32 %v7066_v9, %v7446_v40  ;;  %v2304_v38 = vmul.f32 %v2176_v6, %v1500_v41 }
  0xe6   : > { %v1436_v17 = vsub.f32 1.0, %v1308_v11  ;;  %v2112_v39 = vsub.f32 1.0, %v1984_v3  ;;  %v1245_v12 = vand.u32 2147483647, %v1117_v26  ;;  %v1921_v56 = vand.u32 2147483647, %v1793_v19 }
  0xe7   : > { %v7523_v16 = vperm.slane %v822_v49, 0  ;;  %v7525_v5 = vperm.slane %v830_v37, 3  ;;  %v7527_v48 = vperm.slane %v822_v49, 1  ;;  %v7529_v13 = vperm.slane %v830_v37, 4  ;;  %2385 = vmatpush.msrb.mxu0 %v2304_v38 }
  0xe8   : > { %v7531_v46 = vperm.slane %v822_v49, 2  ;;  %v7533_v1 = vperm.slane %v830_v37, 5  ;;  %v1857_v36 = vsub.f32 %v7112_v30, %v7448_v44  ;;  %v1564_v50 = vmax.f32 %v1436_v17, 0.0  ;;  %v7543_v21 = vpop.permute.xlu0 %1699 }
  0xe9   : > { %10022 = vst [vmem:[#allocation51_spill] sm:$0xff] %v7527_v48  ;;  %v1309_v31 = vand.u32 2147483647, %v1181_v53  ;;  %v1112_v24 = vsub.f32 %v7110_v29, %v7380_v58  ;;  %v1788_v49 = vsub.f32 %v7204_v28, %v7382_v2  ;;  %v1373_v37 = vsub.f32 1.0, %v1245_v12  ;;  %v7547_v12 = vpop.permute.xlu1 %938 }
  0xea   : > { %10023 = vst [vmem:[#allocation52_spill] sm:$0xff] %v7529_v13  ;;  %v1985_v41 = vand.u32 2147483647, %v1857_v36  ;;  %v1176_v26 = vsub.f32 %v7193_v14, %v7380_v58 }
  0xeb   : > { %10024 = vst [vmem:[#allocation53_spill] sm:$0xff] %v7531_v46  ;;  %v2240_v46 = vmax.f32 %v2112_v39, 0.0  ;;  %v1437_v6 = vsub.f32 1.0, %v1309_v31  ;;  %v1240_v11 = vand.u32 2147483647, %v1112_v24  ;;  %v1501_v38 = vmax.f32 %v1373_v37, 0.0  ;;  %v7545_v39 = vpop.permute.xlu2 %1018 }
  0xec   : > { %10025 = vst [vmem:[#allocation54_spill] sm:$0xff] %v7533_v1  ;;  %v2049_v1 = vsub.f32 1.0, %v1921_v56  ;;  %v1916_v3 = vand.u32 2147483647, %v1788_v49  ;;  %v2113_v53 = vsub.f32 1.0, %v1985_v41  ;;  %v1852_v56 = vsub.f32 %v7199_v25, %v7382_v2 }
  0xed   : > { %v2368_v19 = vmul.f32 %v2240_v46, %v1564_v50  ;;  %10026 = vst [vmem:[#allocation55_spill] sm:$0xff] %v7543_v21  ;;  %v1565_v13 = vmax.f32 %v1437_v6, 0.0  ;;  %v1368_v48 = vsub.f32 1.0, %v1240_v11  ;;  %v1304_v0 = vand.u32 2147483647, %v1176_v26 }
  0xee   : > { %v2177_v17 = vmax.f32 %v2049_v1, 0.0  ;;  %v2044_v42 = vsub.f32 1.0, %v1916_v3  ;;  %10027 = vst [vmem:[#allocation56_spill] sm:$0xff] %v7545_v39  ;;  %v2241_v24 = vmax.f32 %v2113_v53, 0.0  ;;  %v1113_v46 = vsub.f32 %v7110_v29, %v7446_v40 }
  0xef   : > { %2414 = vmatpush.msrb.mxu1 %v2368_v19  ;;  %v1496_v1 = vmax.f32 %v1368_v48, 0.0  ;;  %v1432_v50 = vsub.f32 1.0, %v1304_v0  ;;  %v1789_v49 = vsub.f32 %v7204_v28, %v7448_v44  ;;  %v1980_v41 = vand.u32 2147483647, %v1852_v56 }
  0xf0   : > { %v2305_v31 = vmul.f32 %v2177_v17, %v1501_v38  ;;  %v2172_v36 = vmax.f32 %v2044_v42, 0.0  ;;  %v2369_v37 = vmul.f32 %v2241_v24, %v1565_v13  ;;  %v1241_v6 = vand.u32 2147483647, %v1113_v46  ;;  %v7567_v54 = vpop.permute.xlu0 %1614 }
  0xf1   : > { %v1177_v11 = vsub.f32 %v7193_v14, %v7446_v40  ;;  %v1560_v26 = vmax.f32 %v1432_v50, 0.0  ;;  %v1917_v19 = vand.u32 2147483647, %v1789_v49  ;;  %v1853_v38 = vsub.f32 %v7199_v25, %v7448_v44 }
  0xf2   : > { %2443 = vmatpush.msrb.mxu2 %v2305_v31  ;;  %v2300_v3 = vmul.f32 %v2172_v36, %v1496_v1  ;;  %2472 = vmatpush.msrb.mxu3 %v2369_v37  ;;  %v2108_v48 = vsub.f32 1.0, %v1980_v41  ;;  %v1369_v42 = vsub.f32 1.0, %v1241_v6  ;;  %v1108_v17 = vsub.f32 %v7285_v4, %v7380_v58 }
  0xf3   : > { %v1305_v0 = vand.u32 2147483647, %v1177_v11  ;;  %v2045_v13 = vsub.f32 1.0, %v1917_v19  ;;  %v1981_v53 = vand.u32 2147483647, %v1853_v38  ;;  %v1784_v31 = vsub.f32 %v7287_v7, %v7382_v2 }
  0xf4   : > { %2386 = vmatpush.msrb.mxu0 %v2300_v3  ;;  %v1172_v24 = vsub.f32 %v7296_v15, %v7380_v58  ;;  %v2236_v56 = vmax.f32 %v2108_v48, 0.0  ;;  %v1497_v46 = vmax.f32 %v1369_v42, 0.0  ;;  %v1236_v36 = vand.u32 2147483647, %v1108_v17  ;;  %v7569_v48 = vpop.permute.xlu2 %933  ;;  %v7571_v42 = vpop.permute.xlu1 %1694 }
  0xf5   : > { %v1433_v1 = vsub.f32 1.0, %v1305_v0  ;;  %v2173_v50 = vmax.f32 %v2045_v13, 0.0  ;;  %v2109_v49 = vsub.f32 1.0, %v1981_v53  ;;  %v1912_v37 = vand.u32 2147483647, %v1784_v31  ;;  %10028 = vst [vmem:[#allocation57_spill] sm:$0xff] %v7569_v48 }
  0xf6   : > { %v1300_v41 = vand.u32 2147483647, %v1172_v24  ;;  %v2364_v6 = vmul.f32 %v2236_v56, %v1560_v26  ;;  %v1364_v57 = vsub.f32 1.0, %v1236_v36  ;;  %v1848_v3 = vsub.f32 %v7350_v33, %v7382_v2  ;;  %10029 = vst [vmem:[#allocation58_spill] sm:$0xff] %v7571_v42 }
  0xf7   : > { %v1561_v11 = vmax.f32 %v1433_v1, 0.0  ;;  %v2301_v19 = vmul.f32 %v2173_v50, %v1497_v46  ;;  %v2237_v38 = vmax.f32 %v2109_v49, 0.0  ;;  %v2040_v18 = vsub.f32 1.0, %v1912_v37 }
  0xf8   : > { %v1428_v35 = vsub.f32 1.0, %v1300_v41  ;;  %2415 = vmatpush.msrb.mxu1 %v2364_v6  ;;  %v1492_v0 = vmax.f32 %v1364_v57, 0.0  ;;  %v1976_v17 = vand.u32 2147483647, %v1848_v3  ;;  %v1109_v26 = vsub.f32 %v7285_v4, %v7446_v40 }
  0xf9   : > { %v1785_v13 = vsub.f32 %v7287_v7, %v7448_v44  ;;  %2444 = vmatpush.msrb.mxu2 %v2301_v19  ;;  %v2365_v53 = vmul.f32 %v2237_v38, %v1561_v11  ;;  %v2168_v31 = vmax.f32 %v2040_v18, 0.0  ;;  %v1173_v56 = vsub.f32 %v7296_v15, %v7446_v40 }
  0xfa   : > { %v1556_v24 = vmax.f32 %v1428_v35, 0.0  ;;  %v2104_v46 = vsub.f32 1.0, %v1976_v17  ;;  %v1237_v1 = vand.u32 2147483647, %v1109_v26  ;;  %v1849_v57 = vsub.f32 %v7350_v33, %v7448_v44 }
  0xfb   : > { %v1913_v36 = vand.u32 2147483647, %v1785_v13  ;;  %2473 = vmatpush.msrb.mxu3 %v2365_v53  ;;  %v2296_v50 = vmul.f32 %v2168_v31, %v1492_v0  ;;  %v1301_v49 = vand.u32 2147483647, %v1173_v56  ;;  %v1104_v37 = vsub.f32 %v7359_v22, %v7380_v58 }
  0xfc   : > { %v1780_v41 = vsub.f32 %v7419_v51, %v7382_v2  ;;  %v2232_v18 = vmax.f32 %v2104_v46, 0.0  ;;  %v1365_v35 = vsub.f32 1.0, %v1237_v1  ;;  %v1977_v11 = vand.u32 2147483647, %v1849_v57 }
  0xfd   : > { %v2041_v6 = vsub.f32 1.0, %v1913_v36  ;;  %2387 = vmatpush.msrb.mxu0 %v2296_v50  ;;  %v1429_v3 = vsub.f32 1.0, %v1301_v49  ;;  %v1232_v19 = vand.u32 2147483647, %v1104_v37  ;;  %v1168_v17 = vsub.f32 %v7352_v20, %v7380_v58 }
  0xfe   : > { %v1908_v38 = vand.u32 2147483647, %v1780_v41  ;;  %v2360_v26 = vmul.f32 %v2232_v18, %v1556_v24  ;;  %v1493_v0 = vmax.f32 %v1365_v35, 0.0  ;;  %v2105_v53 = vsub.f32 1.0, %v1977_v11  ;;  %v7593_v41 = vpop.permute.xlu0 %1013  ;;  %v7595_v18 = vpop.permute.xlu2 %1689 }
  0xff   : > { %v2169_v13 = vmax.f32 %v2041_v6, 0.0  ;;  %v1557_v31 = vmax.f32 %v1429_v3, 0.0  ;;  %v1360_v56 = vsub.f32 1.0, %v1232_v19  ;;  %v1296_v15 = vand.u32 2147483647, %v1168_v17  ;;  %10030 = vst [vmem:[#allocation59_spill] sm:$0xff] %v7593_v41  ;;  %v7599_v19 = vpop.permute.xlu1 %1609 }
 0x100   : > { %v2036_v33 = vsub.f32 1.0, %v1908_v38  ;;  %2416 = vmatpush.msrb.mxu1 %v2360_v26  ;;  %v2233_v1 = vmax.f32 %v2105_v53, 0.0  ;;  %v1844_v36 = vsub.f32 %v7424_v55, %v7382_v2  ;;  %v1105_v57 = vsub.f32 %v7359_v22, %v7446_v40  ;;  %10031 = vst [vmem:[#allocation60_spill] sm:$0xff] %v7595_v18 }
 0x101   : > { %v2297_v46 = vmul.f32 %v2169_v13, %v1493_v0  ;;  %v1488_v50 = vmax.f32 %v1360_v56, 0.0  ;;  %v1424_v37 = vsub.f32 1.0, %v1296_v15  ;;  %v1781_v24 = vsub.f32 %v7419_v51, %v7448_v44  ;;  %10032 = vst [vmem:[#allocation61_spill] sm:$0xff] %v7599_v19 }
 0x102   : > { %v2164_v49 = vmax.f32 %v2036_v33, 0.0  ;;  %v2361_v35 = vmul.f32 %v2233_v1, %v1557_v31  ;;  %v1972_v6 = vand.u32 2147483647, %v1844_v36  ;;  %v1233_v11 = vand.u32 2147483647, %v1105_v57 }
 0x103   : > { %2445 = vmatpush.msrb.mxu2 %v2297_v46  ;;  %v1169_v3 = vsub.f32 %v7352_v20, %v7446_v40  ;;  %v1552_v17 = vmax.f32 %v1424_v37, 0.0  ;;  %v1909_v33 = vand.u32 2147483647, %v1781_v24  ;;  %v1845_v15 = vsub.f32 %v7424_v55, %v7448_v44 }
 0x104   : > { %v2292_v38 = vmul.f32 %v2164_v49, %v1488_v50  ;;  %2474 = vmatpush.msrb.mxu3 %v2361_v35  ;;  %v2100_v26 = vsub.f32 1.0, %v1972_v6  ;;  %v1361_v0 = vsub.f32 1.0, %v1233_v11  ;;  %v1100_v53 = vsub.f32 %v7421_v32, %v7380_v58 }
 0x105   : > { %v1297_v13 = vand.u32 2147483647, %v1169_v3  ;;  %v2037_v31 = vsub.f32 1.0, %v1909_v33  ;;  %v1973_v56 = vand.u32 2147483647, %v1845_v15  ;;  %v1776_v46 = vsub.f32 %v7481_v43, %v7382_v2 }
 0x106   : > { %2388 = vmatpush.msrb.mxu0 %v2292_v38  ;;  %v1164_v1 = vsub.f32 %v7477_v47, %v7380_v58  ;;  %v2228_v36 = vmax.f32 %v2100_v26, 0.0  ;;  %v1489_v57 = vmax.f32 %v1361_v0, 0.0  ;;  %v1228_v49 = vand.u32 2147483647, %v1100_v53 }
 0x107   : > { %v1425_v50 = vsub.f32 1.0, %v1297_v13  ;;  %v2165_v37 = vmax.f32 %v2037_v31, 0.0  ;;  %v2101_v24 = vsub.f32 1.0, %v1973_v56  ;;  %v1904_v35 = vand.u32 2147483647, %v1776_v46  ;;  %v7617_v46 = vpop.permute.xlu0 %928 }
 0x108   : > { %v1292_v6 = vand.u32 2147483647, %v1164_v1  ;;  %v2356_v11 = vmul.f32 %v2228_v36, %v1552_v17  ;;  %v1356_v55 = vsub.f32 1.0, %v1228_v49  ;;  %v1840_v38 = vsub.f32 %v7479_v34, %v7382_v2  ;;  %10033 = vst [vmem:[#allocation62_spill] sm:$0xff] %v7617_v46  ;;  %v7619_v1 = vpop.permute.xlu2 %1604  ;;  %v7623_v49 = vpop.permute.xlu1 %1008 }
 0x109   : > { %v1553_v3 = vmax.f32 %v1425_v50, 0.0  ;;  %v2293_v33 = vmul.f32 %v2165_v37, %v1489_v57  ;;  %v2229_v15 = vmax.f32 %v2101_v24, 0.0  ;;  %v2032_v20 = vsub.f32 1.0, %v1904_v35  ;;  %10034 = vst [vmem:[#allocation63_spill] sm:$0xff] %v7619_v1 }
 0x10a   : > { %v1420_v25 = vsub.f32 1.0, %v1292_v6  ;;  %2417 = vmatpush.msrb.mxu1 %v2356_v11  ;;  %v1484_v14 = vmax.f32 %v1356_v55, 0.0  ;;  %v1968_v26 = vand.u32 2147483647, %v1840_v38  ;;  %v1101_v0 = vsub.f32 %v7421_v32, %v7446_v40  ;;  %10035 = vst [vmem:[#allocation64_spill] sm:$0xff] %v7623_v49 }
 0x10b   : > { %v1777_v13 = vsub.f32 %v7481_v43, %v7448_v44  ;;  %2446 = vmatpush.msrb.mxu2 %v2293_v33  ;;  %v2357_v17 = vmul.f32 %v2229_v15, %v1553_v3  ;;  %v2160_v53 = vmax.f32 %v2032_v20, 0.0  ;;  %v1165_v56 = vsub.f32 %v7477_v47, %v7446_v40 }
 0x10c   : > { %v1548_v31 = vmax.f32 %v1420_v25, 0.0  ;;  %v2096_v36 = vsub.f32 1.0, %v1968_v26  ;;  %v1229_v55 = vand.u32 2147483647, %v1101_v0  ;;  %v1841_v50 = vsub.f32 %v7479_v34, %v7448_v44 }
 0x10d   : > { %v1905_v57 = vand.u32 2147483647, %v1777_v13  ;;  %2475 = vmatpush.msrb.mxu3 %v2357_v17  ;;  %v2288_v37 = vmul.f32 %v2160_v53, %v1484_v14  ;;  %v1293_v24 = vand.u32 2147483647, %v1165_v56  ;;  %v1096_v25 = vsub.f32 %v7509_v45, %v7380_v58 }
 0x10e   : > { %v1772_v20 = vsub.f32 %v7513_v59, %v7382_v2  ;;  %v2224_v35 = vmax.f32 %v2096_v36, 0.0  ;;  %v1357_v6 = vsub.f32 1.0, %v1229_v55  ;;  %v1969_v3 = vand.u32 2147483647, %v1841_v50 }
 0x10f   : > { %v2033_v11 = vsub.f32 1.0, %v1905_v57  ;;  %2389 = vmatpush.msrb.mxu0 %v2288_v37  ;;  %v1421_v38 = vsub.f32 1.0, %v1293_v24  ;;  %v1224_v33 = vand.u32 2147483647, %v1096_v25  ;;  %v1160_v26 = vsub.f32 %v7515_v52, %v7380_v58 }
 0x110   : > { %v1900_v15 = vand.u32 2147483647, %v1772_v20  ;;  %v2352_v0 = vmul.f32 %v2224_v35, %v1548_v31  ;;  %v1485_v14 = vmax.f32 %v1357_v6, 0.0  ;;  %v2097_v17 = vsub.f32 1.0, %v1969_v3 }
 0x111   : > { %v2161_v13 = vmax.f32 %v2033_v11, 0.0  ;;  %v1549_v53 = vmax.f32 %v1421_v38, 0.0  ;;  %v1352_v56 = vsub.f32 1.0, %v1224_v33  ;;  %v1288_v47 = vand.u32 2147483647, %v1160_v26  ;;  %v7641_v26 = vpop.permute.xlu0 %1684 }
 0x112   : > { %v2028_v34 = vsub.f32 1.0, %v1900_v15  ;;  %2418 = vmatpush.msrb.mxu1 %v2352_v0  ;;  %v2225_v55 = vmax.f32 %v2097_v17, 0.0  ;;  %v1836_v57 = vsub.f32 %v7543_v21, %v7382_v2  ;;  %v1097_v50 = vsub.f32 %v7509_v45, %v7446_v40  ;;  %10036 = vst [vmem:[#allocation65_spill] sm:$0xff] %v7641_v26  ;;  %v7647_v17 = vpop.permute.xlu1 %923 }
 0x113   : > { %v2289_v36 = vmul.f32 %v2161_v13, %v1485_v14  ;;  %v1480_v37 = vmax.f32 %v1352_v56, 0.0  ;;  %v1416_v25 = vsub.f32 1.0, %v1288_v47  ;;  %v1773_v31 = vsub.f32 %v7513_v59, %v7448_v44  ;;  %10038 = vst [vmem:[#allocation67_spill] sm:$0xff] %v7647_v17 }
 0x114   : > { %v2156_v24 = vmax.f32 %v2028_v34, 0.0  ;;  %v2353_v20 = vmul.f32 %v2225_v55, %v1549_v53  ;;  %v1964_v35 = vand.u32 2147483647, %v1836_v57  ;;  %v1225_v6 = vand.u32 2147483647, %v1097_v50  ;;  %v7643_v34 = vpop.permute.xlu2 %1003 }
 0x115   : > { %2447 = vmatpush.msrb.mxu2 %v2289_v36  ;;  %v1161_v11 = vsub.f32 %v7515_v52, %v7446_v40  ;;  %v1544_v38 = vmax.f32 %v1416_v25, 0.0  ;;  %v1901_v33 = vand.u32 2147483647, %v1773_v31  ;;  %v1837_v15 = vsub.f32 %v7543_v21, %v7448_v44  ;;  %10037 = vst [vmem:[#allocation66_spill] sm:$0xff] %v7643_v34 }
 0x116   : > { %v2284_v3 = vmul.f32 %v2156_v24, %v1480_v37  ;;  %2476 = vmatpush.msrb.mxu3 %v2353_v20  ;;  %v2092_v47 = vsub.f32 1.0, %v1964_v35  ;;  %v1353_v0 = vsub.f32 1.0, %v1225_v6  ;;  %v1092_v13 = vsub.f32 %v7547_v12, %v7380_v58 }
 0x117   : > { %v1289_v14 = vand.u32 2147483647, %v1161_v11  ;;  %v2029_v53 = vsub.f32 1.0, %v1901_v33  ;;  %v1965_v56 = vand.u32 2147483647, %v1837_v15  ;;  %v1768_v36 = vsub.f32 %v7567_v54, %v7382_v2 }
 0x118   : > { %2390 = vmatpush.msrb.mxu0 %v2284_v3  ;;  %v1156_v55 = vsub.f32 %v7545_v39, %v7380_v58  ;;  %v2220_v57 = vmax.f32 %v2092_v47, 0.0  ;;  %v1481_v50 = vmax.f32 %v1353_v0, 0.0  ;;  %v1220_v24 = vand.u32 2147483647, %v1092_v13 }
 0x119   : > { %v1417_v37 = vsub.f32 1.0, %v1289_v14  ;;  %v2157_v25 = vmax.f32 %v2029_v53, 0.0  ;;  %v2093_v31 = vsub.f32 1.0, %v1965_v56  ;;  %v1896_v20 = vand.u32 2147483647, %v1768_v36 }
 0x11a   : > { %v1284_v35 = vand.u32 2147483647, %v1156_v55  ;;  %v2348_v6 = vmul.f32 %v2220_v57, %v1544_v38  ;;  %v1348_v21 = vsub.f32 1.0, %v1220_v24  ;;  %v1832_v3 = vsub.f32 %v7571_v42, %v7382_v2 }
 0x11b   : > { %v1545_v11 = vmax.f32 %v1417_v37, 0.0  ;;  %v2285_v33 = vmul.f32 %v2157_v25, %v1481_v50  ;;  %v2221_v15 = vmax.f32 %v2093_v31, 0.0  ;;  %v2024_v52 = vsub.f32 1.0, %v1896_v20 }
 0x11c   : > { %v1412_v59 = vsub.f32 1.0, %v1284_v35  ;;  %2419 = vmatpush.msrb.mxu1 %v2348_v6  ;;  %v1476_v45 = vmax.f32 %v1348_v21, 0.0  ;;  %v1960_v47 = vand.u32 2147483647, %v1832_v3  ;;  %v1093_v0 = vsub.f32 %v7547_v12, %v7446_v40 }
 0x11d   : > { %v1769_v14 = vsub.f32 %v7567_v54, %v7448_v44  ;;  %2448 = vmatpush.msrb.mxu2 %v2285_v33  ;;  %v2349_v38 = vmul.f32 %v2221_v15, %v1545_v11  ;;  %v2152_v13 = vmax.f32 %v2024_v52, 0.0  ;;  %v1157_v56 = vsub.f32 %v7545_v39, %v7446_v40  ;;  %v7667_v52 = vpop.permute.xlu0 %1599  ;;  %v7671_v11 = vpop.permute.xlu1 %1679 }
 0x11e   : > { %v1540_v53 = vmax.f32 %v1412_v59, 0.0  ;;  %v2088_v36 = vsub.f32 1.0, %v1960_v47  ;;  %v1221_v55 = vand.u32 2147483647, %v1093_v0  ;;  %v1833_v21 = vsub.f32 %v7571_v42, %v7448_v44  ;;  %10039 = vst [vmem:[#allocation68_spill] sm:$0xff] %v7667_v52  ;;  %v7669_v59 = vpop.permute.xlu2 %918 }
 0x11f   : > { %v1897_v57 = vand.u32 2147483647, %v1769_v14  ;;  %2477 = vmatpush.msrb.mxu3 %v2349_v38  ;;  %v2280_v50 = vmul.f32 %v2152_v13, %v1476_v45  ;;  %v1285_v37 = vand.u32 2147483647, %v1157_v56  ;;  %v1088_v24 = vsub.f32 %v7569_v48, %v7380_v58  ;;  %10040 = vst [vmem:[#allocation69_spill] sm:$0xff] %v7669_v59 }
 0x120   : > { %v1764_v25 = vsub.f32 %v7599_v19, %v7382_v2  ;;  %v2216_v31 = vmax.f32 %v2088_v36, 0.0  ;;  %v1349_v20 = vsub.f32 1.0, %v1221_v55  ;;  %v1961_v6 = vand.u32 2147483647, %v1833_v21  ;;  %10041 = vst [vmem:[#allocation70_spill] sm:$0xff] %v7671_v11 }
 0x121   : > { %v2025_v35 = vsub.f32 1.0, %v1897_v57  ;;  %2391 = vmatpush.msrb.mxu0 %v2280_v50  ;;  %v1413_v3 = vsub.f32 1.0, %v1285_v37  ;;  %v1216_v45 = vand.u32 2147483647, %v1088_v24  ;;  %v1152_v15 = vsub.f32 %v7593_v41, %v7380_v58 }
 0x122   : > { %v1892_v33 = vand.u32 2147483647, %v1764_v25  ;;  %v2344_v47 = vmul.f32 %v2216_v31, %v1540_v53  ;;  %v1477_v0 = vmax.f32 %v1349_v20, 0.0  ;;  %v2089_v38 = vsub.f32 1.0, %v1961_v6 }
 0x123   : > { %v2153_v14 = vmax.f32 %v2025_v35, 0.0  ;;  %v1541_v13 = vmax.f32 %v1413_v3, 0.0  ;;  %v1344_v56 = vsub.f32 1.0, %v1216_v45  ;;  %v1280_v36 = vand.u32 2147483647, %v1152_v15 }
 0x124   : > { %v2020_v42 = vsub.f32 1.0, %v1892_v33  ;;  %2420 = vmatpush.msrb.mxu1 %v2344_v47  ;;  %v2217_v57 = vmax.f32 %v2089_v38, 0.0  ;;  %v1828_v21 = vsub.f32 %v7595_v18, %v7382_v2  ;;  %v1089_v50 = vsub.f32 %v7569_v48, %v7446_v40 }
 0x125   : > { %v2281_v55 = vmul.f32 %v2153_v14, %v1477_v0  ;;  %v1472_v37 = vmax.f32 %v1344_v56, 0.0  ;;  %v1408_v25 = vsub.f32 1.0, %v1280_v36  ;;  %v1765_v53 = vsub.f32 %v7599_v19, %v7448_v44 }
 0x126   : > { %v2148_v24 = vmax.f32 %v2020_v42, 0.0  ;;  %v2345_v31 = vmul.f32 %v2217_v57, %v1541_v13  ;;  %v1956_v20 = vand.u32 2147483647, %v1828_v21  ;;  %v1217_v35 = vand.u32 2147483647, %v1089_v50  ;;  %v7693_v57 = vpop.permute.xlu2 %1674 }
 0x127   : > { %2449 = vmatpush.msrb.mxu2 %v2281_v55  ;;  %v1153_v6 = vsub.f32 %v7593_v41, %v7446_v40  ;;  %v1536_v45 = vmax.f32 %v1408_v25, 0.0  ;;  %v1893_v33 = vand.u32 2147483647, %v1765_v53  ;;  %v1829_v15 = vsub.f32 %v7595_v18, %v7448_v44  ;;  %v7691_v55 = vpop.permute.xlu0 %998  ;;  %10043 = vst [vmem:[#allocation72_spill] sm:$0xff] %v7693_v57  ;;  %v7695_v25 = vpop.permute.xlu1 %1594 }
 0x128   : > { %v2276_v3 = vmul.f32 %v2148_v24, %v1472_v37  ;;  %2478 = vmatpush.msrb.mxu3 %v2345_v31  ;;  %v2084_v47 = vsub.f32 1.0, %v1956_v20  ;;  %v1345_v42 = vsub.f32 1.0, %v1217_v35  ;;  %v1084_v14 = vsub.f32 %v7617_v46, %v7380_v58  ;;  %10042 = vst [vmem:[#allocation71_spill] sm:$0xff] %v7691_v55 }
 0x129   : > { %v1281_v0 = vand.u32 2147483647, %v1153_v6  ;;  %v2021_v38 = vsub.f32 1.0, %v1893_v33  ;;  %v1957_v13 = vand.u32 2147483647, %v1829_v15  ;;  %v1760_v56 = vsub.f32 %v7619_v1, %v7382_v2  ;;  %10044 = vst [vmem:[#allocation73_spill] sm:$0xff] %v7695_v25 }
 0x12a   : > { %2392 = vmatpush.msrb.mxu0 %v2276_v3  ;;  %v1085_v36 = vsub.f32 %v7617_v46, %v7446_v40  ;;  %v2212_v21 = vmax.f32 %v2084_v47, 0.0  ;;  %v1473_v50 = vmax.f32 %v1345_v42, 0.0  ;;  %v1212_v24 = vand.u32 2147483647, %v1084_v14 }
 0x12b   : > { %v1409_v37 = vsub.f32 1.0, %v1281_v0  ;;  %v2149_v53 = vmax.f32 %v2021_v38, 0.0  ;;  %v2085_v31 = vsub.f32 1.0, %v1957_v13  ;;  %v1888_v20 = vand.u32 2147483647, %v1760_v56 }
 0x12c   : > { %v1213_v35 = vand.u32 2147483647, %v1085_v36  ;;  %v2340_v6 = vmul.f32 %v2212_v21, %v1536_v45  ;;  %v1340_v33 = vsub.f32 1.0, %v1212_v24  ;;  %v1761_v15 = vsub.f32 %v7619_v1, %v7448_v44 }
 0x12d   : > { %v1537_v3 = vmax.f32 %v1409_v37, 0.0  ;;  %v2277_v18 = vmul.f32 %v2149_v53, %v1473_v50  ;;  %v2213_v41 = vmax.f32 %v2085_v31, 0.0  ;;  %v2016_v39 = vsub.f32 1.0, %v1888_v20 }
 0x12e   : > { %v1341_v46 = vsub.f32 1.0, %v1213_v35  ;;  %2421 = vmatpush.msrb.mxu1 %v2340_v6  ;;  %v1468_v47 = vmax.f32 %v1340_v33, 0.0  ;;  %v1889_v42 = vand.u32 2147483647, %v1761_v15  ;;  %v1148_v0 = vsub.f32 %v7623_v49, %v7380_v58 }
 0x12f   : > { %v1824_v14 = vsub.f32 %v7641_v26, %v7382_v2  ;;  %2450 = vmatpush.msrb.mxu2 %v2277_v18  ;;  %v2341_v45 = vmul.f32 %v2213_v41, %v1537_v3  ;;  %v2144_v38 = vmax.f32 %v2016_v39, 0.0  ;;  %v1149_v56 = vsub.f32 %v7623_v49, %v7446_v40  ;;  %v7713_v15 = vpop.permute.xlu0 %913 }
 0x130   : > { %v1469_v13 = vmax.f32 %v1341_v46, 0.0  ;;  %v2017_v36 = vsub.f32 1.0, %v1889_v42  ;;  %v1276_v21 = vand.u32 2147483647, %v1148_v0  ;;  %v1825_v37 = vsub.f32 %v7641_v26, %v7448_v44  ;;  %10045 = vst [vmem:[#allocation74_spill] sm:$0xff] %v7713_v15 }
 0x131   : > { %v1952_v50 = vand.u32 2147483647, %v1824_v14  ;;  %2479 = vmatpush.msrb.mxu3 %v2341_v45  ;;  %v2272_v24 = vmul.f32 %v2144_v38, %v1468_v47  ;;  %v1277_v53 = vand.u32 2147483647, %v1149_v56  ;;  %v1080_v31 = vsub.f32 %v7647_v17, %v7380_v58  ;;  %v7715_v47 = vpop.permute.xlu2 %1589  ;;  %v7717_v38 = vpop.permute.xlu1 %993 }
 0x132   : > { %v1756_v41 = vsub.f32 %v7667_v52, %v7382_v2  ;;  %v2145_v39 = vmax.f32 %v2017_v36, 0.0  ;;  %v1404_v18 = vsub.f32 1.0, %v1276_v21  ;;  %v1953_v20 = vand.u32 2147483647, %v1825_v37  ;;  %10046 = vst [vmem:[#allocation75_spill] sm:$0xff] %v7715_v47 }
 0x133   : > { %v2080_v46 = vsub.f32 1.0, %v1952_v50  ;;  %2393 = vmatpush.msrb.mxu0 %v2272_v24  ;;  %v1405_v35 = vsub.f32 1.0, %v1277_v53  ;;  %v1208_v6 = vand.u32 2147483647, %v1080_v31  ;;  %v1144_v33 = vsub.f32 %v7643_v34, %v7380_v58  ;;  %10047 = vst [vmem:[#allocation76_spill] sm:$0xff] %v7717_v38 }
 0x134   : > { %v1884_v3 = vand.u32 2147483647, %v1756_v41  ;;  %v2273_v42 = vmul.f32 %v2145_v39, %v1469_v13  ;;  %v1532_v0 = vmax.f32 %v1404_v18, 0.0  ;;  %v2081_v45 = vsub.f32 1.0, %v1953_v20 }
 0x135   : > { %v2208_v14 = vmax.f32 %v2080_v46, 0.0  ;;  %v1533_v56 = vmax.f32 %v1405_v35, 0.0  ;;  %v1336_v36 = vsub.f32 1.0, %v1208_v6  ;;  %v1272_v50 = vand.u32 2147483647, %v1144_v33 }
 0x136   : > { %v2012_v21 = vsub.f32 1.0, %v1884_v3  ;;  %2451 = vmatpush.msrb.mxu2 %v2273_v42  ;;  %v2209_v24 = vmax.f32 %v2081_v45, 0.0  ;;  %v1820_v53 = vsub.f32 %v7671_v11, %v7382_v2  ;;  %v1081_v31 = vsub.f32 %v7647_v17, %v7446_v40 }
 0x137   : > { %v2336_v37 = vmul.f32 %v2208_v14, %v1532_v0  ;;  %v1464_v41 = vmax.f32 %v1336_v36, 0.0  ;;  %v1400_v39 = vsub.f32 1.0, %v1272_v50  ;;  %v1757_v18 = vsub.f32 %v7667_v52, %v7448_v44 }
 0x138   : > { %v2140_v13 = vmax.f32 %v2012_v21, 0.0  ;;  %v2337_v46 = vmul.f32 %v2209_v24, %v1533_v56  ;;  %v1948_v20 = vand.u32 2147483647, %v1820_v53  ;;  %v1209_v35 = vand.u32 2147483647, %v1081_v31 }
 0x139   : > { %2422 = vmatpush.msrb.mxu1 %v2336_v37  ;;  %v1145_v6 = vsub.f32 %v7643_v34, %v7446_v40  ;;  %v1528_v33 = vmax.f32 %v1400_v39, 0.0  ;;  %v1885_v42 = vand.u32 2147483647, %v1757_v18  ;;  %v1821_v0 = vsub.f32 %v7671_v11, %v7448_v44  ;;  %v7741_v34 = vpop.permute.xlu1 %908 }
 0x13a   : > { %v2268_v3 = vmul.f32 %v2140_v13, %v1464_v41  ;;  %2480 = vmatpush.msrb.mxu3 %v2337_v46  ;;  %v2076_v14 = vsub.f32 1.0, %v1948_v20  ;;  %v1337_v45 = vsub.f32 1.0, %v1209_v35  ;;  %v1076_v21 = vsub.f32 %v7669_v59, %v7380_v58  ;;  %v7735_v35 = vpop.permute.xlu0 %1669  ;;  %10050 = vst [vmem:[#allocation79_spill] sm:$0xff] %v7741_v34 }
 0x13b   : > { %v1273_v36 = vand.u32 2147483647, %v1145_v6  ;;  %v2013_v56 = vsub.f32 1.0, %v1885_v42  ;;  %v1949_v50 = vand.u32 2147483647, %v1821_v0  ;;  %v1752_v37 = vsub.f32 %v7695_v25, %v7382_v2  ;;  %10048 = vst [vmem:[#allocation77_spill] sm:$0xff] %v7735_v35  ;;  %v7737_v6 = vpop.permute.xlu2 %988 }
 0x13c   : > { %2394 = vmatpush.msrb.mxu0 %v2268_v3  ;;  %v1140_v24 = vsub.f32 %v7691_v55, %v7380_v58  ;;  %v2204_v53 = vmax.f32 %v2076_v14, 0.0  ;;  %v1465_v31 = vmax.f32 %v1337_v45, 0.0  ;;  %v1204_v13 = vand.u32 2147483647, %v1076_v21  ;;  %10049 = vst [vmem:[#allocation78_spill] sm:$0xff] %v7737_v6 }
 0x13d   : > { %v1401_v41 = vsub.f32 1.0, %v1273_v36  ;;  %v2141_v39 = vmax.f32 %v2013_v56, 0.0  ;;  %v2077_v18 = vsub.f32 1.0, %v1949_v50  ;;  %v1880_v46 = vand.u32 2147483647, %v1752_v37 }
 0x13e   : > { %v1268_v20 = vand.u32 2147483647, %v1140_v24  ;;  %v2332_v3 = vmul.f32 %v2204_v53, %v1528_v33  ;;  %v1332_v0 = vsub.f32 1.0, %v1204_v13  ;;  %v1816_v11 = vsub.f32 %v7693_v57, %v7382_v2 }
 0x13f   : > { %v1529_v42 = vmax.f32 %v1401_v41, 0.0  ;;  %v2269_v14 = vmul.f32 %v2141_v39, %v1465_v31  ;;  %v2205_v45 = vmax.f32 %v2077_v18, 0.0  ;;  %v2008_v36 = vsub.f32 1.0, %v1880_v46 }
 0x140   : > { %v1396_v21 = vsub.f32 1.0, %v1268_v20  ;;  %2423 = vmatpush.msrb.mxu1 %v2332_v3  ;;  %v1460_v56 = vmax.f32 %v1332_v0, 0.0  ;;  %v1944_v50 = vand.u32 2147483647, %v1816_v11  ;;  %v1077_v37 = vsub.f32 %v7669_v59, %v7446_v40 }
 0x141   : > { %v1753_v33 = vsub.f32 %v7695_v25, %v7448_v44  ;;  %2452 = vmatpush.msrb.mxu2 %v2269_v14  ;;  %v2333_v24 = vmul.f32 %v2205_v45, %v1529_v42  ;;  %v2136_v53 = vmax.f32 %v2008_v36, 0.0  ;;  %v1141_v13 = vsub.f32 %v7691_v55, %v7446_v40 }
 0x142   : > { %v1524_v41 = vmax.f32 %v1396_v21, 0.0  ;;  %v2072_v31 = vsub.f32 1.0, %v1944_v50  ;;  %v1205_v39 = vand.u32 2147483647, %v1077_v37  ;;  %v1817_v46 = vsub.f32 %v7693_v57, %v7448_v44  ;;  %v7757_v25 = vpop.permute.xlu0 %1584 }
 0x143   : > { %v1881_v18 = vand.u32 2147483647, %v1753_v33  ;;  %2481 = vmatpush.msrb.mxu3 %v2333_v24  ;;  %v2264_v11 = vmul.f32 %v2136_v53, %v1460_v56  ;;  %v1269_v20 = vand.u32 2147483647, %v1141_v13  ;;  %v1072_v3 = vsub.f32 %v7713_v15, %v7380_v58  ;;  %10051 = vst [vmem:[#allocation80_spill] sm:$0xff] %v7757_v25 }
 0x144   : > { %v1748_v42 = vsub.f32 %v7715_v47, %v7382_v2  ;;  %v2200_v0 = vmax.f32 %v2072_v31, 0.0  ;;  %v1333_v14 = vsub.f32 1.0, %v1205_v39  ;;  %v1945_v36 = vand.u32 2147483647, %v1817_v46  ;;  %v7759_v31 = vpop.permute.xlu2 %903 }
 0x145   : > { %v2009_v45 = vsub.f32 1.0, %v1881_v18  ;;  %2395 = vmatpush.msrb.mxu0 %v2264_v11  ;;  %v1397_v21 = vsub.f32 1.0, %v1269_v20  ;;  %v1200_v50 = vand.u32 2147483647, %v1072_v3  ;;  %v1073_v33 = vsub.f32 %v7713_v15, %v7446_v40  ;;  %10052 = vst [vmem:[#allocation81_spill] sm:$0xff] %v7759_v31  ;;  %v7763_v11 = vpop.permute.xlu1 %1664 }
 0x146   : > { %v1876_v37 = vand.u32 2147483647, %v1748_v42  ;;  %v2328_v24 = vmul.f32 %v2200_v0, %v1524_v41  ;;  %v1461_v56 = vmax.f32 %v1333_v14, 0.0  ;;  %v2073_v13 = vsub.f32 1.0, %v1945_v36  ;;  %10053 = vst [vmem:[#allocation82_spill] sm:$0xff] %v7763_v11 }
 0x147   : > { %v2137_v53 = vmax.f32 %v2009_v45, 0.0  ;;  %v1525_v57 = vmax.f32 %v1397_v21, 0.0  ;;  %v1328_v55 = vsub.f32 1.0, %v1200_v50  ;;  %v1201_v49 = vand.u32 2147483647, %v1073_v33 }
 0x148   : > { %v2004_v26 = vsub.f32 1.0, %v1876_v37  ;;  %2424 = vmatpush.msrb.mxu1 %v2328_v24  ;;  %v2201_v18 = vmax.f32 %v2073_v13, 0.0  ;;  %v1749_v46 = vsub.f32 %v7715_v47, %v7448_v44  ;;  %v1136_v41 = vsub.f32 %v7717_v38, %v7380_v58 }
 0x149   : > { %v2265_v39 = vmul.f32 %v2137_v53, %v1461_v56  ;;  %v1456_v20 = vmax.f32 %v1328_v55, 0.0  ;;  %v1329_v42 = vsub.f32 1.0, %v1201_v49  ;;  %v1812_v0 = vsub.f32 %v7735_v35, %v7382_v2 }
 0x14a   : > { %v2132_v3 = vmax.f32 %v2004_v26, 0.0  ;;  %v2329_v14 = vmul.f32 %v2201_v18, %v1525_v57  ;;  %v1877_v45 = vand.u32 2147483647, %v1749_v46  ;;  %v1264_v36 = vand.u32 2147483647, %v1136_v41 }
 0x14b   : > { %2453 = vmatpush.msrb.mxu2 %v2265_v39  ;;  %v1137_v21 = vsub.f32 %v7717_v38, %v7446_v40  ;;  %v1457_v37 = vmax.f32 %v1329_v42, 0.0  ;;  %v1940_v33 = vand.u32 2147483647, %v1812_v0  ;;  %v1813_v24 = vsub.f32 %v7735_v35, %v7448_v44  ;;  %v7781_v35 = vpop.permute.xlu0 %983 }
 0x14c   : > { %v2260_v50 = vmul.f32 %v2132_v3, %v1456_v20  ;;  %2482 = vmatpush.msrb.mxu3 %v2329_v14  ;;  %v2005_v55 = vsub.f32 1.0, %v1877_v45  ;;  %v1392_v26 = vsub.f32 1.0, %v1264_v36  ;;  %v1068_v56 = vsub.f32 %v7741_v34, %v7380_v58  ;;  %10054 = vst [vmem:[#allocation83_spill] sm:$0xff] %v7781_v35 }
 0x14d   : > { %v1265_v49 = vand.u32 2147483647, %v1137_v21  ;;  %v2068_v57 = vsub.f32 1.0, %v1940_v33  ;;  %v1941_v53 = vand.u32 2147483647, %v1813_v24  ;;  %v1744_v13 = vsub.f32 %v7757_v25, %v7382_v2 }
 0x14e   : > { %2396 = vmatpush.msrb.mxu0 %v2260_v50  ;;  %v1132_v39 = vsub.f32 %v7737_v6, %v7380_v58  ;;  %v2133_v18 = vmax.f32 %v2005_v55, 0.0  ;;  %v1520_v46 = vmax.f32 %v1392_v26, 0.0  ;;  %v1196_v20 = vand.u32 2147483647, %v1068_v56  ;;  %v7783_v55 = vpop.permute.xlu2 %1659  ;;  %v7785_v26 = vpop.permute.xlu1 %1579 }
 0x14f   : > { %v1393_v41 = vsub.f32 1.0, %v1265_v49  ;;  %v2196_v3 = vmax.f32 %v2068_v57, 0.0  ;;  %v2069_v42 = vsub.f32 1.0, %v1941_v53  ;;  %v1872_v0 = vand.u32 2147483647, %v1744_v13  ;;  %10055 = vst [vmem:[#allocation84_spill] sm:$0xff] %v7783_v55 }
 0x150   : > { %v1260_v14 = vand.u32 2147483647, %v1132_v39  ;;  %v2261_v45 = vmul.f32 %v2133_v18, %v1457_v37  ;;  %v1324_v21 = vsub.f32 1.0, %v1196_v20  ;;  %v1808_v50 = vsub.f32 %v7763_v11, %v7382_v2  ;;  %10056 = vst [vmem:[#allocation85_spill] sm:$0xff] %v7785_v26 }
 0x151   : > { %v1521_v36 = vmax.f32 %v1393_v41, 0.0  ;;  %v2324_v33 = vmul.f32 %v2196_v3, %v1520_v46  ;;  %v2197_v24 = vmax.f32 %v2069_v42, 0.0  ;;  %v2000_v38 = vsub.f32 1.0, %v1872_v0 }
 0x152   : > { %v1388_v47 = vsub.f32 1.0, %v1260_v14  ;;  %2454 = vmatpush.msrb.mxu2 %v2261_v45  ;;  %v1452_v49 = vmax.f32 %v1324_v21, 0.0  ;;  %v1936_v56 = vand.u32 2147483647, %v1808_v50  ;;  %v1069_v37 = vsub.f32 %v7741_v34, %v7446_v40 }
 0x153   : > { %v1745_v57 = vsub.f32 %v7757_v25, %v7448_v44  ;;  %2425 = vmatpush.msrb.mxu1 %v2324_v33  ;;  %v2325_v53 = vmul.f32 %v2197_v24, %v1521_v36  ;;  %v2128_v13 = vmax.f32 %v2000_v38, 0.0  ;;  %v1133_v18 = vsub.f32 %v7737_v6, %v7446_v40 }
 0x154   : > { %v1516_v39 = vmax.f32 %v1388_v47, 0.0  ;;  %v2064_v46 = vsub.f32 1.0, %v1936_v56  ;;  %v1197_v41 = vand.u32 2147483647, %v1069_v37  ;;  %v1809_v3 = vsub.f32 %v7763_v11, %v7448_v44 }
 0x155   : > { %v1873_v20 = vand.u32 2147483647, %v1745_v57  ;;  %2483 = vmatpush.msrb.mxu3 %v2325_v53  ;;  %v2256_v42 = vmul.f32 %v2128_v13, %v1452_v49  ;;  %v1261_v0 = vand.u32 2147483647, %v1133_v18  ;;  %v1064_v14 = vsub.f32 %v7759_v31, %v7380_v58 }
 0x156   : > { %v1740_v45 = vsub.f32 %v7785_v26, %v7382_v2  ;;  %v2192_v38 = vmax.f32 %v2064_v46, 0.0  ;;  %v1325_v47 = vsub.f32 1.0, %v1197_v41  ;;  %v1937_v21 = vand.u32 2147483647, %v1809_v3 }
 0x157   : > { %v2001_v36 = vsub.f32 1.0, %v1873_v20  ;;  %2397 = vmatpush.msrb.mxu0 %v2256_v42  ;;  %v1389_v50 = vsub.f32 1.0, %v1261_v0  ;;  %v1192_v33 = vand.u32 2147483647, %v1064_v14  ;;  %v1128_v56 = vsub.f32 %v7781_v35, %v7380_v58  ;;  %v7805_v42 = vpop.permute.xlu0 %898 }
 0x158   : > { %v1868_v24 = vand.u32 2147483647, %v1740_v45  ;;  %v2320_v37 = vmul.f32 %v2192_v38, %v1516_v39  ;;  %v1453_v49 = vmax.f32 %v1325_v47, 0.0  ;;  %v2065_v53 = vsub.f32 1.0, %v1937_v21  ;;  %10057 = vst [vmem:[#allocation86_spill] sm:$0xff] %v7805_v42  ;;  %v7809_v38 = vpop.permute.xlu2 %1574 }
 0x159   : > { %v2129_v57 = vmax.f32 %v2001_v36, 0.0  ;;  %v1517_v13 = vmax.f32 %v1389_v50, 0.0  ;;  %v1320_v18 = vsub.f32 1.0, %v1192_v33  ;;  %v1256_v6 = vand.u32 2147483647, %v1128_v56  ;;  %10058 = vst [vmem:[#allocation87_spill] sm:$0xff] %v7809_v38 }
 0x15a   : > { %v1996_v11 = vsub.f32 1.0, %v1868_v24  ;;  %2426 = vmatpush.msrb.mxu1 %v2320_v37  ;;  %v2193_v41 = vmax.f32 %v2065_v53, 0.0  ;;  %v1804_v20 = vsub.f32 %v7783_v55, %v7382_v2  ;;  %v1065_v3 = vsub.f32 %v7759_v31, %v7446_v40 }
 0x15b   : > { %v2257_v46 = vmul.f32 %v2129_v57, %v1453_v49  ;;  %v1448_v0 = vmax.f32 %v1320_v18, 0.0  ;;  %v1384_v14 = vsub.f32 1.0, %v1256_v6  ;;  %v1741_v45 = vsub.f32 %v7785_v26, %v7448_v44 }
 0x15c   : > { %v2124_v39 = vmax.f32 %v1996_v11, 0.0  ;;  %v2321_v47 = vmul.f32 %v2193_v41, %v1517_v13  ;;  %v1932_v36 = vand.u32 2147483647, %v1804_v20  ;;  %v1193_v21 = vand.u32 2147483647, %v1065_v3 }
 0x15d   : > { %2455 = vmatpush.msrb.mxu2 %v2257_v46  ;;  %v1129_v50 = vsub.f32 %v7781_v35, %v7446_v40  ;;  %v1512_v24 = vmax.f32 %v1384_v14, 0.0  ;;  %v1869_v56 = vand.u32 2147483647, %v1741_v45  ;;  %v1805_v11 = vsub.f32 %v7783_v55, %v7448_v44 }
 0x15e   : > { %v2252_v33 = vmul.f32 %v2124_v39, %v1448_v0  ;;  %2484 = vmatpush.msrb.mxu3 %v2321_v47  ;;  %v2060_v6 = vsub.f32 1.0, %v1932_v36  ;;  %v1321_v37 = vsub.f32 1.0, %v1193_v21  ;;  %v1060_v57 = vsub.f32 %v7805_v42, %v7380_v58 }
 0x15f   : > { %v1257_v49 = vand.u32 2147483647, %v1129_v50  ;;  %v1997_v53 = vsub.f32 1.0, %v1869_v56  ;;  %v1933_v13 = vand.u32 2147483647, %v1805_v11  ;;  %v1736_v18 = vsub.f32 %v7809_v38, %v7382_v2 }
 0x160   : > { %2398 = vmatpush.msrb.mxu0 %v2252_v33  ;;  %v1061_v46 = vsub.f32 %v7805_v42, %v7446_v40  ;;  %v2188_v41 = vmax.f32 %v2060_v6, 0.0  ;;  %v1449_v20 = vmax.f32 %v1321_v37, 0.0  ;;  %v1188_v0 = vand.u32 2147483647, %v1060_v57 }
 0x161   : > { %v1385_v3 = vsub.f32 1.0, %v1257_v49  ;;  %v2125_v39 = vmax.f32 %v1997_v53, 0.0  ;;  %v2061_v14 = vsub.f32 1.0, %v1933_v13  ;;  %v1864_v45 = vand.u32 2147483647, %v1736_v18 }
 0x162   : > { %v1189_v47 = vand.u32 2147483647, %v1061_v46  ;;  %v2316_v36 = vmul.f32 %v2188_v41, %v1512_v24  ;;  %v1316_v50 = vsub.f32 1.0, %v1188_v0  ;;  %v1737_v33 = vsub.f32 %v7809_v38, %v7448_v44 }
 0x163   : > { %v1513_v21 = vmax.f32 %v1385_v3, 0.0  ;;  %v2253_v56 = vmul.f32 %v2125_v39, %v1449_v20  ;;  %v2189_v11 = vmax.f32 %v2061_v14, 0.0  ;;  %v1992_v55 = vsub.f32 1.0, %v1864_v45  ;;  %v2376_v39 = vld [vmem:[%s7827_s25] sm:$0xff] }
 0x164   : > { %v1317_v35 = vsub.f32 1.0, %v1189_v47  ;;  %2427 = vmatpush.msrb.mxu1 %v2316_v36  ;;  %v1444_v6 = vmax.f32 %v1316_v50, 0.0  ;;  %v1865_v37 = vand.u32 2147483647, %v1737_v33  ;;  %v1122_v24 = vsub.f32 %v7039_v60, %v7465_v63 }
 0x165   : > { %v1798_v49 = vsub.f32 %v7043_v62, %v7467_v23  ;;  %2456 = vmatpush.msrb.mxu2 %v2253_v56  ;;  %v2317_v57 = vmul.f32 %v2189_v11, %v1513_v21  ;;  %v2120_v53 = vmax.f32 %v1992_v55, 0.0  ;;  %v1123_v18 = vsub.f32 %v7039_v60, %v7523_v16 }
 0x166   : > { %v1445_v13 = vmax.f32 %v1317_v35, 0.0  ;;  %v1993_v46 = vsub.f32 1.0, %v1865_v37  ;;  %v1250_v41 = vand.u32 2147483647, %v1122_v24  ;;  %v1799_v3 = vsub.f32 %v7043_v62, %v7525_v5 }
 0x167   : > { %v1926_v20 = vand.u32 2147483647, %v1798_v49  ;;  %2485 = vmatpush.msrb.mxu3 %v2317_v57  ;;  %v2248_v0 = vmul.f32 %v2120_v53, %v1444_v6  ;;  %v1251_v14 = vand.u32 2147483647, %v1123_v18  ;;  %v1118_v45 = vsub.f32 %v7041_v61, %v7465_v63 }
 0x168   : > { %v1794_v55 = vsub.f32 %v7107_v27, %v7467_v23  ;;  %v2121_v35 = vmax.f32 %v1993_v46, 0.0  ;;  %v1378_v47 = vsub.f32 1.0, %v1250_v41  ;;  %v1927_v21 = vand.u32 2147483647, %v1799_v3 }
 0x169   : > { %v2054_v36 = vsub.f32 1.0, %v1926_v20  ;;  %2399 = vmatpush.msrb.mxu0 %v2248_v0  ;;  %v1379_v50 = vsub.f32 1.0, %v1251_v14  ;;  %v1246_v33 = vand.u32 2147483647, %v1118_v45  ;;  %v1119_v11 = vsub.f32 %v7041_v61, %v7523_v16 }
 0x16a   : > { %v1922_v56 = vand.u32 2147483647, %v1794_v55  ;;  %v2249_v6 = vmul.f32 %v2121_v35, %v1445_v13  ;;  %2400 = vmatmul.f32.vlgmr.msrb.gmra.mxu0 %v2376_v39  ;;  %v1506_v37 = vmax.f32 %v1378_v47, 0.0  ;;  %v2055_v49 = vsub.f32 1.0, %v1927_v21 }
 0x16b   : > { %v2182_v24 = vmax.f32 %v2054_v36, 0.0  ;;  %v1507_v57 = vmax.f32 %v1379_v50, 0.0  ;;  %v1374_v53 = vsub.f32 1.0, %v1246_v33  ;;  %v1247_v62 = vand.u32 2147483647, %v1119_v11  ;;  %v2378_v11 = vld [vmem:[%s7827_s25 + $0x10] sm:$0xff] }
 0x16c   : > { %v2050_v18 = vsub.f32 1.0, %v1922_v56  ;;  %2457 = vmatpush.msrb.mxu2 %v2249_v6  ;;  %v2183_v41 = vmax.f32 %v2055_v49, 0.0  ;;  %v1795_v20 = vsub.f32 %v7107_v27, %v7525_v5  ;;  %v1114_v3 = vsub.f32 %v7110_v29, %v7465_v63 }
 0x16d   : > { %v2310_v46 = vmul.f32 %v2182_v24, %v1506_v37  ;;  %v1502_v0 = vmax.f32 %v1374_v53, 0.0  ;;  %v1375_v14 = vsub.f32 1.0, %v1247_v62  ;;  %v1790_v45 = vsub.f32 %v7204_v28, %v7467_v23  ;;  %2458 = vmatmul.f32.vlgmr.msrb.gmra.mxu2 %v2376_v39 }
 0x16e   : > { %v2178_v13 = vmax.f32 %v2050_v18, 0.0  ;;  %v2311_v55 = vmul.f32 %v2183_v41, %v1507_v57  ;;  %v1923_v35 = vand.u32 2147483647, %v1795_v20  ;;  %v1242_v47 = vand.u32 2147483647, %v1114_v3  ;;  %v7861_v3 = vpop.permute.xlu1 %978 }
 0x16f   : > { %2500 = vmatpush.msra.mxu0 %v2310_v46  ;;  %v1115_v36 = vsub.f32 %v7110_v29, %v7523_v16  ;;  %v1503_v50 = vmax.f32 %v1375_v14, 0.0  ;;  %v1918_v33 = vand.u32 2147483647, %v1790_v45  ;;  %v1791_v56 = vsub.f32 %v7204_v28, %v7525_v5 }
 0x170   : > { %v2306_v21 = vmul.f32 %v2178_v13, %v1502_v0  ;;  %2558 = vmatpush.msra.mxu2 %v2311_v55  ;;  %v2051_v62 = vsub.f32 1.0, %v1923_v35  ;;  %v1370_v6 = vsub.f32 1.0, %v1242_v47  ;;  %v1110_v39 = vsub.f32 %v7285_v4, %v7465_v63  ;;  %v7863_v0 = vpop.permute.xlu0 %1654 }
 0x171   : > { %v1243_v37 = vand.u32 2147483647, %v1115_v36  ;;  %v2046_v24 = vsub.f32 1.0, %v1918_v33  ;;  %v1919_v49 = vand.u32 2147483647, %v1791_v56  ;;  %v1786_v57 = vsub.f32 %v7287_v7, %v7467_v23 }
 0x172   : > { %2501 = vmatpush.msra.mxu0 %v2306_v21  ;;  %v1111_v53 = vsub.f32 %v7285_v4, %v7523_v16  ;;  %v2179_v18 = vmax.f32 %v2051_v62, 0.0  ;;  %v1498_v46 = vmax.f32 %v1370_v6, 0.0  ;;  %v1238_v20 = vand.u32 2147483647, %v1110_v39 }
 0x173   : > { %v1371_v41 = vsub.f32 1.0, %v1243_v37  ;;  %2403 = vmatmul.f32.gmra.mxu0 %v2378_v11  ;;  %v2174_v13 = vmax.f32 %v2046_v24, 0.0  ;;  %v2047_v14 = vsub.f32 1.0, %v1919_v49  ;;  %v1914_v45 = vand.u32 2147483647, %v1786_v57 }
 0x174   : > { %v1239_v55 = vand.u32 2147483647, %v1111_v53  ;;  %v2307_v35 = vmul.f32 %v2179_v18, %v1503_v50  ;;  %v1366_v36 = vsub.f32 1.0, %v1238_v20  ;;  %v1787_v21 = vsub.f32 %v7287_v7, %v7525_v5 }
 0x175   : > { %v1499_v47 = vmax.f32 %v1371_v41, 0.0  ;;  %v2302_v33 = vmul.f32 %v2174_v13, %v1498_v46  ;;  %v2175_v56 = vmax.f32 %v2047_v14, 0.0  ;;  %v2042_v62 = vsub.f32 1.0, %v1914_v45  ;;  %2461 = vmatmul.f32.gmra.mxu2 %v2378_v11 }
 0x176   : > { %v1367_v6 = vsub.f32 1.0, %v1239_v55  ;;  %2559 = vmatpush.msra.mxu2 %v2307_v35  ;;  %v1494_v37 = vmax.f32 %v1366_v36, 0.0  ;;  %v1915_v39 = vand.u32 2147483647, %v1787_v21  ;;  %v1124_v24 = vsub.f32 %v7861_v3, %v7380_v58 }
 0x177   : > { %v1800_v49 = vsub.f32 %v7863_v0, %v7382_v2  ;;  %2502 = vmatpush.msra.mxu0 %v2302_v33  ;;  %v2303_v50 = vmul.f32 %v2175_v56, %v1499_v47  ;;  %v2170_v57 = vmax.f32 %v2042_v62, 0.0  ;;  %v1125_v18 = vsub.f32 %v7861_v3, %v7446_v40 }
 0x178   : > { %v1495_v53 = vmax.f32 %v1367_v6, 0.0  ;;  %v2043_v46 = vsub.f32 1.0, %v1915_v39  ;;  %v1252_v41 = vand.u32 2147483647, %v1124_v24  ;;  %v1801_v11 = vsub.f32 %v7863_v0, %v7448_v44 }
 0x179   : > { %v1928_v20 = vand.u32 2147483647, %v1800_v49  ;;  %2560 = vmatpush.msra.mxu2 %v2303_v50  ;;  %v2298_v13 = vmul.f32 %v2170_v57, %v1494_v37  ;;  %v1253_v14 = vand.u32 2147483647, %v1125_v18  ;;  %v1106_v58 = vsub.f32 %v7359_v22, %v7465_v63  ;;  %v2377_v18 = vld [vmem:[%s7827_s25 + $0x8] sm:$0xff] }
 0x17a   : > { %v1782_v2 = vsub.f32 %v7419_v51, %v7467_v23  ;;  %v2171_v45 = vmax.f32 %v2043_v46, 0.0  ;;  %v1380_v55 = vsub.f32 1.0, %v1252_v41  ;;  %v1929_v47 = vand.u32 2147483647, %v1801_v11 }
 0x17b   : > { %v2056_v35 = vsub.f32 1.0, %v1928_v20  ;;  %2503 = vmatpush.msra.mxu0 %v2298_v13  ;;  %v1381_v40 = vsub.f32 1.0, %v1253_v14  ;;  %v1234_v36 = vand.u32 2147483647, %v1106_v58  ;;  %v1186_v44 = vsub.f32 %v7063_v8, %v7465_v63 }
 0x17c   : > { %v1910_v21 = vand.u32 2147483647, %v1782_v2  ;;  %v2299_v33 = vmul.f32 %v2171_v45, %v1495_v53  ;;  %v1508_v56 = vmax.f32 %v1380_v55, 0.0  ;;  %v2057_v6 = vsub.f32 1.0, %v1929_v47 }
 0x17d   : > { %v2184_v62 = vmax.f32 %v2056_v35, 0.0  ;;  %v1509_v37 = vmax.f32 %v1381_v40, 0.0  ;;  %v1362_v39 = vsub.f32 1.0, %v1234_v36  ;;  %v1314_v49 = vand.u32 2147483647, %v1186_v44 }
 0x17e   : > { %v2038_v24 = vsub.f32 1.0, %v1910_v21  ;;  %2561 = vmatpush.msra.mxu2 %v2299_v33  ;;  %v2185_v57 = vmax.f32 %v2057_v6, 0.0  ;;  %v1862_v46 = vsub.f32 %v7068_v10, %v7467_v23  ;;  %v1107_v41 = vsub.f32 %v7359_v22, %v7523_v16 }
 0x17f   : > { %v2312_v50 = vmul.f32 %v2184_v62, %v1508_v56  ;;  %v1490_v20 = vmax.f32 %v1362_v39, 0.0  ;;  %v1442_v53 = vsub.f32 1.0, %v1314_v49  ;;  %v1783_v13 = vsub.f32 %v7419_v51, %v7525_v5 }
 0x180   : > { %v2166_v11 = vmax.f32 %v2038_v24, 0.0  ;;  %v2313_v14 = vmul.f32 %v2185_v57, %v1509_v37  ;;  %v1990_v58 = vand.u32 2147483647, %v1862_v46  ;;  %v1235_v2 = vand.u32 2147483647, %v1107_v41 }
 0x181   : > { %2428 = vmatpush.msrb.mxu1 %v2312_v50  ;;  %v1187_v45 = vsub.f32 %v7063_v8, %v7523_v16  ;;  %v1570_v35 = vmax.f32 %v1442_v53, 0.0  ;;  %v1911_v47 = vand.u32 2147483647, %v1783_v13  ;;  %v1863_v40 = vsub.f32 %v7068_v10, %v7525_v5 }
 0x182   : > { %2429 = vmatmul.f32.vlgmr.msrb.gmra.mxu1 %v2377_v18  ;;  %v2294_v55 = vmul.f32 %v2166_v11, %v1490_v20  ;;  %2486 = vmatpush.msrb.mxu3 %v2313_v14  ;;  %v2118_v36 = vsub.f32 1.0, %v1990_v58  ;;  %v1363_v21 = vsub.f32 1.0, %v1235_v2  ;;  %v1102_v33 = vsub.f32 %v7421_v32, %v7465_v63  ;;  %v2380_v14 = vld [vmem:[%s7827_s25 + $0x20] sm:$0xff]  ;;  %v2379_v58 = vld [vmem:[%s7827_s25 + $0x18] sm:$0xff] }
 0x183   : > { %v1315_v44 = vand.u32 2147483647, %v1187_v45  ;;  %2487 = vmatmul.f32.vlgmr.msrb.gmra.mxu3 %v2377_v18  ;;  %v2039_v56 = vsub.f32 1.0, %v1911_v47  ;;  %v1991_v62 = vand.u32 2147483647, %v1863_v40  ;;  %v1778_v6 = vsub.f32 %v7481_v43, %v7467_v23  ;;  %2406 = vmatmul.f32.gmra.mxu0 %v2380_v14 }
 0x184   : > { %2504 = vmatpush.msra.mxu0 %v2294_v55  ;;  %v1182_v37 = vsub.f32 %v7066_v9, %v7465_v63  ;;  %v2246_v39 = vmax.f32 %v2118_v36, 0.0  ;;  %v1491_v24 = vmax.f32 %v1363_v21, 0.0  ;;  %v1230_v50 = vand.u32 2147483647, %v1102_v33  ;;  %2464 = vmatmul.f32.gmra.mxu2 %v2380_v14 }
 0x185   : > { %v1443_v49 = vsub.f32 1.0, %v1315_v44  ;;  %v2167_v57 = vmax.f32 %v2039_v56, 0.0  ;;  %v2119_v46 = vsub.f32 1.0, %v1991_v62  ;;  %v1906_v41 = vand.u32 2147483647, %v1778_v6 }
 0x186   : > { %v1310_v20 = vand.u32 2147483647, %v1182_v37  ;;  %v2374_v18 = vmul.f32 %v2246_v39, %v1570_v35  ;;  %v1358_v53 = vsub.f32 1.0, %v1230_v50  ;;  %v1858_v13 = vsub.f32 %v7112_v30, %v7467_v23 }
 0x187   : > { %v1571_v11 = vmax.f32 %v1443_v49, 0.0  ;;  %v2295_v2 = vmul.f32 %v2167_v57, %v1491_v24  ;;  %v2247_v45 = vmax.f32 %v2119_v46, 0.0  ;;  %v2034_v55 = vsub.f32 1.0, %v1906_v41  ;;  %v10059_v57 = vld [vmem:[#allocation48_spill] sm:$0xff]  ;;  %v10060_v41 = vld [vmem:[#allocation49_spill] sm:$0xff] }
 0x188   : > { %v1438_v47 = vsub.f32 1.0, %v1310_v20  ;;  %2529 = vmatpush.msra.mxu1 %v2374_v18  ;;  %v1486_v40 = vmax.f32 %v1358_v53, 0.0  ;;  %v1986_v36 = vand.u32 2147483647, %v1858_v13  ;;  %v1103_v21 = vsub.f32 %v7421_v32, %v7523_v16 }
 0x189   : > { %v1779_v35 = vsub.f32 %v7481_v43, %v7525_v5  ;;  %2562 = vmatpush.msra.mxu2 %v2295_v2  ;;  %v2375_v44 = vmul.f32 %v2247_v45, %v1571_v11  ;;  %v2162_v33 = vmax.f32 %v2034_v55, 0.0  ;;  %v1183_v62 = vsub.f32 %v7066_v9, %v7523_v16  ;;  %v10061_v55 = vld [vmem:[#allocation18_spill] sm:$0xff] }
 0x18a   : > { %v1566_v56 = vmax.f32 %v1438_v47, 0.0  ;;  %2432 = vmatmul.f32.gmra.mxu1 %v2379_v58  ;;  %v2114_v6 = vsub.f32 1.0, %v1986_v36  ;;  %v1231_v37 = vand.u32 2147483647, %v1103_v21  ;;  %v1859_v24 = vsub.f32 %v7112_v30, %v7525_v5 }
 0x18b   : > { %v1907_v39 = vand.u32 2147483647, %v1779_v35  ;;  %2587 = vmatpush.msra.mxu3 %v2375_v44  ;;  %v2290_v49 = vmul.f32 %v2162_v33, %v1486_v40  ;;  %v1311_v50 = vand.u32 2147483647, %v1183_v62  ;;  %v1098_v46 = vsub.f32 %v10059_v57, %v7465_v63 }
 0x18c   : > { %v1774_v20 = vsub.f32 %v10060_v41, %v7467_v23  ;;  %v2242_v18 = vmax.f32 %v2114_v6, 0.0  ;;  %v1359_v11 = vsub.f32 1.0, %v1231_v37  ;;  %v1987_v13 = vand.u32 2147483647, %v1859_v24  ;;  %2490 = vmatmul.f32.gmra.mxu3 %v2379_v58  ;;  %v10062_v58 = vld [vmem:[#allocation19_spill] sm:$0xff] }
 0x18d   : > { %v2035_v53 = vsub.f32 1.0, %v1907_v39  ;;  %2505 = vmatpush.msra.mxu0 %v2290_v49  ;;  %v1439_v14 = vsub.f32 1.0, %v1311_v50  ;;  %v1226_v2 = vand.u32 2147483647, %v1098_v46  ;;  %v1178_v47 = vsub.f32 %v10061_v55, %v7465_v63 }
 0x18e   : > { %v1902_v45 = vand.u32 2147483647, %v1774_v20  ;;  %v2370_v40 = vmul.f32 %v2242_v18, %v1566_v56  ;;  %v1487_v36 = vmax.f32 %v1359_v11, 0.0  ;;  %v2115_v35 = vsub.f32 1.0, %v1987_v13 }
 0x18f   : > { %v2163_v21 = vmax.f32 %v2035_v53, 0.0  ;;  %v1567_v44 = vmax.f32 %v1439_v14, 0.0  ;;  %v1354_v33 = vsub.f32 1.0, %v1226_v2  ;;  %v1306_v30 = vand.u32 2147483647, %v1178_v47 }
 0x190   : > { %v2030_v62 = vsub.f32 1.0, %v1902_v45  ;;  %2530 = vmatpush.msra.mxu1 %v2370_v40  ;;  %v2243_v37 = vmax.f32 %v2115_v35, 0.0  ;;  %v1854_v39 = vsub.f32 %v10062_v58, %v7467_v23  ;;  %v1099_v24 = vsub.f32 %v10059_v57, %v7523_v16 }
 0x191   : > { %v2291_v6 = vmul.f32 %v2163_v21, %v1487_v36  ;;  %v1482_v49 = vmax.f32 %v1354_v33, 0.0  ;;  %v1434_v46 = vsub.f32 1.0, %v1306_v30  ;;  %v1775_v56 = vsub.f32 %v10060_v41, %v7525_v5  ;;  %v10063_v33 = vld [vmem:[#allocation22_spill] sm:$0xff] }
 0x192   : > { %v2158_v50 = vmax.f32 %v2030_v62, 0.0  ;;  %v2371_v20 = vmul.f32 %v2243_v37, %v1567_v44  ;;  %v1982_v18 = vand.u32 2147483647, %v1854_v39  ;;  %v1227_v11 = vand.u32 2147483647, %v1099_v24 }
 0x193   : > { %2563 = vmatpush.msra.mxu2 %v2291_v6  ;;  %v1179_v53 = vsub.f32 %v10061_v55, %v7523_v16  ;;  %v1562_v14 = vmax.f32 %v1434_v46, 0.0  ;;  %v1903_v2 = vand.u32 2147483647, %v1775_v56  ;;  %v1855_v45 = vsub.f32 %v10062_v58, %v7525_v5 }
 0x194   : > { %v2286_v13 = vmul.f32 %v2158_v50, %v1482_v49  ;;  %2588 = vmatpush.msra.mxu3 %v2371_v20  ;;  %v2110_v47 = vsub.f32 1.0, %v1982_v18  ;;  %v1355_v40 = vsub.f32 1.0, %v1227_v11  ;;  %v1094_v36 = vsub.f32 %v7547_v12, %v7465_v63 }
 0x195   : > { %v1307_v30 = vand.u32 2147483647, %v1179_v53  ;;  %v2031_v21 = vsub.f32 1.0, %v1903_v2  ;;  %v1983_v35 = vand.u32 2147483647, %v1855_v45  ;;  %v1770_v44 = vsub.f32 %v7567_v54, %v7467_v23  ;;  %v10064_v53 = vld [vmem:[#allocation25_spill] sm:$0xff] }
 0x196   : > { %2506 = vmatpush.msra.mxu0 %v2286_v13  ;;  %v1174_v62 = vsub.f32 %v10063_v33, %v7465_v63  ;;  %v2238_v6 = vmax.f32 %v2110_v47, 0.0  ;;  %v1483_v37 = vmax.f32 %v1355_v40, 0.0  ;;  %v1222_v24 = vand.u32 2147483647, %v1094_v36 }
 0x197   : > { %v1435_v39 = vsub.f32 1.0, %v1307_v30  ;;  %v2159_v49 = vmax.f32 %v2031_v21, 0.0  ;;  %v2111_v50 = vsub.f32 1.0, %v1983_v35  ;;  %v1898_v46 = vand.u32 2147483647, %v1770_v44 }
 0x198   : > { %v1302_v56 = vand.u32 2147483647, %v1174_v62  ;;  %v2366_v20 = vmul.f32 %v2238_v6, %v1562_v14  ;;  %v1350_v11 = vsub.f32 1.0, %v1222_v24  ;;  %v1850_v13 = vsub.f32 %v10064_v53, %v7467_v23 }
 0x199   : > { %v1563_v18 = vmax.f32 %v1435_v39, 0.0  ;;  %v2287_v2 = vmul.f32 %v2159_v49, %v1483_v37  ;;  %v2239_v45 = vmax.f32 %v2111_v50, 0.0  ;;  %v2026_v58 = vsub.f32 1.0, %v1898_v46 }
 0x19a   : > { %v1430_v55 = vsub.f32 1.0, %v1302_v56  ;;  %2531 = vmatpush.msra.mxu1 %v2366_v20  ;;  %v1478_v41 = vmax.f32 %v1350_v11, 0.0  ;;  %v1978_v47 = vand.u32 2147483647, %v1850_v13  ;;  %v1095_v40 = vsub.f32 %v7547_v12, %v7523_v16  ;;  %v10065_v13 = vld [vmem:[#allocation26_spill] sm:$0xff] }
 0x19b   : > { %v1771_v30 = vsub.f32 %v7567_v54, %v7525_v5  ;;  %2564 = vmatpush.msra.mxu2 %v2287_v2  ;;  %v2367_v14 = vmul.f32 %v2239_v45, %v1563_v18  ;;  %v2154_v36 = vmax.f32 %v2026_v58, 0.0  ;;  %v1175_v35 = vsub.f32 %v10063_v33, %v7523_v16 }
 0x19c   : > { %v1558_v21 = vmax.f32 %v1430_v55, 0.0  ;;  %v2106_v44 = vsub.f32 1.0, %v1978_v47  ;;  %v1223_v62 = vand.u32 2147483647, %v1095_v40  ;;  %v1851_v37 = vsub.f32 %v10064_v53, %v7525_v5 }
 0x19d   : > { %v1899_v6 = vand.u32 2147483647, %v1771_v30  ;;  %2589 = vmatpush.msra.mxu3 %v2367_v14  ;;  %v2282_v39 = vmul.f32 %v2154_v36, %v1478_v41  ;;  %v1303_v24 = vand.u32 2147483647, %v1175_v35  ;;  %v1090_v49 = vsub.f32 %v7569_v48, %v7465_v63 }
 0x19e   : > { %v1766_v50 = vsub.f32 %v7599_v19, %v7467_v23  ;;  %v2234_v58 = vmax.f32 %v2106_v44, 0.0  ;;  %v1351_v55 = vsub.f32 1.0, %v1223_v62  ;;  %v1979_v56 = vand.u32 2147483647, %v1851_v37 }
 0x19f   : > { %v2027_v46 = vsub.f32 1.0, %v1899_v6  ;;  %2507 = vmatpush.msra.mxu0 %v2282_v39  ;;  %v1431_v20 = vsub.f32 1.0, %v1303_v24  ;;  %v1218_v18 = vand.u32 2147483647, %v1090_v49  ;;  %v1170_v2 = vsub.f32 %v10065_v13, %v7465_v63  ;;  %v10066_v6 = vld [vmem:[#allocation33_spill] sm:$0xff] }
 0x1a0   : > { %v1894_v11 = vand.u32 2147483647, %v1766_v50  ;;  %v2362_v45 = vmul.f32 %v2234_v58, %v1558_v21  ;;  %v1479_v41 = vmax.f32 %v1351_v55, 0.0  ;;  %v2107_v40 = vsub.f32 1.0, %v1979_v56 }
 0x1a1   : > { %v2155_v47 = vmax.f32 %v2027_v46, 0.0  ;;  %v1559_v30 = vmax.f32 %v1431_v20, 0.0  ;;  %v1346_v14 = vsub.f32 1.0, %v1218_v18  ;;  %v1298_v35 = vand.u32 2147483647, %v1170_v2 }
 0x1a2   : > { %v2022_v36 = vsub.f32 1.0, %v1894_v11  ;;  %2532 = vmatpush.msra.mxu1 %v2362_v45  ;;  %v2235_v62 = vmax.f32 %v2107_v40, 0.0  ;;  %v1846_v37 = vsub.f32 %v10066_v6, %v7467_v23  ;;  %v1091_v39 = vsub.f32 %v7569_v48, %v7523_v16  ;;  %v10067_v40 = vld [vmem:[#allocation62_spill] sm:$0xff] }
 0x1a3   : > { %v2283_v44 = vmul.f32 %v2155_v47, %v1479_v41  ;;  %v1474_v24 = vmax.f32 %v1346_v14, 0.0  ;;  %v1426_v50 = vsub.f32 1.0, %v1298_v35  ;;  %v1767_v21 = vsub.f32 %v7599_v19, %v7525_v5 }
 0x1a4   : > { %v2150_v49 = vmax.f32 %v2022_v36, 0.0  ;;  %v2363_v58 = vmul.f32 %v2235_v62, %v1559_v30  ;;  %v1974_v55 = vand.u32 2147483647, %v1846_v37  ;;  %v1219_v46 = vand.u32 2147483647, %v1091_v39 }
 0x1a5   : > { %2565 = vmatpush.msra.mxu2 %v2283_v44  ;;  %v1171_v56 = vsub.f32 %v10065_v13, %v7523_v16  ;;  %v1554_v18 = vmax.f32 %v1426_v50, 0.0  ;;  %v1895_v11 = vand.u32 2147483647, %v1767_v21  ;;  %v1847_v2 = vsub.f32 %v10066_v6, %v7525_v5  ;;  %v10068_v44 = vld [vmem:[#allocation44_spill] sm:$0xff]  ;;  %v7967_v6 = vld [vmem:[%s7827_s25 + $0x30] sm:$0xff]  ;;  %v2381_v13 = vld [vmem:[%s7827_s25 + $0x28] sm:$0xff] }
 0x1a6   : > { %v2278_v20 = vmul.f32 %v2150_v49, %v1474_v24  ;;  %2590 = vmatpush.msra.mxu3 %v2363_v58  ;;  %v2102_v45 = vsub.f32 1.0, %v1974_v55  ;;  %v1347_v41 = vsub.f32 1.0, %v1219_v46  ;;  %v1086_v14 = vsub.f32 %v10067_v40, %v7465_v63  ;;  %2409 = vmatmul.f32.gmra.mxu0 %v7967_v6 }
 0x1a7   : > { %v1299_v47 = vand.u32 2147483647, %v1171_v56  ;;  %v2023_v30 = vsub.f32 1.0, %v1895_v11  ;;  %v1975_v36 = vand.u32 2147483647, %v1847_v2  ;;  %v1762_v35 = vsub.f32 %v7619_v1, %v7467_v23  ;;  %v10069_v11 = vld [vmem:[#allocation45_spill] sm:$0xff]  ;;  %2435 = vmatmul.f32.gmra.mxu1 %v2381_v13  ;;  %2493 = vmatmul.f32.gmra.mxu3 %v2381_v13 }
 0x1a8   : > { %2508 = vmatpush.msra.mxu0 %v2278_v20  ;;  %v1166_v62 = vsub.f32 %v10068_v44, %v7465_v63  ;;  %v2230_v37 = vmax.f32 %v2102_v45, 0.0  ;;  %v1475_v39 = vmax.f32 %v1347_v41, 0.0  ;;  %v1214_v49 = vand.u32 2147483647, %v1086_v14  ;;  %2467 = vmatmul.f32.gmra.mxu2 %v7967_v6 }
 0x1a9   : > { %v1427_v24 = vsub.f32 1.0, %v1299_v47  ;;  %v2151_v50 = vmax.f32 %v2023_v30, 0.0  ;;  %v2103_v21 = vsub.f32 1.0, %v1975_v36  ;;  %v1890_v58 = vand.u32 2147483647, %v1762_v35 }
 0x1aa   : > { %v1294_v55 = vand.u32 2147483647, %v1166_v62  ;;  %v2358_v46 = vmul.f32 %v2230_v37, %v1554_v18  ;;  %v1342_v20 = vsub.f32 1.0, %v1214_v49  ;;  %v1842_v2 = vsub.f32 %v10069_v11, %v7467_v23 }
 0x1ab   : > { %v1555_v56 = vmax.f32 %v1427_v24, 0.0  ;;  %v2279_v19 = vmul.f32 %v2151_v50, %v1475_v39  ;;  %v2231_v48 = vmax.f32 %v2103_v21, 0.0  ;;  %v2018_v53 = vsub.f32 1.0, %v1890_v58 }
 0x1ac   : > { %v1422_v45 = vsub.f32 1.0, %v1294_v55  ;;  %2533 = vmatpush.msra.mxu1 %v2358_v46  ;;  %v1470_v41 = vmax.f32 %v1342_v20, 0.0  ;;  %v1970_v47 = vand.u32 2147483647, %v1842_v2  ;;  %v1087_v18 = vsub.f32 %v10067_v40, %v7523_v16  ;;  %v10070_v2 = vld [vmem:[#allocation50_spill] sm:$0xff] }
 0x1ad   : > { %v1763_v14 = vsub.f32 %v7619_v1, %v7525_v5  ;;  %2566 = vmatpush.msra.mxu2 %v2279_v19  ;;  %v2359_v30 = vmul.f32 %v2231_v48, %v1555_v56  ;;  %v2146_v36 = vmax.f32 %v2018_v53, 0.0  ;;  %v1167_v62 = vsub.f32 %v10068_v44, %v7523_v16 }
 0x1ae   : > { %v1550_v35 = vmax.f32 %v1422_v45, 0.0  ;;  %v2098_v37 = vsub.f32 1.0, %v1970_v47  ;;  %v1215_v39 = vand.u32 2147483647, %v1087_v18  ;;  %v1843_v49 = vsub.f32 %v10069_v11, %v7525_v5 }
 0x1af   : > { %v1891_v24 = vand.u32 2147483647, %v1763_v14  ;;  %2591 = vmatpush.msra.mxu3 %v2359_v30  ;;  %v2274_v50 = vmul.f32 %v2146_v36, %v1470_v41  ;;  %v1295_v21 = vand.u32 2147483647, %v1167_v62  ;;  %v1082_v19 = vsub.f32 %v7647_v17, %v7465_v63 }
 0x1b0   : > { %v1758_v48 = vsub.f32 %v7667_v52, %v7467_v23  ;;  %v2226_v53 = vmax.f32 %v2098_v37, 0.0  ;;  %v1343_v13 = vsub.f32 1.0, %v1215_v39  ;;  %v1971_v55 = vand.u32 2147483647, %v1843_v49 }
 0x1b1   : > { %v2019_v58 = vsub.f32 1.0, %v1891_v24  ;;  %2509 = vmatpush.msra.mxu0 %v2274_v50  ;;  %v1423_v46 = vsub.f32 1.0, %v1295_v21  ;;  %v1210_v56 = vand.u32 2147483647, %v1082_v19  ;;  %v1162_v45 = vsub.f32 %v10070_v2, %v7465_v63  ;;  %v10071_v24 = vld [vmem:[#allocation55_spill] sm:$0xff] }
 0x1b2   : > { %v1886_v20 = vand.u32 2147483647, %v1758_v48  ;;  %v2354_v47 = vmul.f32 %v2226_v53, %v1550_v35  ;;  %v1471_v41 = vmax.f32 %v1343_v13, 0.0  ;;  %v2099_v14 = vsub.f32 1.0, %v1971_v55 }
 0x1b3   : > { %v2147_v18 = vmax.f32 %v2019_v58, 0.0  ;;  %v1551_v30 = vmax.f32 %v1423_v46, 0.0  ;;  %v1338_v36 = vsub.f32 1.0, %v1210_v56  ;;  %v1290_v11 = vand.u32 2147483647, %v1162_v45 }
 0x1b4   : > { %v2014_v62 = vsub.f32 1.0, %v1886_v20  ;;  %2534 = vmatpush.msra.mxu1 %v2354_v47  ;;  %v2227_v39 = vmax.f32 %v2099_v14, 0.0  ;;  %v1838_v49 = vsub.f32 %v10071_v24, %v7467_v23  ;;  %v1083_v50 = vsub.f32 %v7647_v17, %v7523_v16 }
 0x1b5   : > { %v2275_v37 = vmul.f32 %v2147_v18, %v1471_v41  ;;  %v1466_v21 = vmax.f32 %v1338_v36, 0.0  ;;  %v1418_v48 = vsub.f32 1.0, %v1290_v11  ;;  %v1759_v35 = vsub.f32 %v7667_v52, %v7525_v5  ;;  %v10072_v36 = vld [vmem:[#allocation73_spill] sm:$0xff] }
 0x1b6   : > { %v2142_v19 = vmax.f32 %v2014_v62, 0.0  ;;  %v2355_v53 = vmul.f32 %v2227_v39, %v1551_v30  ;;  %v1966_v13 = vand.u32 2147483647, %v1838_v49  ;;  %v1211_v58 = vand.u32 2147483647, %v1083_v50 }
 0x1b7   : > { %2567 = vmatpush.msra.mxu2 %v2275_v37  ;;  %v1163_v55 = vsub.f32 %v10070_v2, %v7523_v16  ;;  %v1546_v56 = vmax.f32 %v1418_v48, 0.0  ;;  %v1887_v20 = vand.u32 2147483647, %v1759_v35  ;;  %v1839_v45 = vsub.f32 %v10071_v24, %v7525_v5  ;;  %v10073_v37 = vld [vmem:[#allocation56_spill] sm:$0xff] }
 0x1b8   : > { %v2270_v46 = vmul.f32 %v2142_v19, %v1466_v21  ;;  %2592 = vmatpush.msra.mxu3 %v2355_v53  ;;  %v2094_v47 = vsub.f32 1.0, %v1966_v13  ;;  %v1339_v41 = vsub.f32 1.0, %v1211_v58  ;;  %v1078_v18 = vsub.f32 %v7669_v59, %v7465_v63 }
 0x1b9   : > { %v1291_v11 = vand.u32 2147483647, %v1163_v55  ;;  %v2015_v14 = vsub.f32 1.0, %v1887_v20  ;;  %v1967_v30 = vand.u32 2147483647, %v1839_v45  ;;  %v1754_v62 = vsub.f32 %v10072_v36, %v7467_v23 }
 0x1ba   : > { %2510 = vmatpush.msra.mxu0 %v2270_v46  ;;  %v1158_v39 = vsub.f32 %v10073_v37, %v7465_v63  ;;  %v2222_v49 = vmax.f32 %v2094_v47, 0.0  ;;  %v1467_v50 = vmax.f32 %v1339_v41, 0.0  ;;  %v1206_v19 = vand.u32 2147483647, %v1078_v18  ;;  %v10074_v46 = vld [vmem:[#allocation58_spill] sm:$0xff] }
 0x1bb   : > { %v1419_v21 = vsub.f32 1.0, %v1291_v11  ;;  %v2143_v48 = vmax.f32 %v2015_v14, 0.0  ;;  %v2095_v35 = vsub.f32 1.0, %v1967_v30  ;;  %v1882_v53 = vand.u32 2147483647, %v1754_v62 }
 0x1bc   : > { %v1286_v13 = vand.u32 2147483647, %v1158_v39  ;;  %v2350_v58 = vmul.f32 %v2222_v49, %v1546_v56  ;;  %v1334_v24 = vsub.f32 1.0, %v1206_v19  ;;  %v1834_v20 = vsub.f32 %v10074_v46, %v7467_v23 }
 0x1bd   : > { %v1547_v55 = vmax.f32 %v1419_v21, 0.0  ;;  %v2271_v45 = vmul.f32 %v2143_v48, %v1467_v50  ;;  %v2223_v2 = vmax.f32 %v2095_v35, 0.0  ;;  %v2010_v52 = vsub.f32 1.0, %v1882_v53  ;;  %v10075_v48 = vld [vmem:[#allocation75_spill] sm:$0xff] }
 0x1be   : > { %v1414_v17 = vsub.f32 1.0, %v1286_v13  ;;  %2535 = vmatpush.msra.mxu1 %v2350_v58  ;;  %v1462_v44 = vmax.f32 %v1334_v24, 0.0  ;;  %v1962_v47 = vand.u32 2147483647, %v1834_v20  ;;  %v1079_v41 = vsub.f32 %v7669_v59, %v7523_v16  ;;  %v10076_v20 = vld [vmem:[#allocation59_spill] sm:$0xff] }
 0x1bf   : > { %v1755_v11 = vsub.f32 %v10072_v36, %v7525_v5  ;;  %2568 = vmatpush.msra.mxu2 %v2271_v45  ;;  %v2351_v56 = vmul.f32 %v2223_v2, %v1547_v55  ;;  %v2138_v18 = vmax.f32 %v2010_v52, 0.0  ;;  %v1159_v30 = vsub.f32 %v10073_v37, %v7523_v16 }
 0x1c0   : > { %v1542_v14 = vmax.f32 %v1414_v17, 0.0  ;;  %v2090_v62 = vsub.f32 1.0, %v1962_v47  ;;  %v1207_v39 = vand.u32 2147483647, %v1079_v41  ;;  %v1835_v24 = vsub.f32 %v10074_v46, %v7525_v5 }
 0x1c1   : > { %v1883_v49 = vand.u32 2147483647, %v1755_v11  ;;  %2593 = vmatpush.msra.mxu3 %v2351_v56  ;;  %v2266_v50 = vmul.f32 %v2138_v18, %v1462_v44  ;;  %v1287_v21 = vand.u32 2147483647, %v1159_v30  ;;  %v1074_v19 = vsub.f32 %v7713_v15, %v7465_v63 }
 0x1c2   : > { %v1750_v2 = vsub.f32 %v10075_v48, %v7467_v23  ;;  %v2218_v52 = vmax.f32 %v2090_v62, 0.0  ;;  %v1335_v17 = vsub.f32 1.0, %v1207_v39  ;;  %v1963_v53 = vand.u32 2147483647, %v1835_v24 }
 0x1c3   : > { %v2011_v35 = vsub.f32 1.0, %v1883_v49  ;;  %2511 = vmatpush.msra.mxu0 %v2266_v50  ;;  %v1415_v13 = vsub.f32 1.0, %v1287_v21  ;;  %v1202_v58 = vand.u32 2147483647, %v1074_v19  ;;  %v1154_v45 = vsub.f32 %v10076_v20, %v7465_v63  ;;  %v10077_v49 = vld [vmem:[#allocation60_spill] sm:$0xff] }
 0x1c4   : > { %v1878_v55 = vand.u32 2147483647, %v1750_v2  ;;  %v2346_v47 = vmul.f32 %v2218_v52, %v1542_v14  ;;  %v1463_v44 = vmax.f32 %v1335_v17, 0.0  ;;  %v2091_v11 = vsub.f32 1.0, %v1963_v53 }
 0x1c5   : > { %v2139_v41 = vmax.f32 %v2011_v35, 0.0  ;;  %v1543_v56 = vmax.f32 %v1415_v13, 0.0  ;;  %v1330_v18 = vsub.f32 1.0, %v1202_v58  ;;  %v1282_v46 = vand.u32 2147483647, %v1154_v45 }
 0x1c6   : > { %v2006_v30 = vsub.f32 1.0, %v1878_v55  ;;  %2536 = vmatpush.msra.mxu1 %v2346_v47  ;;  %v2219_v39 = vmax.f32 %v2091_v11, 0.0  ;;  %v1830_v24 = vsub.f32 %v10077_v49, %v7467_v23  ;;  %v1075_v50 = vsub.f32 %v7713_v15, %v7523_v16 }
 0x1c7   : > { %v2267_v62 = vmul.f32 %v2139_v41, %v1463_v44  ;;  %v1458_v21 = vmax.f32 %v1330_v18, 0.0  ;;  %v1410_v2 = vsub.f32 1.0, %v1282_v46  ;;  %v1751_v14 = vsub.f32 %v10075_v48, %v7525_v5 }
 0x1c8   : > { %v2134_v19 = vmax.f32 %v2006_v30, 0.0  ;;  %v2347_v52 = vmul.f32 %v2219_v39, %v1543_v56  ;;  %v1958_v17 = vand.u32 2147483647, %v1830_v24  ;;  %v1203_v35 = vand.u32 2147483647, %v1075_v50  ;;  %v10078_v30 = vld [vmem:[#allocation64_spill] sm:$0xff] }
 0x1c9   : > { %2569 = vmatpush.msra.mxu2 %v2267_v62  ;;  %v1155_v53 = vsub.f32 %v10076_v20, %v7523_v16  ;;  %v1538_v58 = vmax.f32 %v1410_v2, 0.0  ;;  %v1879_v55 = vand.u32 2147483647, %v1751_v14  ;;  %v1831_v45 = vsub.f32 %v10077_v49, %v7525_v5 }
 0x1ca   : > { %v2262_v13 = vmul.f32 %v2134_v19, %v1458_v21  ;;  %2594 = vmatpush.msra.mxu3 %v2347_v52  ;;  %v2086_v47 = vsub.f32 1.0, %v1958_v17  ;;  %v1331_v44 = vsub.f32 1.0, %v1203_v35  ;;  %v1070_v41 = vsub.f32 %v7741_v34, %v7465_v63 }
 0x1cb   : > { %v1283_v46 = vand.u32 2147483647, %v1155_v53  ;;  %v2007_v11 = vsub.f32 1.0, %v1879_v55  ;;  %v1959_v56 = vand.u32 2147483647, %v1831_v45  ;;  %v1746_v18 = vsub.f32 %v7757_v25, %v7467_v23 }
 0x1cc   : > { %2512 = vmatpush.msra.mxu0 %v2262_v13  ;;  %v1150_v62 = vsub.f32 %v10078_v30, %v7465_v63  ;;  %v2214_v39 = vmax.f32 %v2086_v47, 0.0  ;;  %v1459_v24 = vmax.f32 %v1331_v44, 0.0  ;;  %v1198_v21 = vand.u32 2147483647, %v1070_v41  ;;  %v10079_v13 = vld [vmem:[#allocation65_spill] sm:$0xff] }
 0x1cd   : > { %v1411_v50 = vsub.f32 1.0, %v1283_v46  ;;  %v2135_v19 = vmax.f32 %v2007_v11, 0.0  ;;  %v2087_v2 = vsub.f32 1.0, %v1959_v56  ;;  %v1874_v14 = vand.u32 2147483647, %v1746_v18 }
 0x1ce   : > { %v1278_v52 = vand.u32 2147483647, %v1150_v62  ;;  %v2342_v17 = vmul.f32 %v2214_v39, %v1538_v58  ;;  %v1326_v53 = vsub.f32 1.0, %v1198_v21  ;;  %v1826_v55 = vsub.f32 %v10079_v13, %v7467_v23 }
 0x1cf   : > { %v1539_v35 = vmax.f32 %v1411_v50, 0.0  ;;  %v2263_v45 = vmul.f32 %v2135_v19, %v1459_v24  ;;  %v2215_v49 = vmax.f32 %v2087_v2, 0.0  ;;  %v2002_v20 = vsub.f32 1.0, %v1874_v14 }
 0x1d0   : > { %v1406_v48 = vsub.f32 1.0, %v1278_v52  ;;  %2537 = vmatpush.msra.mxu1 %v2342_v17  ;;  %v1454_v15 = vmax.f32 %v1326_v53, 0.0  ;;  %v1954_v47 = vand.u32 2147483647, %v1826_v55  ;;  %v1071_v44 = vsub.f32 %v7741_v34, %v7523_v16  ;;  %v8049_v52 = vld [vmem:[%s7827_s25 + $0x38] sm:$0xff]  ;;  %v10080_v55 = vld [vmem:[#allocation66_spill] sm:$0xff] }
 0x1d1   : > { %v1747_v46 = vsub.f32 %v7757_v25, %v7525_v5  ;;  %2570 = vmatpush.msra.mxu2 %v2263_v45  ;;  %v2343_v58 = vmul.f32 %v2215_v49, %v1539_v35  ;;  %v2130_v41 = vmax.f32 %v2002_v20, 0.0  ;;  %v1151_v56 = vsub.f32 %v10078_v30, %v7523_v16  ;;  %2438 = vmatmul.f32.gmra.mxu1 %v8049_v52 }
 0x1d2   : > { %v1534_v11 = vmax.f32 %v1406_v48, 0.0  ;;  %v2082_v18 = vsub.f32 1.0, %v1954_v47  ;;  %v1199_v62 = vand.u32 2147483647, %v1071_v44  ;;  %v1827_v24 = vsub.f32 %v10079_v13, %v7525_v5  ;;  %2496 = vmatmul.f32.gmra.mxu3 %v8049_v52 }
 0x1d3   : > { %v1875_v39 = vand.u32 2147483647, %v1747_v46  ;;  %2595 = vmatpush.msra.mxu3 %v2343_v58  ;;  %v2258_v50 = vmul.f32 %v2130_v41, %v1454_v15  ;;  %v1279_v21 = vand.u32 2147483647, %v1151_v56  ;;  %v1066_v19 = vsub.f32 %v7759_v31, %v7465_v63 }
 0x1d4   : > { %v1742_v20 = vsub.f32 %v7785_v26, %v7467_v23  ;;  %v2210_v49 = vmax.f32 %v2082_v18, 0.0  ;;  %v1327_v48 = vsub.f32 1.0, %v1199_v62  ;;  %v1955_v14 = vand.u32 2147483647, %v1827_v24  ;;  %v10081_v24 = vld [vmem:[#allocation70_spill] sm:$0xff] }
 0x1d5   : > { %v2003_v2 = vsub.f32 1.0, %v1875_v39  ;;  %2513 = vmatpush.msra.mxu0 %v2258_v50  ;;  %v1407_v17 = vsub.f32 1.0, %v1279_v21  ;;  %v1194_v35 = vand.u32 2147483647, %v1066_v19  ;;  %v1146_v15 = vsub.f32 %v10080_v55, %v7465_v63 }
 0x1d6   : > { %v1870_v53 = vand.u32 2147483647, %v1742_v20  ;;  %v2338_v45 = vmul.f32 %v2210_v49, %v1534_v11  ;;  %v1455_v47 = vmax.f32 %v1327_v48, 0.0  ;;  %v2083_v46 = vsub.f32 1.0, %v1955_v14 }
 0x1d7   : > { %v2131_v44 = vmax.f32 %v2003_v2, 0.0  ;;  %v1535_v58 = vmax.f32 %v1407_v17, 0.0  ;;  %v1322_v41 = vsub.f32 1.0, %v1194_v35  ;;  %v1274_v18 = vand.u32 2147483647, %v1146_v15 }
 0x1d8   : > { %v1998_v56 = vsub.f32 1.0, %v1870_v53  ;;  %2538 = vmatpush.msra.mxu1 %v2338_v45  ;;  %v2211_v39 = vmax.f32 %v2083_v46, 0.0  ;;  %v1822_v50 = vsub.f32 %v10081_v24, %v7467_v23  ;;  %v1067_v21 = vsub.f32 %v7759_v31, %v7523_v16 }
 0x1d9   : > { %v2259_v62 = vmul.f32 %v2131_v44, %v1455_v47  ;;  %v1450_v19 = vmax.f32 %v1322_v41, 0.0  ;;  %v1402_v20 = vsub.f32 1.0, %v1274_v18  ;;  %v1743_v49 = vsub.f32 %v7785_v26, %v7525_v5 }
 0x1da   : > { %v2126_v11 = vmax.f32 %v1998_v56, 0.0  ;;  %v2339_v48 = vmul.f32 %v2211_v39, %v1535_v58  ;;  %v1950_v2 = vand.u32 2147483647, %v1822_v50  ;;  %v1195_v14 = vand.u32 2147483647, %v1067_v21 }
 0x1db   : > { %2571 = vmatpush.msra.mxu2 %v2259_v62  ;;  %v1147_v17 = vsub.f32 %v10080_v55, %v7523_v16  ;;  %v1530_v53 = vmax.f32 %v1402_v20, 0.0  ;;  %v1871_v15 = vand.u32 2147483647, %v1743_v49  ;;  %v1823_v45 = vsub.f32 %v10081_v24, %v7525_v5  ;;  %v10082_v62 = vld [vmem:[#allocation71_spill] sm:$0xff] }
 0x1dc   : > { %v2254_v35 = vmul.f32 %v2126_v11, %v1450_v19  ;;  %2596 = vmatpush.msra.mxu3 %v2339_v48  ;;  %v2078_v47 = vsub.f32 1.0, %v1950_v2  ;;  %v1323_v44 = vsub.f32 1.0, %v1195_v14  ;;  %v1062_v41 = vsub.f32 %v7805_v42, %v7465_v63 }
 0x1dd   : > { %v1275_v46 = vand.u32 2147483647, %v1147_v17  ;;  %v1999_v58 = vsub.f32 1.0, %v1871_v15  ;;  %v1951_v56 = vand.u32 2147483647, %v1823_v45  ;;  %v1738_v18 = vsub.f32 %v7809_v38, %v7467_v23 }
 0x1de   : > { %2514 = vmatpush.msra.mxu0 %v2254_v35  ;;  %v1142_v39 = vsub.f32 %v10082_v62, %v7465_v63  ;;  %v2206_v50 = vmax.f32 %v2078_v47, 0.0  ;;  %v1451_v21 = vmax.f32 %v1323_v44, 0.0  ;;  %v1190_v11 = vand.u32 2147483647, %v1062_v41  ;;  %v10083_v35 = vld [vmem:[#allocation72_spill] sm:$0xff] }
 0x1df   : > { %v1403_v19 = vsub.f32 1.0, %v1275_v46  ;;  %v2127_v20 = vmax.f32 %v1999_v58, 0.0  ;;  %v2079_v49 = vsub.f32 1.0, %v1951_v56  ;;  %v1866_v48 = vand.u32 2147483647, %v1738_v18 }
 0x1e0   : > { %v1270_v2 = vand.u32 2147483647, %v1142_v39  ;;  %v2334_v14 = vmul.f32 %v2206_v50, %v1530_v53  ;;  %v1318_v24 = vsub.f32 1.0, %v1190_v11  ;;  %v1818_v15 = vsub.f32 %v10083_v35, %v7467_v23  ;;  %v10084_v11 = vld [vmem:[#allocation27_spill] sm:$0xff] }
 0x1e1   : > { %v1531_v17 = vmax.f32 %v1403_v19, 0.0  ;;  %v2255_v45 = vmul.f32 %v2127_v20, %v1451_v21  ;;  %v2207_v55 = vmax.f32 %v2079_v49, 0.0  ;;  %v1994_v26 = vsub.f32 1.0, %v1866_v48  ;;  %v10085_v49 = vld [vmem:[#allocation28_spill] sm:$0xff] }
 0x1e2   : > { %v1398_v31 = vsub.f32 1.0, %v1270_v2  ;;  %2539 = vmatpush.msra.mxu1 %v2334_v14  ;;  %v1446_v13 = vmax.f32 %v1318_v24, 0.0  ;;  %v1946_v47 = vand.u32 2147483647, %v1818_v15  ;;  %v1063_v44 = vsub.f32 %v7805_v42, %v7523_v16 }
 0x1e3   : > { %v1739_v46 = vsub.f32 %v7809_v38, %v7525_v5  ;;  %2572 = vmatpush.msra.mxu2 %v2255_v45  ;;  %v2335_v53 = vmul.f32 %v2207_v55, %v1531_v17  ;;  %v2122_v41 = vmax.f32 %v1994_v26, 0.0  ;;  %v1143_v56 = vsub.f32 %v10082_v62, %v7523_v16  ;;  %v10086_v55 = vld [vmem:[#allocation8_spill] sm:$0xff] }
 0x1e4   : > { %v1526_v58 = vmax.f32 %v1398_v31, 0.0  ;;  %v2074_v18 = vsub.f32 1.0, %v1946_v47  ;;  %v1191_v39 = vand.u32 2147483647, %v1063_v44  ;;  %v1819_v24 = vsub.f32 %v10083_v35, %v7525_v5  ;;  %v10087_v47 = vld [vmem:[#allocation36_spill] sm:$0xff] }
 0x1e5   : > { %v1867_v50 = vand.u32 2147483647, %v1739_v46  ;;  %2597 = vmatpush.msra.mxu3 %v2335_v53  ;;  %v2250_v21 = vmul.f32 %v2122_v41, %v1446_v13  ;;  %v1271_v19 = vand.u32 2147483647, %v1143_v56  ;;  %v2696_v20 = vsub.f32 %v7039_v60, %v10084_v11  ;;  %v6657_v56 = vld [vmem:[%s7827_s25] sm:$0xff] }
 0x1e6   : > { %v3212_v26 = vsub.f32 %v10086_v55, %v10085_v49  ;;  %v2202_v31 = vmax.f32 %v2074_v18, 0.0  ;;  %v1319_v48 = vsub.f32 1.0, %v1191_v39  ;;  %v1947_v14 = vand.u32 2147483647, %v1819_v24  ;;  %v10088_v24 = vld [vmem:[#allocation37_spill] sm:$0xff] }
 0x1e7   : > { %v1995_v2 = vsub.f32 1.0, %v1867_v50  ;;  %2515 = vmatpush.msra.mxu0 %v2250_v21  ;;  %v1399_v17 = vsub.f32 1.0, %v1271_v19  ;;  %v2824_v15 = vand.u32 2147483647, %v2696_v20  ;;  %v2697_v44 = vsub.f32 %v7039_v60, %v10087_v47  ;;  %v10089_v19 = vld [vmem:[#allocation76_spill] sm:$0xff] }
 0x1e8   : > { %v3340_v45 = vand.u32 2147483647, %v3212_v26  ;;  %v2330_v13 = vmul.f32 %v2202_v31, %v1526_v58  ;;  %v1447_v46 = vmax.f32 %v1319_v48, 0.0  ;;  %v2075_v41 = vsub.f32 1.0, %v1947_v14  ;;  %2516 = vmatmul.f32.vlgmr.msra.gmra.mxu0 %v6657_v56  ;;  %v10090_v48 = vld [vmem:[#allocation77_spill] sm:$0xff] }
 0x1e9   : > { %v2123_v53 = vmax.f32 %v1995_v2, 0.0  ;;  %v1527_v35 = vmax.f32 %v1399_v17, 0.0  ;;  %v2952_v62 = vsub.f32 1.0, %v2824_v15  ;;  %v2825_v18 = vand.u32 2147483647, %v2697_v44 }
 0x1ea   : > { %v3468_v38 = vsub.f32 1.0, %v3340_v45  ;;  %2540 = vmatpush.msra.mxu1 %v2330_v13  ;;  %v2203_v50 = vmax.f32 %v2075_v41, 0.0  ;;  %v3213_v21 = vsub.f32 %v10086_v55, %v10088_v24  ;;  %v1138_v20 = vsub.f32 %v10089_v19, %v7465_v63 }
 0x1eb   : > { %v2251_v39 = vmul.f32 %v2123_v53, %v1447_v46  ;;  %v3080_v26 = vmax.f32 %v2952_v62, 0.0  ;;  %v2953_v31 = vsub.f32 1.0, %v2825_v18  ;;  %v1814_v2 = vsub.f32 %v10090_v48, %v7467_v23 }
 0x1ec   : > { %v3596_v58 = vmax.f32 %v3468_v38, 0.0  ;;  %v2331_v14 = vmul.f32 %v2203_v50, %v1527_v35  ;;  %v3341_v17 = vand.u32 2147483647, %v3213_v21  ;;  %v1266_v15 = vand.u32 2147483647, %v1138_v20 }
 0x1ed   : > { %2573 = vmatpush.msra.mxu2 %v2251_v39  ;;  %v1139_v45 = vsub.f32 %v10089_v19, %v7523_v16  ;;  %v3081_v13 = vmax.f32 %v2953_v31, 0.0  ;;  %v1942_v46 = vand.u32 2147483647, %v1814_v2  ;;  %v1815_v53 = vsub.f32 %v10090_v48, %v7525_v5  ;;  %v6658_v31 = vld [vmem:[%s7827_s25 + $0x10] sm:$0xff] }
 0x1ee   : > { %v3724_v44 = vmul.f32 %v3596_v58, %v3080_v26  ;;  %2574 = vmatmul.f32.vlgmr.msra.gmra.mxu2 %v6657_v56  ;;  %2598 = vmatpush.msra.mxu3 %v2331_v14  ;;  %v3469_v38 = vsub.f32 1.0, %v3341_v17  ;;  %v1394_v62 = vsub.f32 1.0, %v1266_v15  ;;  %v2692_v35 = vsub.f32 %v7041_v61, %v10084_v11 }
 0x1ef   : > { %v1267_v41 = vand.u32 2147483647, %v1139_v45  ;;  %v2070_v18 = vsub.f32 1.0, %v1942_v46  ;;  %v1943_v39 = vand.u32 2147483647, %v1815_v53  ;;  %v3208_v50 = vsub.f32 %v7107_v27, %v10085_v49 }
 0x1f0   : > { %3801 = vmatpush.msrb.mxu0 %v3724_v44  ;;  %v2693_v21 = vsub.f32 %v7041_v61, %v10087_v47  ;;  %v3597_v20 = vmax.f32 %v3469_v38, 0.0  ;;  %v1522_v26 = vmax.f32 %v1394_v62, 0.0  ;;  %v2820_v56 = vand.u32 2147483647, %v2692_v35 }
 0x1f1   : > { %v1395_v58 = vsub.f32 1.0, %v1267_v41  ;;  %2519 = vmatmul.f32.gmra.mxu0 %v6658_v31  ;;  %v2198_v2 = vmax.f32 %v2070_v18, 0.0  ;;  %v2071_v14 = vsub.f32 1.0, %v1943_v39  ;;  %v3336_v17 = vand.u32 2147483647, %v3208_v50  ;;  %v10091_v41 = vld [vmem:[#allocation78_spill] sm:$0xff] }
 0x1f2   : > { %v2821_v15 = vand.u32 2147483647, %v2693_v21  ;;  %v3725_v45 = vmul.f32 %v3597_v20, %v3081_v13  ;;  %v2948_v46 = vsub.f32 1.0, %v2820_v56  ;;  %v3209_v53 = vsub.f32 %v7107_v27, %v10088_v24  ;;  %v10092_v18 = vld [vmem:[#allocation82_spill] sm:$0xff] }
 0x1f3   : > { %v1523_v44 = vmax.f32 %v1395_v58, 0.0  ;;  %v2326_v48 = vmul.f32 %v2198_v2, %v1522_v26  ;;  %v2199_v19 = vmax.f32 %v2071_v14, 0.0  ;;  %v3464_v55 = vsub.f32 1.0, %v3336_v17 }
 0x1f4   : > { %v2949_v61 = vsub.f32 1.0, %v2821_v15  ;;  %3859 = vmatpush.msrb.mxu2 %v3725_v45  ;;  %v3076_v38 = vmax.f32 %v2948_v46, 0.0  ;;  %v3337_v62 = vand.u32 2147483647, %v3209_v53  ;;  %v1134_v35 = vsub.f32 %v10091_v41, %v7465_v63 }
 0x1f5   : > { %v1810_v39 = vsub.f32 %v10092_v18, %v7467_v23  ;;  %2541 = vmatpush.msra.mxu1 %v2326_v48  ;;  %v2327_v13 = vmul.f32 %v2199_v19, %v1523_v44  ;;  %v3592_v50 = vmax.f32 %v3464_v55, 0.0  ;;  %v1135_v20 = vsub.f32 %v10091_v41, %v7523_v16 }
 0x1f6   : > { %v3077_v21 = vmax.f32 %v2949_v61, 0.0  ;;  %2577 = vmatmul.f32.gmra.mxu2 %v6658_v31  ;;  %v3465_v26 = vsub.f32 1.0, %v3337_v62  ;;  %v1262_v58 = vand.u32 2147483647, %v1134_v35  ;;  %v1811_v2 = vsub.f32 %v10092_v18, %v7525_v5  ;;  %v6659_v31 = vld [vmem:[%s7827_s25 + $0x20] sm:$0xff] }
 0x1f7   : > { %v1938_v56 = vand.u32 2147483647, %v1810_v39  ;;  %2599 = vmatpush.msra.mxu3 %v2327_v13  ;;  %v3720_v14 = vmul.f32 %v3592_v50, %v3076_v38  ;;  %v1263_v17 = vand.u32 2147483647, %v1135_v20  ;;  %v2688_v48 = vsub.f32 %v7110_v29, %v10084_v11 }
 0x1f8   : > { %v3204_v61 = vsub.f32 %v7204_v28, %v10085_v49  ;;  %v3593_v55 = vmax.f32 %v3465_v26, 0.0  ;;  %v1390_v19 = vsub.f32 1.0, %v1262_v58  ;;  %v1939_v45 = vand.u32 2147483647, %v1811_v2 }
 0x1f9   : > { %v2066_v15 = vsub.f32 1.0, %v1938_v56  ;;  %2522 = vmatmul.f32.gmra.mxu0 %v6659_v31  ;;  %v1391_v44 = vsub.f32 1.0, %v1263_v17  ;;  %v2816_v46 = vand.u32 2147483647, %v2688_v48  ;;  %v2689_v38 = vsub.f32 %v7110_v29, %v10087_v47 }
 0x1fa   : > { %3802 = vmatpush.msrb.mxu0 %v3720_v14  ;;  %v3332_v53 = vand.u32 2147483647, %v3204_v61  ;;  %v3721_v62 = vmul.f32 %v3593_v55, %v3077_v21  ;;  %v1518_v35 = vmax.f32 %v1390_v19, 0.0  ;;  %v2067_v13 = vsub.f32 1.0, %v1939_v45  ;;  %v10093_v14 = vld [vmem:[#allocation83_spill] sm:$0xff]  ;;  %v10094_v21 = vld [vmem:[#allocation84_spill] sm:$0xff] }
 0x1fb   : > { %v2194_v39 = vmax.f32 %v2066_v15, 0.0  ;;  %v1519_v50 = vmax.f32 %v1391_v44, 0.0  ;;  %v2944_v20 = vsub.f32 1.0, %v2816_v46  ;;  %v2817_v26 = vand.u32 2147483647, %v2689_v38 }
 0x1fc   : > { %v3460_v18 = vsub.f32 1.0, %v3332_v53  ;;  %3860 = vmatpush.msrb.mxu2 %v3721_v62  ;;  %v2195_v56 = vmax.f32 %v2067_v13, 0.0  ;;  %v3205_v2 = vsub.f32 %v7204_v28, %v10088_v24  ;;  %v1130_v17 = vsub.f32 %v10093_v14, %v7465_v63 }
 0x1fd   : > { %v2322_v58 = vmul.f32 %v2194_v39, %v1518_v35  ;;  %v3072_v48 = vmax.f32 %v2944_v20, 0.0  ;;  %v2945_v29 = vsub.f32 1.0, %v2817_v26  ;;  %v1806_v55 = vsub.f32 %v10094_v21, %v7467_v23 }
 0x1fe   : > { %v3588_v61 = vmax.f32 %v3460_v18, 0.0  ;;  %2580 = vmatmul.f32.gmra.mxu2 %v6659_v31  ;;  %v2323_v19 = vmul.f32 %v2195_v56, %v1519_v50  ;;  %v3333_v15 = vand.u32 2147483647, %v3205_v2  ;;  %v1258_v45 = vand.u32 2147483647, %v1130_v17 }
 0x1ff   : > { %2542 = vmatpush.msra.mxu1 %v2322_v58  ;;  %v1131_v44 = vsub.f32 %v10093_v14, %v7523_v16  ;;  %v3073_v53 = vmax.f32 %v2945_v29, 0.0  ;;  %v1934_v38 = vand.u32 2147483647, %v1806_v55  ;;  %v1807_v62 = vsub.f32 %v10094_v21, %v7525_v5 }
 0x200   : > { %v3716_v46 = vmul.f32 %v3588_v61, %v3072_v48  ;;  %2600 = vmatpush.msra.mxu3 %v2323_v19  ;;  %v3461_v18 = vsub.f32 1.0, %v3333_v15  ;;  %v1386_v35 = vsub.f32 1.0, %v1258_v45  ;;  %v2684_v31 = vsub.f32 %v7285_v4, %v10084_v11 }
 0x201   : > { %v1259_v39 = vand.u32 2147483647, %v1131_v44  ;;  %2525 = vmatmul.f32.gmra.mxu0 %v7967_v6  ;;  %v2062_v13 = vsub.f32 1.0, %v1934_v38  ;;  %v1935_v50 = vand.u32 2147483647, %v1807_v62  ;;  %v3200_v20 = vsub.f32 %v7287_v7, %v10085_v49 }
 0x202   : > { %3803 = vmatpush.msrb.mxu0 %v3716_v46  ;;  %v2685_v29 = vsub.f32 %v7285_v4, %v10087_v47  ;;  %v3589_v26 = vmax.f32 %v3461_v18, 0.0  ;;  %v1514_v58 = vmax.f32 %v1386_v35, 0.0  ;;  %v2812_v2 = vand.u32 2147483647, %v2684_v31 }
 0x203   : > { %v1387_v56 = vsub.f32 1.0, %v1259_v39  ;;  %v2190_v17 = vmax.f32 %v2062_v13, 0.0  ;;  %v2063_v48 = vsub.f32 1.0, %v1935_v50  ;;  %v3328_v61 = vand.u32 2147483647, %v3200_v20 }
 0x204   : > { %v2813_v55 = vand.u32 2147483647, %v2685_v29  ;;  %v3717_v19 = vmul.f32 %v3589_v26, %v3073_v53  ;;  %v2940_v45 = vsub.f32 1.0, %v2812_v2  ;;  %v3201_v44 = vsub.f32 %v7287_v7, %v10088_v24 }
 0x205   : > { %v1515_v15 = vmax.f32 %v1387_v56, 0.0  ;;  %v2318_v46 = vmul.f32 %v2190_v17, %v1514_v58  ;;  %v2191_v38 = vmax.f32 %v2063_v48, 0.0  ;;  %v3456_v62 = vsub.f32 1.0, %v3328_v61 }
 0x206   : > { %v2941_v21 = vsub.f32 1.0, %v2813_v55  ;;  %2583 = vmatmul.f32.gmra.mxu2 %v7967_v6  ;;  %v3068_v18 = vmax.f32 %v2940_v45, 0.0  ;;  %v3329_v35 = vand.u32 2147483647, %v3201_v44  ;;  %v1126_v39 = vsub.f32 %v7861_v3, %v7465_v63 }
 0x207   : > { %3861 = vmatpush.msrb.mxu2 %v3717_v19  ;;  %v1802_v53 = vsub.f32 %v7863_v0, %v7467_v23  ;;  %2543 = vmatpush.msra.mxu1 %v2318_v46  ;;  %v2319_v31 = vmul.f32 %v2191_v38, %v1515_v15  ;;  %v3584_v13 = vmax.f32 %v3456_v62, 0.0  ;;  %v1127_v20 = vsub.f32 %v7861_v3, %v7523_v16 }
 0x208   : > { %v3069_v50 = vmax.f32 %v2941_v21, 0.0  ;;  %v3457_v29 = vsub.f32 1.0, %v3329_v35  ;;  %v1254_v26 = vand.u32 2147483647, %v1126_v39  ;;  %v1803_v6 = vsub.f32 %v7863_v0, %v7525_v5 }
 0x209   : > { %v1930_v58 = vand.u32 2147483647, %v1802_v53  ;;  %2601 = vmatpush.msra.mxu3 %v2319_v31  ;;  %v3712_v56 = vmul.f32 %v3584_v13, %v3068_v18  ;;  %v1255_v2 = vand.u32 2147483647, %v1127_v20  ;;  %v2680_v63 = vsub.f32 %v7359_v22, %v10084_v11 }
 0x20a   : > { %v3196_v23 = vsub.f32 %v7419_v51, %v10085_v49  ;;  %v3585_v17 = vmax.f32 %v3457_v29, 0.0  ;;  %v1382_v21 = vsub.f32 1.0, %v1254_v26  ;;  %v1931_v61 = vand.u32 2147483647, %v1803_v6 }
 0x20b   : > { %v2058_v48 = vsub.f32 1.0, %v1930_v58  ;;  %3804 = vmatpush.msrb.mxu0 %v3712_v56  ;;  %v1383_v16 = vsub.f32 1.0, %v1255_v2  ;;  %v2808_v55 = vand.u32 2147483647, %v2680_v63  ;;  %v2760_v5 = vsub.f32 %v7063_v8, %v10084_v11 }
 0x20c   : > { %v3324_v19 = vand.u32 2147483647, %v3196_v23  ;;  %v3713_v15 = vmul.f32 %v3585_v17, %v3069_v50  ;;  %v1510_v45 = vmax.f32 %v1382_v21, 0.0  ;;  %v2059_v46 = vsub.f32 1.0, %v1931_v61 }
 0x20d   : > { %v2186_v44 = vmax.f32 %v2058_v48, 0.0  ;;  %v1511_v38 = vmax.f32 %v1383_v16, 0.0  ;;  %v2936_v62 = vsub.f32 1.0, %v2808_v55  ;;  %v2888_v35 = vand.u32 2147483647, %v2760_v5  ;;  %v6660_v48 = vld [vmem:[%s7827_s25 + $0x8] sm:$0xff] }
 0x20e   : > { %v3452_v18 = vsub.f32 1.0, %v3324_v19  ;;  %3862 = vmatpush.msrb.mxu2 %v3713_v15  ;;  %v2187_v53 = vmax.f32 %v2059_v46, 0.0  ;;  %v3276_v31 = vsub.f32 %v7068_v10, %v10085_v49  ;;  %v2681_v13 = vsub.f32 %v7359_v22, %v10087_v47 }
 0x20f   : > { %v2314_v39 = vmul.f32 %v2186_v44, %v1510_v45  ;;  %v3064_v20 = vmax.f32 %v2936_v62, 0.0  ;;  %v3016_v50 = vsub.f32 1.0, %v2888_v35  ;;  %v3197_v26 = vsub.f32 %v7419_v51, %v10088_v24 }
 0x210   : > { %v3580_v29 = vmax.f32 %v3452_v18, 0.0  ;;  %v2315_v58 = vmul.f32 %v2187_v53, %v1511_v38  ;;  %v3404_v6 = vand.u32 2147483647, %v3276_v31  ;;  %v2809_v56 = vand.u32 2147483647, %v2681_v13 }
 0x211   : > { %2544 = vmatpush.msra.mxu1 %v2314_v39  ;;  %v2761_v2 = vsub.f32 %v7063_v8, %v10087_v47  ;;  %v3144_v23 = vmax.f32 %v3016_v50, 0.0  ;;  %v3325_v17 = vand.u32 2147483647, %v3197_v26  ;;  %v3277_v21 = vsub.f32 %v7068_v10, %v10088_v24  ;;  %v10095_v50 = vld [vmem:[#allocation15_spill] sm:$0xff] }
 0x212   : > { %v3708_v63 = vmul.f32 %v3580_v29, %v3064_v20  ;;  %2545 = vmatmul.f32.vlgmr.msra.gmra.mxu1 %v6660_v48  ;;  %2602 = vmatpush.msra.mxu3 %v2315_v58  ;;  %v3532_v61 = vsub.f32 1.0, %v3404_v6  ;;  %v2937_v16 = vsub.f32 1.0, %v2809_v56  ;;  %v2676_v19 = vsub.f32 %v7421_v32, %v10084_v11 }
 0x213   : > { %v2889_v55 = vand.u32 2147483647, %v2761_v2  ;;  %v3453_v5 = vsub.f32 1.0, %v3325_v17  ;;  %v3405_v15 = vand.u32 2147483647, %v3277_v21  ;;  %2603 = vmatmul.f32.vlgmr.msra.gmra.mxu3 %v6660_v48  ;;  %v3192_v45 = vsub.f32 %v7481_v43, %v10085_v49 }
 0x214   : > { %3805 = vmatpush.msrb.mxu0 %v3708_v63  ;;  %v2756_v44 = vsub.f32 %v7066_v9, %v10084_v11  ;;  %v3660_v46 = vmax.f32 %v3532_v61, 0.0  ;;  %v3065_v38 = vmax.f32 %v2937_v16, 0.0  ;;  %v2804_v18 = vand.u32 2147483647, %v2676_v19  ;;  %v6661_v19 = vld [vmem:[%s7827_s25 + $0x18] sm:$0xff] }
 0x215   : > { %v3017_v62 = vsub.f32 1.0, %v2889_v55  ;;  %v3581_v35 = vmax.f32 %v3453_v5, 0.0  ;;  %v3533_v39 = vsub.f32 1.0, %v3405_v15  ;;  %v3320_v53 = vand.u32 2147483647, %v3192_v45 }
 0x216   : > { %v2884_v31 = vand.u32 2147483647, %v2756_v44  ;;  %v3788_v13 = vmul.f32 %v3660_v46, %v3144_v23  ;;  %v2932_v29 = vsub.f32 1.0, %v2804_v18  ;;  %v3272_v26 = vsub.f32 %v10095_v50, %v10085_v49  ;;  %v10096_v18 = vld [vmem:[#allocation49_spill] sm:$0xff] }
 0x217   : > { %v3145_v20 = vmax.f32 %v3017_v62, 0.0  ;;  %v3709_v58 = vmul.f32 %v3581_v35, %v3065_v38  ;;  %v3661_v6 = vmax.f32 %v3533_v39, 0.0  ;;  %v3448_v56 = vsub.f32 1.0, %v3320_v53 }
 0x218   : > { %v3012_v2 = vsub.f32 1.0, %v2884_v31  ;;  %3830 = vmatpush.msrb.mxu1 %v3788_v13  ;;  %v3060_v63 = vmax.f32 %v2932_v29, 0.0  ;;  %v3400_v17 = vand.u32 2147483647, %v3272_v26  ;;  %v2677_v21 = vsub.f32 %v7421_v32, %v10087_v47 }
 0x219   : > { %v3193_v48 = vsub.f32 %v7481_v43, %v10088_v24  ;;  %3863 = vmatpush.msrb.mxu2 %v3709_v58  ;;  %v3789_v23 = vmul.f32 %v3661_v6, %v3145_v20  ;;  %v3576_v61 = vmax.f32 %v3448_v56, 0.0  ;;  %v2757_v55 = vsub.f32 %v7066_v9, %v10087_v47  ;;  %v10097_v58 = vld [vmem:[#allocation18_spill] sm:$0xff] }
 0x21a   : > { %v3140_v16 = vmax.f32 %v3012_v2, 0.0  ;;  %2548 = vmatmul.f32.gmra.mxu1 %v6661_v19  ;;  %v3528_v5 = vsub.f32 1.0, %v3400_v17  ;;  %v2805_v15 = vand.u32 2147483647, %v2677_v21  ;;  %v3273_v44 = vsub.f32 %v10095_v50, %v10088_v24 }
 0x21b   : > { %v3321_v45 = vand.u32 2147483647, %v3193_v48  ;;  %3888 = vmatpush.msrb.mxu3 %v3789_v23  ;;  %v3704_v46 = vmul.f32 %v3576_v61, %v3060_v63  ;;  %v2885_v38 = vand.u32 2147483647, %v2757_v55  ;;  %v2672_v62 = vsub.f32 %v10059_v57, %v10084_v11 }
 0x21c   : > { %v3188_v35 = vsub.f32 %v10096_v18, %v10085_v49  ;;  %v3656_v39 = vmax.f32 %v3528_v5, 0.0  ;;  %v2933_v53 = vsub.f32 1.0, %v2805_v15  ;;  %v3401_v13 = vand.u32 2147483647, %v3273_v44  ;;  %2606 = vmatmul.f32.gmra.mxu3 %v6661_v19  ;;  %v10098_v19 = vld [vmem:[#allocation19_spill] sm:$0xff] }
 0x21d   : > { %v3449_v31 = vsub.f32 1.0, %v3321_v45  ;;  %3806 = vmatpush.msrb.mxu0 %v3704_v46  ;;  %v3013_v20 = vsub.f32 1.0, %v2885_v38  ;;  %v2800_v29 = vand.u32 2147483647, %v2672_v62  ;;  %v2752_v6 = vsub.f32 %v10097_v58, %v10084_v11  ;;  %v6662_v62 = vld [vmem:[%s7827_s25 + $0x28] sm:$0xff] }
 0x21e   : > { %v3316_v26 = vand.u32 2147483647, %v3188_v35  ;;  %v3784_v56 = vmul.f32 %v3656_v39, %v3140_v16  ;;  %v3061_v2 = vmax.f32 %v2933_v53, 0.0  ;;  %v3529_v17 = vsub.f32 1.0, %v3401_v13 }
 0x21f   : > { %v3577_v63 = vmax.f32 %v3449_v31, 0.0  ;;  %v3141_v21 = vmax.f32 %v3013_v20, 0.0  ;;  %v2928_v48 = vsub.f32 1.0, %v2800_v29  ;;  %v2880_v61 = vand.u32 2147483647, %v2752_v6 }
 0x220   : > { %v3444_v23 = vsub.f32 1.0, %v3316_v26  ;;  %3831 = vmatpush.msrb.mxu1 %v3784_v56  ;;  %v3657_v5 = vmax.f32 %v3529_v17, 0.0  ;;  %v3268_v15 = vsub.f32 %v10098_v19, %v10085_v49  ;;  %v2673_v45 = vsub.f32 %v10059_v57, %v10087_v47 }
 0x221   : > { %v3705_v55 = vmul.f32 %v3577_v63, %v3061_v2  ;;  %v3056_v44 = vmax.f32 %v2928_v48, 0.0  ;;  %v3008_v16 = vsub.f32 1.0, %v2880_v61  ;;  %v3189_v38 = vsub.f32 %v10096_v18, %v10088_v24 }
 0x222   : > { %v3572_v46 = vmax.f32 %v3444_v23, 0.0  ;;  %2551 = vmatmul.f32.gmra.mxu1 %v6662_v62  ;;  %v3785_v35 = vmul.f32 %v3657_v5, %v3141_v21  ;;  %v3396_v39 = vand.u32 2147483647, %v3268_v15  ;;  %v2801_v53 = vand.u32 2147483647, %v2673_v45 }
 0x223   : > { %3864 = vmatpush.msrb.mxu2 %v3705_v55  ;;  %v2753_v31 = vsub.f32 %v10097_v58, %v10087_v47  ;;  %v3136_v20 = vmax.f32 %v3008_v16, 0.0  ;;  %v3317_v29 = vand.u32 2147483647, %v3189_v38  ;;  %v3269_v26 = vsub.f32 %v10098_v19, %v10088_v24 }
 0x224   : > { %v3700_v13 = vmul.f32 %v3572_v46, %v3056_v44  ;;  %3889 = vmatpush.msrb.mxu3 %v3785_v35  ;;  %v3524_v6 = vsub.f32 1.0, %v3396_v39  ;;  %v2929_v56 = vsub.f32 1.0, %v2801_v53  ;;  %v2668_v63 = vsub.f32 %v7547_v12, %v10084_v11  ;;  %v10099_v53 = vld [vmem:[#allocation25_spill] sm:$0xff] }
 0x225   : > { %v2881_v2 = vand.u32 2147483647, %v2753_v31  ;;  %v3445_v17 = vsub.f32 1.0, %v3317_v29  ;;  %v3397_v21 = vand.u32 2147483647, %v3269_v26  ;;  %v3184_v48 = vsub.f32 %v7567_v54, %v10085_v49  ;;  %2609 = vmatmul.f32.gmra.mxu3 %v6662_v62 }
 0x226   : > { %3807 = vmatpush.msrb.mxu0 %v3700_v13  ;;  %v2748_v23 = vsub.f32 %v10063_v33, %v10084_v11  ;;  %v3652_v61 = vmax.f32 %v3524_v6, 0.0  ;;  %v3057_v55 = vmax.f32 %v2929_v56, 0.0  ;;  %v2796_v15 = vand.u32 2147483647, %v2668_v63 }
 0x227   : > { %v3009_v5 = vsub.f32 1.0, %v2881_v2  ;;  %v3573_v45 = vmax.f32 %v3445_v17, 0.0  ;;  %v3525_v44 = vsub.f32 1.0, %v3397_v21  ;;  %v3312_v46 = vand.u32 2147483647, %v3184_v48 }
 0x228   : > { %v2876_v16 = vand.u32 2147483647, %v2748_v23  ;;  %v3780_v38 = vmul.f32 %v3652_v61, %v3136_v20  ;;  %v2924_v39 = vsub.f32 1.0, %v2796_v15  ;;  %v3264_v31 = vsub.f32 %v10099_v53, %v10085_v49 }
 0x229   : > { %v3137_v35 = vmax.f32 %v3009_v5, 0.0  ;;  %v3701_v13 = vmul.f32 %v3573_v45, %v3057_v55  ;;  %v3653_v29 = vmax.f32 %v3525_v44, 0.0  ;;  %v3440_v26 = vsub.f32 1.0, %v3312_v46  ;;  %v10100_v45 = vld [vmem:[#allocation57_spill] sm:$0xff] }
 0x22a   : > { %v3004_v19 = vsub.f32 1.0, %v2876_v16  ;;  %2554 = vmatmul.f32.gmra.mxu1 %v8049_v52  ;;  %v3052_v62 = vmax.f32 %v2924_v39, 0.0  ;;  %v3392_v6 = vand.u32 2147483647, %v3264_v31  ;;  %v2669_v56 = vsub.f32 %v7547_v12, %v10087_v47  ;;  %v10101_v46 = vld [vmem:[#allocation61_spill] sm:$0xff] }
 0x22b   : > { %3832 = vmatpush.msrb.mxu1 %v3780_v38  ;;  %v3185_v20 = vsub.f32 %v7567_v54, %v10088_v24  ;;  %3865 = vmatpush.msrb.mxu2 %v3701_v13  ;;  %v3781_v2 = vmul.f32 %v3653_v29, %v3137_v35  ;;  %v3568_v63 = vmax.f32 %v3440_v26, 0.0  ;;  %v2749_v21 = vsub.f32 %v10063_v33, %v10087_v47  ;;  %v10102_v26 = vld [vmem:[#allocation26_spill] sm:$0xff] }
 0x22c   : > { %v3132_v17 = vmax.f32 %v3004_v19, 0.0  ;;  %v3520_v48 = vsub.f32 1.0, %v3392_v6  ;;  %v2797_v23 = vand.u32 2147483647, %v2669_v56  ;;  %v3265_v55 = vsub.f32 %v10099_v53, %v10088_v24 }
 0x22d   : > { %v3313_v61 = vand.u32 2147483647, %v3185_v20  ;;  %3890 = vmatpush.msrb.mxu3 %v3781_v2  ;;  %v3696_v5 = vmul.f32 %v3568_v63, %v3052_v62  ;;  %v2877_v15 = vand.u32 2147483647, %v2749_v21  ;;  %v2664_v44 = vsub.f32 %v10100_v45, %v10084_v11 }
 0x22e   : > { %v3180_v16 = vsub.f32 %v10101_v46, %v10085_v49  ;;  %v3648_v38 = vmax.f32 %v3520_v48, 0.0  ;;  %v2925_v19 = vsub.f32 1.0, %v2797_v23  ;;  %v3393_v39 = vand.u32 2147483647, %v3265_v55  ;;  %2612 = vmatmul.f32.gmra.mxu3 %v8049_v52  ;;  %v10103_v52 = vld [vmem:[#allocation33_spill] sm:$0xff] }
 0x22f   : > { %v3441_v35 = vsub.f32 1.0, %v3313_v61  ;;  %3808 = vmatpush.msrb.mxu0 %v3696_v5  ;;  %v3005_v31 = vsub.f32 1.0, %v2877_v15  ;;  %v2792_v13 = vand.u32 2147483647, %v2664_v44  ;;  %v2744_v62 = vsub.f32 %v10102_v26, %v10084_v11 }
 0x230   : > { %v3308_v29 = vand.u32 2147483647, %v3180_v16  ;;  %v3776_v6 = vmul.f32 %v3648_v38, %v3132_v17  ;;  %v3053_v56 = vmax.f32 %v2925_v19, 0.0  ;;  %v3521_v2 = vsub.f32 1.0, %v3393_v39 }
 0x231   : > { %v3569_v20 = vmax.f32 %v3441_v35, 0.0  ;;  %v3133_v63 = vmax.f32 %v3005_v31, 0.0  ;;  %v2920_v21 = vsub.f32 1.0, %v2792_v13  ;;  %v2872_v48 = vand.u32 2147483647, %v2744_v62 }
 0x232   : > { %v3436_v53 = vsub.f32 1.0, %v3308_v29  ;;  %3833 = vmatpush.msrb.mxu1 %v3776_v6  ;;  %v3649_v61 = vmax.f32 %v3521_v2, 0.0  ;;  %v3260_v55 = vsub.f32 %v10103_v52, %v10085_v49  ;;  %v2665_v5 = vsub.f32 %v10100_v45, %v10087_v47 }
 0x233   : > { %v3697_v23 = vmul.f32 %v3569_v20, %v3053_v56  ;;  %v3048_v15 = vmax.f32 %v2920_v21, 0.0  ;;  %v3000_v16 = vsub.f32 1.0, %v2872_v48  ;;  %v3181_v17 = vsub.f32 %v10101_v46, %v10088_v24  ;;  %v10104_v48 = vld [vmem:[#allocation44_spill] sm:$0xff] }
 0x234   : > { %v3564_v44 = vmax.f32 %v3436_v53, 0.0  ;;  %v3777_v38 = vmul.f32 %v3649_v61, %v3133_v63  ;;  %v3388_v19 = vand.u32 2147483647, %v3260_v55  ;;  %v2793_v35 = vand.u32 2147483647, %v2665_v5 }
 0x235   : > { %3866 = vmatpush.msrb.mxu2 %v3697_v23  ;;  %v2745_v39 = vsub.f32 %v10102_v26, %v10087_v47  ;;  %v3128_v13 = vmax.f32 %v3000_v16, 0.0  ;;  %v3309_v29 = vand.u32 2147483647, %v3181_v17  ;;  %v3261_v62 = vsub.f32 %v10103_v52, %v10088_v24 }
 0x236   : > { %v3692_v31 = vmul.f32 %v3564_v44, %v3048_v15  ;;  %3891 = vmatpush.msrb.mxu3 %v3777_v38  ;;  %v3516_v6 = vsub.f32 1.0, %v3388_v19  ;;  %v2921_v53 = vsub.f32 1.0, %v2793_v35  ;;  %v2660_v20 = vsub.f32 %v10067_v40, %v10084_v11 }
 0x237   : > { %v2873_v56 = vand.u32 2147483647, %v2745_v39  ;;  %v3437_v2 = vsub.f32 1.0, %v3309_v29  ;;  %v3389_v63 = vand.u32 2147483647, %v3261_v62  ;;  %v3176_v21 = vsub.f32 %v7619_v1, %v10085_v49 }
 0x238   : > { %3809 = vmatpush.msrb.mxu0 %v3692_v31  ;;  %v2740_v23 = vsub.f32 %v10104_v48, %v10084_v11  ;;  %v3644_v61 = vmax.f32 %v3516_v6, 0.0  ;;  %v3049_v55 = vmax.f32 %v2921_v53, 0.0  ;;  %v2788_v15 = vand.u32 2147483647, %v2660_v20  ;;  %v10105_v31 = vld [vmem:[#allocation45_spill] sm:$0xff] }
 0x239   : > { %v3001_v5 = vsub.f32 1.0, %v2873_v56  ;;  %v3565_v44 = vmax.f32 %v3437_v2, 0.0  ;;  %v3517_v16 = vsub.f32 1.0, %v3389_v63  ;;  %v3304_v17 = vand.u32 2147483647, %v3176_v21 }
 0x23a   : > { %v2868_v38 = vand.u32 2147483647, %v2740_v23  ;;  %v3772_v19 = vmul.f32 %v3644_v61, %v3128_v13  ;;  %v2916_v39 = vsub.f32 1.0, %v2788_v15  ;;  %v3256_v29 = vsub.f32 %v10105_v31, %v10085_v49 }
 0x23b   : > { %v3129_v35 = vmax.f32 %v3001_v5, 0.0  ;;  %v3693_v62 = vmul.f32 %v3565_v44, %v3049_v55  ;;  %v3645_v52 = vmax.f32 %v3517_v16, 0.0  ;;  %v3432_v26 = vsub.f32 1.0, %v3304_v17  ;;  %v10106_v44 = vld [vmem:[#allocation67_spill] sm:$0xff]  ;;  %v10107_v17 = vld [vmem:[#allocation68_spill] sm:$0xff] }
 0x23c   : > { %v2996_v46 = vsub.f32 1.0, %v2868_v38  ;;  %3834 = vmatpush.msrb.mxu1 %v3772_v19  ;;  %v3044_v45 = vmax.f32 %v2916_v39, 0.0  ;;  %v3384_v6 = vand.u32 2147483647, %v3256_v29  ;;  %v2661_v53 = vsub.f32 %v10067_v40, %v10087_v47 }
 0x23d   : > { %v3177_v56 = vsub.f32 %v7619_v1, %v10088_v24  ;;  %3867 = vmatpush.msrb.mxu2 %v3693_v62  ;;  %v3773_v13 = vmul.f32 %v3645_v52, %v3129_v35  ;;  %v3560_v20 = vmax.f32 %v3432_v26, 0.0  ;;  %v2741_v63 = vsub.f32 %v10104_v48, %v10087_v47  ;;  %v10108_v62 = vld [vmem:[#allocation50_spill] sm:$0xff] }
 0x23e   : > { %v3124_v2 = vmax.f32 %v2996_v46, 0.0  ;;  %v3512_v21 = vsub.f32 1.0, %v3384_v6  ;;  %v2789_v23 = vand.u32 2147483647, %v2661_v53  ;;  %v3257_v55 = vsub.f32 %v10105_v31, %v10088_v24 }
 0x23f   : > { %v3305_v61 = vand.u32 2147483647, %v3177_v56  ;;  %3892 = vmatpush.msrb.mxu3 %v3773_v13  ;;  %v3688_v5 = vmul.f32 %v3560_v20, %v3044_v45  ;;  %v2869_v15 = vand.u32 2147483647, %v2741_v63  ;;  %v2656_v16 = vsub.f32 %v10106_v44, %v10084_v11 }
 0x240   : > { %v3172_v52 = vsub.f32 %v10107_v17, %v10085_v49  ;;  %v3640_v26 = vmax.f32 %v3512_v21, 0.0  ;;  %v2917_v46 = vsub.f32 1.0, %v2789_v23  ;;  %v3385_v19 = vand.u32 2147483647, %v3257_v55 }
 0x241   : > { %v3433_v38 = vsub.f32 1.0, %v3305_v61  ;;  %3810 = vmatpush.msrb.mxu0 %v3688_v5  ;;  %v2997_v35 = vsub.f32 1.0, %v2869_v15  ;;  %v2784_v39 = vand.u32 2147483647, %v2656_v16  ;;  %v2736_v6 = vsub.f32 %v10108_v62, %v10084_v11  ;;  %v10109_v61 = vld [vmem:[#allocation55_spill] sm:$0xff] }
 0x242   : > { %v3300_v29 = vand.u32 2147483647, %v3172_v52  ;;  %v3768_v53 = vmul.f32 %v3640_v26, %v3124_v2  ;;  %v3045_v45 = vmax.f32 %v2917_v46, 0.0  ;;  %v3513_v13 = vsub.f32 1.0, %v3385_v19 }
 0x243   : > { %v3561_v56 = vmax.f32 %v3433_v38, 0.0  ;;  %v3125_v20 = vmax.f32 %v2997_v35, 0.0  ;;  %v2912_v63 = vsub.f32 1.0, %v2784_v39  ;;  %v2864_v48 = vand.u32 2147483647, %v2736_v6 }
 0x244   : > { %v3428_v31 = vsub.f32 1.0, %v3300_v29  ;;  %3835 = vmatpush.msrb.mxu1 %v3768_v53  ;;  %v3641_v23 = vmax.f32 %v3513_v13, 0.0  ;;  %v3252_v55 = vsub.f32 %v10109_v61, %v10085_v49  ;;  %v2657_v5 = vsub.f32 %v10106_v44, %v10087_v47 }
 0x245   : > { %v3689_v21 = vmul.f32 %v3561_v56, %v3045_v45  ;;  %v3040_v15 = vmax.f32 %v2912_v63, 0.0  ;;  %v2992_v52 = vsub.f32 1.0, %v2864_v48  ;;  %v3173_v2 = vsub.f32 %v10107_v17, %v10088_v24 }
 0x246   : > { %v3556_v16 = vmax.f32 %v3428_v31, 0.0  ;;  %v3769_v26 = vmul.f32 %v3641_v23, %v3125_v20  ;;  %v3380_v46 = vand.u32 2147483647, %v3252_v55  ;;  %v2785_v38 = vand.u32 2147483647, %v2657_v5 }
 0x247   : > { %3868 = vmatpush.msrb.mxu2 %v3689_v21  ;;  %v2737_v19 = vsub.f32 %v10108_v62, %v10087_v47  ;;  %v3120_v39 = vmax.f32 %v2992_v52, 0.0  ;;  %v3301_v29 = vand.u32 2147483647, %v3173_v2  ;;  %v3253_v6 = vsub.f32 %v10109_v61, %v10088_v24 }
 0x248   : > { %v3684_v35 = vmul.f32 %v3556_v16, %v3040_v15  ;;  %3893 = vmatpush.msrb.mxu3 %v3769_v26  ;;  %v3508_v53 = vsub.f32 1.0, %v3380_v46  ;;  %v2913_v31 = vsub.f32 1.0, %v2785_v38  ;;  %v2652_v45 = vsub.f32 %v7669_v59, %v10084_v11 }
 0x249   : > { %v2865_v48 = vand.u32 2147483647, %v2737_v19  ;;  %v3429_v56 = vsub.f32 1.0, %v3301_v29  ;;  %v3381_v13 = vand.u32 2147483647, %v3253_v6  ;;  %v3168_v20 = vsub.f32 %v10072_v36, %v10085_v49  ;;  %v10110_v19 = vld [vmem:[#allocation58_spill] sm:$0xff] }
 0x24a   : > { %3811 = vmatpush.msrb.mxu0 %v3684_v35  ;;  %v2732_v63 = vsub.f32 %v10073_v37, %v10084_v11  ;;  %v3636_v21 = vmax.f32 %v3508_v53, 0.0  ;;  %v3041_v23 = vmax.f32 %v2913_v31, 0.0  ;;  %v2780_v5 = vand.u32 2147483647, %v2652_v45 }
 0x24b   : > { %v2993_v55 = vsub.f32 1.0, %v2865_v48  ;;  %v3557_v15 = vmax.f32 %v3429_v56, 0.0  ;;  %v3509_v16 = vsub.f32 1.0, %v3381_v13  ;;  %v3296_v52 = vand.u32 2147483647, %v3168_v20 }
 0x24c   : > { %v2860_v2 = vand.u32 2147483647, %v2732_v63  ;;  %v3764_v26 = vmul.f32 %v3636_v21, %v3120_v39  ;;  %v2908_v38 = vsub.f32 1.0, %v2780_v5  ;;  %v3248_v35 = vsub.f32 %v10110_v19, %v10085_v49 }
 0x24d   : > { %v3121_v46 = vmax.f32 %v2993_v55, 0.0  ;;  %v3685_v29 = vmul.f32 %v3557_v15, %v3041_v23  ;;  %v3637_v6 = vmax.f32 %v3509_v16, 0.0  ;;  %v3424_v61 = vsub.f32 1.0, %v3296_v52  ;;  %v10111_v15 = vld [vmem:[#allocation74_spill] sm:$0xff]  ;;  %v10112_v52 = vld [vmem:[#allocation75_spill] sm:$0xff] }
 0x24e   : > { %v2988_v62 = vsub.f32 1.0, %v2860_v2  ;;  %3836 = vmatpush.msrb.mxu1 %v3764_v26  ;;  %v3036_v17 = vmax.f32 %v2908_v38, 0.0  ;;  %v3376_v53 = vand.u32 2147483647, %v3248_v35  ;;  %v2653_v31 = vsub.f32 %v7669_v59, %v10087_v47 }
 0x24f   : > { %v3169_v48 = vsub.f32 %v10072_v36, %v10088_v24  ;;  %3869 = vmatpush.msrb.mxu2 %v3685_v29  ;;  %v3765_v39 = vmul.f32 %v3637_v6, %v3121_v46  ;;  %v3552_v45 = vmax.f32 %v3424_v61, 0.0  ;;  %v2733_v13 = vsub.f32 %v10073_v37, %v10087_v47  ;;  %v10113_v6 = vld [vmem:[#allocation59_spill] sm:$0xff] }
 0x250   : > { %v3116_v56 = vmax.f32 %v2988_v62, 0.0  ;;  %v3504_v20 = vsub.f32 1.0, %v3376_v53  ;;  %v2781_v63 = vand.u32 2147483647, %v2653_v31  ;;  %v3249_v23 = vsub.f32 %v10110_v19, %v10088_v24 }
 0x251   : > { %v3297_v21 = vand.u32 2147483647, %v3169_v48  ;;  %3894 = vmatpush.msrb.mxu3 %v3765_v39  ;;  %v3680_v55 = vmul.f32 %v3552_v45, %v3036_v17  ;;  %v2861_v5 = vand.u32 2147483647, %v2733_v13  ;;  %v2648_v16 = vsub.f32 %v10111_v15, %v10084_v11 }
 0x252   : > { %v3164_v2 = vsub.f32 %v10112_v52, %v10085_v49  ;;  %v3632_v61 = vmax.f32 %v3504_v20, 0.0  ;;  %v2909_v62 = vsub.f32 1.0, %v2781_v63  ;;  %v3377_v46 = vand.u32 2147483647, %v3249_v23 }
 0x253   : > { %v3425_v26 = vsub.f32 1.0, %v3297_v21  ;;  %3812 = vmatpush.msrb.mxu0 %v3680_v55  ;;  %v2989_v38 = vsub.f32 1.0, %v2861_v5  ;;  %v2776_v35 = vand.u32 2147483647, %v2648_v16  ;;  %v2728_v53 = vsub.f32 %v10113_v6, %v10084_v11  ;;  %v10114_v21 = vld [vmem:[#allocation60_spill] sm:$0xff] }
 0x254   : > { %v3292_v29 = vand.u32 2147483647, %v3164_v2  ;;  %v3760_v31 = vmul.f32 %v3632_v61, %v3116_v56  ;;  %v3037_v17 = vmax.f32 %v2909_v62, 0.0  ;;  %v3505_v39 = vsub.f32 1.0, %v3377_v46 }
 0x255   : > { %v3553_v48 = vmax.f32 %v3425_v26, 0.0  ;;  %v3117_v45 = vmax.f32 %v2989_v38, 0.0  ;;  %v2904_v13 = vsub.f32 1.0, %v2776_v35  ;;  %v2856_v37 = vand.u32 2147483647, %v2728_v53 }
 0x256   : > { %v3420_v19 = vsub.f32 1.0, %v3292_v29  ;;  %3837 = vmatpush.msrb.mxu1 %v3760_v31  ;;  %v3633_v63 = vmax.f32 %v3505_v39, 0.0  ;;  %v3244_v23 = vsub.f32 %v10114_v21, %v10085_v49  ;;  %v2649_v55 = vsub.f32 %v10111_v15, %v10087_v47 }
 0x257   : > { %v3681_v20 = vmul.f32 %v3553_v48, %v3037_v17  ;;  %v3032_v5 = vmax.f32 %v2904_v13, 0.0  ;;  %v2984_v2 = vsub.f32 1.0, %v2856_v37  ;;  %v3165_v56 = vsub.f32 %v10112_v52, %v10088_v24 }
 0x258   : > { %v3548_v16 = vmax.f32 %v3420_v19, 0.0  ;;  %v3761_v61 = vmul.f32 %v3633_v63, %v3117_v45  ;;  %v3372_v62 = vand.u32 2147483647, %v3244_v23  ;;  %v2777_v26 = vand.u32 2147483647, %v2649_v55 }
 0x259   : > { %3870 = vmatpush.msrb.mxu2 %v3681_v20  ;;  %v2729_v46 = vsub.f32 %v10113_v6, %v10087_v47  ;;  %v3112_v35 = vmax.f32 %v2984_v2, 0.0  ;;  %v3293_v29 = vand.u32 2147483647, %v3165_v56  ;;  %v3245_v53 = vsub.f32 %v10114_v21, %v10088_v24 }
 0x25a   : > { %v3676_v38 = vmul.f32 %v3548_v16, %v3032_v5  ;;  %3895 = vmatpush.msrb.mxu3 %v3761_v61  ;;  %v3500_v31 = vsub.f32 1.0, %v3372_v62  ;;  %v2905_v19 = vsub.f32 1.0, %v2777_v26  ;;  %v2644_v17 = vsub.f32 %v7741_v34, %v10084_v11 }
 0x25b   : > { %v2857_v37 = vand.u32 2147483647, %v2729_v46  ;;  %v3421_v48 = vsub.f32 1.0, %v3293_v29  ;;  %v3373_v39 = vand.u32 2147483647, %v3245_v53  ;;  %v3160_v45 = vsub.f32 %v7757_v25, %v10085_v49  ;;  %v10115_v46 = vld [vmem:[#allocation65_spill] sm:$0xff] }
 0x25c   : > { %3813 = vmatpush.msrb.mxu0 %v3676_v38  ;;  %v2724_v13 = vsub.f32 %v10078_v30, %v10084_v11  ;;  %v3628_v20 = vmax.f32 %v3500_v31, 0.0  ;;  %v3033_v63 = vmax.f32 %v2905_v19, 0.0  ;;  %v2772_v55 = vand.u32 2147483647, %v2644_v17 }
 0x25d   : > { %v2985_v23 = vsub.f32 1.0, %v2857_v37  ;;  %v3549_v5 = vmax.f32 %v3421_v48, 0.0  ;;  %v3501_v16 = vsub.f32 1.0, %v3373_v39  ;;  %v3288_v2 = vand.u32 2147483647, %v3160_v45 }
 0x25e   : > { %v2852_v56 = vand.u32 2147483647, %v2724_v13  ;;  %v3756_v61 = vmul.f32 %v3628_v20, %v3112_v35  ;;  %v2900_v26 = vsub.f32 1.0, %v2772_v55  ;;  %v3240_v38 = vsub.f32 %v10115_v46, %v10085_v49 }
 0x25f   : > { %v3113_v62 = vmax.f32 %v2985_v23, 0.0  ;;  %v3677_v29 = vmul.f32 %v3549_v5, %v3033_v63  ;;  %v3629_v53 = vmax.f32 %v3501_v16, 0.0  ;;  %v3416_v21 = vsub.f32 1.0, %v3288_v2  ;;  %v10116_v5 = vld [vmem:[#allocation81_spill] sm:$0xff] }
 0x260   : > { %v2980_v6 = vsub.f32 1.0, %v2852_v56  ;;  %3838 = vmatpush.msrb.mxu1 %v3756_v61  ;;  %v3028_v52 = vmax.f32 %v2900_v26, 0.0  ;;  %v3368_v31 = vand.u32 2147483647, %v3240_v38  ;;  %v2645_v19 = vsub.f32 %v7741_v34, %v10087_v47  ;;  %v10117_v2 = vld [vmem:[#allocation85_spill] sm:$0xff] }
 0x261   : > { %v3161_v37 = vsub.f32 %v7757_v25, %v10088_v24  ;;  %3871 = vmatpush.msrb.mxu2 %v3677_v29  ;;  %v3757_v35 = vmul.f32 %v3629_v53, %v3113_v62  ;;  %v3544_v17 = vmax.f32 %v3416_v21, 0.0  ;;  %v2725_v39 = vsub.f32 %v10078_v30, %v10087_v47  ;;  %v10118_v53 = vld [vmem:[#allocation66_spill] sm:$0xff] }
 0x262   : > { %v3108_v48 = vmax.f32 %v2980_v6, 0.0  ;;  %v3496_v45 = vsub.f32 1.0, %v3368_v31  ;;  %v2773_v13 = vand.u32 2147483647, %v2645_v19  ;;  %v3241_v63 = vsub.f32 %v10115_v46, %v10088_v24 }
 0x263   : > { %v3289_v20 = vand.u32 2147483647, %v3161_v37  ;;  %3896 = vmatpush.msrb.mxu3 %v3757_v35  ;;  %v3672_v23 = vmul.f32 %v3544_v17, %v3028_v52  ;;  %v2853_v55 = vand.u32 2147483647, %v2725_v39  ;;  %v2640_v16 = vsub.f32 %v10116_v5, %v10084_v11 }
 0x264   : > { %v3156_v56 = vsub.f32 %v10117_v2, %v10085_v49  ;;  %v3624_v21 = vmax.f32 %v3496_v45, 0.0  ;;  %v2901_v6 = vsub.f32 1.0, %v2773_v13  ;;  %v3369_v62 = vand.u32 2147483647, %v3241_v63 }
 0x265   : > { %v3417_v61 = vsub.f32 1.0, %v3289_v20  ;;  %3814 = vmatpush.msrb.mxu0 %v3672_v23  ;;  %v2981_v26 = vsub.f32 1.0, %v2853_v55  ;;  %v2768_v38 = vand.u32 2147483647, %v2640_v16  ;;  %v2720_v31 = vsub.f32 %v10118_v53, %v10084_v11  ;;  %v10119_v20 = vld [vmem:[#allocation70_spill] sm:$0xff] }
 0x266   : > { %v3284_v29 = vand.u32 2147483647, %v3156_v56  ;;  %v3752_v19 = vmul.f32 %v3624_v21, %v3108_v48  ;;  %v3029_v52 = vmax.f32 %v2901_v6, 0.0  ;;  %v3497_v35 = vsub.f32 1.0, %v3369_v62 }
 0x267   : > { %v3545_v37 = vmax.f32 %v3417_v61, 0.0  ;;  %v3109_v17 = vmax.f32 %v2981_v26, 0.0  ;;  %v2896_v39 = vsub.f32 1.0, %v2768_v38  ;;  %v2848_v30 = vand.u32 2147483647, %v2720_v31 }
 0x268   : > { %v3412_v46 = vsub.f32 1.0, %v3284_v29  ;;  %3839 = vmatpush.msrb.mxu1 %v3752_v19  ;;  %v3625_v13 = vmax.f32 %v3497_v35, 0.0  ;;  %v3236_v63 = vsub.f32 %v10119_v20, %v10085_v49  ;;  %v2641_v23 = vsub.f32 %v10116_v5, %v10087_v47 }
 0x269   : > { %v3673_v45 = vmul.f32 %v3545_v37, %v3029_v52  ;;  %v3024_v55 = vmax.f32 %v2896_v39, 0.0  ;;  %v2976_v56 = vsub.f32 1.0, %v2848_v30  ;;  %v3157_v48 = vsub.f32 %v10117_v2, %v10088_v24 }
 0x26a   : > { %v3540_v16 = vmax.f32 %v3412_v46, 0.0  ;;  %v3753_v21 = vmul.f32 %v3625_v13, %v3109_v17  ;;  %v3364_v6 = vand.u32 2147483647, %v3236_v63  ;;  %v2769_v61 = vand.u32 2147483647, %v2641_v23  ;;  %v10120_v17 = vld [vmem:[#allocation87_spill] sm:$0xff] }
 0x26b   : > { %3872 = vmatpush.msrb.mxu2 %v3673_v45  ;;  %v2721_v62 = vsub.f32 %v10118_v53, %v10087_v47  ;;  %v3104_v38 = vmax.f32 %v2976_v56, 0.0  ;;  %v3285_v29 = vand.u32 2147483647, %v3157_v48  ;;  %v3237_v31 = vsub.f32 %v10119_v20, %v10088_v24  ;;  %v10121_v45 = vld [vmem:[#allocation71_spill] sm:$0xff] }
 0x26c   : > { %v3668_v26 = vmul.f32 %v3540_v16, %v3024_v55  ;;  %3897 = vmatpush.msrb.mxu3 %v3753_v21  ;;  %v3492_v19 = vsub.f32 1.0, %v3364_v6  ;;  %v2897_v46 = vsub.f32 1.0, %v2769_v61  ;;  %v2636_v52 = vsub.f32 %v7805_v42, %v10084_v11 }
 0x26d   : > { %v2849_v30 = vand.u32 2147483647, %v2721_v62  ;;  %v3413_v37 = vsub.f32 1.0, %v3285_v29  ;;  %v3365_v35 = vand.u32 2147483647, %v3237_v31  ;;  %v3152_v39 = vsub.f32 %v10120_v17, %v10085_v49 }
 0x26e   : > { %3815 = vmatpush.msrb.mxu0 %v3668_v26  ;;  %v2716_v13 = vsub.f32 %v10121_v45, %v10084_v11  ;;  %v3620_v63 = vmax.f32 %v3492_v19, 0.0  ;;  %v3025_v23 = vmax.f32 %v2897_v46, 0.0  ;;  %v2764_v16 = vand.u32 2147483647, %v2636_v52  ;;  %v10122_v26 = vld [vmem:[#allocation72_spill] sm:$0xff] }
 0x26f   : > { %v2977_v55 = vsub.f32 1.0, %v2849_v30  ;;  %v3541_v56 = vmax.f32 %v3413_v37, 0.0  ;;  %v3493_v48 = vsub.f32 1.0, %v3365_v35  ;;  %v3280_v21 = vand.u32 2147483647, %v3152_v39 }
 0x270   : > { %v2844_v6 = vand.u32 2147483647, %v2716_v13  ;;  %v3748_v61 = vmul.f32 %v3620_v63, %v3104_v38  ;;  %v2892_v20 = vsub.f32 1.0, %v2764_v16  ;;  %v3232_v29 = vsub.f32 %v10122_v26, %v10085_v49  ;;  %v10123_v16 = vld [vmem:[#allocation40_spill] sm:$0xff] }
 0x271   : > { %v3105_v62 = vmax.f32 %v2977_v55, 0.0  ;;  %v3669_v31 = vmul.f32 %v3541_v56, %v3025_v23  ;;  %v3621_v53 = vmax.f32 %v3493_v48, 0.0  ;;  %v3408_v2 = vsub.f32 1.0, %v3280_v21  ;;  %v10124_v48 = vld [vmem:[#allocation41_spill] sm:$0xff]  ;;  %v10125_v21 = vld [vmem:[#allocation8_spill] sm:$0xff] }
 0x272   : > { %v2972_v5 = vsub.f32 1.0, %v2844_v6  ;;  %3840 = vmatpush.msrb.mxu1 %v3748_v61  ;;  %v3020_v25 = vmax.f32 %v2892_v20, 0.0  ;;  %v3360_v19 = vand.u32 2147483647, %v3232_v29  ;;  %v2637_v46 = vsub.f32 %v7805_v42, %v10087_v47 }
 0x273   : > { %v3153_v30 = vsub.f32 %v10120_v17, %v10088_v24  ;;  %3873 = vmatpush.msrb.mxu2 %v3669_v31  ;;  %v3749_v38 = vmul.f32 %v3621_v53, %v3105_v62  ;;  %v3536_v52 = vmax.f32 %v3408_v2, 0.0  ;;  %v2717_v35 = vsub.f32 %v10121_v45, %v10087_v47  ;;  %v6511_v2 = vld [vmem:[%s7827_s25 + $0x40] sm:$0xff] }
 0x274   : > { %v3100_v37 = vmax.f32 %v2972_v5, 0.0  ;;  %v3488_v39 = vsub.f32 1.0, %v3360_v19  ;;  %v2765_v13 = vand.u32 2147483647, %v2637_v46  ;;  %v3233_v20 = vsub.f32 %v10122_v26, %v10088_v24  ;;  %v10126_v46 = vld [vmem:[#allocation51_spill] sm:$0xff] }
 0x275   : > { %v3281_v63 = vand.u32 2147483647, %v3153_v30  ;;  %3898 = vmatpush.msrb.mxu3 %v3749_v38  ;;  %v3664_v23 = vmul.f32 %v3536_v52, %v3020_v25  ;;  %v2845_v55 = vand.u32 2147483647, %v2717_v35  ;;  %v2698_v56 = vsub.f32 %v7039_v60, %v10123_v16 }
 0x276   : > { %v3214_v53 = vsub.f32 %v10125_v21, %v10124_v48  ;;  %v3616_v5 = vmax.f32 %v3488_v39, 0.0  ;;  %v2893_v6 = vsub.f32 1.0, %v2765_v13  ;;  %v3361_v62 = vand.u32 2147483647, %v3233_v20 }
 0x277   : > { %v3409_v61 = vsub.f32 1.0, %v3281_v63  ;;  %3816 = vmatpush.msrb.mxu0 %v3664_v23  ;;  %v2973_v29 = vsub.f32 1.0, %v2845_v55  ;;  %v2826_v31 = vand.u32 2147483647, %v2698_v56  ;;  %v2699_v30 = vsub.f32 %v7039_v60, %v10126_v46  ;;  %v10127_v63 = vld [vmem:[#allocation52_spill] sm:$0xff] }
 0x278   : > { %v3342_v19 = vand.u32 2147483647, %v3214_v53  ;;  %v3744_v25 = vmul.f32 %v3616_v5, %v3100_v37  ;;  %v3021_v38 = vmax.f32 %v2893_v6, 0.0  ;;  %v3489_v35 = vsub.f32 1.0, %v3361_v62  ;;  %3817 = vmatmul.f32.vlgmr.msrb.gmra.mxu0 %v6511_v2  ;;  %v10128_v23 = vld [vmem:[#allocation76_spill] sm:$0xff]  ;;  %v10129_v5 = vld [vmem:[#allocation77_spill] sm:$0xff] }
 0x279   : > { %v3537_v52 = vmax.f32 %v3409_v61, 0.0  ;;  %v3101_v26 = vmax.f32 %v2973_v29, 0.0  ;;  %v2954_v45 = vsub.f32 1.0, %v2826_v31  ;;  %v2827_v42 = vand.u32 2147483647, %v2699_v30 }
 0x27a   : > { %v3470_v17 = vsub.f32 1.0, %v3342_v19  ;;  %3841 = vmatpush.msrb.mxu1 %v3744_v25  ;;  %v3617_v13 = vmax.f32 %v3489_v35, 0.0  ;;  %v3215_v20 = vsub.f32 %v10125_v21, %v10127_v63  ;;  %v2712_v55 = vsub.f32 %v10128_v23, %v10084_v11 }
 0x27b   : > { %v3665_v39 = vmul.f32 %v3537_v52, %v3021_v38  ;;  %v3082_v56 = vmax.f32 %v2954_v45, 0.0  ;;  %v2955_v37 = vsub.f32 1.0, %v2827_v42  ;;  %v3228_v6 = vsub.f32 %v10129_v5, %v10085_v49  ;;  %v10130_v52 = vld [vmem:[#allocation7_spill] sm:$0xff] }
 0x27c   : > { %v3598_v53 = vmax.f32 %v3470_v17, 0.0  ;;  %v3745_v61 = vmul.f32 %v3617_v13, %v3101_v26  ;;  %v3343_v62 = vand.u32 2147483647, %v3215_v20  ;;  %v2840_v29 = vand.u32 2147483647, %v2712_v55 }
 0x27d   : > { %3874 = vmatpush.msrb.mxu2 %v3665_v39  ;;  %v2713_v31 = vsub.f32 %v10128_v23, %v10087_v47  ;;  %v3083_v30 = vmax.f32 %v2955_v37, 0.0  ;;  %v3356_v25 = vand.u32 2147483647, %v3228_v6  ;;  %v3229_v38 = vsub.f32 %v10129_v5, %v10088_v24 }
 0x27e   : > { %v3726_v19 = vmul.f32 %v3598_v53, %v3082_v56  ;;  %3875 = vmatmul.f32.vlgmr.msrb.gmra.mxu2 %v6511_v2  ;;  %3899 = vmatpush.msrb.mxu3 %v3745_v61  ;;  %v3471_v17 = vsub.f32 1.0, %v3343_v62  ;;  %v2968_v42 = vsub.f32 1.0, %v2840_v29  ;;  %v2694_v35 = vsub.f32 %v10130_v52, %v10123_v16 }
 0x27f   : > { %v2841_v45 = vand.u32 2147483647, %v2713_v31  ;;  %v3484_v26 = vsub.f32 1.0, %v3356_v25  ;;  %v3357_v39 = vand.u32 2147483647, %v3229_v38  ;;  %v3210_v13 = vsub.f32 %v7107_v27, %v10124_v48 }
 0x280   : > { %3917 = vmatpush.msra.mxu0 %v3726_v19  ;;  %v2695_v20 = vsub.f32 %v10130_v52, %v10126_v46  ;;  %v3599_v55 = vmax.f32 %v3471_v17, 0.0  ;;  %v3096_v56 = vmax.f32 %v2968_v42, 0.0  ;;  %v2822_v2 = vand.u32 2147483647, %v2694_v35 }
 0x281   : > { %v2969_v53 = vsub.f32 1.0, %v2841_v45  ;;  %v3612_v37 = vmax.f32 %v3484_v26, 0.0  ;;  %v3485_v6 = vsub.f32 1.0, %v3357_v39  ;;  %v3338_v61 = vand.u32 2147483647, %v3210_v13  ;;  %v10131_v45 = vld [vmem:[#allocation82_spill] sm:$0xff] }
 0x282   : > { %v2823_v62 = vand.u32 2147483647, %v2695_v20  ;;  %v3727_v29 = vmul.f32 %v3599_v55, %v3083_v30  ;;  %v2950_v5 = vsub.f32 1.0, %v2822_v2  ;;  %v3211_v19 = vsub.f32 %v7107_v27, %v10127_v63 }
 0x283   : > { %v3097_v31 = vmax.f32 %v2969_v53, 0.0  ;;  %v3740_v25 = vmul.f32 %v3612_v37, %v3096_v56  ;;  %v3613_v38 = vmax.f32 %v3485_v6, 0.0  ;;  %v3466_v23 = vsub.f32 1.0, %v3338_v61  ;;  %v10132_v37 = vld [vmem:[#allocation14_spill] sm:$0xff] }
 0x284   : > { %v2951_v21 = vsub.f32 1.0, %v2823_v62  ;;  %3975 = vmatpush.msra.mxu2 %v3727_v29  ;;  %v3078_v52 = vmax.f32 %v2950_v5, 0.0  ;;  %v3339_v17 = vand.u32 2147483647, %v3211_v19  ;;  %v2708_v42 = vsub.f32 %v10091_v41, %v10084_v11 }
 0x285   : > { %v3224_v35 = vsub.f32 %v10131_v45, %v10085_v49  ;;  %3842 = vmatpush.msrb.mxu1 %v3740_v25  ;;  %v3741_v30 = vmul.f32 %v3613_v38, %v3097_v31  ;;  %v3594_v26 = vmax.f32 %v3466_v23, 0.0  ;;  %v2709_v13 = vsub.f32 %v10091_v41, %v10087_v47 }
 0x286   : > { %v3079_v39 = vmax.f32 %v2951_v21, 0.0  ;;  %v3467_v20 = vsub.f32 1.0, %v3339_v17  ;;  %v2836_v55 = vand.u32 2147483647, %v2708_v42  ;;  %v3225_v5 = vsub.f32 %v10131_v45, %v10088_v24 }
 0x287   : > { %v3352_v56 = vand.u32 2147483647, %v3224_v35  ;;  %3900 = vmatpush.msrb.mxu3 %v3741_v30  ;;  %v3722_v53 = vmul.f32 %v3594_v26, %v3078_v52  ;;  %v2837_v2 = vand.u32 2147483647, %v2709_v13  ;;  %v2690_v6 = vsub.f32 %v10132_v37, %v10123_v16 }
 0x288   : > { %v3206_v61 = vsub.f32 %v7204_v28, %v10124_v48  ;;  %v3595_v23 = vmax.f32 %v3467_v20, 0.0  ;;  %v2964_v21 = vsub.f32 1.0, %v2836_v55  ;;  %v3353_v29 = vand.u32 2147483647, %v3225_v5  ;;  %v6513_v20 = vld [vmem:[%s7827_s25 + $0x50] sm:$0xff] }
 0x289   : > { %v3480_v62 = vsub.f32 1.0, %v3352_v56  ;;  %3918 = vmatpush.msra.mxu0 %v3722_v53  ;;  %v2965_v31 = vsub.f32 1.0, %v2837_v2  ;;  %v2818_v19 = vand.u32 2147483647, %v2690_v6  ;;  %v2691_v38 = vsub.f32 %v10132_v37, %v10126_v46  ;;  %3878 = vmatmul.f32.gmra.mxu2 %v6513_v20 }
 0x28a   : > { %v3334_v25 = vand.u32 2147483647, %v3206_v61  ;;  %v3723_v52 = vmul.f32 %v3595_v23, %v3079_v39  ;;  %v3092_v17 = vmax.f32 %v2964_v21, 0.0  ;;  %v3481_v35 = vsub.f32 1.0, %v3353_v29  ;;  %3820 = vmatmul.f32.gmra.mxu0 %v6513_v20  ;;  %v10133_v61 = vld [vmem:[#allocation84_spill] sm:$0xff] }
 0x28b   : > { %v3608_v42 = vmax.f32 %v3480_v62, 0.0  ;;  %v3093_v30 = vmax.f32 %v2965_v31, 0.0  ;;  %v2946_v26 = vsub.f32 1.0, %v2818_v19  ;;  %v2819_v45 = vand.u32 2147483647, %v2691_v38 }
 0x28c   : > { %v3462_v13 = vsub.f32 1.0, %v3334_v25  ;;  %3976 = vmatpush.msra.mxu2 %v3723_v52  ;;  %v3609_v56 = vmax.f32 %v3481_v35, 0.0  ;;  %v3207_v5 = vsub.f32 %v7204_v28, %v10127_v63  ;;  %v2704_v53 = vsub.f32 %v10093_v14, %v10084_v11 }
 0x28d   : > { %v3736_v55 = vmul.f32 %v3608_v42, %v3092_v17  ;;  %v3074_v2 = vmax.f32 %v2946_v26, 0.0  ;;  %v2947_v6 = vsub.f32 1.0, %v2819_v45  ;;  %v3220_v23 = vsub.f32 %v10133_v61, %v10085_v49 }
 0x28e   : > { %v3590_v39 = vmax.f32 %v3462_v13, 0.0  ;;  %v3737_v21 = vmul.f32 %v3609_v56, %v3093_v30  ;;  %v3335_v62 = vand.u32 2147483647, %v3207_v5  ;;  %v2832_v29 = vand.u32 2147483647, %v2704_v53 }
 0x28f   : > { %3843 = vmatpush.msrb.mxu1 %v3736_v55  ;;  %v2705_v31 = vsub.f32 %v10093_v14, %v10087_v47  ;;  %v3075_v25 = vmax.f32 %v2947_v6, 0.0  ;;  %v3348_v38 = vand.u32 2147483647, %v3220_v23  ;;  %v3221_v52 = vsub.f32 %v10133_v61, %v10088_v24 }
 0x290   : > { %v3718_v19 = vmul.f32 %v3590_v39, %v3074_v2  ;;  %3901 = vmatpush.msrb.mxu3 %v3737_v21  ;;  %v3463_v17 = vsub.f32 1.0, %v3335_v62  ;;  %v2960_v45 = vsub.f32 1.0, %v2832_v29  ;;  %v2686_v35 = vsub.f32 %v7285_v4, %v10123_v16 }
 0x291   : > { %v2833_v42 = vand.u32 2147483647, %v2705_v31  ;;  %v3476_v30 = vsub.f32 1.0, %v3348_v38  ;;  %v3349_v26 = vand.u32 2147483647, %v3221_v52  ;;  %v3202_v13 = vsub.f32 %v7287_v7, %v10124_v48 }
 0x292   : > { %3919 = vmatpush.msra.mxu0 %v3718_v19  ;;  %v2687_v20 = vsub.f32 %v7285_v4, %v10126_v46  ;;  %v3591_v55 = vmax.f32 %v3463_v17, 0.0  ;;  %v3088_v56 = vmax.f32 %v2960_v45, 0.0  ;;  %v2814_v53 = vand.u32 2147483647, %v2686_v35 }
 0x293   : > { %v2961_v5 = vsub.f32 1.0, %v2833_v42  ;;  %v3604_v2 = vmax.f32 %v3476_v30, 0.0  ;;  %v3477_v39 = vsub.f32 1.0, %v3349_v26  ;;  %v3330_v6 = vand.u32 2147483647, %v3202_v13 }
 0x294   : > { %v2815_v23 = vand.u32 2147483647, %v2687_v20  ;;  %v3719_v21 = vmul.f32 %v3591_v55, %v3075_v25  ;;  %v2942_v29 = vsub.f32 1.0, %v2814_v53  ;;  %v3203_v31 = vsub.f32 %v7287_v7, %v10127_v63 }
 0x295   : > { %v3089_v62 = vmax.f32 %v2961_v5, 0.0  ;;  %v3732_v19 = vmul.f32 %v3604_v2, %v3088_v56  ;;  %v3605_v38 = vmax.f32 %v3477_v39, 0.0  ;;  %v3458_v52 = vsub.f32 1.0, %v3330_v6 }
 0x296   : > { %v2943_v61 = vsub.f32 1.0, %v2815_v23  ;;  %3977 = vmatpush.msra.mxu2 %v3719_v21  ;;  %v3070_v4 = vmax.f32 %v2942_v29, 0.0  ;;  %v3331_v17 = vand.u32 2147483647, %v3203_v31  ;;  %v2700_v45 = vsub.f32 %v7861_v3, %v10084_v11 }
 0x297   : > { %v3216_v42 = vsub.f32 %v7863_v0, %v10085_v49  ;;  %3844 = vmatpush.msrb.mxu1 %v3732_v19  ;;  %v3733_v25 = vmul.f32 %v3605_v38, %v3089_v62  ;;  %v3586_v35 = vmax.f32 %v3458_v52, 0.0  ;;  %v2701_v26 = vsub.f32 %v7861_v3, %v10087_v47 }
 0x298   : > { %v3071_v30 = vmax.f32 %v2943_v61, 0.0  ;;  %v3459_v13 = vsub.f32 1.0, %v3331_v17  ;;  %v2828_v20 = vand.u32 2147483647, %v2700_v45  ;;  %v3217_v56 = vsub.f32 %v7863_v0, %v10088_v24 }
 0x299   : > { %v3344_v55 = vand.u32 2147483647, %v3216_v42  ;;  %3902 = vmatpush.msrb.mxu3 %v3733_v25  ;;  %v3714_v5 = vmul.f32 %v3586_v35, %v3070_v4  ;;  %v2829_v53 = vand.u32 2147483647, %v2701_v26  ;;  %v2682_v11 = vsub.f32 %v7359_v22, %v10123_v16  ;;  %v6512_v26 = vld [vmem:[%s7827_s25 + $0x48] sm:$0xff] }
 0x29a   : > { %v3198_v49 = vsub.f32 %v7419_v51, %v10124_v48  ;;  %v3587_v2 = vmax.f32 %v3459_v13, 0.0  ;;  %v2956_v61 = vsub.f32 1.0, %v2828_v20  ;;  %v3345_v6 = vand.u32 2147483647, %v3217_v56 }
 0x29b   : > { %v3472_v39 = vsub.f32 1.0, %v3344_v55  ;;  %3920 = vmatpush.msra.mxu0 %v3714_v5  ;;  %v2957_v47 = vsub.f32 1.0, %v2829_v53  ;;  %v2810_v23 = vand.u32 2147483647, %v2682_v11  ;;  %v2762_v24 = vsub.f32 %v7063_v8, %v10123_v16 }
 0x29c   : > { %v3326_v21 = vand.u32 2147483647, %v3198_v49  ;;  %v3715_v4 = vmul.f32 %v3587_v2, %v3071_v30  ;;  %v3084_v62 = vmax.f32 %v2956_v61, 0.0  ;;  %v3473_v31 = vsub.f32 1.0, %v3345_v6 }
 0x29d   : > { %v3600_v29 = vmax.f32 %v3472_v39, 0.0  ;;  %v3085_v19 = vmax.f32 %v2957_v47, 0.0  ;;  %v2938_v38 = vsub.f32 1.0, %v2810_v23  ;;  %v2890_v17 = vand.u32 2147483647, %v2762_v24 }
 0x29e   : > { %v3454_v52 = vsub.f32 1.0, %v3326_v21  ;;  %3978 = vmatpush.msra.mxu2 %v3715_v4  ;;  %v3601_v42 = vmax.f32 %v3473_v31, 0.0  ;;  %v3278_v25 = vsub.f32 %v7068_v10, %v10124_v48  ;;  %v2683_v35 = vsub.f32 %v7359_v22, %v10126_v46 }
 0x29f   : > { %v3728_v45 = vmul.f32 %v3600_v29, %v3084_v62  ;;  %v3066_v13 = vmax.f32 %v2938_v38, 0.0  ;;  %v3018_v30 = vsub.f32 1.0, %v2890_v17  ;;  %v3199_v55 = vsub.f32 %v7419_v51, %v10127_v63 }
 0x2a0   : > { %v3582_v20 = vmax.f32 %v3454_v52, 0.0  ;;  %v3729_v56 = vmul.f32 %v3601_v42, %v3085_v19  ;;  %v3406_v5 = vand.u32 2147483647, %v3278_v25  ;;  %v2811_v53 = vand.u32 2147483647, %v2683_v35 }
 0x2a1   : > { %3845 = vmatpush.msrb.mxu1 %v3728_v45  ;;  %v2763_v11 = vsub.f32 %v7063_v8, %v10126_v46  ;;  %v3146_v2 = vmax.f32 %v3018_v30, 0.0  ;;  %v3327_v61 = vand.u32 2147483647, %v3199_v55  ;;  %v3279_v39 = vsub.f32 %v7068_v10, %v10127_v63 }
 0x2a2   : > { %v3710_v49 = vmul.f32 %v3582_v20, %v3066_v13  ;;  %3846 = vmatmul.f32.vlgmr.msrb.gmra.mxu1 %v6512_v26  ;;  %3903 = vmatpush.msrb.mxu3 %v3729_v56  ;;  %v3534_v6 = vsub.f32 1.0, %v3406_v5  ;;  %v2939_v47 = vsub.f32 1.0, %v2811_v53  ;;  %v2678_v21 = vsub.f32 %v7421_v32, %v10123_v16 }
 0x2a3   : > { %v2891_v23 = vand.u32 2147483647, %v2763_v11  ;;  %v3455_v24 = vsub.f32 1.0, %v3327_v61  ;;  %v3407_v4 = vand.u32 2147483647, %v3279_v39  ;;  %3904 = vmatmul.f32.vlgmr.msrb.gmra.mxu3 %v6512_v26  ;;  %v3194_v62 = vsub.f32 %v7481_v43, %v10124_v48 }
 0x2a4   : > { %3921 = vmatpush.msra.mxu0 %v3710_v49  ;;  %v2758_v29 = vsub.f32 %v7066_v9, %v10123_v16  ;;  %v3662_v31 = vmax.f32 %v3534_v6, 0.0  ;;  %v3067_v19 = vmax.f32 %v2939_v47, 0.0  ;;  %v2806_v52 = vand.u32 2147483647, %v2678_v21 }
 0x2a5   : > { %v3019_v38 = vsub.f32 1.0, %v2891_v23  ;;  %v3583_v17 = vmax.f32 %v3455_v24, 0.0  ;;  %v3535_v45 = vsub.f32 1.0, %v3407_v4  ;;  %v3322_v42 = vand.u32 2147483647, %v3194_v62 }
 0x2a6   : > { %v2886_v25 = vand.u32 2147483647, %v2758_v29  ;;  %v3790_v35 = vmul.f32 %v3662_v31, %v3146_v2  ;;  %v2934_v20 = vsub.f32 1.0, %v2806_v52  ;;  %v3274_v26 = vsub.f32 %v10095_v50, %v10124_v48 }
 0x2a7   : > { %v3147_v13 = vmax.f32 %v3019_v38, 0.0  ;;  %v3711_v30 = vmul.f32 %v3583_v17, %v3067_v19  ;;  %v3663_v55 = vmax.f32 %v3535_v45, 0.0  ;;  %v3450_v56 = vsub.f32 1.0, %v3322_v42 }
 0x2a8   : > { %v3014_v5 = vsub.f32 1.0, %v2886_v25  ;;  %3946 = vmatpush.msra.mxu1 %v3790_v35  ;;  %v3062_v53 = vmax.f32 %v2934_v20, 0.0  ;;  %v3402_v11 = vand.u32 2147483647, %v3274_v26  ;;  %v2679_v49 = vsub.f32 %v7421_v32, %v10126_v46 }
 0x2a9   : > { %v3195_v61 = vsub.f32 %v7481_v43, %v10127_v63  ;;  %3979 = vmatpush.msra.mxu2 %v3711_v30  ;;  %v3791_v2 = vmul.f32 %v3663_v55, %v3147_v13  ;;  %v3578_v39 = vmax.f32 %v3450_v56, 0.0  ;;  %v2759_v47 = vsub.f32 %v7066_v9, %v10126_v46 }
 0x2aa   : > { %v3142_v6 = vmax.f32 %v3014_v5, 0.0  ;;  %v3530_v23 = vsub.f32 1.0, %v3402_v11  ;;  %v2807_v21 = vand.u32 2147483647, %v2679_v49  ;;  %v3275_v4 = vsub.f32 %v10095_v50, %v10127_v63  ;;  %v8453_v49 = vld [vmem:[%s7827_s25 + $0x60] sm:$0xff] }
 0x2ab   : > { %v3323_v24 = vand.u32 2147483647, %v3195_v61  ;;  %4004 = vmatpush.msra.mxu3 %v3791_v2  ;;  %v3706_v62 = vmul.f32 %v3578_v39, %v3062_v53  ;;  %v2887_v29 = vand.u32 2147483647, %v2759_v47  ;;  %v2674_v31 = vsub.f32 %v10059_v57, %v10123_v16  ;;  %v10134_v39 = vld [vmem:[#allocation19_spill] sm:$0xff]  ;;  %3823 = vmatmul.f32.gmra.mxu0 %v8453_v49 }
 0x2ac   : > { %v3190_v19 = vsub.f32 %v10096_v18, %v10124_v48  ;;  %v3658_v38 = vmax.f32 %v3530_v23, 0.0  ;;  %v2935_v52 = vsub.f32 1.0, %v2807_v21  ;;  %v3403_v45 = vand.u32 2147483647, %v3275_v4  ;;  %3881 = vmatmul.f32.gmra.mxu2 %v8453_v49 }
 0x2ad   : > { %v3451_v17 = vsub.f32 1.0, %v3323_v24  ;;  %3922 = vmatpush.msra.mxu0 %v3706_v62  ;;  %v3015_v42 = vsub.f32 1.0, %v2887_v29  ;;  %v2802_v25 = vand.u32 2147483647, %v2674_v31  ;;  %v2754_v13 = vsub.f32 %v10097_v58, %v10123_v16 }
 0x2ae   : > { %v3318_v35 = vand.u32 2147483647, %v3190_v19  ;;  %v3786_v20 = vmul.f32 %v3658_v38, %v3142_v6  ;;  %v3063_v26 = vmax.f32 %v2935_v52, 0.0  ;;  %v3531_v55 = vsub.f32 1.0, %v3403_v45  ;;  %v6514_v6 = vld [vmem:[%s7827_s25 + $0x58] sm:$0xff] }
 0x2af   : > { %v3579_v30 = vmax.f32 %v3451_v17, 0.0  ;;  %v3143_v56 = vmax.f32 %v3015_v42, 0.0  ;;  %v2930_v5 = vsub.f32 1.0, %v2802_v25  ;;  %v2882_v11 = vand.u32 2147483647, %v2754_v13  ;;  %3849 = vmatmul.f32.gmra.mxu1 %v6514_v6  ;;  %3907 = vmatmul.f32.gmra.mxu3 %v6514_v6 }
 0x2b0   : > { %v3446_v53 = vsub.f32 1.0, %v3318_v35  ;;  %3947 = vmatpush.msra.mxu1 %v3786_v20  ;;  %v3659_v2 = vmax.f32 %v3531_v55, 0.0  ;;  %v3270_v47 = vsub.f32 %v10134_v39, %v10124_v48  ;;  %v2675_v23 = vsub.f32 %v10059_v57, %v10126_v46 }
 0x2b1   : > { %v3707_v61 = vmul.f32 %v3579_v30, %v3063_v26  ;;  %v3058_v21 = vmax.f32 %v2930_v5, 0.0  ;;  %v3010_v4 = vsub.f32 1.0, %v2882_v11  ;;  %v3191_v62 = vsub.f32 %v10096_v18, %v10127_v63 }
 0x2b2   : > { %v3574_v24 = vmax.f32 %v3446_v53, 0.0  ;;  %v3787_v29 = vmul.f32 %v3659_v2, %v3143_v56  ;;  %v3398_v31 = vand.u32 2147483647, %v3270_v47  ;;  %v2803_v19 = vand.u32 2147483647, %v2675_v23 }
 0x2b3   : > { %3980 = vmatpush.msra.mxu2 %v3707_v61  ;;  %v2755_v38 = vsub.f32 %v10097_v58, %v10126_v46  ;;  %v3138_v17 = vmax.f32 %v3010_v4, 0.0  ;;  %v3319_v45 = vand.u32 2147483647, %v3191_v62  ;;  %v3271_v42 = vsub.f32 %v10134_v39, %v10127_v63  ;;  %v10135_v62 = vld [vmem:[#allocation25_spill] sm:$0xff] }
 0x2b4   : > { %v3702_v52 = vmul.f32 %v3574_v24, %v3058_v21  ;;  %4005 = vmatpush.msra.mxu3 %v3787_v29  ;;  %v3526_v25 = vsub.f32 1.0, %v3398_v31  ;;  %v2931_v35 = vsub.f32 1.0, %v2803_v19  ;;  %v2670_v20 = vsub.f32 %v7547_v12, %v10123_v16 }
 0x2b5   : > { %v2883_v13 = vand.u32 2147483647, %v2755_v38  ;;  %v3447_v26 = vsub.f32 1.0, %v3319_v45  ;;  %v3399_v30 = vand.u32 2147483647, %v3271_v42  ;;  %v3186_v55 = vsub.f32 %v7567_v54, %v10124_v48 }
 0x2b6   : > { %3923 = vmatpush.msra.mxu0 %v3702_v52  ;;  %v2750_v56 = vsub.f32 %v10063_v33, %v10123_v16  ;;  %v3654_v5 = vmax.f32 %v3526_v25, 0.0  ;;  %v3059_v53 = vmax.f32 %v2931_v35, 0.0  ;;  %v2798_v61 = vand.u32 2147483647, %v2670_v20 }
 0x2b7   : > { %v3011_v11 = vsub.f32 1.0, %v2883_v13  ;;  %v3575_v2 = vmax.f32 %v3447_v26, 0.0  ;;  %v3527_v47 = vsub.f32 1.0, %v3399_v30  ;;  %v3314_v23 = vand.u32 2147483647, %v3186_v55 }
 0x2b8   : > { %v2878_v6 = vand.u32 2147483647, %v2750_v56  ;;  %v3782_v21 = vmul.f32 %v3654_v5, %v3138_v17  ;;  %v2926_v4 = vsub.f32 1.0, %v2798_v61  ;;  %v3266_v29 = vsub.f32 %v10135_v62, %v10124_v48  ;;  %v10136_v61 = vld [vmem:[#allocation57_spill] sm:$0xff] }
 0x2b9   : > { %v3139_v24 = vmax.f32 %v3011_v11, 0.0  ;;  %v3703_v31 = vmul.f32 %v3575_v2, %v3059_v53  ;;  %v3655_v19 = vmax.f32 %v3527_v47, 0.0  ;;  %v3442_v38 = vsub.f32 1.0, %v3314_v23  ;;  %v10137_v47 = vld [vmem:[#allocation61_spill] sm:$0xff] }
 0x2ba   : > { %v3006_v52 = vsub.f32 1.0, %v2878_v6  ;;  %3948 = vmatpush.msra.mxu1 %v3782_v21  ;;  %v3054_v45 = vmax.f32 %v2926_v4, 0.0  ;;  %v3394_v42 = vand.u32 2147483647, %v3266_v29  ;;  %v2671_v25 = vsub.f32 %v7547_v12, %v10126_v46 }
 0x2bb   : > { %v3187_v35 = vsub.f32 %v7567_v54, %v10127_v63  ;;  %3981 = vmatpush.msra.mxu2 %v3703_v31  ;;  %v3783_v17 = vmul.f32 %v3655_v19, %v3139_v24  ;;  %v3570_v13 = vmax.f32 %v3442_v38, 0.0  ;;  %v2751_v26 = vsub.f32 %v10063_v33, %v10126_v46  ;;  %v10138_v38 = vld [vmem:[#allocation26_spill] sm:$0xff] }
 0x2bc   : > { %v3134_v20 = vmax.f32 %v3006_v52, 0.0  ;;  %v3522_v30 = vsub.f32 1.0, %v3394_v42  ;;  %v2799_v55 = vand.u32 2147483647, %v2671_v25  ;;  %v3267_v5 = vsub.f32 %v10135_v62, %v10127_v63 }
 0x2bd   : > { %v3315_v56 = vand.u32 2147483647, %v3187_v35  ;;  %4006 = vmatpush.msra.mxu3 %v3783_v17  ;;  %v3698_v53 = vmul.f32 %v3570_v13, %v3054_v45  ;;  %v2879_v11 = vand.u32 2147483647, %v2751_v26  ;;  %v2666_v2 = vsub.f32 %v10136_v61, %v10123_v16 }
 0x2be   : > { %v3182_v23 = vsub.f32 %v10137_v47, %v10124_v48  ;;  %v3650_v6 = vmax.f32 %v3522_v30, 0.0  ;;  %v2927_v21 = vsub.f32 1.0, %v2799_v55  ;;  %v3395_v4 = vand.u32 2147483647, %v3267_v5 }
 0x2bf   : > { %v3443_v24 = vsub.f32 1.0, %v3315_v56  ;;  %3924 = vmatpush.msra.mxu0 %v3698_v53  ;;  %v3007_v29 = vsub.f32 1.0, %v2879_v11  ;;  %v2794_v31 = vand.u32 2147483647, %v2666_v2  ;;  %v2746_v52 = vsub.f32 %v10138_v38, %v10123_v16  ;;  %v10139_v56 = vld [vmem:[#allocation33_spill] sm:$0xff] }
 0x2c0   : > { %v3310_v19 = vand.u32 2147483647, %v3182_v23  ;;  %v3778_v42 = vmul.f32 %v3650_v6, %v3134_v20  ;;  %v3055_v45 = vmax.f32 %v2927_v21, 0.0  ;;  %v3523_v35 = vsub.f32 1.0, %v3395_v4 }
 0x2c1   : > { %v3571_v25 = vmax.f32 %v3443_v24, 0.0  ;;  %v3135_v17 = vmax.f32 %v3007_v29, 0.0  ;;  %v2922_v13 = vsub.f32 1.0, %v2794_v31  ;;  %v2874_v62 = vand.u32 2147483647, %v2746_v52 }
 0x2c2   : > { %v3438_v26 = vsub.f32 1.0, %v3310_v19  ;;  %3949 = vmatpush.msra.mxu1 %v3778_v42  ;;  %v3651_v55 = vmax.f32 %v3523_v35, 0.0  ;;  %v3262_v5 = vsub.f32 %v10139_v56, %v10124_v48  ;;  %v2667_v53 = vsub.f32 %v10136_v61, %v10126_v46 }
 0x2c3   : > { %v3699_v30 = vmul.f32 %v3571_v25, %v3055_v45  ;;  %v3050_v11 = vmax.f32 %v2922_v13, 0.0  ;;  %v3002_v23 = vsub.f32 1.0, %v2874_v62  ;;  %v3183_v20 = vsub.f32 %v10137_v47, %v10127_v63 }
 0x2c4   : > { %v3566_v2 = vmax.f32 %v3438_v26, 0.0  ;;  %v3779_v6 = vmul.f32 %v3651_v55, %v3135_v17  ;;  %v3390_v21 = vand.u32 2147483647, %v3262_v5  ;;  %v2795_v24 = vand.u32 2147483647, %v2667_v53  ;;  %v10140_v26 = vld [vmem:[#allocation44_spill] sm:$0xff] }
 0x2c5   : > { %3982 = vmatpush.msra.mxu2 %v3699_v30  ;;  %v2747_v4 = vsub.f32 %v10138_v38, %v10126_v46  ;;  %v3130_v31 = vmax.f32 %v3002_v23, 0.0  ;;  %v3311_v19 = vand.u32 2147483647, %v3183_v20  ;;  %v3263_v52 = vsub.f32 %v10139_v56, %v10127_v63 }
 0x2c6   : > { %v3694_v29 = vmul.f32 %v3566_v2, %v3050_v11  ;;  %4007 = vmatpush.msra.mxu3 %v3779_v6  ;;  %v3518_v42 = vsub.f32 1.0, %v3390_v21  ;;  %v2923_v45 = vsub.f32 1.0, %v2795_v24  ;;  %v2662_v25 = vsub.f32 %v10067_v40, %v10123_v16 }
 0x2c7   : > { %v2875_v62 = vand.u32 2147483647, %v2747_v4  ;;  %v3439_v35 = vsub.f32 1.0, %v3311_v19  ;;  %v3391_v17 = vand.u32 2147483647, %v3263_v52  ;;  %v3178_v13 = vsub.f32 %v7619_v1, %v10124_v48 }
 0x2c8   : > { %3925 = vmatpush.msra.mxu0 %v3694_v29  ;;  %v2742_v30 = vsub.f32 %v10140_v26, %v10123_v16  ;;  %v3646_v55 = vmax.f32 %v3518_v42, 0.0  ;;  %v3051_v5 = vmax.f32 %v2923_v45, 0.0  ;;  %v2790_v11 = vand.u32 2147483647, %v2662_v25  ;;  %v10141_v29 = vld [vmem:[#allocation45_spill] sm:$0xff] }
 0x2c9   : > { %v3003_v53 = vsub.f32 1.0, %v2875_v62  ;;  %v3567_v2 = vmax.f32 %v3439_v35, 0.0  ;;  %v3519_v23 = vsub.f32 1.0, %v3391_v17  ;;  %v3306_v20 = vand.u32 2147483647, %v3178_v13 }
 0x2ca   : > { %v2870_v6 = vand.u32 2147483647, %v2742_v30  ;;  %v3774_v21 = vmul.f32 %v3646_v55, %v3130_v31  ;;  %v2918_v4 = vsub.f32 1.0, %v2790_v11  ;;  %v3258_v19 = vsub.f32 %v10141_v29, %v10124_v48 }
 0x2cb   : > { %v3131_v24 = vmax.f32 %v3003_v53, 0.0  ;;  %v3695_v52 = vmul.f32 %v3567_v2, %v3051_v5  ;;  %v3647_v56 = vmax.f32 %v3519_v23, 0.0  ;;  %v3434_v38 = vsub.f32 1.0, %v3306_v20  ;;  %v10142_v23 = vld [vmem:[#allocation68_spill] sm:$0xff] }
 0x2cc   : > { %v2998_v47 = vsub.f32 1.0, %v2870_v6  ;;  %3950 = vmatpush.msra.mxu1 %v3774_v21  ;;  %v3046_v61 = vmax.f32 %v2918_v4, 0.0  ;;  %v3386_v42 = vand.u32 2147483647, %v3258_v19  ;;  %v2663_v45 = vsub.f32 %v10067_v40, %v10126_v46  ;;  %v10143_v19 = vld [vmem:[#allocation50_spill] sm:$0xff] }
 0x2cd   : > { %v3179_v62 = vsub.f32 %v7619_v1, %v10127_v63  ;;  %3983 = vmatpush.msra.mxu2 %v3695_v52  ;;  %v3775_v31 = vmul.f32 %v3647_v56, %v3131_v24  ;;  %v3562_v25 = vmax.f32 %v3434_v38, 0.0  ;;  %v2743_v17 = vsub.f32 %v10140_v26, %v10126_v46 }
 0x2ce   : > { %v3126_v35 = vmax.f32 %v2998_v47, 0.0  ;;  %v3514_v13 = vsub.f32 1.0, %v3386_v42  ;;  %v2791_v30 = vand.u32 2147483647, %v2663_v45  ;;  %v3259_v5 = vsub.f32 %v10141_v29, %v10127_v63 }
 0x2cf   : > { %v3307_v55 = vand.u32 2147483647, %v3179_v62  ;;  %4008 = vmatpush.msra.mxu3 %v3775_v31  ;;  %v3690_v53 = vmul.f32 %v3562_v25, %v3046_v61  ;;  %v2871_v11 = vand.u32 2147483647, %v2743_v17  ;;  %v2658_v2 = vsub.f32 %v10106_v44, %v10123_v16 }
 0x2d0   : > { %v3174_v56 = vsub.f32 %v10142_v23, %v10124_v48  ;;  %v3642_v38 = vmax.f32 %v3514_v13, 0.0  ;;  %v2919_v47 = vsub.f32 1.0, %v2791_v30  ;;  %v3387_v6 = vand.u32 2147483647, %v3259_v5  ;;  %v8523_v30 = vld [vmem:[%s7827_s25 + $0x70] sm:$0xff] }
 0x2d1   : > { %v3435_v20 = vsub.f32 1.0, %v3307_v55  ;;  %3926 = vmatpush.msra.mxu0 %v3690_v53  ;;  %v2999_v21 = vsub.f32 1.0, %v2871_v11  ;;  %v2786_v24 = vand.u32 2147483647, %v2658_v2  ;;  %v2738_v52 = vsub.f32 %v10143_v19, %v10123_v16  ;;  %v10144_v53 = vld [vmem:[#allocation55_spill] sm:$0xff]  ;;  %3884 = vmatmul.f32.gmra.mxu2 %v8523_v30 }
 0x2d2   : > { %v3302_v4 = vand.u32 2147483647, %v3174_v56  ;;  %v3770_v61 = vmul.f32 %v3642_v38, %v3126_v35  ;;  %v3047_v42 = vmax.f32 %v2919_v47, 0.0  ;;  %v3515_v62 = vsub.f32 1.0, %v3387_v6  ;;  %3826 = vmatmul.f32.gmra.mxu0 %v8523_v30  ;;  %v8531_v35 = vld [vmem:[%s7827_s25 + $0x68] sm:$0xff] }
 0x2d3   : > { %v3563_v45 = vmax.f32 %v3435_v20, 0.0  ;;  %v3127_v31 = vmax.f32 %v2999_v21, 0.0  ;;  %v2914_v25 = vsub.f32 1.0, %v2786_v24  ;;  %v2866_v13 = vand.u32 2147483647, %v2738_v52  ;;  %3852 = vmatmul.f32.gmra.mxu1 %v8531_v35  ;;  %3910 = vmatmul.f32.gmra.mxu3 %v8531_v35 }
 0x2d4   : > { %v3430_v17 = vsub.f32 1.0, %v3302_v4  ;;  %3951 = vmatpush.msra.mxu1 %v3770_v61  ;;  %v3643_v5 = vmax.f32 %v3515_v62, 0.0  ;;  %v3254_v11 = vsub.f32 %v10144_v53, %v10124_v48  ;;  %v2659_v2 = vsub.f32 %v10106_v44, %v10126_v46 }
 0x2d5   : > { %v3691_v55 = vmul.f32 %v3563_v45, %v3047_v42  ;;  %v3042_v56 = vmax.f32 %v2914_v25, 0.0  ;;  %v2994_v47 = vsub.f32 1.0, %v2866_v13  ;;  %v3175_v20 = vsub.f32 %v10142_v23, %v10127_v63 }
 0x2d6   : > { %v3558_v38 = vmax.f32 %v3430_v17, 0.0  ;;  %v3771_v6 = vmul.f32 %v3643_v5, %v3127_v31  ;;  %v3382_v21 = vand.u32 2147483647, %v3254_v11  ;;  %v2787_v24 = vand.u32 2147483647, %v2659_v2  ;;  %v10145_v11 = vld [vmem:[#allocation56_spill] sm:$0xff] }
 0x2d7   : > { %3984 = vmatpush.msra.mxu2 %v3691_v55  ;;  %v2739_v4 = vsub.f32 %v10143_v19, %v10126_v46  ;;  %v3122_v61 = vmax.f32 %v2994_v47, 0.0  ;;  %v3303_v42 = vand.u32 2147483647, %v3175_v20  ;;  %v3255_v45 = vsub.f32 %v10144_v53, %v10127_v63 }
 0x2d8   : > { %v3686_v52 = vmul.f32 %v3558_v38, %v3042_v56  ;;  %4009 = vmatpush.msra.mxu3 %v3771_v6  ;;  %v3510_v62 = vsub.f32 1.0, %v3382_v21  ;;  %v2915_v25 = vsub.f32 1.0, %v2787_v24  ;;  %v2654_v31 = vsub.f32 %v7669_v59, %v10123_v16 }
 0x2d9   : > { %v2867_v17 = vand.u32 2147483647, %v2739_v4  ;;  %v3431_v13 = vsub.f32 1.0, %v3303_v42  ;;  %v3383_v55 = vand.u32 2147483647, %v3255_v45  ;;  %v3170_v5 = vsub.f32 %v10072_v36, %v10124_v48 }
 0x2da   : > { %3927 = vmatpush.msra.mxu0 %v3686_v52  ;;  %v2734_v2 = vsub.f32 %v10145_v11, %v10123_v16  ;;  %v3638_v56 = vmax.f32 %v3510_v62, 0.0  ;;  %v3043_v38 = vmax.f32 %v2915_v25, 0.0  ;;  %v2782_v20 = vand.u32 2147483647, %v2654_v31  ;;  %v10146_v52 = vld [vmem:[#allocation58_spill] sm:$0xff] }
 0x2db   : > { %v2995_v47 = vsub.f32 1.0, %v2867_v17  ;;  %v3559_v6 = vmax.f32 %v3431_v13, 0.0  ;;  %v3511_v21 = vsub.f32 1.0, %v3383_v55  ;;  %v3298_v24 = vand.u32 2147483647, %v3170_v5 }
 0x2dc   : > { %v2862_v4 = vand.u32 2147483647, %v2734_v2  ;;  %v3766_v53 = vmul.f32 %v3638_v56, %v3122_v61  ;;  %v2910_v23 = vsub.f32 1.0, %v2782_v20  ;;  %v3250_v42 = vsub.f32 %v10146_v52, %v10124_v48  ;;  %v10147_v20 = vld [vmem:[#allocation75_spill] sm:$0xff] }
 0x2dd   : > { %v3123_v19 = vmax.f32 %v2995_v47, 0.0  ;;  %v3687_v45 = vmul.f32 %v3559_v6, %v3043_v38  ;;  %v3639_v44 = vmax.f32 %v3511_v21, 0.0  ;;  %v3426_v29 = vsub.f32 1.0, %v3298_v24 }
 0x2de   : > { %v2990_v26 = vsub.f32 1.0, %v2862_v4  ;;  %3952 = vmatpush.msra.mxu1 %v3766_v53  ;;  %v3038_v1 = vmax.f32 %v2910_v23, 0.0  ;;  %v3378_v62 = vand.u32 2147483647, %v3250_v42  ;;  %v2655_v25 = vsub.f32 %v7669_v59, %v10126_v46  ;;  %v10148_v42 = vld [vmem:[#allocation59_spill] sm:$0xff] }
 0x2df   : > { %v3171_v17 = vsub.f32 %v10072_v36, %v10127_v63  ;;  %3985 = vmatpush.msra.mxu2 %v3687_v45  ;;  %v3767_v61 = vmul.f32 %v3639_v44, %v3123_v19  ;;  %v3554_v31 = vmax.f32 %v3426_v29, 0.0  ;;  %v2735_v55 = vsub.f32 %v10145_v11, %v10126_v46 }
 0x2e0   : > { %v3118_v13 = vmax.f32 %v2990_v26, 0.0  ;;  %v3506_v5 = vsub.f32 1.0, %v3378_v62  ;;  %v2783_v2 = vand.u32 2147483647, %v2655_v25  ;;  %v3251_v23 = vsub.f32 %v10146_v52, %v10127_v63 }
 0x2e1   : > { %v3299_v56 = vand.u32 2147483647, %v3171_v17  ;;  %4010 = vmatpush.msra.mxu3 %v3767_v61  ;;  %v3682_v53 = vmul.f32 %v3554_v31, %v3038_v1  ;;  %v2863_v38 = vand.u32 2147483647, %v2735_v55  ;;  %v2650_v47 = vsub.f32 %v10111_v15, %v10123_v16 }
 0x2e2   : > { %v3166_v44 = vsub.f32 %v10147_v20, %v10124_v48  ;;  %v3634_v29 = vmax.f32 %v3506_v5, 0.0  ;;  %v2911_v26 = vsub.f32 1.0, %v2783_v2  ;;  %v3379_v6 = vand.u32 2147483647, %v3251_v23 }
 0x2e3   : > { %v3427_v19 = vsub.f32 1.0, %v3299_v56  ;;  %3928 = vmatpush.msra.mxu0 %v3682_v53  ;;  %v2991_v21 = vsub.f32 1.0, %v2863_v38  ;;  %v2778_v24 = vand.u32 2147483647, %v2650_v47  ;;  %v2730_v45 = vsub.f32 %v10148_v42, %v10123_v16  ;;  %v10149_v56 = vld [vmem:[#allocation60_spill] sm:$0xff] }
 0x2e4   : > { %v3294_v4 = vand.u32 2147483647, %v3166_v44  ;;  %v3762_v62 = vmul.f32 %v3634_v29, %v3118_v13  ;;  %v3039_v1 = vmax.f32 %v2911_v26, 0.0  ;;  %v3507_v17 = vsub.f32 1.0, %v3379_v6 }
 0x2e5   : > { %v3555_v25 = vmax.f32 %v3427_v19, 0.0  ;;  %v3119_v61 = vmax.f32 %v2991_v21, 0.0  ;;  %v2906_v31 = vsub.f32 1.0, %v2778_v24  ;;  %v2858_v52 = vand.u32 2147483647, %v2730_v45 }
 0x2e6   : > { %v3422_v55 = vsub.f32 1.0, %v3294_v4  ;;  %3953 = vmatpush.msra.mxu1 %v3762_v62  ;;  %v3635_v2 = vmax.f32 %v3507_v17, 0.0  ;;  %v3246_v23 = vsub.f32 %v10149_v56, %v10124_v48  ;;  %v2651_v53 = vsub.f32 %v10111_v15, %v10126_v46 }
 0x2e7   : > { %v3683_v5 = vmul.f32 %v3555_v25, %v3039_v1  ;;  %v3034_v38 = vmax.f32 %v2906_v31, 0.0  ;;  %v2986_v44 = vsub.f32 1.0, %v2858_v52  ;;  %v3167_v13 = vsub.f32 %v10147_v20, %v10127_v63  ;;  %v10150_v31 = vld [vmem:[#allocation80_spill] sm:$0xff] }
 0x2e8   : > { %v3550_v47 = vmax.f32 %v3422_v55, 0.0  ;;  %v3763_v29 = vmul.f32 %v3635_v2, %v3119_v61  ;;  %v3374_v26 = vand.u32 2147483647, %v3246_v23  ;;  %v2779_v19 = vand.u32 2147483647, %v2651_v53 }
 0x2e9   : > { %3986 = vmatpush.msra.mxu2 %v3683_v5  ;;  %v2731_v6 = vsub.f32 %v10148_v42, %v10126_v46  ;;  %v3114_v24 = vmax.f32 %v2986_v44, 0.0  ;;  %v3295_v4 = vand.u32 2147483647, %v3167_v13  ;;  %v3247_v45 = vsub.f32 %v10149_v56, %v10127_v63  ;;  %v10151_v5 = vld [vmem:[#allocation64_spill] sm:$0xff] }
 0x2ea   : > { %v3678_v21 = vmul.f32 %v3550_v47, %v3034_v38  ;;  %4011 = vmatpush.msra.mxu3 %v3763_v29  ;;  %v3502_v62 = vsub.f32 1.0, %v3374_v26  ;;  %v2907_v1 = vsub.f32 1.0, %v2779_v19  ;;  %v2646_v25 = vsub.f32 %v7741_v34, %v10123_v16 }
 0x2eb   : > { %v2859_v52 = vand.u32 2147483647, %v2731_v6  ;;  %v3423_v17 = vsub.f32 1.0, %v3295_v4  ;;  %v3375_v61 = vand.u32 2147483647, %v3247_v45  ;;  %v3162_v55 = vsub.f32 %v10150_v31, %v10124_v48 }
 0x2ec   : > { %3929 = vmatpush.msra.mxu0 %v3678_v21  ;;  %v2726_v2 = vsub.f32 %v10151_v5, %v10123_v16  ;;  %v3630_v23 = vmax.f32 %v3502_v62, 0.0  ;;  %v3035_v53 = vmax.f32 %v2907_v1, 0.0  ;;  %v2774_v47 = vand.u32 2147483647, %v2646_v25  ;;  %v10152_v21 = vld [vmem:[#allocation65_spill] sm:$0xff] }
 0x2ed   : > { %v2987_v38 = vsub.f32 1.0, %v2859_v52  ;;  %v3551_v44 = vmax.f32 %v3423_v17, 0.0  ;;  %v3503_v13 = vsub.f32 1.0, %v3375_v61  ;;  %v3290_v29 = vand.u32 2147483647, %v3162_v55 }
 0x2ee   : > { %v2854_v26 = vand.u32 2147483647, %v2726_v2  ;;  %v3758_v19 = vmul.f32 %v3630_v23, %v3114_v24  ;;  %v2902_v56 = vsub.f32 1.0, %v2774_v47  ;;  %v3242_v4 = vsub.f32 %v10152_v21, %v10124_v48  ;;  %v10153_v47 = vld [vmem:[#allocation81_spill] sm:$0xff] }
 0x2ef   : > { %v3115_v6 = vmax.f32 %v2987_v38, 0.0  ;;  %v3679_v45 = vmul.f32 %v3551_v44, %v3035_v53  ;;  %v3631_v42 = vmax.f32 %v3503_v13, 0.0  ;;  %v3418_v20 = vsub.f32 1.0, %v3290_v29  ;;  %v10154_v13 = vld [vmem:[#allocation85_spill] sm:$0xff] }
 0x2f0   : > { %v2982_v15 = vsub.f32 1.0, %v2854_v26  ;;  %3954 = vmatpush.msra.mxu1 %v3758_v19  ;;  %v3030_v11 = vmax.f32 %v2902_v56, 0.0  ;;  %v3370_v62 = vand.u32 2147483647, %v3242_v4  ;;  %v2647_v1 = vsub.f32 %v7741_v34, %v10126_v46 }
 0x2f1   : > { %v3163_v52 = vsub.f32 %v10150_v31, %v10127_v63  ;;  %3987 = vmatpush.msra.mxu2 %v3679_v45  ;;  %v3759_v24 = vmul.f32 %v3631_v42, %v3115_v6  ;;  %v3546_v25 = vmax.f32 %v3418_v20, 0.0  ;;  %v2727_v61 = vsub.f32 %v10151_v5, %v10126_v46  ;;  %v10155_v45 = vld [vmem:[#allocation66_spill] sm:$0xff] }
 0x2f2   : > { %v3110_v17 = vmax.f32 %v2982_v15, 0.0  ;;  %v3498_v55 = vsub.f32 1.0, %v3370_v62  ;;  %v2775_v2 = vand.u32 2147483647, %v2647_v1  ;;  %v3243_v56 = vsub.f32 %v10152_v21, %v10127_v63 }
 0x2f3   : > { %v3291_v23 = vand.u32 2147483647, %v3163_v52  ;;  %4012 = vmatpush.msra.mxu3 %v3759_v24  ;;  %v3674_v53 = vmul.f32 %v3546_v25, %v3030_v11  ;;  %v2855_v38 = vand.u32 2147483647, %v2727_v61  ;;  %v2642_v44 = vsub.f32 %v10153_v47, %v10123_v16 }
 0x2f4   : > { %v3158_v42 = vsub.f32 %v10154_v13, %v10124_v48  ;;  %v3626_v20 = vmax.f32 %v3498_v55, 0.0  ;;  %v2903_v15 = vsub.f32 1.0, %v2775_v2  ;;  %v3371_v26 = vand.u32 2147483647, %v3243_v56 }
 0x2f5   : > { %v3419_v29 = vsub.f32 1.0, %v3291_v23  ;;  %3930 = vmatpush.msra.mxu0 %v3674_v53  ;;  %v2983_v19 = vsub.f32 1.0, %v2855_v38  ;;  %v2770_v6 = vand.u32 2147483647, %v2642_v44  ;;  %v2722_v62 = vsub.f32 %v10155_v45, %v10123_v16  ;;  %v10156_v23 = vld [vmem:[#allocation70_spill] sm:$0xff] }
 0x2f6   : > { %v3286_v4 = vand.u32 2147483647, %v3158_v42  ;;  %v3754_v1 = vmul.f32 %v3626_v20, %v3110_v17  ;;  %v3031_v11 = vmax.f32 %v2903_v15, 0.0  ;;  %v3499_v24 = vsub.f32 1.0, %v3371_v26 }
 0x2f7   : > { %v3547_v52 = vmax.f32 %v3419_v29, 0.0  ;;  %v3111_v25 = vmax.f32 %v2983_v19, 0.0  ;;  %v2898_v61 = vsub.f32 1.0, %v2770_v6  ;;  %v2850_v5 = vand.u32 2147483647, %v2722_v62 }
 0x2f8   : > { %v3414_v21 = vsub.f32 1.0, %v3286_v4  ;;  %3955 = vmatpush.msra.mxu1 %v3754_v1  ;;  %v3627_v2 = vmax.f32 %v3499_v24, 0.0  ;;  %v3238_v56 = vsub.f32 %v10156_v23, %v10124_v48  ;;  %v2643_v53 = vsub.f32 %v10153_v47, %v10126_v46  ;;  %v8609_v24 = vld [vmem:[%s7827_s25 + $0x78] sm:$0xff] }
 0x2f9   : > { %v3675_v55 = vmul.f32 %v3547_v52, %v3031_v11  ;;  %v3026_v38 = vmax.f32 %v2898_v61, 0.0  ;;  %v2978_v42 = vsub.f32 1.0, %v2850_v5  ;;  %v3159_v17 = vsub.f32 %v10154_v13, %v10127_v63  ;;  %v10157_v11 = vld [vmem:[#allocation86_spill] sm:$0xff]  ;;  %3855 = vmatmul.f32.gmra.mxu1 %v8609_v24  ;;  %3913 = vmatmul.f32.gmra.mxu3 %v8609_v24 }
 0x2fa   : > { %v3542_v44 = vmax.f32 %v3414_v21, 0.0  ;;  %v3755_v20 = vmul.f32 %v3627_v2, %v3111_v25  ;;  %v3366_v15 = vand.u32 2147483647, %v3238_v56  ;;  %v2771_v29 = vand.u32 2147483647, %v2643_v53  ;;  %v10159_v56 = vld [vmem:[#allocation71_spill] sm:$0xff] }
 0x2fb   : > { %3988 = vmatpush.msra.mxu2 %v3675_v55  ;;  %v2723_v26 = vsub.f32 %v10155_v45, %v10126_v46  ;;  %v3106_v6 = vmax.f32 %v2978_v42, 0.0  ;;  %v3287_v4 = vand.u32 2147483647, %v3159_v17  ;;  %v3239_v62 = vsub.f32 %v10156_v23, %v10127_v63  ;;  %v10158_v55 = vld [vmem:[#allocation87_spill] sm:$0xff]  ;;  %v10160_v23 = vld [vmem:[#allocation72_spill] sm:$0xff] }
 0x2fc   : > { %v3670_v19 = vmul.f32 %v3542_v44, %v3026_v38  ;;  %4013 = vmatpush.msra.mxu3 %v3755_v20  ;;  %v3494_v21 = vsub.f32 1.0, %v3366_v15  ;;  %v2899_v5 = vsub.f32 1.0, %v2771_v29  ;;  %v2638_v52 = vsub.f32 %v10157_v11, %v10123_v16 }
 0x2fd   : > { %v2851_v1 = vand.u32 2147483647, %v2723_v26  ;;  %v3415_v25 = vsub.f32 1.0, %v3287_v4  ;;  %v3367_v61 = vand.u32 2147483647, %v3239_v62  ;;  %v3154_v2 = vsub.f32 %v10158_v55, %v10124_v48 }
 0x2fe   : > { %3931 = vmatpush.msra.mxu0 %v3670_v19  ;;  %v2718_v53 = vsub.f32 %v10159_v56, %v10123_v16  ;;  %v3622_v38 = vmax.f32 %v3494_v21, 0.0  ;;  %v3027_v44 = vmax.f32 %v2899_v5, 0.0  ;;  %v2766_v17 = vand.u32 2147483647, %v2638_v52 }
 0x2ff   : > { %v2979_v42 = vsub.f32 1.0, %v2851_v1  ;;  %v3543_v20 = vmax.f32 %v3415_v25, 0.0  ;;  %v3495_v15 = vsub.f32 1.0, %v3367_v61  ;;  %v3282_v29 = vand.u32 2147483647, %v3154_v2 }
 0x300   : > { %v2846_v26 = vand.u32 2147483647, %v2718_v53  ;;  %v3750_v19 = vmul.f32 %v3622_v38, %v3106_v6  ;;  %v2894_v62 = vsub.f32 1.0, %v2766_v17  ;;  %v3234_v45 = vsub.f32 %v10160_v23, %v10124_v48 }
 0x301   : > { %v3107_v4 = vmax.f32 %v2979_v42, 0.0  ;;  %v3671_v13 = vmul.f32 %v3543_v20, %v3027_v44  ;;  %v3623_v47 = vmax.f32 %v3495_v15, 0.0  ;;  %v3410_v31 = vsub.f32 1.0, %v3282_v29  ;;  %v10161_v20 = vld [vmem:[#allocation29_spill] sm:$0xff] }
 0x302   : > { %v2974_v34 = vsub.f32 1.0, %v2846_v26  ;;  %3956 = vmatpush.msra.mxu1 %v3750_v19  ;;  %v3022_v21 = vmax.f32 %v2894_v62, 0.0  ;;  %v3362_v5 = vand.u32 2147483647, %v3234_v45  ;;  %v2639_v1 = vsub.f32 %v10157_v11, %v10126_v46 }
 0x303   : > { %v3155_v52 = vsub.f32 %v10158_v55, %v10127_v63  ;;  %3989 = vmatpush.msra.mxu2 %v3671_v13  ;;  %v3751_v6 = vmul.f32 %v3623_v47, %v3107_v4  ;;  %v3538_v25 = vmax.f32 %v3410_v31, 0.0  ;;  %v2719_v2 = vsub.f32 %v10159_v56, %v10126_v46  ;;  %v10162_v13 = vld [vmem:[#allocation30_spill] sm:$0xff]  ;;  %v10163_v47 = vld [vmem:[#allocation8_spill] sm:$0xff] }
 0x304   : > { %v3102_v61 = vmax.f32 %v2974_v34, 0.0  ;;  %v3490_v53 = vsub.f32 1.0, %v3362_v5  ;;  %v2767_v38 = vand.u32 2147483647, %v2639_v1  ;;  %v3235_v42 = vsub.f32 %v10160_v23, %v10127_v63  ;;  %v10164_v1 = vld [vmem:[#allocation38_spill] sm:$0xff]  ;;  %v6663_v23 = vld [vmem:[%s7827_s25 + $0x40] sm:$0xff] }
 0x305   : > { %v3283_v44 = vand.u32 2147483647, %v3155_v52  ;;  %4014 = vmatpush.msra.mxu3 %v3751_v6  ;;  %v3666_v45 = vmul.f32 %v3538_v25, %v3022_v21  ;;  %v2847_v17 = vand.u32 2147483647, %v2719_v2  ;;  %v4113_v15 = vsub.f32 %v7039_v60, %v10161_v20 }
 0x306   : > { %v4629_v31 = vsub.f32 %v10163_v47, %v10162_v13  ;;  %v3618_v34 = vmax.f32 %v3490_v53, 0.0  ;;  %v2895_v29 = vsub.f32 1.0, %v2767_v38  ;;  %v3363_v19 = vand.u32 2147483647, %v3235_v42  ;;  %v10165_v42 = vld [vmem:[#allocation39_spill] sm:$0xff] }
 0x307   : > { %v3411_v26 = vsub.f32 1.0, %v3283_v44  ;;  %3932 = vmatpush.msra.mxu0 %v3666_v45  ;;  %v2975_v4 = vsub.f32 1.0, %v2847_v17  ;;  %v4241_v62 = vand.u32 2147483647, %v4113_v15  ;;  %v4114_v52 = vsub.f32 %v7039_v60, %v10164_v1  ;;  %v10166_v17 = vld [vmem:[#allocation76_spill] sm:$0xff] }
 0x308   : > { %v4757_v5 = vand.u32 2147483647, %v4629_v31  ;;  %v3746_v21 = vmul.f32 %v3618_v34, %v3102_v61  ;;  %v3023_v6 = vmax.f32 %v2895_v29, 0.0  ;;  %v3491_v2 = vsub.f32 1.0, %v3363_v19  ;;  %3933 = vmatmul.f32.vlgmr.msra.gmra.mxu0 %v6663_v23  ;;  %v10167_v29 = vld [vmem:[#allocation77_spill] sm:$0xff] }
 0x309   : > { %v3539_v25 = vmax.f32 %v3411_v26, 0.0  ;;  %v3103_v56 = vmax.f32 %v2975_v4, 0.0  ;;  %v4369_v55 = vsub.f32 1.0, %v4241_v62  ;;  %v4242_v53 = vand.u32 2147483647, %v4114_v52 }
 0x30a   : > { %v4885_v11 = vsub.f32 1.0, %v4757_v5  ;;  %3957 = vmatpush.msra.mxu1 %v3746_v21  ;;  %v3619_v44 = vmax.f32 %v3491_v2, 0.0  ;;  %v4630_v45 = vsub.f32 %v10163_v47, %v10165_v42  ;;  %v2714_v15 = vsub.f32 %v10166_v17, %v10123_v16 }
 0x30b   : > { %v3667_v38 = vmul.f32 %v3539_v25, %v3023_v6  ;;  %v4497_v31 = vmax.f32 %v4369_v55, 0.0  ;;  %v4370_v34 = vsub.f32 1.0, %v4242_v53  ;;  %v3230_v26 = vsub.f32 %v10167_v29, %v10124_v48  ;;  %v10168_v53 = vld [vmem:[#allocation7_spill] sm:$0xff] }
 0x30c   : > { %v5013_v61 = vmax.f32 %v4885_v11, 0.0  ;;  %v3747_v19 = vmul.f32 %v3619_v44, %v3103_v56  ;;  %v4758_v4 = vand.u32 2147483647, %v4630_v45  ;;  %v2842_v62 = vand.u32 2147483647, %v2714_v15 }
 0x30d   : > { %3990 = vmatpush.msra.mxu2 %v3667_v38  ;;  %v2715_v5 = vsub.f32 %v10166_v17, %v10126_v46  ;;  %v4498_v21 = vmax.f32 %v4370_v34, 0.0  ;;  %v3358_v6 = vand.u32 2147483647, %v3230_v26  ;;  %v3231_v25 = vsub.f32 %v10167_v29, %v10127_v63  ;;  %v6664_v26 = vld [vmem:[%s7827_s25 + $0x50] sm:$0xff] }
 0x30e   : > { %v5141_v52 = vmul.f32 %v5013_v61, %v4497_v31  ;;  %3991 = vmatmul.f32.vlgmr.msra.gmra.mxu2 %v6663_v23  ;;  %4015 = vmatpush.msra.mxu3 %v3747_v19  ;;  %v4886_v11 = vsub.f32 1.0, %v4758_v4  ;;  %v2970_v55 = vsub.f32 1.0, %v2842_v62  ;;  %v4109_v56 = vsub.f32 %v10168_v53, %v10161_v20 }
 0x30f   : > { %v2843_v2 = vand.u32 2147483647, %v2715_v5  ;;  %v3486_v38 = vsub.f32 1.0, %v3358_v6  ;;  %v3359_v44 = vand.u32 2147483647, %v3231_v25  ;;  %v4625_v45 = vsub.f32 %v7107_v27, %v10162_v13 }
 0x310   : > { %5218 = vmatpush.msrb.mxu0 %v5141_v52  ;;  %v4110_v15 = vsub.f32 %v10168_v53, %v10164_v1  ;;  %v5014_v31 = vmax.f32 %v4886_v11, 0.0  ;;  %v3098_v61 = vmax.f32 %v2970_v55, 0.0  ;;  %v4237_v23 = vand.u32 2147483647, %v4109_v56  ;;  %v10169_v56 = vld [vmem:[#allocation82_spill] sm:$0xff] }
 0x311   : > { %v2971_v34 = vsub.f32 1.0, %v2843_v2  ;;  %3936 = vmatmul.f32.gmra.mxu0 %v6664_v26  ;;  %v3614_v19 = vmax.f32 %v3486_v38, 0.0  ;;  %v3487_v4 = vsub.f32 1.0, %v3359_v44  ;;  %v4753_v62 = vand.u32 2147483647, %v4625_v45 }
 0x312   : > { %v4238_v5 = vand.u32 2147483647, %v4110_v15  ;;  %v5142_v29 = vmul.f32 %v5014_v31, %v4498_v21  ;;  %v4365_v6 = vsub.f32 1.0, %v4237_v23  ;;  %v4626_v25 = vsub.f32 %v7107_v27, %v10165_v42 }
 0x313   : > { %v3099_v52 = vmax.f32 %v2971_v34, 0.0  ;;  %v3742_v17 = vmul.f32 %v3614_v19, %v3098_v61  ;;  %v3615_v47 = vmax.f32 %v3487_v4, 0.0  ;;  %v4881_v60 = vsub.f32 1.0, %v4753_v62 }
 0x314   : > { %v4366_v53 = vsub.f32 1.0, %v4238_v5  ;;  %5276 = vmatpush.msrb.mxu2 %v5142_v29  ;;  %v4493_v11 = vmax.f32 %v4365_v6, 0.0  ;;  %v4754_v55 = vand.u32 2147483647, %v4626_v25  ;;  %v2710_v2 = vsub.f32 %v10091_v41, %v10123_v16 }
 0x315   : > { %v3226_v38 = vsub.f32 %v10169_v56, %v10124_v48  ;;  %3958 = vmatpush.msra.mxu1 %v3742_v17  ;;  %v3743_v21 = vmul.f32 %v3615_v47, %v3099_v52  ;;  %v5009_v44 = vmax.f32 %v4881_v60, 0.0  ;;  %v2711_v15 = vsub.f32 %v10091_v41, %v10126_v46 }
 0x316   : > { %v4494_v45 = vmax.f32 %v4366_v53, 0.0  ;;  %3994 = vmatmul.f32.gmra.mxu2 %v6664_v26  ;;  %v4882_v31 = vsub.f32 1.0, %v4754_v55  ;;  %v2838_v61 = vand.u32 2147483647, %v2710_v2  ;;  %v3227_v29 = vsub.f32 %v10169_v56, %v10127_v63 }
 0x317   : > { %v3354_v34 = vand.u32 2147483647, %v3226_v38  ;;  %4016 = vmatpush.msra.mxu3 %v3743_v21  ;;  %v5137_v23 = vmul.f32 %v5009_v44, %v4493_v11  ;;  %v2839_v19 = vand.u32 2147483647, %v2711_v15  ;;  %v4105_v4 = vsub.f32 %v10132_v37, %v10161_v20 }
 0x318   : > { %v4621_v60 = vsub.f32 %v7204_v28, %v10162_v13  ;;  %v5010_v47 = vmax.f32 %v4882_v31, 0.0  ;;  %v2966_v17 = vsub.f32 1.0, %v2838_v61  ;;  %v3355_v62 = vand.u32 2147483647, %v3227_v29 }
 0x319   : > { %v3482_v53 = vsub.f32 1.0, %v3354_v34  ;;  %3939 = vmatmul.f32.gmra.mxu0 %v8453_v49  ;;  %v2967_v26 = vsub.f32 1.0, %v2839_v19  ;;  %v4233_v5 = vand.u32 2147483647, %v4105_v4  ;;  %v4106_v6 = vsub.f32 %v10132_v37, %v10164_v1 }
 0x31a   : > { %5219 = vmatpush.msrb.mxu0 %v5137_v23  ;;  %v4749_v52 = vand.u32 2147483647, %v4621_v60  ;;  %v5138_v25 = vmul.f32 %v5010_v47, %v4494_v45  ;;  %v3094_v11 = vmax.f32 %v2966_v17, 0.0  ;;  %v3483_v2 = vsub.f32 1.0, %v3355_v62  ;;  %v10170_v45 = vld [vmem:[#allocation84_spill] sm:$0xff] }
 0x31b   : > { %v3610_v55 = vmax.f32 %v3482_v53, 0.0  ;;  %v3095_v38 = vmax.f32 %v2967_v26, 0.0  ;;  %v4361_v21 = vsub.f32 1.0, %v4233_v5  ;;  %v4234_v15 = vand.u32 2147483647, %v4106_v6 }
 0x31c   : > { %v4877_v44 = vsub.f32 1.0, %v4749_v52  ;;  %5277 = vmatpush.msrb.mxu2 %v5138_v25  ;;  %v3611_v61 = vmax.f32 %v3483_v2, 0.0  ;;  %v4622_v34 = vsub.f32 %v7204_v28, %v10165_v42  ;;  %v2706_v29 = vsub.f32 %v10093_v14, %v10123_v16  ;;  %v10171_v2 = vld [vmem:[#allocation21_spill] sm:$0xff] }
 0x31d   : > { %v3738_v31 = vmul.f32 %v3610_v55, %v3094_v11  ;;  %v4489_v23 = vmax.f32 %v4361_v21, 0.0  ;;  %v4362_v4 = vsub.f32 1.0, %v4234_v15  ;;  %v3222_v60 = vsub.f32 %v10170_v45, %v10124_v48 }
 0x31e   : > { %v5005_v19 = vmax.f32 %v4877_v44, 0.0  ;;  %3997 = vmatmul.f32.gmra.mxu2 %v8453_v49  ;;  %v3739_v47 = vmul.f32 %v3611_v61, %v3095_v38  ;;  %v4750_v17 = vand.u32 2147483647, %v4622_v34  ;;  %v2834_v53 = vand.u32 2147483647, %v2706_v29 }
 0x31f   : > { %3959 = vmatpush.msra.mxu1 %v3738_v31  ;;  %v2707_v62 = vsub.f32 %v10093_v14, %v10126_v46  ;;  %v4490_v5 = vmax.f32 %v4362_v4, 0.0  ;;  %v3350_v52 = vand.u32 2147483647, %v3222_v60  ;;  %v3223_v6 = vsub.f32 %v10170_v45, %v10127_v63 }
 0x320   : > { %v5133_v26 = vmul.f32 %v5005_v19, %v4489_v23  ;;  %4017 = vmatpush.msra.mxu3 %v3739_v47  ;;  %v4878_v25 = vsub.f32 1.0, %v4750_v17  ;;  %v2962_v11 = vsub.f32 1.0, %v2834_v53  ;;  %v4101_v49 = vsub.f32 %v10171_v2, %v10161_v20 }
 0x321   : > { %v2835_v55 = vand.u32 2147483647, %v2707_v62  ;;  %3942 = vmatmul.f32.gmra.mxu0 %v8523_v30  ;;  %v3478_v38 = vsub.f32 1.0, %v3350_v52  ;;  %v3351_v21 = vand.u32 2147483647, %v3223_v6  ;;  %v4617_v44 = vsub.f32 %v7287_v7, %v10162_v13 }
 0x322   : > { %5220 = vmatpush.msrb.mxu0 %v5133_v26  ;;  %v4102_v15 = vsub.f32 %v10171_v2, %v10164_v1  ;;  %v5006_v31 = vmax.f32 %v4878_v25, 0.0  ;;  %v3090_v61 = vmax.f32 %v2962_v11, 0.0  ;;  %v4229_v29 = vand.u32 2147483647, %v4101_v49 }
 0x323   : > { %v2963_v34 = vsub.f32 1.0, %v2835_v55  ;;  %v3606_v23 = vmax.f32 %v3478_v38, 0.0  ;;  %v3479_v19 = vsub.f32 1.0, %v3351_v21  ;;  %v4745_v4 = vand.u32 2147483647, %v4617_v44 }
 0x324   : > { %v4230_v60 = vand.u32 2147483647, %v4102_v15  ;;  %v5134_v47 = vmul.f32 %v5006_v31, %v4490_v5  ;;  %v4357_v53 = vsub.f32 1.0, %v4229_v29  ;;  %v4618_v62 = vsub.f32 %v7287_v7, %v10165_v42 }
 0x325   : > { %v3091_v17 = vmax.f32 %v2963_v34, 0.0  ;;  %v3734_v26 = vmul.f32 %v3606_v23, %v3090_v61  ;;  %v3607_v52 = vmax.f32 %v3479_v19, 0.0  ;;  %v4873_v6 = vsub.f32 1.0, %v4745_v4 }
 0x326   : > { %v4358_v45 = vsub.f32 1.0, %v4230_v60  ;;  %4000 = vmatmul.f32.gmra.mxu2 %v8523_v30  ;;  %v4485_v25 = vmax.f32 %v4357_v53, 0.0  ;;  %v4746_v11 = vand.u32 2147483647, %v4618_v62  ;;  %v2702_v55 = vsub.f32 %v7861_v3, %v10123_v16 }
 0x327   : > { %5278 = vmatpush.msrb.mxu2 %v5134_v47  ;;  %v3218_v5 = vsub.f32 %v7863_v0, %v10124_v48  ;;  %3960 = vmatpush.msra.mxu1 %v3734_v26  ;;  %v3735_v49 = vmul.f32 %v3607_v52, %v3091_v17  ;;  %v5001_v38 = vmax.f32 %v4873_v6, 0.0  ;;  %v2703_v44 = vsub.f32 %v7861_v3, %v10126_v46 }
 0x328   : > { %v4486_v21 = vmax.f32 %v4358_v45, 0.0  ;;  %v4874_v15 = vsub.f32 1.0, %v4746_v11  ;;  %v2830_v31 = vand.u32 2147483647, %v2702_v55  ;;  %v3219_v30 = vsub.f32 %v7863_v0, %v10127_v63 }
 0x329   : > { %v3346_v61 = vand.u32 2147483647, %v3218_v5  ;;  %4018 = vmatpush.msra.mxu3 %v3735_v49  ;;  %v5129_v34 = vmul.f32 %v5001_v38, %v4485_v25  ;;  %v2831_v29 = vand.u32 2147483647, %v2703_v44  ;;  %v4097_v16 = vsub.f32 %v7359_v22, %v10161_v20 }
 0x32a   : > { %v4613_v48 = vsub.f32 %v7419_v51, %v10162_v13  ;;  %v5002_v23 = vmax.f32 %v4874_v15, 0.0  ;;  %v2958_v45 = vsub.f32 1.0, %v2830_v31  ;;  %v3347_v4 = vand.u32 2147483647, %v3219_v30 }
 0x32b   : > { %v3474_v19 = vsub.f32 1.0, %v3346_v61  ;;  %5221 = vmatpush.msrb.mxu0 %v5129_v34  ;;  %v2959_v46 = vsub.f32 1.0, %v2831_v29  ;;  %v4225_v60 = vand.u32 2147483647, %v4097_v16  ;;  %v4177_v63 = vsub.f32 %v7063_v8, %v10161_v20 }
 0x32c   : > { %v4741_v47 = vand.u32 2147483647, %v4613_v48  ;;  %v5130_v17 = vmul.f32 %v5002_v23, %v4486_v21  ;;  %v3086_v53 = vmax.f32 %v2958_v45, 0.0  ;;  %v3475_v26 = vsub.f32 1.0, %v3347_v4 }
 0x32d   : > { %v3602_v62 = vmax.f32 %v3474_v19, 0.0  ;;  %v3087_v52 = vmax.f32 %v2959_v46, 0.0  ;;  %v4353_v6 = vsub.f32 1.0, %v4225_v60  ;;  %v4305_v11 = vand.u32 2147483647, %v4177_v63  ;;  %v6665_v19 = vld [vmem:[%s7827_s25 + $0x48] sm:$0xff] }
 0x32e   : > { %v4869_v25 = vsub.f32 1.0, %v4741_v47  ;;  %5279 = vmatpush.msrb.mxu2 %v5130_v17  ;;  %v3603_v5 = vmax.f32 %v3475_v26, 0.0  ;;  %v4693_v49 = vsub.f32 %v7068_v10, %v10162_v13  ;;  %v4098_v38 = vsub.f32 %v7359_v22, %v10164_v1 }
 0x32f   : > { %v3730_v55 = vmul.f32 %v3602_v62, %v3086_v53  ;;  %v4481_v44 = vmax.f32 %v4353_v6, 0.0  ;;  %v4433_v21 = vsub.f32 1.0, %v4305_v11  ;;  %v4614_v31 = vsub.f32 %v7419_v51, %v10165_v42 }
 0x330   : > { %v4997_v15 = vmax.f32 %v4869_v25, 0.0  ;;  %v3731_v61 = vmul.f32 %v3603_v5, %v3087_v52  ;;  %v4821_v30 = vand.u32 2147483647, %v4693_v49  ;;  %v4226_v34 = vand.u32 2147483647, %v4098_v38 }
 0x331   : > { %3961 = vmatpush.msra.mxu1 %v3730_v55  ;;  %v4178_v29 = vsub.f32 %v7063_v8, %v10164_v1  ;;  %v4561_v48 = vmax.f32 %v4433_v21, 0.0  ;;  %v4742_v23 = vand.u32 2147483647, %v4614_v31  ;;  %v4694_v45 = vsub.f32 %v7068_v10, %v10165_v42 }
 0x332   : > { %v5125_v16 = vmul.f32 %v4997_v15, %v4481_v44  ;;  %3962 = vmatmul.f32.vlgmr.msra.gmra.mxu1 %v6665_v19  ;;  %4019 = vmatpush.msra.mxu3 %v3731_v61  ;;  %v4949_v4 = vsub.f32 1.0, %v4821_v30  ;;  %v4354_v46 = vsub.f32 1.0, %v4226_v34  ;;  %v4093_v47 = vsub.f32 %v7421_v32, %v10161_v20 }
 0x333   : > { %v4306_v60 = vand.u32 2147483647, %v4178_v29  ;;  %v4870_v63 = vsub.f32 1.0, %v4742_v23  ;;  %v4822_v17 = vand.u32 2147483647, %v4694_v45  ;;  %v4609_v53 = vsub.f32 %v7481_v43, %v10162_v13  ;;  %4020 = vmatmul.f32.vlgmr.msra.gmra.mxu3 %v6665_v19 }
 0x334   : > { %5222 = vmatpush.msrb.mxu0 %v5125_v16  ;;  %v4173_v62 = vsub.f32 %v7066_v9, %v10161_v20  ;;  %v5077_v26 = vmax.f32 %v4949_v4, 0.0  ;;  %v4482_v52 = vmax.f32 %v4354_v46, 0.0  ;;  %v4221_v25 = vand.u32 2147483647, %v4093_v47 }
 0x335   : > { %v4434_v6 = vsub.f32 1.0, %v4306_v60  ;;  %v4998_v11 = vmax.f32 %v4870_v63, 0.0  ;;  %v4950_v55 = vsub.f32 1.0, %v4822_v17  ;;  %v4737_v5 = vand.u32 2147483647, %v4609_v53  ;;  %v6666_v60 = vld [vmem:[%s7827_s25 + $0x58] sm:$0xff] }
 0x336   : > { %v4301_v49 = vand.u32 2147483647, %v4173_v62  ;;  %v5205_v38 = vmul.f32 %v5077_v26, %v4561_v48  ;;  %v4349_v15 = vsub.f32 1.0, %v4221_v25  ;;  %v4689_v21 = vsub.f32 %v10095_v50, %v10162_v13 }
 0x337   : > { %v4562_v44 = vmax.f32 %v4434_v6, 0.0  ;;  %v5126_v31 = vmul.f32 %v4998_v11, %v4482_v52  ;;  %v5078_v61 = vmax.f32 %v4950_v55, 0.0  ;;  %v4865_v30 = vsub.f32 1.0, %v4737_v5 }
 0x338   : > { %v4429_v34 = vsub.f32 1.0, %v4301_v49  ;;  %5247 = vmatpush.msrb.mxu1 %v5205_v38  ;;  %v4477_v29 = vmax.f32 %v4349_v15, 0.0  ;;  %v4817_v16 = vand.u32 2147483647, %v4689_v21  ;;  %v4094_v23 = vsub.f32 %v7421_v32, %v10164_v1 }
 0x339   : > { %v4610_v45 = vsub.f32 %v7481_v43, %v10165_v42  ;;  %5280 = vmatpush.msrb.mxu2 %v5126_v31  ;;  %v5206_v48 = vmul.f32 %v5078_v61, %v4562_v44  ;;  %v4993_v19 = vmax.f32 %v4865_v30, 0.0  ;;  %v4174_v46 = vsub.f32 %v7066_v9, %v10164_v1 }
 0x33a   : > { %v4557_v4 = vmax.f32 %v4429_v34, 0.0  ;;  %3965 = vmatmul.f32.gmra.mxu1 %v6666_v60  ;;  %v4945_v47 = vsub.f32 1.0, %v4817_v16  ;;  %v4222_v63 = vand.u32 2147483647, %v4094_v23  ;;  %v4690_v53 = vsub.f32 %v10095_v50, %v10165_v42 }
 0x33b   : > { %v4738_v17 = vand.u32 2147483647, %v4610_v45  ;;  %5305 = vmatpush.msrb.mxu3 %v5206_v48  ;;  %v5121_v62 = vmul.f32 %v4993_v19, %v4477_v29  ;;  %v4302_v26 = vand.u32 2147483647, %v4174_v46  ;;  %v4089_v52 = vsub.f32 %v10059_v57, %v10161_v20 }
 0x33c   : > { %v4605_v6 = vsub.f32 %v10096_v18, %v10162_v13  ;;  %v5073_v25 = vmax.f32 %v4945_v47, 0.0  ;;  %v4350_v11 = vsub.f32 1.0, %v4222_v63  ;;  %v4818_v5 = vand.u32 2147483647, %v4690_v53  ;;  %4023 = vmatmul.f32.gmra.mxu3 %v6666_v60 }
 0x33d   : > { %v4866_v55 = vsub.f32 1.0, %v4738_v17  ;;  %5223 = vmatpush.msrb.mxu0 %v5121_v62  ;;  %v4430_v49 = vsub.f32 1.0, %v4302_v26  ;;  %v4217_v38 = vand.u32 2147483647, %v4089_v52  ;;  %v4169_v15 = vsub.f32 %v10097_v58, %v10161_v20 }
 0x33e   : > { %v4733_v44 = vand.u32 2147483647, %v4605_v6  ;;  %v5201_v21 = vmul.f32 %v5073_v25, %v4557_v4  ;;  %v4478_v31 = vmax.f32 %v4350_v11, 0.0  ;;  %v4946_v30 = vsub.f32 1.0, %v4818_v5 }
 0x33f   : > { %v4994_v61 = vmax.f32 %v4866_v55, 0.0  ;;  %v4558_v34 = vmax.f32 %v4430_v49, 0.0  ;;  %v4345_v29 = vsub.f32 1.0, %v4217_v38  ;;  %v4297_v23 = vand.u32 2147483647, %v4169_v15 }
 0x340   : > { %v4861_v16 = vsub.f32 1.0, %v4733_v44  ;;  %5248 = vmatpush.msrb.mxu1 %v5201_v21  ;;  %v5074_v48 = vmax.f32 %v4946_v30, 0.0  ;;  %v4685_v19 = vsub.f32 %v10134_v39, %v10162_v13  ;;  %v4090_v46 = vsub.f32 %v10059_v57, %v10164_v1 }
 0x341   : > { %v5122_v45 = vmul.f32 %v4994_v61, %v4478_v31  ;;  %v4473_v60 = vmax.f32 %v4345_v29, 0.0  ;;  %v4425_v63 = vsub.f32 1.0, %v4297_v23  ;;  %v4606_v4 = vsub.f32 %v10096_v18, %v10165_v42  ;;  %v6667_v31 = vld [vmem:[%s7827_s25 + $0x68] sm:$0xff] }
 0x342   : > { %v4989_v47 = vmax.f32 %v4861_v16, 0.0  ;;  %3968 = vmatmul.f32.gmra.mxu1 %v8531_v35  ;;  %v5202_v17 = vmul.f32 %v5074_v48, %v4558_v34  ;;  %v4813_v53 = vand.u32 2147483647, %v4685_v19  ;;  %v4218_v62 = vand.u32 2147483647, %v4090_v46 }
 0x343   : > { %5281 = vmatpush.msrb.mxu2 %v5122_v45  ;;  %v4170_v26 = vsub.f32 %v10097_v58, %v10164_v1  ;;  %v4553_v6 = vmax.f32 %v4425_v63, 0.0  ;;  %v4734_v25 = vand.u32 2147483647, %v4606_v4  ;;  %v4686_v11 = vsub.f32 %v10134_v39, %v10165_v42 }
 0x344   : > { %v5117_v52 = vmul.f32 %v4989_v47, %v4473_v60  ;;  %5306 = vmatpush.msrb.mxu3 %v5202_v17  ;;  %v4941_v55 = vsub.f32 1.0, %v4813_v53  ;;  %v4346_v5 = vsub.f32 1.0, %v4218_v62  ;;  %v4085_v35 = vsub.f32 %v7547_v12, %v10161_v20  ;;  %v10172_v47 = vld [vmem:[#allocation25_spill] sm:$0xff] }
 0x345   : > { %v4298_v49 = vand.u32 2147483647, %v4170_v26  ;;  %v4862_v38 = vsub.f32 1.0, %v4734_v25  ;;  %v4814_v44 = vand.u32 2147483647, %v4686_v11  ;;  %v4601_v15 = vsub.f32 %v7567_v54, %v10162_v13  ;;  %4026 = vmatmul.f32.gmra.mxu3 %v6667_v31 }
 0x346   : > { %5224 = vmatpush.msrb.mxu0 %v5117_v52  ;;  %v4165_v21 = vsub.f32 %v10063_v33, %v10161_v20  ;;  %v5069_v61 = vmax.f32 %v4941_v55, 0.0  ;;  %v4474_v30 = vmax.f32 %v4346_v5, 0.0  ;;  %v4213_v29 = vand.u32 2147483647, %v4085_v35 }
 0x347   : > { %v4426_v34 = vsub.f32 1.0, %v4298_v49  ;;  %v4990_v16 = vmax.f32 %v4862_v38, 0.0  ;;  %v4942_v23 = vsub.f32 1.0, %v4814_v44  ;;  %v4729_v45 = vand.u32 2147483647, %v4601_v15 }
 0x348   : > { %v4293_v48 = vand.u32 2147483647, %v4165_v21  ;;  %v5197_v19 = vmul.f32 %v5069_v61, %v4553_v6  ;;  %v4341_v60 = vsub.f32 1.0, %v4213_v29  ;;  %v4681_v63 = vsub.f32 %v10172_v47, %v10162_v13  ;;  %v10173_v61 = vld [vmem:[#allocation57_spill] sm:$0xff] }
 0x349   : > { %v4554_v46 = vmax.f32 %v4426_v34, 0.0  ;;  %v5118_v4 = vmul.f32 %v4990_v16, %v4474_v30  ;;  %v5070_v17 = vmax.f32 %v4942_v23, 0.0  ;;  %v4857_v53 = vsub.f32 1.0, %v4729_v45  ;;  %v10174_v34 = vld [vmem:[#allocation61_spill] sm:$0xff] }
 0x34a   : > { %v4421_v62 = vsub.f32 1.0, %v4293_v48  ;;  %3971 = vmatmul.f32.gmra.mxu1 %v8609_v24  ;;  %v4469_v26 = vmax.f32 %v4341_v60, 0.0  ;;  %v4809_v52 = vand.u32 2147483647, %v4681_v63  ;;  %v4086_v25 = vsub.f32 %v7547_v12, %v10164_v1  ;;  %v10175_v63 = vld [vmem:[#allocation26_spill] sm:$0xff] }
 0x34b   : > { %5249 = vmatpush.msrb.mxu1 %v5197_v19  ;;  %v4602_v6 = vsub.f32 %v7567_v54, %v10165_v42  ;;  %5282 = vmatpush.msrb.mxu2 %v5118_v4  ;;  %v5198_v11 = vmul.f32 %v5070_v17, %v4554_v46  ;;  %v4985_v55 = vmax.f32 %v4857_v53, 0.0  ;;  %v4166_v49 = vsub.f32 %v10063_v33, %v10164_v1 }
 0x34c   : > { %v4549_v5 = vmax.f32 %v4421_v62, 0.0  ;;  %v4937_v35 = vsub.f32 1.0, %v4809_v52  ;;  %v4214_v38 = vand.u32 2147483647, %v4086_v25  ;;  %v4682_v15 = vsub.f32 %v10172_v47, %v10165_v42 }
 0x34d   : > { %v4730_v44 = vand.u32 2147483647, %v4602_v6  ;;  %5307 = vmatpush.msrb.mxu3 %v5198_v11  ;;  %v5113_v21 = vmul.f32 %v4985_v55, %v4469_v26  ;;  %v4294_v31 = vand.u32 2147483647, %v4166_v49  ;;  %v4081_v30 = vsub.f32 %v10173_v61, %v10161_v20 }
 0x34e   : > { %v4597_v29 = vsub.f32 %v10174_v34, %v10162_v13  ;;  %v5065_v16 = vmax.f32 %v4937_v35, 0.0  ;;  %v4342_v23 = vsub.f32 1.0, %v4214_v38  ;;  %v4810_v48 = vand.u32 2147483647, %v4682_v15  ;;  %4029 = vmatmul.f32.gmra.mxu3 %v8609_v24  ;;  %v10176_v24 = vld [vmem:[#allocation33_spill] sm:$0xff] }
 0x34f   : > { %v4858_v45 = vsub.f32 1.0, %v4730_v44  ;;  %5225 = vmatpush.msrb.mxu0 %v5113_v21  ;;  %v4422_v19 = vsub.f32 1.0, %v4294_v31  ;;  %v4209_v46 = vand.u32 2147483647, %v4081_v30  ;;  %v4161_v4 = vsub.f32 %v10175_v63, %v10161_v20 }
 0x350   : > { %v4725_v60 = vand.u32 2147483647, %v4597_v29  ;;  %v5193_v17 = vmul.f32 %v5065_v16, %v4549_v5  ;;  %v4470_v53 = vmax.f32 %v4342_v23, 0.0  ;;  %v4938_v26 = vsub.f32 1.0, %v4810_v48 }
 0x351   : > { %v4986_v62 = vmax.f32 %v4858_v45, 0.0  ;;  %v4550_v52 = vmax.f32 %v4422_v19, 0.0  ;;  %v4337_v25 = vsub.f32 1.0, %v4209_v46  ;;  %v4289_v11 = vand.u32 2147483647, %v4161_v4 }
 0x352   : > { %v4853_v6 = vsub.f32 1.0, %v4725_v60  ;;  %5250 = vmatpush.msrb.mxu1 %v5193_v17  ;;  %v5066_v49 = vmax.f32 %v4938_v26, 0.0  ;;  %v4677_v35 = vsub.f32 %v10176_v24, %v10162_v13  ;;  %v4082_v38 = vsub.f32 %v10173_v61, %v10164_v1  ;;  %v10177_v26 = vld [vmem:[#allocation63_spill] sm:$0xff] }
 0x353   : > { %v5114_v55 = vmul.f32 %v4986_v62, %v4470_v53  ;;  %v4465_v44 = vmax.f32 %v4337_v25, 0.0  ;;  %v4417_v21 = vsub.f32 1.0, %v4289_v11  ;;  %v4598_v5 = vsub.f32 %v10174_v34, %v10165_v42  ;;  %v10178_v25 = vld [vmem:[#allocation44_spill] sm:$0xff] }
 0x354   : > { %v4981_v15 = vmax.f32 %v4853_v6, 0.0  ;;  %v5194_v31 = vmul.f32 %v5066_v49, %v4550_v52  ;;  %v4805_v30 = vand.u32 2147483647, %v4677_v35  ;;  %v4210_v29 = vand.u32 2147483647, %v4082_v38 }
 0x355   : > { %5283 = vmatpush.msrb.mxu2 %v5114_v55  ;;  %v4162_v16 = vsub.f32 %v10175_v63, %v10164_v1  ;;  %v4545_v45 = vmax.f32 %v4417_v21, 0.0  ;;  %v4726_v48 = vand.u32 2147483647, %v4598_v5  ;;  %v4678_v19 = vsub.f32 %v10176_v24, %v10165_v42 }
 0x356   : > { %v5109_v23 = vmul.f32 %v4981_v15, %v4465_v44  ;;  %5308 = vmatpush.msrb.mxu3 %v5194_v31  ;;  %v4933_v46 = vsub.f32 1.0, %v4805_v30  ;;  %v4338_v60 = vsub.f32 1.0, %v4210_v29  ;;  %v4077_v17 = vsub.f32 %v10067_v40, %v10161_v20  ;;  %v10179_v29 = vld [vmem:[#allocation45_spill] sm:$0xff] }
 0x357   : > { %v4290_v4 = vand.u32 2147483647, %v4162_v16  ;;  %v4854_v53 = vsub.f32 1.0, %v4726_v48  ;;  %v4806_v62 = vand.u32 2147483647, %v4678_v19  ;;  %v4593_v52 = vsub.f32 %v10177_v26, %v10162_v13 }
 0x358   : > { %5226 = vmatpush.msrb.mxu0 %v5109_v23  ;;  %v4157_v6 = vsub.f32 %v10178_v25, %v10161_v20  ;;  %v5061_v11 = vmax.f32 %v4933_v46, 0.0  ;;  %v4466_v55 = vmax.f32 %v4338_v60, 0.0  ;;  %v4205_v35 = vand.u32 2147483647, %v4077_v17 }
 0x359   : > { %v4418_v49 = vsub.f32 1.0, %v4290_v4  ;;  %v4982_v38 = vmax.f32 %v4854_v53, 0.0  ;;  %v4934_v44 = vsub.f32 1.0, %v4806_v62  ;;  %v4721_v15 = vand.u32 2147483647, %v4593_v52 }
 0x35a   : > { %v4285_v21 = vand.u32 2147483647, %v4157_v6  ;;  %v5189_v5 = vmul.f32 %v5061_v11, %v4545_v45  ;;  %v4333_v30 = vsub.f32 1.0, %v4205_v35  ;;  %v4673_v16 = vsub.f32 %v10179_v29, %v10162_v13 }
 0x35b   : > { %v4546_v31 = vmax.f32 %v4418_v49, 0.0  ;;  %v5110_v23 = vmul.f32 %v4982_v38, %v4466_v55  ;;  %v5062_v48 = vmax.f32 %v4934_v44, 0.0  ;;  %v4849_v19 = vsub.f32 1.0, %v4721_v15  ;;  %v10180_v38 = vld [vmem:[#allocation67_spill] sm:$0xff]  ;;  %v10181_v15 = vld [vmem:[#allocation68_spill] sm:$0xff] }
 0x35c   : > { %v4413_v24 = vsub.f32 1.0, %v4285_v21  ;;  %5251 = vmatpush.msrb.mxu1 %v5189_v5  ;;  %v4461_v63 = vmax.f32 %v4333_v30, 0.0  ;;  %v4801_v46 = vand.u32 2147483647, %v4673_v16  ;;  %v4078_v60 = vsub.f32 %v10067_v40, %v10164_v1 }
 0x35d   : > { %v4594_v4 = vsub.f32 %v10177_v26, %v10165_v42  ;;  %5284 = vmatpush.msrb.mxu2 %v5110_v23  ;;  %v5190_v45 = vmul.f32 %v5062_v48, %v4546_v31  ;;  %v4977_v17 = vmax.f32 %v4849_v19, 0.0  ;;  %v4158_v62 = vsub.f32 %v10178_v25, %v10164_v1  ;;  %v10182_v19 = vld [vmem:[#allocation50_spill] sm:$0xff] }
 0x35e   : > { %v4541_v53 = vmax.f32 %v4413_v24, 0.0  ;;  %v4929_v52 = vsub.f32 1.0, %v4801_v46  ;;  %v4206_v6 = vand.u32 2147483647, %v4078_v60  ;;  %v4674_v55 = vsub.f32 %v10179_v29, %v10165_v42 }
 0x35f   : > { %v4722_v11 = vand.u32 2147483647, %v4594_v4  ;;  %5309 = vmatpush.msrb.mxu3 %v5190_v45  ;;  %v5105_v49 = vmul.f32 %v4977_v17, %v4461_v63  ;;  %v4286_v35 = vand.u32 2147483647, %v4158_v62  ;;  %v4073_v44 = vsub.f32 %v10180_v38, %v10161_v20 }
 0x360   : > { %v4589_v21 = vsub.f32 %v10181_v15, %v10162_v13  ;;  %v5057_v5 = vmax.f32 %v4929_v52, 0.0  ;;  %v4334_v24 = vsub.f32 1.0, %v4206_v6  ;;  %v4802_v30 = vand.u32 2147483647, %v4674_v55 }
 0x361   : > { %v4850_v31 = vsub.f32 1.0, %v4722_v11  ;;  %5227 = vmatpush.msrb.mxu0 %v5105_v49  ;;  %v4414_v16 = vsub.f32 1.0, %v4286_v35  ;;  %v4201_v23 = vand.u32 2147483647, %v4073_v44  ;;  %v4153_v46 = vsub.f32 %v10182_v19, %v10161_v20  ;;  %v10183_v11 = vld [vmem:[#allocation55_spill] sm:$0xff] }
 0x362   : > { %v4717_v48 = vand.u32 2147483647, %v4589_v21  ;;  %v5185_v60 = vmul.f32 %v5057_v5, %v4541_v53  ;;  %v4462_v63 = vmax.f32 %v4334_v24, 0.0  ;;  %v4930_v45 = vsub.f32 1.0, %v4802_v30 }
 0x363   : > { %v4978_v4 = vmax.f32 %v4850_v31, 0.0  ;;  %v4542_v17 = vmax.f32 %v4414_v16, 0.0  ;;  %v4329_v62 = vsub.f32 1.0, %v4201_v23  ;;  %v4281_v25 = vand.u32 2147483647, %v4153_v46 }
 0x364   : > { %v4845_v29 = vsub.f32 1.0, %v4717_v48  ;;  %5252 = vmatpush.msrb.mxu1 %v5185_v60  ;;  %v5058_v6 = vmax.f32 %v4930_v45, 0.0  ;;  %v4669_v55 = vsub.f32 %v10183_v11, %v10162_v13  ;;  %v4074_v49 = vsub.f32 %v10180_v38, %v10164_v1 }
 0x365   : > { %v5106_v52 = vmul.f32 %v4978_v4, %v4462_v63  ;;  %v4457_v35 = vmax.f32 %v4329_v62, 0.0  ;;  %v4409_v21 = vsub.f32 1.0, %v4281_v25  ;;  %v4590_v53 = vsub.f32 %v10181_v15, %v10165_v42  ;;  %v10184_v62 = vld [vmem:[#allocation56_spill] sm:$0xff] }
 0x366   : > { %v4973_v44 = vmax.f32 %v4845_v29, 0.0  ;;  %v5186_v5 = vmul.f32 %v5058_v6, %v4542_v17  ;;  %v4797_v24 = vand.u32 2147483647, %v4669_v55  ;;  %v4202_v31 = vand.u32 2147483647, %v4074_v49 }
 0x367   : > { %5285 = vmatpush.msrb.mxu2 %v5106_v52  ;;  %v4154_v30 = vsub.f32 %v10182_v19, %v10164_v1  ;;  %v4537_v23 = vmax.f32 %v4409_v21, 0.0  ;;  %v4718_v48 = vand.u32 2147483647, %v4590_v53  ;;  %v4670_v46 = vsub.f32 %v10183_v11, %v10165_v42 }
 0x368   : > { %v5101_v16 = vmul.f32 %v4973_v44, %v4457_v35  ;;  %5310 = vmatpush.msrb.mxu3 %v5186_v5  ;;  %v4925_v60 = vsub.f32 1.0, %v4797_v24  ;;  %v4330_v29 = vsub.f32 1.0, %v4202_v31  ;;  %v4069_v63 = vsub.f32 %v7669_v59, %v10161_v20 }
 0x369   : > { %v4282_v25 = vand.u32 2147483647, %v4154_v30  ;;  %v4846_v4 = vsub.f32 1.0, %v4718_v48  ;;  %v4798_v45 = vand.u32 2147483647, %v4670_v46  ;;  %v4585_v17 = vsub.f32 %v10072_v36, %v10162_v13 }
 0x36a   : > { %5228 = vmatpush.msrb.mxu0 %v5101_v16  ;;  %v4149_v52 = vsub.f32 %v10184_v62, %v10161_v20  ;;  %v5053_v6 = vmax.f32 %v4925_v60, 0.0  ;;  %v4458_v55 = vmax.f32 %v4330_v29, 0.0  ;;  %v4197_v35 = vand.u32 2147483647, %v4069_v63  ;;  %v10185_v16 = vld [vmem:[#allocation58_spill] sm:$0xff] }
 0x36b   : > { %v4410_v49 = vsub.f32 1.0, %v4282_v25  ;;  %v4974_v44 = vmax.f32 %v4846_v4, 0.0  ;;  %v4926_v21 = vsub.f32 1.0, %v4798_v45  ;;  %v4713_v53 = vand.u32 2147483647, %v4585_v17 }
 0x36c   : > { %v4277_v5 = vand.u32 2147483647, %v4149_v52  ;;  %v5181_v24 = vmul.f32 %v5053_v6, %v4537_v23  ;;  %v4325_v30 = vsub.f32 1.0, %v4197_v35  ;;  %v4665_v48 = vsub.f32 %v10185_v16, %v10162_v13 }
 0x36d   : > { %v4538_v31 = vmax.f32 %v4410_v49, 0.0  ;;  %v5102_v46 = vmul.f32 %v4974_v44, %v4458_v55  ;;  %v5054_v11 = vmax.f32 %v4926_v21, 0.0  ;;  %v4841_v19 = vsub.f32 1.0, %v4713_v53  ;;  %v10186_v44 = vld [vmem:[#allocation74_spill] sm:$0xff]  ;;  %v10187_v53 = vld [vmem:[#allocation75_spill] sm:$0xff] }
 0x36e   : > { %v4405_v15 = vsub.f32 1.0, %v4277_v5  ;;  %5253 = vmatpush.msrb.mxu1 %v5181_v24  ;;  %v4453_v38 = vmax.f32 %v4325_v30, 0.0  ;;  %v4793_v60 = vand.u32 2147483647, %v4665_v48  ;;  %v4070_v29 = vsub.f32 %v7669_v59, %v10164_v1 }
 0x36f   : > { %v4586_v25 = vsub.f32 %v10072_v36, %v10165_v42  ;;  %5286 = vmatpush.msrb.mxu2 %v5102_v46  ;;  %v5182_v23 = vmul.f32 %v5054_v11, %v4538_v31  ;;  %v4969_v63 = vmax.f32 %v4841_v19, 0.0  ;;  %v4150_v45 = vsub.f32 %v10184_v62, %v10164_v1  ;;  %v10188_v46 = vld [vmem:[#allocation59_spill] sm:$0xff] }
 0x370   : > { %v4533_v4 = vmax.f32 %v4405_v15, 0.0  ;;  %v4921_v17 = vsub.f32 1.0, %v4793_v60  ;;  %v4198_v52 = vand.u32 2147483647, %v4070_v29  ;;  %v4666_v55 = vsub.f32 %v10185_v16, %v10165_v42 }
 0x371   : > { %v4714_v6 = vand.u32 2147483647, %v4586_v25  ;;  %5311 = vmatpush.msrb.mxu3 %v5182_v23  ;;  %v5097_v49 = vmul.f32 %v4969_v63, %v4453_v38  ;;  %v4278_v35 = vand.u32 2147483647, %v4150_v45  ;;  %v4065_v21 = vsub.f32 %v10186_v44, %v10161_v20 }
 0x372   : > { %v4581_v11 = vsub.f32 %v10187_v53, %v10162_v13  ;;  %v5049_v19 = vmax.f32 %v4921_v17, 0.0  ;;  %v4326_v15 = vsub.f32 1.0, %v4198_v52  ;;  %v4794_v24 = vand.u32 2147483647, %v4666_v55 }
 0x373   : > { %v4842_v5 = vsub.f32 1.0, %v4714_v6  ;;  %5229 = vmatpush.msrb.mxu0 %v5097_v49  ;;  %v4406_v31 = vsub.f32 1.0, %v4278_v35  ;;  %v4193_v30 = vand.u32 2147483647, %v4065_v21  ;;  %v4145_v60 = vsub.f32 %v10188_v46, %v10161_v20  ;;  %v10189_v6 = vld [vmem:[#allocation60_spill] sm:$0xff] }
 0x374   : > { %v4709_v48 = vand.u32 2147483647, %v4581_v11  ;;  %v5177_v29 = vmul.f32 %v5049_v19, %v4533_v4  ;;  %v4454_v38 = vmax.f32 %v4326_v15, 0.0  ;;  %v4922_v23 = vsub.f32 1.0, %v4794_v24 }
 0x375   : > { %v4970_v25 = vmax.f32 %v4842_v5, 0.0  ;;  %v4534_v63 = vmax.f32 %v4406_v31, 0.0  ;;  %v4321_v45 = vsub.f32 1.0, %v4193_v30  ;;  %v4273_v62 = vand.u32 2147483647, %v4145_v60 }
 0x376   : > { %v4837_v16 = vsub.f32 1.0, %v4709_v48  ;;  %5254 = vmatpush.msrb.mxu1 %v5177_v29  ;;  %v5050_v52 = vmax.f32 %v4922_v23, 0.0  ;;  %v4661_v55 = vsub.f32 %v10189_v6, %v10162_v13  ;;  %v4066_v49 = vsub.f32 %v10186_v44, %v10164_v1 }
 0x377   : > { %v5098_v17 = vmul.f32 %v4970_v25, %v4454_v38  ;;  %v4449_v35 = vmax.f32 %v4321_v45, 0.0  ;;  %v4401_v11 = vsub.f32 1.0, %v4273_v62  ;;  %v4582_v4 = vsub.f32 %v10187_v53, %v10165_v42  ;;  %v10190_v38 = vld [vmem:[#allocation79_spill] sm:$0xff]  ;;  %v10191_v45 = vld [vmem:[#allocation80_spill] sm:$0xff] }
 0x378   : > { %v4965_v21 = vmax.f32 %v4837_v16, 0.0  ;;  %v5178_v19 = vmul.f32 %v5050_v52, %v4534_v63  ;;  %v4789_v15 = vand.u32 2147483647, %v4661_v55  ;;  %v4194_v5 = vand.u32 2147483647, %v4066_v49  ;;  %v10192_v52 = vld [vmem:[#allocation64_spill] sm:$0xff] }
 0x379   : > { %5287 = vmatpush.msrb.mxu2 %v5098_v17  ;;  %v4146_v24 = vsub.f32 %v10188_v46, %v10164_v1  ;;  %v4529_v30 = vmax.f32 %v4401_v11, 0.0  ;;  %v4710_v48 = vand.u32 2147483647, %v4582_v4  ;;  %v4662_v60 = vsub.f32 %v10189_v6, %v10165_v42 }
 0x37a   : > { %v5093_v31 = vmul.f32 %v4965_v21, %v4449_v35  ;;  %5312 = vmatpush.msrb.mxu3 %v5178_v19  ;;  %v4917_v29 = vsub.f32 1.0, %v4789_v15  ;;  %v4322_v16 = vsub.f32 1.0, %v4194_v5  ;;  %v4061_v25 = vsub.f32 %v10190_v38, %v10161_v20 }
 0x37b   : > { %v4274_v62 = vand.u32 2147483647, %v4146_v24  ;;  %v4838_v23 = vsub.f32 1.0, %v4710_v48  ;;  %v4790_v63 = vand.u32 2147483647, %v4662_v60  ;;  %v4577_v17 = vsub.f32 %v10191_v45, %v10162_v13 }
 0x37c   : > { %5230 = vmatpush.msrb.mxu0 %v5093_v31  ;;  %v4141_v55 = vsub.f32 %v10192_v52, %v10161_v20  ;;  %v5045_v49 = vmax.f32 %v4917_v29, 0.0  ;;  %v4450_v35 = vmax.f32 %v4322_v16, 0.0  ;;  %v4189_v11 = vand.u32 2147483647, %v4061_v25  ;;  %v10193_v31 = vld [vmem:[#allocation65_spill] sm:$0xff] }
 0x37d   : > { %v4402_v21 = vsub.f32 1.0, %v4274_v62  ;;  %v4966_v4 = vmax.f32 %v4838_v23, 0.0  ;;  %v4918_v19 = vsub.f32 1.0, %v4790_v63  ;;  %v4705_v15 = vand.u32 2147483647, %v4577_v17 }
 0x37e   : > { %v4269_v5 = vand.u32 2147483647, %v4141_v55  ;;  %v5173_v24 = vmul.f32 %v5045_v49, %v4529_v30  ;;  %v4317_v46 = vsub.f32 1.0, %v4189_v11  ;;  %v4657_v48 = vsub.f32 %v10193_v31, %v10162_v13  ;;  %v10194_v11 = vld [vmem:[#allocation81_spill] sm:$0xff] }
 0x37f   : > { %v4530_v6 = vmax.f32 %v4402_v21, 0.0  ;;  %v5094_v60 = vmul.f32 %v4966_v4, %v4450_v35  ;;  %v5046_v53 = vmax.f32 %v4918_v19, 0.0  ;;  %v4833_v44 = vsub.f32 1.0, %v4705_v15  ;;  %v10195_v19 = vld [vmem:[#allocation85_spill] sm:$0xff] }
 0x380   : > { %v4397_v36 = vsub.f32 1.0, %v4269_v5  ;;  %5255 = vmatpush.msrb.mxu1 %v5173_v24  ;;  %v4445_v59 = vmax.f32 %v4317_v46, 0.0  ;;  %v4785_v29 = vand.u32 2147483647, %v4657_v48  ;;  %v4062_v16 = vsub.f32 %v10190_v38, %v10164_v1 }
 0x381   : > { %v4578_v62 = vsub.f32 %v10191_v45, %v10165_v42  ;;  %5288 = vmatpush.msrb.mxu2 %v5094_v60  ;;  %v5174_v30 = vmul.f32 %v5046_v53, %v4530_v6  ;;  %v4961_v25 = vmax.f32 %v4833_v44, 0.0  ;;  %v4142_v63 = vsub.f32 %v10192_v52, %v10164_v1  ;;  %v10196_v60 = vld [vmem:[#allocation66_spill] sm:$0xff] }
 0x382   : > { %v4525_v23 = vmax.f32 %v4397_v36, 0.0  ;;  %v4913_v17 = vsub.f32 1.0, %v4785_v29  ;;  %v4190_v55 = vand.u32 2147483647, %v4062_v16  ;;  %v4658_v46 = vsub.f32 %v10193_v31, %v10165_v42 }
 0x383   : > { %v4706_v49 = vand.u32 2147483647, %v4578_v62  ;;  %5313 = vmatpush.msrb.mxu3 %v5174_v30  ;;  %v5089_v35 = vmul.f32 %v4961_v25, %v4445_v59  ;;  %v4270_v21 = vand.u32 2147483647, %v4142_v63  ;;  %v4057_v4 = vsub.f32 %v10194_v11, %v10161_v20 }
 0x384   : > { %v4573_v53 = vsub.f32 %v10195_v19, %v10162_v13  ;;  %v5041_v44 = vmax.f32 %v4913_v17, 0.0  ;;  %v4318_v36 = vsub.f32 1.0, %v4190_v55  ;;  %v4786_v15 = vand.u32 2147483647, %v4658_v46 }
 0x385   : > { %v4834_v6 = vsub.f32 1.0, %v4706_v49  ;;  %5231 = vmatpush.msrb.mxu0 %v5089_v35  ;;  %v4398_v5 = vsub.f32 1.0, %v4270_v21  ;;  %v4185_v24 = vand.u32 2147483647, %v4057_v4  ;;  %v4137_v29 = vsub.f32 %v10196_v60, %v10161_v20  ;;  %v10197_v49 = vld [vmem:[#allocation70_spill] sm:$0xff] }
 0x386   : > { %v4701_v48 = vand.u32 2147483647, %v4573_v53  ;;  %v5169_v16 = vmul.f32 %v5041_v44, %v4525_v23  ;;  %v4446_v59 = vmax.f32 %v4318_v36, 0.0  ;;  %v4914_v30 = vsub.f32 1.0, %v4786_v15 }
 0x387   : > { %v4962_v62 = vmax.f32 %v4834_v6, 0.0  ;;  %v4526_v25 = vmax.f32 %v4398_v5, 0.0  ;;  %v4313_v63 = vsub.f32 1.0, %v4185_v24  ;;  %v4265_v52 = vand.u32 2147483647, %v4137_v29 }
 0x388   : > { %v4829_v31 = vsub.f32 1.0, %v4701_v48  ;;  %5256 = vmatpush.msrb.mxu1 %v5169_v16  ;;  %v5042_v55 = vmax.f32 %v4914_v30, 0.0  ;;  %v4653_v46 = vsub.f32 %v10197_v49, %v10162_v13  ;;  %v4058_v35 = vsub.f32 %v10194_v11, %v10164_v1 }
 0x389   : > { %v5090_v17 = vmul.f32 %v4962_v62, %v4446_v59  ;;  %v4441_v21 = vmax.f32 %v4313_v63, 0.0  ;;  %v4393_v53 = vsub.f32 1.0, %v4265_v52  ;;  %v4574_v23 = vsub.f32 %v10195_v19, %v10165_v42  ;;  %v10198_v59 = vld [vmem:[#allocation86_spill] sm:$0xff]  ;;  %v10199_v63 = vld [vmem:[#allocation87_spill] sm:$0xff] }
 0x38a   : > { %v4957_v4 = vmax.f32 %v4829_v31, 0.0  ;;  %v5170_v44 = vmul.f32 %v5042_v55, %v4526_v25  ;;  %v4781_v36 = vand.u32 2147483647, %v4653_v46  ;;  %v4186_v6 = vand.u32 2147483647, %v4058_v35  ;;  %v10200_v55 = vld [vmem:[#allocation71_spill] sm:$0xff] }
 0x38b   : > { %5289 = vmatpush.msrb.mxu2 %v5090_v17  ;;  %v4138_v15 = vsub.f32 %v10196_v60, %v10164_v1  ;;  %v4521_v24 = vmax.f32 %v4393_v53, 0.0  ;;  %v4702_v48 = vand.u32 2147483647, %v4574_v23  ;;  %v4654_v29 = vsub.f32 %v10197_v49, %v10165_v42 }
 0x38c   : > { %v5085_v5 = vmul.f32 %v4957_v4, %v4441_v21  ;;  %5314 = vmatpush.msrb.mxu3 %v5170_v44  ;;  %v4909_v16 = vsub.f32 1.0, %v4781_v36  ;;  %v4314_v31 = vsub.f32 1.0, %v4186_v6  ;;  %v4053_v62 = vsub.f32 %v10198_v59, %v10161_v20 }
 0x38d   : > { %v4266_v52 = vand.u32 2147483647, %v4138_v15  ;;  %v4830_v30 = vsub.f32 1.0, %v4702_v48  ;;  %v4782_v25 = vand.u32 2147483647, %v4654_v29  ;;  %v4569_v17 = vsub.f32 %v10199_v63, %v10162_v13 }
 0x38e   : > { %5232 = vmatpush.msrb.mxu0 %v5085_v5  ;;  %v4133_v46 = vsub.f32 %v10200_v55, %v10161_v20  ;;  %v5037_v35 = vmax.f32 %v4909_v16, 0.0  ;;  %v4442_v21 = vmax.f32 %v4314_v31, 0.0  ;;  %v4181_v53 = vand.u32 2147483647, %v4053_v62  ;;  %v10201_v5 = vld [vmem:[#allocation72_spill] sm:$0xff] }
 0x38f   : > { %v4394_v4 = vsub.f32 1.0, %v4266_v52  ;;  %v4958_v23 = vmax.f32 %v4830_v30, 0.0  ;;  %v4910_v44 = vsub.f32 1.0, %v4782_v25  ;;  %v4697_v36 = vand.u32 2147483647, %v4569_v17 }
 0x390   : > { %v4261_v6 = vand.u32 2147483647, %v4133_v46  ;;  %v5165_v15 = vmul.f32 %v5037_v35, %v4521_v24  ;;  %v4309_v60 = vsub.f32 1.0, %v4181_v53  ;;  %v4649_v48 = vsub.f32 %v10201_v5, %v10162_v13  ;;  %v10202_v53 = vld [vmem:[#allocation42_spill] sm:$0xff] }
 0x391   : > { %v4522_v49 = vmax.f32 %v4394_v4, 0.0  ;;  %v5086_v29 = vmul.f32 %v4958_v23, %v4442_v21  ;;  %v5038_v19 = vmax.f32 %v4910_v44, 0.0  ;;  %v4825_v11 = vsub.f32 1.0, %v4697_v36  ;;  %v10203_v23 = vld [vmem:[#allocation6_spill] sm:$0xff]  ;;  %v10204_v36 = vld [vmem:[#allocation43_spill] sm:$0xff] }
 0x392   : > { %v4389_v45 = vsub.f32 1.0, %v4261_v6  ;;  %5257 = vmatpush.msrb.mxu1 %v5165_v15  ;;  %v4437_v38 = vmax.f32 %v4309_v60, 0.0  ;;  %v4777_v16 = vand.u32 2147483647, %v4649_v48  ;;  %v4054_v31 = vsub.f32 %v10198_v59, %v10164_v1  ;;  %v10205_v6 = vld [vmem:[#allocation8_spill] sm:$0xff] }
 0x393   : > { %v4570_v52 = vsub.f32 %v10199_v63, %v10165_v42  ;;  %5290 = vmatpush.msrb.mxu2 %v5086_v29  ;;  %v5166_v24 = vmul.f32 %v5038_v19, %v4522_v49  ;;  %v4953_v62 = vmax.f32 %v4825_v11, 0.0  ;;  %v4134_v25 = vsub.f32 %v10200_v55, %v10164_v1  ;;  %v6519_v11 = vld [vmem:[%s7827_s25 + $0x80] sm:$0xff] }
 0x394   : > { %v4517_v30 = vmax.f32 %v4389_v45, 0.0  ;;  %v4905_v17 = vsub.f32 1.0, %v4777_v16  ;;  %v4182_v46 = vand.u32 2147483647, %v4054_v31  ;;  %v4650_v60 = vsub.f32 %v10201_v5, %v10165_v42 }
 0x395   : > { %v4698_v35 = vand.u32 2147483647, %v4570_v52  ;;  %5315 = vmatpush.msrb.mxu3 %v5166_v24  ;;  %v5081_v21 = vmul.f32 %v4953_v62, %v4437_v38  ;;  %v4262_v4 = vand.u32 2147483647, %v4134_v25  ;;  %v4115_v44 = vsub.f32 %v10203_v23, %v10202_v53  ;;  %v10206_v52 = vld [vmem:[#allocation53_spill] sm:$0xff] }
 0x396   : > { %v4631_v19 = vsub.f32 %v10205_v6, %v10204_v36  ;;  %v5033_v45 = vmax.f32 %v4905_v17, 0.0  ;;  %v4310_v49 = vsub.f32 1.0, %v4182_v46  ;;  %v4778_v48 = vand.u32 2147483647, %v4650_v60 }
 0x397   : > { %v4826_v15 = vsub.f32 1.0, %v4698_v35  ;;  %5233 = vmatpush.msrb.mxu0 %v5081_v21  ;;  %v4390_v29 = vsub.f32 1.0, %v4262_v4  ;;  %v4243_v16 = vand.u32 2147483647, %v4115_v44  ;;  %v4116_v24 = vsub.f32 %v10203_v23, %v10206_v52  ;;  %v10207_v35 = vld [vmem:[#allocation54_spill] sm:$0xff]  ;;  %v10208_v21 = vld [vmem:[#allocation76_spill] sm:$0xff] }
 0x398   : > { %v4759_v31 = vand.u32 2147483647, %v4631_v19  ;;  %v5161_v38 = vmul.f32 %v5033_v45, %v4517_v30  ;;  %v4438_v62 = vmax.f32 %v4310_v49, 0.0  ;;  %v4906_v5 = vsub.f32 1.0, %v4778_v48  ;;  %5234 = vmatmul.f32.vlgmr.msrb.gmra.mxu0 %v6519_v11  ;;  %v10209_v19 = vld [vmem:[#allocation77_spill] sm:$0xff] }
 0x399   : > { %v4954_v25 = vmax.f32 %v4826_v15, 0.0  ;;  %v4518_v55 = vmax.f32 %v4390_v29, 0.0  ;;  %v4371_v63 = vsub.f32 1.0, %v4243_v16  ;;  %v4244_v26 = vand.u32 2147483647, %v4116_v24  ;;  %v10210_v24 = vld [vmem:[#allocation7_spill] sm:$0xff] }
 0x39a   : > { %v4887_v59 = vsub.f32 1.0, %v4759_v31  ;;  %5258 = vmatpush.msrb.mxu1 %v5161_v38  ;;  %v5034_v46 = vmax.f32 %v4906_v5, 0.0  ;;  %v4632_v60 = vsub.f32 %v10205_v6, %v10207_v35  ;;  %v4129_v4 = vsub.f32 %v10208_v21, %v10161_v20 }
 0x39b   : > { %v5082_v17 = vmul.f32 %v4954_v25, %v4438_v62  ;;  %v4499_v44 = vmax.f32 %v4371_v63, 0.0  ;;  %v4372_v30 = vsub.f32 1.0, %v4244_v26  ;;  %v4645_v45 = vsub.f32 %v10209_v19, %v10162_v13 }
 0x39c   : > { %v5015_v23 = vmax.f32 %v4887_v59, 0.0  ;;  %v5162_v49 = vmul.f32 %v5034_v46, %v4518_v55  ;;  %v4760_v15 = vand.u32 2147483647, %v4632_v60  ;;  %v4257_v48 = vand.u32 2147483647, %v4129_v4 }
 0x39d   : > { %5291 = vmatpush.msrb.mxu2 %v5082_v17  ;;  %v4130_v29 = vsub.f32 %v10208_v21, %v10164_v1  ;;  %v4500_v16 = vmax.f32 %v4372_v30, 0.0  ;;  %v4773_v31 = vand.u32 2147483647, %v4645_v45  ;;  %v4646_v6 = vsub.f32 %v10209_v19, %v10165_v42 }
 0x39e   : > { %v5143_v5 = vmul.f32 %v5015_v23, %v4499_v44  ;;  %5292 = vmatmul.f32.vlgmr.msrb.gmra.mxu2 %v6519_v11  ;;  %5316 = vmatpush.msrb.mxu3 %v5162_v49  ;;  %v4888_v59 = vsub.f32 1.0, %v4760_v15  ;;  %v4385_v26 = vsub.f32 1.0, %v4257_v48  ;;  %v4111_v38 = vsub.f32 %v10210_v24, %v10202_v53 }
 0x39f   : > { %v4258_v63 = vand.u32 2147483647, %v4130_v29  ;;  %v4901_v55 = vsub.f32 1.0, %v4773_v31  ;;  %v4774_v62 = vand.u32 2147483647, %v4646_v6  ;;  %v4627_v25 = vsub.f32 %v7107_v27, %v10204_v36 }
 0x3a0   : > { %5334 = vmatpush.msra.mxu0 %v5143_v5  ;;  %v4112_v17 = vsub.f32 %v10210_v24, %v10206_v52  ;;  %v5016_v46 = vmax.f32 %v4888_v59, 0.0  ;;  %v4513_v60 = vmax.f32 %v4385_v26, 0.0  ;;  %v4239_v11 = vand.u32 2147483647, %v4111_v38 }
 0x3a1   : > { %v4386_v4 = vsub.f32 1.0, %v4258_v63  ;;  %v5029_v44 = vmax.f32 %v4901_v55, 0.0  ;;  %v4902_v23 = vsub.f32 1.0, %v4774_v62  ;;  %v4755_v30 = vand.u32 2147483647, %v4627_v25 }
 0x3a2   : > { %v4240_v45 = vand.u32 2147483647, %v4112_v17  ;;  %v5144_v49 = vmul.f32 %v5016_v46, %v4500_v16  ;;  %v4367_v48 = vsub.f32 1.0, %v4239_v11  ;;  %v4628_v29 = vsub.f32 %v7107_v27, %v10207_v35 }
 0x3a3   : > { %v4514_v15 = vmax.f32 %v4386_v4, 0.0  ;;  %v5157_v5 = vmul.f32 %v5029_v44, %v4513_v60  ;;  %v5030_v31 = vmax.f32 %v4902_v23, 0.0  ;;  %v4883_v6 = vsub.f32 1.0, %v4755_v30 }
 0x3a4   : > { %v4368_v19 = vsub.f32 1.0, %v4240_v45  ;;  %5392 = vmatpush.msra.mxu2 %v5144_v49  ;;  %v4495_v24 = vmax.f32 %v4367_v48, 0.0  ;;  %v4756_v59 = vand.u32 2147483647, %v4628_v29  ;;  %v4125_v26 = vsub.f32 %v10091_v41, %v10161_v20 }
 0x3a5   : > { %v4641_v63 = vsub.f32 %v10169_v56, %v10162_v13  ;;  %5259 = vmatpush.msrb.mxu1 %v5157_v5  ;;  %v5158_v16 = vmul.f32 %v5030_v31, %v4514_v15  ;;  %v5011_v38 = vmax.f32 %v4883_v6, 0.0  ;;  %v4126_v27 = vsub.f32 %v10091_v41, %v10164_v1 }
 0x3a6   : > { %v4496_v55 = vmax.f32 %v4368_v19, 0.0  ;;  %v4884_v62 = vsub.f32 1.0, %v4756_v59  ;;  %v4253_v25 = vand.u32 2147483647, %v4125_v26  ;;  %v4642_v46 = vsub.f32 %v10169_v56, %v10165_v42 }
 0x3a7   : > { %v4769_v17 = vand.u32 2147483647, %v4641_v63  ;;  %5317 = vmatpush.msrb.mxu3 %v5158_v16  ;;  %v5139_v60 = vmul.f32 %v5011_v38, %v4495_v24  ;;  %v4254_v4 = vand.u32 2147483647, %v4126_v27  ;;  %v4107_v11 = vsub.f32 %v10132_v37, %v10202_v53 }
 0x3a8   : > { %v4623_v44 = vsub.f32 %v7204_v28, %v10204_v36  ;;  %v5012_v23 = vmax.f32 %v4884_v62, 0.0  ;;  %v4381_v19 = vsub.f32 1.0, %v4253_v25  ;;  %v4770_v45 = vand.u32 2147483647, %v4642_v46 }
 0x3a9   : > { %v4897_v30 = vsub.f32 1.0, %v4769_v17  ;;  %5335 = vmatpush.msra.mxu0 %v5139_v60  ;;  %v4382_v49 = vsub.f32 1.0, %v4254_v4  ;;  %v4235_v15 = vand.u32 2147483647, %v4107_v11  ;;  %v4108_v29 = vsub.f32 %v10132_v37, %v10206_v52 }
 0x3aa   : > { %v4751_v48 = vand.u32 2147483647, %v4623_v44  ;;  %v5140_v5 = vmul.f32 %v5012_v23, %v4496_v55  ;;  %v4509_v31 = vmax.f32 %v4381_v19, 0.0  ;;  %v4898_v24 = vsub.f32 1.0, %v4770_v45  ;;  %v10211_v55 = vld [vmem:[#allocation84_spill] sm:$0xff] }
 0x3ab   : > { %v5025_v6 = vmax.f32 %v4897_v30, 0.0  ;;  %v4510_v59 = vmax.f32 %v4382_v49, 0.0  ;;  %v4363_v26 = vsub.f32 1.0, %v4235_v15  ;;  %v4236_v16 = vand.u32 2147483647, %v4108_v29 }
 0x3ac   : > { %v4879_v63 = vsub.f32 1.0, %v4751_v48  ;;  %5393 = vmatpush.msra.mxu2 %v5140_v5  ;;  %v5026_v27 = vmax.f32 %v4898_v24, 0.0  ;;  %v4624_v62 = vsub.f32 %v7204_v28, %v10207_v35  ;;  %v4121_v25 = vsub.f32 %v10093_v14, %v10161_v20 }
 0x3ad   : > { %v5153_v38 = vmul.f32 %v5025_v6, %v4509_v31  ;;  %v4491_v17 = vmax.f32 %v4363_v26, 0.0  ;;  %v4364_v37 = vsub.f32 1.0, %v4236_v16  ;;  %v4637_v60 = vsub.f32 %v10211_v55, %v10162_v13 }
 0x3ae   : > { %v5007_v46 = vmax.f32 %v4879_v63, 0.0  ;;  %v5154_v4 = vmul.f32 %v5026_v27, %v4510_v59  ;;  %v4752_v11 = vand.u32 2147483647, %v4624_v62  ;;  %v4249_v44 = vand.u32 2147483647, %v4121_v25 }
 0x3af   : > { %5260 = vmatpush.msrb.mxu1 %v5153_v38  ;;  %v4122_v23 = vsub.f32 %v10093_v14, %v10164_v1  ;;  %v4492_v30 = vmax.f32 %v4364_v37, 0.0  ;;  %v4765_v45 = vand.u32 2147483647, %v4637_v60  ;;  %v4638_v28 = vsub.f32 %v10211_v55, %v10165_v42 }
 0x3b0   : > { %v5135_v19 = vmul.f32 %v5007_v46, %v4491_v17  ;;  %5318 = vmatpush.msrb.mxu3 %v5154_v4  ;;  %v4880_v49 = vsub.f32 1.0, %v4752_v11  ;;  %v4377_v15 = vsub.f32 1.0, %v4249_v44  ;;  %v4103_v29 = vsub.f32 %v10171_v2, %v10202_v53 }
 0x3b1   : > { %v4250_v48 = vand.u32 2147483647, %v4122_v23  ;;  %v4893_v5 = vsub.f32 1.0, %v4765_v45  ;;  %v4766_v31 = vand.u32 2147483647, %v4638_v28  ;;  %v4619_v6 = vsub.f32 %v7287_v7, %v10204_v36 }
 0x3b2   : > { %5336 = vmatpush.msra.mxu0 %v5135_v19  ;;  %v4104_v24 = vsub.f32 %v10171_v2, %v10206_v52  ;;  %v5008_v59 = vmax.f32 %v4880_v49, 0.0  ;;  %v4505_v26 = vmax.f32 %v4377_v15, 0.0  ;;  %v4231_v16 = vand.u32 2147483647, %v4103_v29  ;;  %v6521_v2 = vld [vmem:[%s7827_s25 + $0x90] sm:$0xff] }
 0x3b3   : > { %v4378_v63 = vsub.f32 1.0, %v4250_v48  ;;  %v5021_v38 = vmax.f32 %v4893_v5, 0.0  ;;  %v4894_v27 = vsub.f32 1.0, %v4766_v31  ;;  %v4747_v62 = vand.u32 2147483647, %v4619_v6  ;;  %5237 = vmatmul.f32.gmra.mxu0 %v6521_v2  ;;  %5295 = vmatmul.f32.gmra.mxu2 %v6521_v2 }
 0x3b4   : > { %v4232_v25 = vand.u32 2147483647, %v4104_v24  ;;  %v5136_v17 = vmul.f32 %v5008_v59, %v4492_v30  ;;  %v4359_v37 = vsub.f32 1.0, %v4231_v16  ;;  %v4620_v60 = vsub.f32 %v7287_v7, %v10207_v35 }
 0x3b5   : > { %v4506_v46 = vmax.f32 %v4378_v63, 0.0  ;;  %v5149_v4 = vmul.f32 %v5021_v38, %v4505_v26  ;;  %v5022_v11 = vmax.f32 %v4894_v27, 0.0  ;;  %v4875_v44 = vsub.f32 1.0, %v4747_v62 }
 0x3b6   : > { %v4360_v23 = vsub.f32 1.0, %v4232_v25  ;;  %5394 = vmatpush.msra.mxu2 %v5136_v17  ;;  %v4487_v19 = vmax.f32 %v4359_v37, 0.0  ;;  %v4748_v45 = vand.u32 2147483647, %v4620_v60  ;;  %v4117_v28 = vsub.f32 %v7861_v3, %v10161_v20 }
 0x3b7   : > { %v4633_v49 = vsub.f32 %v7863_v0, %v10162_v13  ;;  %5261 = vmatpush.msrb.mxu1 %v5149_v4  ;;  %v5150_v30 = vmul.f32 %v5022_v11, %v4506_v46  ;;  %v5003_v15 = vmax.f32 %v4875_v44, 0.0  ;;  %v4118_v7 = vsub.f32 %v7861_v3, %v10164_v1 }
 0x3b8   : > { %v4488_v48 = vmax.f32 %v4360_v23, 0.0  ;;  %v4876_v29 = vsub.f32 1.0, %v4748_v45  ;;  %v4245_v5 = vand.u32 2147483647, %v4117_v28  ;;  %v4634_v6 = vsub.f32 %v7863_v0, %v10165_v42  ;;  %v6520_v28 = vld [vmem:[%s7827_s25 + $0x88] sm:$0xff] }
 0x3b9   : > { %v4761_v31 = vand.u32 2147483647, %v4633_v49  ;;  %5319 = vmatpush.msrb.mxu3 %v5150_v30  ;;  %v5131_v20 = vmul.f32 %v5003_v15, %v4487_v19  ;;  %v4246_v24 = vand.u32 2147483647, %v4118_v7  ;;  %v4099_v13 = vsub.f32 %v7359_v22, %v10202_v53 }
 0x3ba   : > { %v4615_v59 = vsub.f32 %v7419_v51, %v10204_v36  ;;  %v5004_v26 = vmax.f32 %v4876_v29, 0.0  ;;  %v4373_v63 = vsub.f32 1.0, %v4245_v5  ;;  %v4762_v1 = vand.u32 2147483647, %v4634_v6 }
 0x3bb   : > { %v4889_v16 = vsub.f32 1.0, %v4761_v31  ;;  %5337 = vmatpush.msra.mxu0 %v5131_v20  ;;  %v4374_v38 = vsub.f32 1.0, %v4246_v24  ;;  %v4227_v27 = vand.u32 2147483647, %v4099_v13  ;;  %v4179_v42 = vsub.f32 %v7063_v8, %v10202_v53 }
 0x3bc   : > { %v4743_v62 = vand.u32 2147483647, %v4615_v59  ;;  %v5132_v25 = vmul.f32 %v5004_v26, %v4488_v48  ;;  %v4501_v17 = vmax.f32 %v4373_v63, 0.0  ;;  %v4890_v37 = vsub.f32 1.0, %v4762_v1 }
 0x3bd   : > { %v5017_v46 = vmax.f32 %v4889_v16, 0.0  ;;  %v4502_v60 = vmax.f32 %v4374_v38, 0.0  ;;  %v4355_v4 = vsub.f32 1.0, %v4227_v27  ;;  %v4307_v44 = vand.u32 2147483647, %v4179_v42 }
 0x3be   : > { %v4871_v11 = vsub.f32 1.0, %v4743_v62  ;;  %5395 = vmatpush.msra.mxu2 %v5132_v25  ;;  %v5018_v2 = vmax.f32 %v4890_v37, 0.0  ;;  %v4695_v19 = vsub.f32 %v7068_v10, %v10204_v36  ;;  %v4100_v45 = vsub.f32 %v7359_v22, %v10206_v52 }
 0x3bf   : > { %v5145_v23 = vmul.f32 %v5017_v46, %v4501_v17  ;;  %v4483_v49 = vmax.f32 %v4355_v4, 0.0  ;;  %v4435_v15 = vsub.f32 1.0, %v4307_v44  ;;  %v4616_v48 = vsub.f32 %v7419_v51, %v10207_v35 }
 0x3c0   : > { %v4999_v30 = vmax.f32 %v4871_v11, 0.0  ;;  %v5146_v7 = vmul.f32 %v5018_v2, %v4502_v60  ;;  %v4823_v29 = vand.u32 2147483647, %v4695_v19  ;;  %v4228_v5 = vand.u32 2147483647, %v4100_v45 }
 0x3c1   : > { %5262 = vmatpush.msrb.mxu1 %v5145_v23  ;;  %v4180_v31 = vsub.f32 %v7063_v8, %v10206_v52  ;;  %v4744_v20 = vand.u32 2147483647, %v4616_v48  ;;  %v4696_v24 = vsub.f32 %v7068_v10, %v10207_v35  ;;  %v4563_v22 = vmax.f32 %v4435_v15, 0.0 }
 0x3c2   : > { %v5127_v6 = vmul.f32 %v4999_v30, %v4483_v49  ;;  %5263 = vmatmul.f32.vlgmr.msrb.gmra.mxu1 %v6520_v28  ;;  %5320 = vmatpush.msrb.mxu3 %v5146_v7  ;;  %v4951_v13 = vsub.f32 1.0, %v4823_v29  ;;  %v4356_v59 = vsub.f32 1.0, %v4228_v5  ;;  %v4095_v16 = vsub.f32 %v7421_v32, %v10202_v53 }
 0x3c3   : > { %v4308_v26 = vand.u32 2147483647, %v4180_v31  ;;  %v4872_v51 = vsub.f32 1.0, %v4744_v20  ;;  %v4824_v63 = vand.u32 2147483647, %v4696_v24  ;;  %v4611_v8 = vsub.f32 %v7481_v43, %v10204_v36  ;;  %5321 = vmatmul.f32.vlgmr.msrb.gmra.mxu3 %v6520_v28 }
 0x3c4   : > { %5338 = vmatpush.msra.mxu0 %v5127_v6  ;;  %v5079_v1 = vmax.f32 %v4951_v13, 0.0  ;;  %v4484_v38 = vmax.f32 %v4356_v59, 0.0  ;;  %v4223_v42 = vand.u32 2147483647, %v4095_v16  ;;  %v4175_v37 = vsub.f32 %v7066_v9, %v10202_v53 }
 0x3c5   : > { %v4436_v27 = vsub.f32 1.0, %v4308_v26  ;;  %v5000_v10 = vmax.f32 %v4872_v51, 0.0  ;;  %v4952_v62 = vsub.f32 1.0, %v4824_v63  ;;  %v4739_v25 = vand.u32 2147483647, %v4611_v8 }
 0x3c6   : > { %v5207_v17 = vmul.f32 %v5079_v1, %v4563_v22  ;;  %v4691_v60 = vsub.f32 %v10095_v50, %v10204_v36  ;;  %v4351_v44 = vsub.f32 1.0, %v4223_v42  ;;  %v4303_v2 = vand.u32 2147483647, %v4175_v37 }
 0x3c7   : > { %v4564_v46 = vmax.f32 %v4436_v27, 0.0  ;;  %v5128_v4 = vmul.f32 %v5000_v10, %v4484_v38  ;;  %v5080_v11 = vmax.f32 %v4952_v62, 0.0  ;;  %v4867_v23 = vsub.f32 1.0, %v4739_v25 }
 0x3c8   : > { %5363 = vmatpush.msra.mxu1 %v5207_v17  ;;  %v4819_v19 = vand.u32 2147483647, %v4691_v60  ;;  %v4096_v45 = vsub.f32 %v7421_v32, %v10206_v52  ;;  %v4612_v28 = vsub.f32 %v7481_v43, %v10207_v35  ;;  %v4479_v30 = vmax.f32 %v4351_v44, 0.0 }
 0x3c9   : > { %5396 = vmatpush.msra.mxu2 %v5128_v4  ;;  %v5208_v49 = vmul.f32 %v5080_v11, %v4564_v46  ;;  %v4995_v15 = vmax.f32 %v4867_v23, 0.0  ;;  %v4176_v48 = vsub.f32 %v7066_v9, %v10206_v52  ;;  %v4431_v7 = vsub.f32 1.0, %v4303_v2 }
 0x3ca   : > { %v4947_v29 = vsub.f32 1.0, %v4819_v19  ;;  %v4224_v5 = vand.u32 2147483647, %v4096_v45  ;;  %v4740_v31 = vand.u32 2147483647, %v4612_v28  ;;  %v4692_v32 = vsub.f32 %v10095_v50, %v10207_v35 }
 0x3cb   : > { %5421 = vmatpush.msra.mxu3 %v5208_v49  ;;  %v5123_v6 = vmul.f32 %v4995_v15, %v4479_v30  ;;  %v4304_v20 = vand.u32 2147483647, %v4176_v48  ;;  %v4091_v43 = vsub.f32 %v10059_v57, %v10202_v53  ;;  %v4559_v24 = vmax.f32 %v4431_v7, 0.0 }
 0x3cc   : > { %v5075_v22 = vmax.f32 %v4947_v29, 0.0  ;;  %v4352_v13 = vsub.f32 1.0, %v4224_v5  ;;  %v4868_v59 = vsub.f32 1.0, %v4740_v31  ;;  %v4820_v9 = vand.u32 2147483647, %v4692_v32 }
 0x3cd   : > { %5339 = vmatpush.msra.mxu0 %v5123_v6  ;;  %v4432_v26 = vsub.f32 1.0, %v4304_v20  ;;  %v4219_v51 = vand.u32 2147483647, %v4091_v43  ;;  %v4607_v63 = vsub.f32 %v10096_v18, %v10204_v36  ;;  %v4171_v50 = vsub.f32 %v10097_v58, %v10202_v53 }
 0x3ce   : > { %v5203_v16 = vmul.f32 %v5075_v22, %v4559_v24  ;;  %v4480_v8 = vmax.f32 %v4352_v13, 0.0  ;;  %v4996_v1 = vmax.f32 %v4868_v59, 0.0  ;;  %v4948_v27 = vsub.f32 1.0, %v4820_v9 }
 0x3cf   : > { %v4560_v38 = vmax.f32 %v4432_v26, 0.0  ;;  %v4347_v10 = vsub.f32 1.0, %v4219_v51  ;;  %v4735_v62 = vand.u32 2147483647, %v4607_v63  ;;  %v4299_v25 = vand.u32 2147483647, %v4171_v50 }
 0x3d0   : > { %5364 = vmatpush.msra.mxu1 %v5203_v16  ;;  %v5124_v42 = vmul.f32 %v4996_v1, %v4480_v8  ;;  %v4687_v17 = vsub.f32 %v10134_v39, %v10204_v36  ;;  %v4092_v46 = vsub.f32 %v10059_v57, %v10206_v52  ;;  %v5076_v37 = vmax.f32 %v4948_v27, 0.0 }
 0x3d1   : > { %v4475_v60 = vmax.f32 %v4347_v10, 0.0  ;;  %v4863_v4 = vsub.f32 1.0, %v4735_v62  ;;  %v4608_v11 = vsub.f32 %v10096_v18, %v10207_v35  ;;  %v4427_v44 = vsub.f32 1.0, %v4299_v25 }
 0x3d2   : > { %5397 = vmatpush.msra.mxu2 %v5124_v42  ;;  %v4815_v23 = vand.u32 2147483647, %v4687_v17  ;;  %v4220_v2 = vand.u32 2147483647, %v4092_v46  ;;  %v4172_v19 = vsub.f32 %v10097_v58, %v10206_v52  ;;  %v5204_v45 = vmul.f32 %v5076_v37, %v4560_v38  ;;  %v9025_v17 = vld [vmem:[%s7827_s25 + $0xa0] sm:$0xff]  ;;  %v6522_v46 = vld [vmem:[%s7827_s25 + $0x98] sm:$0xff] }
 0x3d3   : > { %v4991_v28 = vmax.f32 %v4863_v4, 0.0  ;;  %v4736_v49 = vand.u32 2147483647, %v4608_v11  ;;  %v4688_v30 = vsub.f32 %v10134_v39, %v10207_v35  ;;  %v4555_v57 = vmax.f32 %v4427_v44, 0.0  ;;  %5240 = vmatmul.f32.gmra.mxu0 %v9025_v17  ;;  %5266 = vmatmul.f32.gmra.mxu1 %v6522_v46 }
 0x3d4   : > { %v4943_v15 = vsub.f32 1.0, %v4815_v23  ;;  %v4348_v48 = vsub.f32 1.0, %v4220_v2  ;;  %v4300_v7 = vand.u32 2147483647, %v4172_v19  ;;  %5422 = vmatpush.msra.mxu3 %v5204_v45  ;;  %v4087_v31 = vsub.f32 %v7547_v12, %v10202_v53  ;;  %5298 = vmatmul.f32.gmra.mxu2 %v9025_v17 }
 0x3d5   : > { %v5119_v29 = vmul.f32 %v4991_v28, %v4475_v60  ;;  %v4864_v18 = vsub.f32 1.0, %v4736_v49  ;;  %v4816_v5 = vand.u32 2147483647, %v4688_v30  ;;  %v4603_v32 = vsub.f32 %v7567_v54, %v10204_v36  ;;  %5324 = vmatmul.f32.gmra.mxu3 %v6522_v46 }
 0x3d6   : > { %v5071_v6 = vmax.f32 %v4943_v15, 0.0  ;;  %v4476_v20 = vmax.f32 %v4348_v48, 0.0  ;;  %v4428_v58 = vsub.f32 1.0, %v4300_v7  ;;  %v4215_v24 = vand.u32 2147483647, %v4087_v31 }
 0x3d7   : > { %5340 = vmatpush.msra.mxu0 %v5119_v29  ;;  %v4992_v43 = vmax.f32 %v4864_v18, 0.0  ;;  %v4944_v39 = vsub.f32 1.0, %v4816_v5  ;;  %v4167_v22 = vsub.f32 %v10063_v33, %v10202_v53  ;;  %v4731_v26 = vand.u32 2147483647, %v4603_v32  ;;  %v10212_v18 = vld [vmem:[#allocation26_spill] sm:$0xff] }
 0x3d8   : > { %v5199_v13 = vmul.f32 %v5071_v6, %v4555_v57  ;;  %v4556_v59 = vmax.f32 %v4428_v58, 0.0  ;;  %v4683_v9 = vsub.f32 %v10172_v47, %v10204_v36  ;;  %v4343_v16 = vsub.f32 1.0, %v4215_v24 }
 0x3d9   : > { %v5120_v51 = vmul.f32 %v4992_v43, %v4476_v20  ;;  %v5072_v63 = vmax.f32 %v4944_v39, 0.0  ;;  %v4295_v8 = vand.u32 2147483647, %v4167_v22  ;;  %v4859_v1 = vsub.f32 1.0, %v4731_v26  ;;  %v10213_v20 = vld [vmem:[#allocation33_spill] sm:$0xff] }
 0x3da   : > { %5365 = vmatpush.msra.mxu1 %v5199_v13  ;;  %v4811_v50 = vand.u32 2147483647, %v4683_v9  ;;  %v4088_v38 = vsub.f32 %v7547_v12, %v10206_v52  ;;  %v4604_v27 = vsub.f32 %v7567_v54, %v10207_v35  ;;  %v4471_v62 = vmax.f32 %v4343_v16, 0.0 }
 0x3db   : > { %5398 = vmatpush.msra.mxu2 %v5120_v51  ;;  %v5200_v10 = vmul.f32 %v5072_v63, %v4556_v59  ;;  %v4423_v42 = vsub.f32 1.0, %v4295_v8  ;;  %v4168_v25 = vsub.f32 %v10063_v33, %v10206_v52  ;;  %v4987_v37 = vmax.f32 %v4859_v1, 0.0  ;;  %v2430_v51 = vpop.f32.mrf.mxu1 }
 0x3dc   : > { %v4939_v60 = vsub.f32 1.0, %v4811_v50  ;;  %v4216_v4 = vand.u32 2147483647, %v4088_v38  ;;  %v4732_v11 = vand.u32 2147483647, %v4604_v27  ;;  %v4684_v44 = vsub.f32 %v10172_v47, %v10207_v35 }
 0x3dd   : > { %5423 = vmatpush.msra.mxu3 %v5200_v10  ;;  %v4551_v12 = vmax.f32 %v4423_v42, 0.0  ;;  %v4296_v54 = vand.u32 2147483647, %v4168_v25  ;;  %v5115_v23 = vmul.f32 %v4987_v37, %v4471_v62  ;;  %v4083_v49 = vsub.f32 %v10173_v61, %v10202_v53  ;;  %v2401_v10 = vpop.f32.mrf.mxu0 }
 0x3de   : > { %v5067_v33 = vmax.f32 %v4939_v60, 0.0  ;;  %v4344_v2 = vsub.f32 1.0, %v4216_v4  ;;  %v4860_v19 = vsub.f32 1.0, %v4732_v11  ;;  %v4812_v28 = vand.u32 2147483647, %v4684_v44 }
 0x3df   : > { %v4424_v45 = vsub.f32 1.0, %v4296_v54  ;;  %5341 = vmatpush.msra.mxu0 %v5115_v23  ;;  %v4599_v48 = vsub.f32 %v10174_v34, %v10204_v36  ;;  %v4211_v29 = vand.u32 2147483647, %v4083_v49  ;;  %v4163_v5 = vsub.f32 %v10212_v18, %v10202_v53 }
 0x3e0   : > { %v5195_v30 = vmul.f32 %v5067_v33, %v4551_v12  ;;  %v4472_v57 = vmax.f32 %v4344_v2, 0.0  ;;  %v4988_v15 = vmax.f32 %v4860_v19, 0.0  ;;  %v4940_v7 = vsub.f32 1.0, %v4812_v28  ;;  %v10214_v33 = vld [vmem:[#allocation63_spill] sm:$0xff]  ;;  %v10215_v19 = vld [vmem:[#allocation44_spill] sm:$0xff] }
 0x3e1   : > { %v4552_v47 = vmax.f32 %v4424_v45, 0.0  ;;  %v4727_v6 = vand.u32 2147483647, %v4599_v48  ;;  %v4679_v58 = vsub.f32 %v10213_v20, %v10204_v36  ;;  %v4084_v32 = vsub.f32 %v10173_v61, %v10206_v52 }
 0x3e2   : > { %5366 = vmatpush.msra.mxu1 %v5195_v30  ;;  %v5116_v31 = vmul.f32 %v4988_v15, %v4472_v57  ;;  %v5068_v43 = vmax.f32 %v4940_v7, 0.0  ;;  %v4339_v39 = vsub.f32 1.0, %v4211_v29  ;;  %v4291_v24 = vand.u32 2147483647, %v4163_v5  ;;  %v10216_v57 = vld [vmem:[#allocation45_spill] sm:$0xff] }
 0x3e3   : > { %v4600_v22 = vsub.f32 %v10174_v34, %v10207_v35  ;;  %v4855_v13 = vsub.f32 1.0, %v4727_v6  ;;  %v4807_v59 = vand.u32 2147483647, %v4679_v58  ;;  %v4212_v26 = vand.u32 2147483647, %v4084_v32 }
 0x3e4   : > { %5399 = vmatpush.msra.mxu2 %v5116_v31  ;;  %v4164_v9 = vsub.f32 %v10212_v18, %v10206_v52  ;;  %v5196_v63 = vmul.f32 %v5068_v43, %v4552_v47  ;;  %v4467_v16 = vmax.f32 %v4339_v39, 0.0  ;;  %v4419_v8 = vsub.f32 1.0, %v4291_v24 }
 0x3e5   : > { %v4728_v1 = vand.u32 2147483647, %v4600_v22  ;;  %v4983_v50 = vmax.f32 %v4855_v13, 0.0  ;;  %v4935_v61 = vsub.f32 1.0, %v4807_v59  ;;  %v4340_v38 = vsub.f32 1.0, %v4212_v26 }
 0x3e6   : > { %v4292_v27 = vand.u32 2147483647, %v4164_v9  ;;  %5424 = vmatpush.msra.mxu3 %v5196_v63  ;;  %v4547_v62 = vmax.f32 %v4419_v8, 0.0  ;;  %v4680_v42 = vsub.f32 %v10213_v20, %v10207_v35  ;;  %v9048_v25 = vadd.f32 %v2430_v51, %v2401_v10  ;;  %v10217_v8 = vld [vmem:[#allocation67_spill] sm:$0xff] }
 0x3e7   : > { %v4856_v34 = vsub.f32 1.0, %v4728_v1  ;;  %v5111_v46 = vmul.f32 %v4983_v50, %v4467_v16  ;;  %v5063_v37 = vmax.f32 %v4935_v61, 0.0  ;;  %v4468_v4 = vmax.f32 %v4340_v38, 0.0 }
 0x3e8   : > { %v4420_v60 = vsub.f32 1.0, %v4292_v27  ;;  %v4808_v12 = vand.u32 2147483647, %v4680_v42  ;;  %v4079_v54 = vsub.f32 %v10067_v40, %v10202_v53  ;;  %v4595_v2 = vsub.f32 %v10214_v33, %v10204_v36  ;;  %v10218_v27 = vld [vmem:[#allocation68_spill] sm:$0xff] }
 0x3e9   : > { %v4984_v11 = vmax.f32 %v4856_v34, 0.0  ;;  %5342 = vmatpush.msra.mxu0 %v5111_v46  ;;  %v5191_v44 = vmul.f32 %v5063_v37, %v4547_v62  ;;  %v4159_v45 = vsub.f32 %v10215_v19, %v10202_v53  ;;  %v4675_v15 = vsub.f32 %v10216_v57, %v10204_v36 }
 0x3ea   : > { %v4548_v23 = vmax.f32 %v4420_v60, 0.0  ;;  %v4936_v49 = vsub.f32 1.0, %v4808_v12  ;;  %v4207_v30 = vand.u32 2147483647, %v4079_v54  ;;  %v4723_v48 = vand.u32 2147483647, %v4595_v2 }
 0x3eb   : > { %v5112_v28 = vmul.f32 %v4984_v11, %v4468_v4  ;;  %5367 = vmatpush.msra.mxu1 %v5191_v44  ;;  %v4287_v47 = vand.u32 2147483647, %v4159_v45  ;;  %v4080_v7 = vsub.f32 %v10067_v40, %v10206_v52  ;;  %v4596_v29 = vsub.f32 %v10214_v33, %v10207_v35  ;;  %v10219_v4 = vld [vmem:[#allocation50_spill] sm:$0xff]  ;;  %v10220_v12 = vld [vmem:[#allocation55_spill] sm:$0xff] }
 0x3ec   : > { %v5064_v18 = vmax.f32 %v4936_v49, 0.0  ;;  %v4335_v5 = vsub.f32 1.0, %v4207_v30  ;;  %v4803_v31 = vand.u32 2147483647, %v4675_v15  ;;  %v4160_v6 = vsub.f32 %v10215_v19, %v10206_v52  ;;  %v9078_v19 = vpop.permute.xlu1 %5535 }
 0x3ed   : > { %5400 = vmatpush.msra.mxu2 %v5112_v28  ;;  %v4851_v20 = vsub.f32 1.0, %v4723_v48  ;;  %v4415_v58 = vsub.f32 1.0, %v4287_v47  ;;  %v4208_v32 = vand.u32 2147483647, %v4080_v7  ;;  %v4724_v43 = vand.u32 2147483647, %v4596_v29 }
 0x3ee   : > { %v5192_v39 = vmul.f32 %v5064_v18, %v4548_v23  ;;  %v4463_v24 = vmax.f32 %v4335_v5, 0.0  ;;  %v4931_v22 = vsub.f32 1.0, %v4803_v31  ;;  %v4288_v13 = vand.u32 2147483647, %v4160_v6 }
 0x3ef   : > { %v4979_v59 = vmax.f32 %v4851_v20, 0.0  ;;  %v4543_v40 = vmax.f32 %v4415_v58, 0.0  ;;  %v4336_v26 = vsub.f32 1.0, %v4208_v32  ;;  %v4852_v9 = vsub.f32 1.0, %v4724_v43 }
 0x3f0   : > { %5425 = vmatpush.msra.mxu3 %v5192_v39  ;;  %v5059_v51 = vmax.f32 %v4931_v22, 0.0  ;;  %v4416_v63 = vsub.f32 1.0, %v4288_v13  ;;  %v4676_v16 = vsub.f32 %v10216_v57, %v10207_v35  ;;  %v4075_v1 = vsub.f32 %v10217_v8, %v10202_v53 }
 0x3f1   : > { %v5107_v50 = vmul.f32 %v4979_v59, %v4463_v24  ;;  %v4464_v61 = vmax.f32 %v4336_v26, 0.0  ;;  %v4980_v38 = vmax.f32 %v4852_v9, 0.0  ;;  %v4591_v10 = vsub.f32 %v10218_v27, %v10204_v36 }
 0x3f2   : > { %v5187_v62 = vmul.f32 %v5059_v51, %v4543_v40  ;;  %v4544_v34 = vmax.f32 %v4416_v63, 0.0  ;;  %v4804_v42 = vand.u32 2147483647, %v4676_v16  ;;  %v4203_v46 = vand.u32 2147483647, %v4075_v1  ;;  %v10221_v40 = vld [vmem:[#allocation69_spill] sm:$0xff] }
 0x3f3   : > { %5343 = vmatpush.msra.mxu0 %v5107_v50  ;;  %v5108_v37 = vmul.f32 %v4980_v38, %v4464_v61  ;;  %v4719_v60 = vand.u32 2147483647, %v4591_v10  ;;  %v4155_v11 = vsub.f32 %v10219_v4, %v10202_v53  ;;  %v4671_v54 = vsub.f32 %v10220_v12, %v10204_v36  ;;  %v10222_v63 = vld [vmem:[#allocation73_spill] sm:$0xff]  ;;  %v2404_v50 = vpop.f32.mrf.mxu0  ;;  %v10224_v10 = vld [vmem:[#allocation58_spill] sm:$0xff] }
 0x3f4   : > { %5368 = vmatpush.msra.mxu1 %v5187_v62  ;;  %v4932_v44 = vsub.f32 1.0, %v4804_v42  ;;  %v4331_v23 = vsub.f32 1.0, %v4203_v46  ;;  %v4076_v33 = vsub.f32 %v10217_v8, %v10206_v52  ;;  %v4592_v2 = vsub.f32 %v10218_v27, %v10207_v35  ;;  %v10223_v8 = vld [vmem:[#allocation56_spill] sm:$0xff]  ;;  %v9096_v42 = vld [vmem:[%s7827_s25 + $0xa8] sm:$0xff] }
 0x3f5   : > { %5401 = vmatpush.msra.mxu2 %v5108_v37  ;;  %v4847_v45 = vsub.f32 1.0, %v4719_v60  ;;  %v4283_v28 = vand.u32 2147483647, %v4155_v11  ;;  %v4799_v49 = vand.u32 2147483647, %v4671_v54  ;;  %v4156_v30 = vsub.f32 %v10219_v4, %v10206_v52  ;;  %5269 = vmatmul.f32.gmra.mxu1 %v9096_v42 }
 0x3f6   : > { %v5060_v57 = vmax.f32 %v4932_v44, 0.0  ;;  %v4459_v15 = vmax.f32 %v4331_v23, 0.0  ;;  %v4204_v48 = vand.u32 2147483647, %v4076_v33  ;;  %v4720_v47 = vand.u32 2147483647, %v4592_v2  ;;  %v9106_v23 = vpop.permute.xlu1 %5520  ;;  %5327 = vmatmul.f32.gmra.mxu3 %v9096_v42 }
 0x3f7   : > { %v4975_v7 = vmax.f32 %v4847_v45, 0.0  ;;  %v4411_v29 = vsub.f32 1.0, %v4283_v28  ;;  %v4927_v18 = vsub.f32 1.0, %v4799_v49  ;;  %v4284_v5 = vand.u32 2147483647, %v4156_v30 }
 0x3f8   : > { %v5188_v31 = vmul.f32 %v5060_v57, %v4544_v34  ;;  %v4332_v6 = vsub.f32 1.0, %v4204_v48  ;;  %v4848_v20 = vsub.f32 1.0, %v4720_v47  ;;  %v4672_v58 = vsub.f32 %v10220_v12, %v10207_v35  ;;  %v9093_v34 = vld [vmem:[%s7827_s25 + $0xb0] sm:$0xff]  ;;  %v2433_v48 = vpop.f32.mrf.mxu1 }
 0x3f9   : > { %v5103_v32 = vmul.f32 %v4975_v7, %v4459_v15  ;;  %v4539_v43 = vmax.f32 %v4411_v29, 0.0  ;;  %v5055_v39 = vmax.f32 %v4927_v18, 0.0  ;;  %v4412_v24 = vsub.f32 1.0, %v4284_v5  ;;  %5243 = vmatmul.f32.gmra.mxu0 %v9093_v34  ;;  %5301 = vmatmul.f32.gmra.mxu2 %v9093_v34 }
 0x3fa   : > { %5426 = vmatpush.msra.mxu3 %v5188_v31  ;;  %v4460_v22 = vmax.f32 %v4332_v6, 0.0  ;;  %v4976_v13 = vmax.f32 %v4848_v20, 0.0  ;;  %v4800_v59 = vand.u32 2147483647, %v4672_v58  ;;  %v4071_v26 = vsub.f32 %v10221_v40, %v10202_v53 }
 0x3fb   : > { %5344 = vmatpush.msra.mxu0 %v5103_v32  ;;  %v5183_v9 = vmul.f32 %v5055_v39, %v4539_v43  ;;  %v4540_v51 = vmax.f32 %v4412_v24, 0.0  ;;  %v4587_v16 = vsub.f32 %v10222_v63, %v10204_v36  ;;  %v4151_v1 = vsub.f32 %v10223_v8, %v10202_v53 }
 0x3fc   : > { %v5104_v61 = vmul.f32 %v4976_v13, %v4460_v22  ;;  %v4928_v38 = vsub.f32 1.0, %v4800_v59  ;;  %v4199_v27 = vand.u32 2147483647, %v4071_v26  ;;  %v4667_v62 = vsub.f32 %v10224_v10, %v10204_v36  ;;  %v9120_v26 = vpop.f32.mrf.mxu3 }
 0x3fd   : > { %5369 = vmatpush.msra.mxu1 %v5183_v9  ;;  %v4715_v46 = vand.u32 2147483647, %v4587_v16  ;;  %v4279_v37 = vand.u32 2147483647, %v4151_v1  ;;  %v4072_v60 = vsub.f32 %v10221_v40, %v10206_v52  ;;  %v4588_v4 = vsub.f32 %v10222_v63, %v10207_v35  ;;  %v9118_v40 = vpop.f32.mrf.mxu2  ;;  %v10226_v63 = vld [vmem:[#allocation75_spill] sm:$0xff] }
 0x3fe   : > { %5402 = vmatpush.msra.mxu2 %v5104_v61  ;;  %v5056_v11 = vmax.f32 %v4928_v38, 0.0  ;;  %v4327_v12 = vsub.f32 1.0, %v4199_v27  ;;  %v4795_v54 = vand.u32 2147483647, %v4667_v62  ;;  %v4152_v44 = vsub.f32 %v10223_v8, %v10206_v52  ;;  %v10227_v8 = vld [vmem:[#allocation59_spill] sm:$0xff]  ;;  %v2407_v61 = vpop.f32.mrf.mxu0 }
 0x3ff   : > { %v4843_v33 = vsub.f32 1.0, %v4715_v46  ;;  %v4407_v2 = vsub.f32 1.0, %v4279_v37  ;;  %v4200_v45 = vand.u32 2147483647, %v4072_v60  ;;  %v4716_v28 = vand.u32 2147483647, %v4588_v4 }
 0x400   : > { %v9112_v49 = vadd.f32 %v9106_v23, %v9048_v25  ;;  %v5184_v30 = vmul.f32 %v5056_v11, %v4540_v51  ;;  %v4923_v57 = vsub.f32 1.0, %v4795_v54  ;;  %v4280_v15 = vand.u32 2147483647, %v4152_v44  ;;  %v10225_v25 = vld [vmem:[#allocation74_spill] sm:$0xff] }
 0x401   : > { %v4455_v47 = vmax.f32 %v4327_v12, 0.0  ;;  %v4971_v7 = vmax.f32 %v4843_v33, 0.0  ;;  %v4328_v29 = vsub.f32 1.0, %v4200_v45  ;;  %v4844_v18 = vsub.f32 1.0, %v4716_v28 }
 0x402   : > { %5427 = vmatpush.msra.mxu3 %v5184_v30  ;;  %v4535_v5 = vmax.f32 %v4407_v2, 0.0  ;;  %v5051_v31 = vmax.f32 %v4923_v57, 0.0  ;;  %v4408_v6 = vsub.f32 1.0, %v4280_v15  ;;  %v4668_v20 = vsub.f32 %v10224_v10, %v10207_v35 }
 0x403   : > { %v5099_v58 = vmul.f32 %v4971_v7, %v4455_v47  ;;  %v4456_v32 = vmax.f32 %v4328_v29, 0.0  ;;  %v4972_v43 = vmax.f32 %v4844_v18, 0.0  ;;  %v4067_v39 = vsub.f32 %v10225_v25, %v10202_v53  ;;  %v9136_v47 = vpop.permute.xlu0 %5525 }
 0x404   : > { %v2434_v24 = vadd.f32 %v2433_v48, %v2404_v50  ;;  %v5179_v22 = vmul.f32 %v5051_v31, %v4535_v5  ;;  %v4536_v13 = vmax.f32 %v4408_v6, 0.0  ;;  %v4796_v59 = vand.u32 2147483647, %v4668_v20  ;;  %v10228_v50 = vld [vmem:[#allocation60_spill] sm:$0xff]  ;;  %v2436_v31 = vpop.f32.mrf.mxu1 }
 0x405   : > { %5345 = vmatpush.msra.mxu0 %v5099_v58  ;;  %v5100_v9 = vmul.f32 %v4972_v43, %v4456_v32  ;;  %v4195_v51 = vand.u32 2147483647, %v4067_v39  ;;  %v4583_v16 = vsub.f32 %v10226_v63, %v10204_v36  ;;  %v4147_v1 = vsub.f32 %v10227_v8, %v10202_v53 }
 0x406   : > { %5370 = vmatpush.msra.mxu1 %v5179_v22  ;;  %v4924_v38 = vsub.f32 1.0, %v4796_v59  ;;  %v4663_v27 = vsub.f32 %v10228_v50, %v10204_v36  ;;  %v4068_v10 = vsub.f32 %v10225_v25, %v10206_v52  ;;  %v4584_v62 = vsub.f32 %v10226_v63, %v10207_v35  ;;  %v10229_v22 = vld [vmem:[#allocation79_spill] sm:$0xff]  ;;  %v10230_v63 = vld [vmem:[#allocation80_spill] sm:$0xff] }
 0x407   : > { %5403 = vmatpush.msra.mxu2 %v5100_v9  ;;  %v4323_v46 = vsub.f32 1.0, %v4195_v51  ;;  %v4711_v37 = vand.u32 2147483647, %v4583_v16  ;;  %v4275_v60 = vand.u32 2147483647, %v4147_v1  ;;  %v4148_v4 = vsub.f32 %v10227_v8, %v10206_v52  ;;  %v9147_v8 = vpop.f32.mrf.mxu2 }
 0x408   : > { %v5052_v11 = vmax.f32 %v4924_v38, 0.0  ;;  %v4791_v12 = vand.u32 2147483647, %v4663_v27  ;;  %v4196_v54 = vand.u32 2147483647, %v4068_v10  ;;  %v4664_v44 = vsub.f32 %v10228_v50, %v10207_v35  ;;  %v10231_v27 = vld [vmem:[#allocation64_spill] sm:$0xff] }
 0x409   : > { %v4451_v33 = vmax.f32 %v4323_v46, 0.0  ;;  %v4839_v2 = vsub.f32 1.0, %v4711_v37  ;;  %v4403_v45 = vsub.f32 1.0, %v4275_v60  ;;  %v4712_v28 = vand.u32 2147483647, %v4584_v62  ;;  %v9153_v62 = vpop.f32.mrf.mxu0 }
 0x40a   : > { %v5180_v30 = vmul.f32 %v5052_v11, %v4536_v13  ;;  %v4919_v57 = vsub.f32 1.0, %v4791_v12  ;;  %v4324_v15 = vsub.f32 1.0, %v4196_v54  ;;  %v4276_v48 = vand.u32 2147483647, %v4148_v4 }
 0x40b   : > { %v4967_v7 = vmax.f32 %v4839_v2, 0.0  ;;  %v4531_v29 = vmax.f32 %v4403_v45, 0.0  ;;  %v4840_v18 = vsub.f32 1.0, %v4712_v28  ;;  %v4792_v5 = vand.u32 2147483647, %v4664_v44 }
 0x40c   : > { %v9139_v6 = vadd.f32 %v9136_v47, %v2434_v24  ;;  %5428 = vmatpush.msra.mxu3 %v5180_v30  ;;  %v5047_v20 = vmax.f32 %v4919_v57, 0.0  ;;  %v4452_v58 = vmax.f32 %v4324_v15, 0.0  ;;  %v4404_v32 = vsub.f32 1.0, %v4276_v48  ;;  %v9149_v24 = vpop.f32.mrf.mxu3 }
 0x40d   : > { %v5095_v43 = vmul.f32 %v4967_v7, %v4451_v33  ;;  %v4968_v25 = vmax.f32 %v4840_v18, 0.0  ;;  %v4920_v39 = vsub.f32 1.0, %v4792_v5  ;;  %v4063_v13 = vsub.f32 %v10229_v22, %v10202_v53 }
 0x40e   : > { %v5175_v59 = vmul.f32 %v5047_v20, %v4531_v29  ;;  %v4532_v9 = vmax.f32 %v4404_v32, 0.0  ;;  %v9143_v51 = vadd.f32 %v2436_v31, %v2407_v61  ;;  %v4579_v16 = vsub.f32 %v10230_v63, %v10204_v36  ;;  %v10232_v61 = vld [vmem:[#allocation65_spill] sm:$0xff] }
 0x40f   : > { %5346 = vmatpush.msra.mxu0 %v5095_v43  ;;  %v5096_v1 = vmul.f32 %v4968_v25, %v4452_v58  ;;  %v5048_v38 = vmax.f32 %v4920_v39, 0.0  ;;  %v4191_v50 = vand.u32 2147483647, %v4063_v13  ;;  %v4143_v10 = vsub.f32 %v10231_v27, %v10202_v53  ;;  %v10233_v32 = vld [vmem:[#allocation81_spill] sm:$0xff] }
 0x410   : > { %5371 = vmatpush.msra.mxu1 %v5175_v59  ;;  %v4707_v46 = vand.u32 2147483647, %v4579_v16  ;;  %v4659_v37 = vsub.f32 %v10232_v61, %v10204_v36  ;;  %v4064_v60 = vsub.f32 %v10229_v22, %v10206_v52  ;;  %v4580_v4 = vsub.f32 %v10230_v63, %v10207_v35  ;;  %v10234_v16 = vld [vmem:[#allocation85_spill] sm:$0xff] }
 0x411   : > { %5404 = vmatpush.msra.mxu2 %v5096_v1  ;;  %v5176_v11 = vmul.f32 %v5048_v38, %v4532_v9  ;;  %v4319_v12 = vsub.f32 1.0, %v4191_v50  ;;  %v4271_v54 = vand.u32 2147483647, %v4143_v10  ;;  %v4144_v44 = vsub.f32 %v10231_v27, %v10206_v52  ;;  %v10235_v27 = vld [vmem:[#allocation66_spill] sm:$0xff] }
 0x412   : > { %v4835_v33 = vsub.f32 1.0, %v4707_v46  ;;  %v4787_v2 = vand.u32 2147483647, %v4659_v37  ;;  %v4192_v45 = vand.u32 2147483647, %v4064_v60  ;;  %v4660_v28 = vsub.f32 %v10232_v61, %v10207_v35  ;;  %v10236_v46 = vld [vmem:[#allocation70_spill] sm:$0xff] }
 0x413   : > { %5429 = vmatpush.msra.mxu3 %v5176_v11  ;;  %v4447_v30 = vmax.f32 %v4319_v12, 0.0  ;;  %v4399_v57 = vsub.f32 1.0, %v4271_v54  ;;  %v4708_v15 = vand.u32 2147483647, %v4580_v4  ;;  %v4272_v48 = vand.u32 2147483647, %v4144_v44  ;;  %v9175_v12 = vpop.f32.mrf.mxu2 }
 0x414   : > { %v4963_v7 = vmax.f32 %v4835_v33, 0.0  ;;  %v4915_v29 = vsub.f32 1.0, %v4787_v2  ;;  %v4320_v18 = vsub.f32 1.0, %v4192_v45  ;;  %v4788_v5 = vand.u32 2147483647, %v4660_v28  ;;  %v9177_v54 = vpop.f32.mrf.mxu3  ;;  %v9181_v28 = vpop.f32.mrf.mxu1 }
 0x415   : > { %v4527_v31 = vmax.f32 %v4399_v57, 0.0  ;;  %v4836_v20 = vsub.f32 1.0, %v4708_v15  ;;  %v4400_v58 = vsub.f32 1.0, %v4272_v48  ;;  %v4059_v43 = vsub.f32 %v10233_v32, %v10202_v53 }
 0x416   : > { %v5091_v25 = vmul.f32 %v4963_v7, %v4447_v30  ;;  %v5043_v39 = vmax.f32 %v4915_v29, 0.0  ;;  %v4448_v22 = vmax.f32 %v4320_v18, 0.0  ;;  %v4916_v13 = vsub.f32 1.0, %v4788_v5  ;;  %v9183_v30 = vpop.f32.mrf.mxu0  ;;  %v9188_v29 = vld [vmem:[%s7827_s25 + $0xb8] sm:$0xff] }
 0x417   : > { %v4964_v59 = vmax.f32 %v4836_v20, 0.0  ;;  %v4528_v9 = vmax.f32 %v4400_v58, 0.0  ;;  %v4187_v63 = vand.u32 2147483647, %v4059_v43  ;;  %v4575_v1 = vsub.f32 %v10234_v16, %v10204_v36  ;;  %5272 = vmatmul.f32.gmra.mxu1 %v9188_v29  ;;  %5330 = vmatmul.f32.gmra.mxu3 %v9188_v29 }
 0x418   : > { %5347 = vmatpush.msra.mxu0 %v5091_v25  ;;  %v5171_v38 = vmul.f32 %v5043_v39, %v4527_v31  ;;  %v5044_v50 = vmax.f32 %v4916_v13, 0.0  ;;  %v4139_v10 = vsub.f32 %v10235_v27, %v10202_v53  ;;  %v4655_v61 = vsub.f32 %v10236_v46, %v10204_v36  ;;  %v10237_v25 = vld [vmem:[#allocation86_spill] sm:$0xff] }
 0x419   : > { %v5092_v37 = vmul.f32 %v4964_v59, %v4448_v22  ;;  %v4315_v60 = vsub.f32 1.0, %v4187_v63  ;;  %v4703_v4 = vand.u32 2147483647, %v4575_v1  ;;  %v4060_v11 = vsub.f32 %v10233_v32, %v10206_v52 }
 0x41a   : > { %5372 = vmatpush.msra.mxu1 %v5171_v38  ;;  %v5172_v44 = vmul.f32 %v5044_v50, %v4528_v9  ;;  %v4267_v33 = vand.u32 2147483647, %v4139_v10  ;;  %v4783_v2 = vand.u32 2147483647, %v4655_v61  ;;  %v4576_v45 = vsub.f32 %v10234_v16, %v10207_v35 }
 0x41b   : > { %5405 = vmatpush.msra.mxu2 %v5092_v37  ;;  %v4443_v57 = vmax.f32 %v4315_v60, 0.0  ;;  %v4831_v15 = vsub.f32 1.0, %v4703_v4  ;;  %v4188_v48 = vand.u32 2147483647, %v4060_v11  ;;  %v4140_v7 = vsub.f32 %v10235_v27, %v10206_v52  ;;  %v10239_v4 = vld [vmem:[#allocation71_spill] sm:$0xff] }
 0x41c   : > { %5430 = vmatpush.msra.mxu3 %v5172_v44  ;;  %v4395_v18 = vsub.f32 1.0, %v4267_v33  ;;  %v4911_v5 = vsub.f32 1.0, %v4783_v2  ;;  %v4704_v31 = vand.u32 2147483647, %v4576_v45  ;;  %v4656_v20 = vsub.f32 %v10236_v46, %v10207_v35  ;;  %v10238_v46 = vld [vmem:[#allocation87_spill] sm:$0xff]  ;;  %v10240_v44 = vld [vmem:[#allocation72_spill] sm:$0xff] }
 0x41d   : > { %v4959_v58 = vmax.f32 %v4831_v15, 0.0  ;;  %v4316_v32 = vsub.f32 1.0, %v4188_v48  ;;  %v4268_v43 = vand.u32 2147483647, %v4140_v7  ;;  %v4055_v39 = vsub.f32 %v10237_v25, %v10202_v53 }
 0x41e   : > { %v4523_v22 = vmax.f32 %v4395_v18, 0.0  ;;  %v5039_v13 = vmax.f32 %v4911_v5, 0.0  ;;  %v4832_v59 = vsub.f32 1.0, %v4704_v31  ;;  %v4784_v9 = vand.u32 2147483647, %v4656_v20  ;;  %v9206_v31 = vpop.f32.mrf.mxu2  ;;  %v9208_v20 = vpop.f32.mrf.mxu3 }
 0x41f   : > { %v5087_v63 = vmul.f32 %v4959_v58, %v4443_v57  ;;  %v4444_v16 = vmax.f32 %v4316_v32, 0.0  ;;  %v4396_v1 = vsub.f32 1.0, %v4268_v43  ;;  %v4183_v38 = vand.u32 2147483647, %v4055_v39 }
 0x420   : > { %v5167_v50 = vmul.f32 %v5039_v13, %v4523_v22  ;;  %v4960_v27 = vmax.f32 %v4832_v59, 0.0  ;;  %v4912_v10 = vsub.f32 1.0, %v4784_v9  ;;  %v4571_v61 = vsub.f32 %v10238_v46, %v10204_v36  ;;  %v9212_v22 = vpop.f32.mrf.mxu0  ;;  %v9216_v13 = vpop.permute.xlu2 %5530 }
 0x421   : > { %5348 = vmatpush.msra.mxu0 %v5087_v63  ;;  %v4524_v37 = vmax.f32 %v4396_v1, 0.0  ;;  %v4311_v60 = vsub.f32 1.0, %v4183_v38  ;;  %v4135_v11 = vsub.f32 %v10239_v4, %v10202_v53  ;;  %v4651_v33 = vsub.f32 %v10240_v44, %v10204_v36 }
 0x422   : > { %5373 = vmatpush.msra.mxu1 %v5167_v50  ;;  %v5088_v2 = vmul.f32 %v4960_v27, %v4444_v16  ;;  %v5040_v45 = vmax.f32 %v4912_v10, 0.0  ;;  %v4699_v57 = vand.u32 2147483647, %v4571_v61  ;;  %v4056_v15 = vsub.f32 %v10237_v25, %v10206_v52  ;;  %v9214_v25 = vpop.f32.mrf.mxu1 }
 0x423   : > { %v4439_v48 = vmax.f32 %v4311_v60, 0.0  ;;  %v4263_v7 = vand.u32 2147483647, %v4135_v11  ;;  %v4779_v18 = vand.u32 2147483647, %v4651_v33  ;;  %v4572_v5 = vsub.f32 %v10238_v46, %v10207_v35 }
 0x424   : > { %5406 = vmatpush.msra.mxu2 %v5088_v2  ;;  %v5168_v58 = vmul.f32 %v5040_v45, %v4524_v37  ;;  %v4827_v32 = vsub.f32 1.0, %v4699_v57  ;;  %v4184_v43 = vand.u32 2147483647, %v4056_v15  ;;  %v4136_v39 = vsub.f32 %v10239_v4, %v10206_v52  ;;  %v10241_v15 = vld [vmem:[#allocation77_spill] sm:$0xff] }
 0x425   : > { %v4391_v59 = vsub.f32 1.0, %v4263_v7  ;;  %v4907_v9 = vsub.f32 1.0, %v4779_v18  ;;  %v4700_v63 = vand.u32 2147483647, %v4572_v5  ;;  %v4652_v16 = vsub.f32 %v10240_v44, %v10207_v35 }
 0x426   : > { %v9222_v1 = vadd.f32 %v9216_v13, %v9143_v51  ;;  %5431 = vmatpush.msra.mxu3 %v5168_v58  ;;  %v4955_v38 = vmax.f32 %v4827_v32, 0.0  ;;  %v4312_v50 = vsub.f32 1.0, %v4184_v43  ;;  %v4264_v27 = vand.u32 2147483647, %v4136_v39  ;;  %v6668_v32 = vld [vmem:[%s7827_s25 + $0x80] sm:$0xff]  ;;  %v9239_v43 = vpop.f32.mrf.mxu2  ;;  %v9241_v39 = vpop.f32.mrf.mxu3 }
 0x427   : > { %v4519_v10 = vmax.f32 %v4391_v59, 0.0  ;;  %v5035_v46 = vmax.f32 %v4907_v9, 0.0  ;;  %v4828_v61 = vsub.f32 1.0, %v4700_v63  ;;  %v4780_v37 = vand.u32 2147483647, %v4652_v16 }
 0x428   : > { %v5083_v60 = vmul.f32 %v4955_v38, %v4439_v48  ;;  %v4440_v4 = vmax.f32 %v4312_v50, 0.0  ;;  %v4392_v11 = vsub.f32 1.0, %v4264_v27  ;;  %v9226_v33 = vadd.f32 %v9177_v54, %v9175_v12  ;;  %v9245_v16 = vpop.f32.mrf.mxu0 }
 0x429   : > { %v5163_v44 = vmul.f32 %v5035_v46, %v4519_v10  ;;  %v4956_v2 = vmax.f32 %v4828_v61, 0.0  ;;  %v4908_v51 = vsub.f32 1.0, %v4780_v37  ;;  %v4131_v45 = vsub.f32 %v10208_v21, %v10202_v53 }
 0x42a   : > { %5349 = vmatpush.msra.mxu0 %v5083_v60  ;;  %v4520_v57 = vmax.f32 %v4392_v11, 0.0  ;;  %v4647_v7 = vsub.f32 %v10241_v15, %v10204_v36  ;;  %v4132_v48 = vsub.f32 %v10208_v21, %v10206_v52  ;;  %v4648_v18 = vsub.f32 %v10241_v15, %v10207_v35  ;;  %v9247_v38 = vpop.f32.mrf.mxu1 }
 0x42b   : > { %5374 = vmatpush.msra.mxu1 %v5163_v44  ;;  %v5084_v12 = vmul.f32 %v4956_v2, %v4440_v4  ;;  %v5036_v54 = vmax.f32 %v4908_v51, 0.0  ;;  %v4259_v5 = vand.u32 2147483647, %v4131_v45  ;;  %v2440_v58 = vadd.f32 %v9181_v28, %v9153_v62  ;;  %5350 = vmatmul.f32.vlgmr.msra.gmra.mxu0 %v6668_v32 }
 0x42c   : > { %v4775_v59 = vand.u32 2147483647, %v4647_v7  ;;  %v4260_v9 = vand.u32 2147483647, %v4132_v48  ;;  %v4776_v63 = vand.u32 2147483647, %v4648_v18  ;;  %v4127_v21 = vsub.f32 %v10091_v41, %v10202_v53 }
 0x42d   : > { %5407 = vmatpush.msra.mxu2 %v5084_v12  ;;  %v5164_v50 = vmul.f32 %v5036_v54, %v4520_v57  ;;  %v4387_v27 = vsub.f32 1.0, %v4259_v5  ;;  %v5574_v62 = vadd.f32 %v9078_v19, %v2440_v58  ;;  %v4643_v28 = vsub.f32 %v10169_v56, %v10204_v36 }
 0x42e   : > { %v4903_v10 = vsub.f32 1.0, %v4775_v59  ;;  %v4388_v46 = vsub.f32 1.0, %v4260_v9  ;;  %v4904_v61 = vsub.f32 1.0, %v4776_v63  ;;  %v4255_v37 = vand.u32 2147483647, %v4127_v21  ;;  %5408 = vmatmul.f32.vlgmr.msra.gmra.mxu2 %v6668_v32  ;;  %v6669_v63 = vld [vmem:[%s7827_s25 + $0x90] sm:$0xff]  ;;  %v9261_v21 = vpop.f32.mrf.mxu2 }
 0x42f   : > { %5432 = vmatpush.msra.mxu3 %v5164_v50  ;;  %v4515_v60 = vmax.f32 %v4387_v27, 0.0  ;;  %v5622_v4 = vmax.f32 %v5574_v62, 0.0  ;;  %v4771_v11 = vand.u32 2147483647, %v4643_v28  ;;  %v4128_v44 = vsub.f32 %v10091_v41, %v10206_v52  ;;  %v9263_v50 = vpop.f32.mrf.mxu3 }
 0x430   : > { %v5031_v2 = vmax.f32 %v4903_v10, 0.0  ;;  %v4516_v51 = vmax.f32 %v4388_v46, 0.0  ;;  %v5032_v45 = vmax.f32 %v4904_v61, 0.0  ;;  %v4383_v57 = vsub.f32 1.0, %v4255_v37  ;;  %v9271_v10 = vpop.f32.mrf.mxu0 }
 0x431   : > { %v4899_v15 = vsub.f32 1.0, %v4771_v11  ;;  %v4256_v7 = vand.u32 2147483647, %v4128_v44  ;;  %v4644_v48 = vsub.f32 %v10169_v56, %v10207_v35  ;;  %v4123_v18 = vsub.f32 %v10093_v14, %v10202_v53  ;;  %5667 = vmatpush.msrb.mxu0 %v5622_v4 }
 0x432   : > { %v5159_v12 = vmul.f32 %v5031_v2, %v4515_v60  ;;  %v5160_v54 = vmul.f32 %v5032_v45, %v4516_v51  ;;  %v4511_v5 = vmax.f32 %v4383_v57, 0.0  ;;  %v4639_v41 = vsub.f32 %v10211_v55, %v10204_v36  ;;  %v2552_v46 = vpop.f32.mrf.mxu1 }
 0x433   : > { %v5027_v58 = vmax.f32 %v4899_v15, 0.0  ;;  %v4384_v32 = vsub.f32 1.0, %v4256_v7  ;;  %v4772_v59 = vand.u32 2147483647, %v4644_v48  ;;  %v4251_v9 = vand.u32 2147483647, %v4123_v18  ;;  %5353 = vmatmul.f32.gmra.mxu0 %v6669_v63 }
 0x434   : > { %5375 = vmatpush.msra.mxu1 %v5159_v12  ;;  %5433 = vmatpush.msra.mxu3 %v5160_v54  ;;  %v4767_v56 = vand.u32 2147483647, %v4639_v41  ;;  %v4124_v27 = vsub.f32 %v10093_v14, %v10206_v52  ;;  %v4640_v62 = vsub.f32 %v10211_v55, %v10207_v35  ;;  %v4119_v28 = vsub.f32 %v7861_v3, %v10202_v53 }
 0x435   : > { %v5155_v61 = vmul.f32 %v5027_v58, %v4511_v5  ;;  %v4512_v37 = vmax.f32 %v4384_v32, 0.0  ;;  %v4900_v60 = vsub.f32 1.0, %v4772_v59  ;;  %v4379_v4 = vsub.f32 1.0, %v4251_v9 }
 0x436   : > { %v4895_v11 = vsub.f32 1.0, %v4767_v56  ;;  %v4252_v44 = vand.u32 2147483647, %v4124_v27  ;;  %v4768_v2 = vand.u32 2147483647, %v4640_v62  ;;  %v4635_v51 = vsub.f32 %v7863_v0, %v10204_v36  ;;  %5411 = vmatmul.f32.gmra.mxu2 %v6669_v63  ;;  %v2581_v63 = vpop.f32.mrf.mxu2 }
 0x437   : > { %5376 = vmatpush.msra.mxu1 %v5155_v61  ;;  %v5028_v14 = vmax.f32 %v4900_v60, 0.0  ;;  %v4507_v55 = vmax.f32 %v4379_v4, 0.0  ;;  %v4247_v45 = vand.u32 2147483647, %v4119_v28  ;;  %v4120_v53 = vsub.f32 %v7861_v3, %v10206_v52  ;;  %v2610_v56 = vpop.f32.mrf.mxu3 }
 0x438   : > { %v5023_v57 = vmax.f32 %v4895_v11, 0.0  ;;  %v4380_v15 = vsub.f32 1.0, %v4252_v44  ;;  %v4896_v7 = vsub.f32 1.0, %v4768_v2  ;;  %v4763_v48 = vand.u32 2147483647, %v4635_v51  ;;  %v9285_v61 = vpop.f32.mrf.mxu0 }
 0x439   : > { %v5156_v18 = vmul.f32 %v5028_v14, %v4512_v37  ;;  %v4375_v12 = vsub.f32 1.0, %v4247_v45  ;;  %v4248_v54 = vand.u32 2147483647, %v4120_v53  ;;  %v4636_v5 = vsub.f32 %v7863_v0, %v10207_v35  ;;  %v10243_v45 = vld [vmem:[#allocation20_spill] sm:$0xff] }
 0x43a   : > { %v5151_v41 = vmul.f32 %v5023_v57, %v4507_v55  ;;  %v4508_v36 = vmax.f32 %v4380_v15, 0.0  ;;  %v5024_v58 = vmax.f32 %v4896_v7, 0.0  ;;  %v4891_v32 = vsub.f32 1.0, %v4763_v48  ;;  %v2555_v28 = vpop.f32.mrf.mxu1  ;;  %v10244_v48 = vld [vmem:[#allocation11_spill] sm:$0xff] }
 0x43b   : > { %v2492_v59 = vadd.f32 %v9149_v24, %v9147_v8  ;;  %5434 = vmatpush.msra.mxu3 %v5156_v18  ;;  %v4376_v9 = vsub.f32 1.0, %v4248_v54  ;;  %v4764_v3 = vand.u32 2147483647, %v4636_v5  ;;  %v2498_v52 = vadd.f32 %v9208_v20, %v9206_v31  ;;  %5356 = vmatmul.f32.gmra.mxu0 %v9025_v17 }
 0x43c   : > { %5377 = vmatpush.msra.mxu1 %v5151_v41  ;;  %v5152_v27 = vmul.f32 %v5024_v58, %v4508_v36  ;;  %v4503_v0 = vmax.f32 %v4375_v12, 0.0  ;;  %v5019_v35 = vmax.f32 %v4891_v32, 0.0  ;;  %v5610_v62 = vmax.f32 %v9222_v1, 0.0  ;;  %v10246_v36 = vld [vmem:[#allocation17_spill] sm:$0xff] }
 0x43d   : > { %v4892_v8 = vsub.f32 1.0, %v4764_v3  ;;  %v5575_v24 = vadd.f32 %v9078_v19, %v2498_v52  ;;  %v2489_v37 = vadd.f32 %v9120_v26, %v9118_v40  ;;  %v5563_v31 = vadd.f32 %v9216_v13, %v9226_v33  ;;  %v10242_v26 = vld [vmem:[#allocation12_spill] sm:$0xff]  ;;  %v6670_v33 = vld [vmem:[%s7827_s25 + $0x88] sm:$0xff] }
 0x43e   : > { %5435 = vmatpush.msra.mxu3 %v5152_v27  ;;  %v5147_v20 = vmul.f32 %v5019_v35, %v4503_v0  ;;  %5668 = vmatpush.msrb.mxu0 %v5610_v62  ;;  %v5598_v60 = vmax.f32 %v9139_v6, 0.0  ;;  %v4504_v4 = vmax.f32 %v4376_v9, 0.0  ;;  %v5551_v44 = vadd.f32 %v9136_v47, %v2492_v59  ;;  %v10247_v27 = vld [vmem:[#allocation47_spill] sm:$0xff] }
 0x43f   : > { %v5020_v1 = vmax.f32 %v4892_v8, 0.0  ;;  %v5623_v11 = vmax.f32 %v5575_v24, 0.0  ;;  %5414 = vmatmul.f32.gmra.mxu2 %v9025_v17  ;;  %v5586_v40 = vmax.f32 %v9112_v49, 0.0  ;;  %vm512_vm12 = vcmp.gt.f32.partialorder %v10242_v26, 0.0 }
 0x440   : > { %5378 = vmatpush.msra.mxu1 %v5147_v20  ;;  %5669 = vmatpush.msrb.mxu0 %v5598_v60  ;;  %v2553_v51 = vadd.f32 %v2552_v46, %v9245_v16  ;;  %v5539_v6 = vadd.f32 %v9106_v23, %v2489_v37  ;;  %v5611_v14 = vmax.f32 %v5563_v31, 0.0  ;;  %v2550_v17 = vadd.f32 %v9247_v38, %v9212_v22  ;;  %v2584_v16 = vpop.f32.mrf.mxu2  ;;  %v2613_v46 = vpop.f32.mrf.mxu3 }
 0x441   : > { %v5148_v2 = vmul.f32 %v5020_v1, %v4504_v4  ;;  %5379 = vmatmul.f32.vlgmr.msra.gmra.mxu1 %v6670_v33  ;;  %v2556_v55 = vadd.f32 %v2555_v28, %v9271_v10  ;;  %vm516_vm14 = vcmp.gt.f32.partialorder %v10243_v45, 0.0  ;;  %v2547_v49 = vadd.f32 %v9214_v25, %v9183_v30  ;;  %v9309_v10 = vpop.f32.mrf.mxu0 }
 0x442   : > { %5670 = vmatpush.msrb.mxu0 %v5586_v40  ;;  %5690 = vmatpush.msrb.mxu1 %v5623_v11  ;;  %v2611_v53 = vadd.f32 %v2610_v56, %v2581_v63  ;;  %v5599_v57 = vmax.f32 %v5551_v44, 0.0  ;;  %v5564_v15 = vadd.f32 %v9216_v13, %v2553_v51  ;;  %v2614_v38 = vadd.f32 %v2613_v46, %v2584_v16  ;;  %v9311_v7 = vpop.f32.mrf.mxu1  ;;  %v10248_v11 = vld [vmem:[#allocation46_spill] sm:$0xff] }
 0x443   : > { %5436 = vmatpush.msra.mxu3 %v5148_v2  ;;  %5359 = vmatmul.f32.gmra.mxu0 %v9093_v34  ;;  %v5576_v22 = vadd.f32 %v9078_v19, %v2556_v55  ;;  %vm511_vm15 = vcmp.gt.f32.partialorder %v10244_v48, 0.0  ;;  %v10245_v30 = vmov 0   ;;  %v2608_v18 = vadd.f32 %v9263_v50, %v9261_v21  ;;  %v9333_v50 = vld [vmem:[%s9675_s5] sm:$0xff]  ;;  %v10249_v2 = vld [vmem:[#allocation35_spill] sm:$0xff]  ;;  %v9365_v51 = vld [vmem:[%s9675_s5 + $0x8] sm:$0xff] }
 0x444   : > { %5437 = vmatmul.f32.vlgmr.msra.gmra.mxu3 %v6670_v33  ;;  %5691 = vmatpush.msrb.mxu1 %v5611_v14  ;;  %v782_v25 = vsel %vm512_vm12, 1, %v10245_v30  ;;  %v5552_v12 = vadd.f32 %v9136_v47, %v2550_v17  ;;  %v5587_v54 = vmax.f32 %v5539_v6, 0.0  ;;  %v5577_v41 = vadd.f32 %v9078_v19, %v2614_v38 }
 0x445   : > { %v5624_v5 = vmax.f32 %v5576_v22, 0.0  ;;  %vm515_vm0 = vcmp.gt.f32.partialorder %v10246_v36, 0.0  ;;  %v786_v58 = vsel %vm516_vm14, 1, %v10245_v30  ;;  %v2605_v32 = vadd.f32 %v9241_v39, %v9239_v43  ;;  %v6671_v39 = vld [vmem:[%s7827_s25 + $0x98] sm:$0xff]  ;;  %s6692_s25 = scalar_lea.hbm %s9679_s9, 128 }
 0x446   : > { %5692 = vmatpush.msrb.mxu1 %v5599_v57  ;;  %v5565_v59 = vadd.f32 %v9216_v13, %v2611_v53  ;;  %v5540_v21 = vadd.f32 %v9106_v23, %v2547_v49  ;;  %v5625_v9 = vmax.f32 %v5577_v41, 0.0  ;;  %v5612_v3 = vmax.f32 %v5564_v15, 0.0  ;;  %v10254_v49 = vld [vmem:[#allocation34_spill] sm:$0xff]  ;;  %p6694_p2 = scmp.lt.s32.totalorder %s6692_s25, %s6688_s18 }
 0x447   : > { %5417 = vmatmul.f32.gmra.mxu2 %v9093_v34  ;;  %v781_v43 = vsel %vm511_vm15, 1, %v10245_v30  ;;  %v5553_v34 = vadd.f32 %v9136_v47, %v2608_v18  ;;  %v796_v52 = vrot.slane %v782_v25, 6  ;;  %v785_v63 = vsel %vm515_vm0, 1, %v10245_v30 }
 0x448   : > { %5693 = vmatpush.msrb.mxu1 %v5587_v54  ;;  %5713 = vmatpush.msrb.mxu2 %v5624_v5  ;;  %v5600_v56 = vmax.f32 %v5552_v12, 0.0  ;;  %vm742_vm2 = vcmp.ge.f32.partialorder %v10247_v27, 0.0  ;;  %v797_v0 = vrot.slane %v786_v58, 6  ;;  %v5541_v35 = vadd.f32 %v9106_v23, %v2605_v32  ;;  %v9347_v62 = vpop.f32.mrf.mxu2  ;;  %v9349_v28 = vpop.f32.mrf.mxu3  ;;  %p6695_p3 = por %p6694_p2, %p6693_p1 }
 0x449   : > { %5382 = vmatmul.f32.gmra.mxu1 %v6671_v39  ;;  %5736 = vmatpush.msrb.mxu3 %v5625_v9  ;;  %v5613_v8 = vmax.f32 %v5565_v59, 0.0  ;;  %v746_v24 = vsel %vm742_vm2, 1, %v10245_v30  ;;  %v5588_v37 = vmax.f32 %v5540_v21, 0.0  ;;  %v3824_v31 = vpop.f32.mrf.mxu0  ;;  %vm762_vm3 = vcmp.le.f32.partialorder %v10247_v27, 15.0 }
 0x44a   : > { %5714 = vmatpush.msrb.mxu2 %v5612_v3  ;;  %v9352_v20 = vpop.f32.mrf.mxu1  ;;  %v793_v60 = vrot.slane %v781_v43, 6  ;;  %v5601_v4 = vmax.f32 %v5553_v34, 0.0  ;;  %v794_v1 = vrot.slane %v785_v63, 6  ;;  %vm730_vm4 = vcmp.ge.f32.partialorder %v10248_v11, 0.0  ;;  %p6696_p5 = pnand %p6695_p3, %p6691_p0 }
 0x44b   : > { %6527 = vmatmul.msk.f32.vlgmr.msrb.gmra.mxu0 %vm5648_vm1, %v9333_v50  ;;  %5737 = vmatpush.msrb.mxu3 %v5613_v8  ;;  %vm734_vm5 = vcmp.le.f32.partialorder %v10248_v11, 15.0  ;;  %v750_v44 = vrot.slane %v746_v24, 3  ;;  %v798_v40 = vsel %vm669_vm13, %v796_v52, %v797_v0  ;;  %v5589_v26 = vmax.f32 %v5541_v35, 0.0 }
 0x44c   : > { %5440 = vmatmul.f32.gmra.mxu3 %v6671_v39  ;;  %5715 = vmatpush.msrb.mxu2 %v5600_v56  ;;  %vm741_vm6 = vcmp.ge.f32.partialorder %v10249_v2, 0.0  ;;  %v766_v33 = vsel %vm762_vm3, 1, %v10245_v30  ;;  %vm761_vm7 = vcmp.le.f32.partialorder %v10249_v2, 15.0  ;;  %vm9378_vm9 = vmand %vm730_vm4, %vm734_vm5  ;;  %v795_v45 = vsel %vm669_vm13, %v793_v60, %v794_v1 }
 0x44d   : > { %5738 = vmatpush.msrb.mxu3 %v5601_v4  ;;  %v745_v6 = vsel %vm741_vm6, 1, %v10245_v30  ;;  %vm9369_vm8 = vcmp.ne.s32.totalorder %v750_v44, 0  ;;  %v770_v17 = vrot.slane %v766_v33, 3  ;;  %vm729_vm11 = vcmp.ge.f32.partialorder %v10254_v49, 0.0 }
 0x44e   : > { %5716 = vmatpush.msrb.mxu2 %v5588_v37  ;;  %vm733_vm10 = vcmp.le.f32.partialorder %v10254_v49, 15.0  ;;  %v749_v53 = vrot.slane %v745_v6, 3  ;;  %vm758_vm12 = vmand %vm9378_vm9, %vm9369_vm8  ;;  %vm802_vm14 = vcmp.ne.s32.totalorder %v798_v40, 0  ;;  %v765_v15 = vsel %vm761_vm7, 1, %v10245_v30 }
 0x44f   : > { %6531 = vmatmul.msk.f32.vlgmr.msrb.gmra.mxu2 %vm5648_vm1, %v9333_v50  ;;  %5739 = vmatpush.msrb.mxu3 %v5589_v26  ;;  %vm9391_vm15 = vmand %vm729_vm11, %vm733_vm10  ;;  %vm774_vm0 = vcmp.ne.s32.totalorder %v770_v17, 0  ;;  %v769_v48 = vrot.slane %v765_v15, 3  ;;  %vm801_vm4 = vcmp.ne.s32.totalorder %v795_v45, 0  ;;  %vm6206_vm9 = vcmask 1042432  }
 0x450   : > { %v3879_v16 = vpop.f32.mrf.mxu2  ;;  %v3908_v46 = vpop.f32.mrf.mxu3  ;;  %vm753_vm2 = vcmp.ne.s32.totalorder %v749_v53, 0  ;;  %vm778_vm3 = vmand %vm758_vm12, %vm774_vm0  ;;  %v6753_v25 = vmov 0.0   ;;  %v3851_v3 = vadd.f32 %v9352_v20, %v9309_v10  ;;  %v3848_v52 = vadd.f32 %v9311_v7, %v9285_v61 }
 0x451   : > { %5385 = vmatmul.f32.gmra.mxu1 %v9096_v42  ;;  %v3827_v22 = vpop.f32.mrf.mxu0  ;;  %vm757_vm5 = vmand %vm9391_vm15, %vm753_vm2  ;;  %vm773_vm6 = vcmp.ne.s32.totalorder %v769_v48, 0  ;;  %v3909_v60 = vadd.f32 %v3908_v46, %v3879_v16  ;;  %v3906_v2 = vadd.f32 %v9349_v28, %v9347_v62  ;;  %vm5962_vm10 = vcmask 130048  }
 0x452   : > { %v3853_v38 = vpop.f32.mrf.mxu1  ;;  %vm806_vm8 = vmand %vm778_vm3, %vm802_vm14  ;;  %v5542_v37 = vadd.f32 %v9106_v23, %v3848_v52 }
 0x453   : > { %6528 = vmatmul.msk.f32.gmra.mxu0 %vm5648_vm1, %v9365_v51  ;;  %vm777_vm7 = vmand %vm757_vm5, %vm773_vm6  ;;  %v3854_v41 = vadd.f32 %v3853_v38, %v3824_v31  ;;  %v5555_v45 = vadd.f32 %v9136_v47, %v3909_v60  ;;  %v5543_v53 = vadd.f32 %v9106_v23, %v3906_v2 }
 0x454   : > { %5443 = vmatmul.f32.gmra.mxu3 %v9096_v42  ;;  %v9405_v42 = vsel %vm806_vm8, 1.0, %v6753_v25  ;;  %vm805_vm11 = vmand %vm777_vm7, %vm801_vm4  ;;  %v5590_v17 = vmax.f32 %v5542_v37, 0.0 }
 0x455   : > { %v6228_v18 = vsel %vm6206_vm9, %v9405_v42, 0.0  ;;  %v9411_v12 = vsel %vm805_vm11, 1.0, %v6753_v25  ;;  %v5566_v63 = vadd.f32 %v9216_v13, %v3854_v41  ;;  %v5603_v46 = vmax.f32 %v5555_v45, 0.0 }
 0x456   : > { %v6221_v54 = vsel %vm6206_vm9, %v9411_v12, 0.0  ;;  %v6229_v5 = vrot.slane %v6228_v18, 4  ;;  %v5591_v38 = vmax.f32 %v5543_v53, 0.0 }
 0x457   : > { %6532 = vmatmul.msk.f32.gmra.mxu2 %vm5648_vm1, %v9365_v51  ;;  %v6222_v32 = vrot.slane %v6221_v54, 4  ;;  %v5614_v31 = vmax.f32 %v5566_v63, 0.0 }
 0x458   : > { %v3882_v36 = vpop.f32.mrf.mxu2  ;;  %v3911_v58 = vpop.f32.mrf.mxu3  ;;  %v6230_v9 = vadd.f32 %v6229_v5, %v6228_v18 }
 0x459   : > { %5388 = vmatmul.f32.gmra.mxu1 %v9188_v29  ;;  %v9416_v21 = vpop.f32.mrf.mxu0  ;;  %v6223_v39 = vadd.f32 %v6222_v32, %v6221_v54  ;;  %v3912_v10 = vadd.f32 %v3911_v58, %v3882_v36 }
 0x45a   : > { %v3856_v59 = vpop.f32.mrf.mxu1  ;;  %v6231_v34 = vrot.slane %v6230_v9, 2 }
 0x45b   : > { %v3857_v43 = vadd.f32 %v3856_v59, %v3827_v22  ;;  %v6224_v27 = vrot.slane %v6223_v39, 2  ;;  %v5567_v33 = vadd.f32 %v9216_v13, %v3912_v10 }
 0x45c   : > { %5446 = vmatmul.f32.gmra.mxu3 %v9188_v29  ;;  %v6232_v0 = vadd.f32 %v6231_v34, %v6230_v9  ;;  %v5554_v29 = vadd.f32 %v9136_v47, %v3851_v3 }
 0x45d   : > { %v5578_v56 = vadd.f32 %v9078_v19, %v3857_v43  ;;  %v6225_v8 = vadd.f32 %v6224_v27, %v6223_v39  ;;  %v5615_v62 = vmax.f32 %v5567_v33, 0.0 }
 0x45e   : > { %v6233_v24 = vrot.slane %v6232_v0, 1  ;;  %v5602_v40 = vmax.f32 %v5554_v29, 0.0 }
 0x45f   : > { %v5626_v35 = vmax.f32 %v5578_v56, 0.0  ;;  %v6226_v7 = vrot.slane %v6225_v8, 1 }
 0x460   : > { %v3885_v20 = vpop.f32.mrf.mxu2  ;;  %v3914_v61 = vpop.f32.mrf.mxu3  ;;  %v6234_v44 = vadd.f32 %v6233_v24, %v6232_v0 }
 0x461   : > { %6529 = vmatmul.msk.f32.vlgmr.msrb.gmra.mxu1 %vm5648_vm1, %v9333_v50  ;;  %5759 = vmatpush.msra.mxu0 %v5626_v35  ;;  %v3915_v4 = vadd.f32 %v3914_v61, %v3885_v20  ;;  %v3937_v1 = vpop.f32.mrf.mxu0  ;;  %v6227_v26 = vadd.f32 %v6226_v7, %v6225_v8 }
 0x462   : > { %v3963_v11 = vpop.f32.mrf.mxu1  ;;  %v6238_v14 = vadd.f32 1e-08, %v6234_v44 }
 0x463   : > { %5760 = vmatpush.msra.mxu0 %v5614_v31  ;;  %v5579_v6 = vadd.f32 %v9078_v19, %v3915_v4  ;;  %v6237_v55 = vadd.f32 1e-08, %v6227_v26  ;;  %v3964_v39 = vadd.f32 %v3963_v11, %v9416_v21 }
 0x464   : > { %6533 = vmatmul.msk.f32.vlgmr.msrb.gmra.mxu3 %vm5648_vm1, %v9333_v50  ;;  %6649 = vrcp.f32 %v6238_v14 }
 0x465   : > { %5761 = vmatpush.msra.mxu0 %v5602_v40  ;;  %v5627_v49 = vmax.f32 %v5579_v6, 0.0  ;;  %6651 = vrcp.f32 %v6237_v55  ;;  %v5544_v0 = vadd.f32 %v9106_v23, %v3964_v39 }
 0x467   : > { %5762 = vmatpush.msra.mxu0 %v5590_v17  ;;  %5782 = vmatpush.msra.mxu1 %v5627_v49  ;;  %v5592_v7 = vmax.f32 %v5544_v0, 0.0 }
 0x468   : > { %6535 = vmatmul.msk.f32.vlgmr.msra.gmra.mxu0 %vm5648_vm1, %v9333_v50  ;;  %v3992_v28 = vpop.f32.mrf.mxu2  ;;  %v4021_v16 = vpop.f32.mrf.mxu3 }
 0x469   : > { %6530 = vmatmul.msk.f32.gmra.mxu1 %vm5648_vm1, %v9365_v51  ;;  %v3940_v57 = vpop.f32.mrf.mxu0  ;;  %v4022_v21 = vadd.f32 %v4021_v16, %v3992_v28 }
 0x46a   : > { %5783 = vmatpush.msra.mxu1 %v5615_v62  ;;  %v3966_v15 = vpop.f32.mrf.mxu1  ;;  %v6650_v22 = vpop.eup %6649 }
 0x46b   : > { %v6652_v48 = vpop.eup %6651  ;;  %v9443_v18 = vmul.f32 %v6650_v22, %v9405_v42  ;;  %v3967_v3 = vadd.f32 %v3966_v15, %v3937_v1  ;;  %v5545_v11 = vadd.f32 %v9106_v23, %v4022_v21 }
 0x46c   : > { %6534 = vmatmul.msk.f32.gmra.mxu3 %vm5648_vm1, %v9365_v51  ;;  %5784 = vmatpush.msra.mxu1 %v5603_v46  ;;  %v9446_v54 = vmul.f32 %v6652_v48, %v9411_v12 }
 0x46d   : > { %v5556_v63 = vadd.f32 %v9136_v47, %v3967_v3  ;;  %v5593_v6 = vmax.f32 %v5545_v11, 0.0  ;;  %v9487_v11 = vpop.permute.xlu2 %5645 }
 0x46e   : > { %5785 = vmatpush.msra.mxu1 %v5591_v38 }
 0x46f   : > { %v5604_v31 = vmax.f32 %v5556_v63, 0.0 }
 0x470   : > { %6536 = vmatmul.msk.f32.gmra.mxu0 %vm5648_vm1, %v9365_v51  ;;  %v3995_v5 = vpop.f32.mrf.mxu2  ;;  %v4024_v41 = vpop.f32.mrf.mxu3 }
 0x471   : > { %6537 = vmatmul.msk.f32.vlgmr.msra.gmra.mxu1 %vm5648_vm1, %v9333_v50  ;;  %v3943_v36 = vpop.f32.mrf.mxu0  ;;  %v4025_v10 = vadd.f32 %v4024_v41, %v3995_v5 }
 0x472   : > { %v3969_v58 = vpop.f32.mrf.mxu1 }
 0x473   : > { %v3970_v32 = vadd.f32 %v3969_v58, %v3940_v57  ;;  %v5557_v60 = vadd.f32 %v9136_v47, %v4025_v10 }
 0x475   : > { %v5568_v34 = vadd.f32 %v9216_v13, %v3970_v32  ;;  %v5605_v2 = vmax.f32 %v5557_v60, 0.0 }
 0x477   : > { %v5616_v29 = vmax.f32 %v5568_v34, 0.0 }
 0x478   : > { %v3998_v42 = vpop.f32.mrf.mxu2  ;;  %v4027_v59 = vpop.f32.mrf.mxu3 }
 0x479   : > { %6538 = vmatmul.msk.f32.gmra.mxu1 %vm5648_vm1, %v9365_v51  ;;  %v5235_v43 = vpop.f32.mrf.mxu0  ;;  %v4028_v27 = vadd.f32 %v4027_v59, %v3998_v42 }
 0x47a   : > { %v3972_v9 = vpop.f32.mrf.mxu1 }
 0x47b   : > { %v3973_v12 = vadd.f32 %v3972_v9, %v3943_v36  ;;  %v5569_v20 = vadd.f32 %v9216_v13, %v4028_v27 }
 0x47d   : > { %v5580_v52 = vadd.f32 %v9078_v19, %v3973_v12  ;;  %v5617_v44 = vmax.f32 %v5569_v20, 0.0 }
 0x47f   : > { %v5628_v56 = vmax.f32 %v5580_v52, 0.0 }
 0x480   : > { %v4001_v35 = vpop.f32.mrf.mxu2  ;;  %v4030_v8 = vpop.f32.mrf.mxu3 }
 0x481   : > { %5805 = vmatpush.msra.mxu2 %v5628_v56  ;;  %v4031_v24 = vadd.f32 %v4030_v8, %v4001_v35  ;;  %v5238_v1 = vpop.f32.mrf.mxu0 }
 0x482   : > { %v5264_v37 = vpop.f32.mrf.mxu1 }
 0x483   : > { %5806 = vmatpush.msra.mxu2 %v5616_v29  ;;  %v5581_v61 = vadd.f32 %v9078_v19, %v4031_v24  ;;  %v5265_v15 = vadd.f32 %v5264_v37, %v5235_v43 }
 0x485   : > { %5807 = vmatpush.msra.mxu2 %v5604_v31  ;;  %v5629_v4 = vmax.f32 %v5581_v61, 0.0  ;;  %v5546_v36 = vadd.f32 %v9106_v23, %v5265_v15 }
 0x487   : > { %5808 = vmatpush.msra.mxu2 %v5592_v7  ;;  %5828 = vmatpush.msra.mxu3 %v5629_v4  ;;  %v5594_v34 = vmax.f32 %v5546_v36, 0.0 }
 0x488   : > { %6539 = vmatmul.msk.f32.vlgmr.msra.gmra.mxu2 %vm5648_vm1, %v9333_v50  ;;  %v5293_v40 = vpop.f32.mrf.mxu2  ;;  %v5322_v26 = vpop.f32.mrf.mxu3 }
 0x489   : > { %5829 = vmatpush.msra.mxu3 %v5617_v44  ;;  %v5241_v14 = vpop.f32.mrf.mxu0  ;;  %v5323_v12 = vadd.f32 %v5322_v26, %v5293_v40  ;;  %v9489_v40 = vpop.permute.xlu0 %5640 }
 0x48a   : > { %v5267_v33 = vpop.f32.mrf.mxu1 }
 0x48b   : > { %5830 = vmatpush.msra.mxu3 %v5605_v2  ;;  %v5268_v46 = vadd.f32 %v5267_v33, %v5238_v1  ;;  %v5547_v27 = vadd.f32 %v9106_v23, %v5323_v12 }
 0x48d   : > { %5831 = vmatpush.msra.mxu3 %v5593_v6  ;;  %v5558_v48 = vadd.f32 %v9136_v47, %v5268_v46  ;;  %v5595_v35 = vmax.f32 %v5547_v27, 0.0 }
 0x48e   : > { %6541 = vmatmul.msk.f32.vlgmr.msra.gmra.mxu3 %vm5648_vm1, %v9333_v50 }
 0x48f   : > { %v5606_v3 = vmax.f32 %v5558_v48, 0.0 }
 0x490   : > { %6540 = vmatmul.msk.f32.gmra.mxu2 %vm5648_vm1, %v9365_v51  ;;  %v5296_v17 = vpop.f32.mrf.mxu2  ;;  %v5325_v55 = vpop.f32.mrf.mxu3 }
 0x491   : > { %v5244_v28 = vpop.f32.mrf.mxu0  ;;  %v5326_v59 = vadd.f32 %v5325_v55, %v5296_v17 }
 0x492   : > { %v5270_v45 = vpop.f32.mrf.mxu1 }
 0x493   : > { %v5271_v49 = vadd.f32 %v5270_v45, %v5241_v14  ;;  %v5559_v52 = vadd.f32 %v9136_v47, %v5326_v59  ;;  %v9496_v45 = vld [vmem:[%s9677_s7] sm:$0xff] }
 0x495   : > { %v5570_v22 = vadd.f32 %v9216_v13, %v5271_v49  ;;  %v5607_v29 = vmax.f32 %v5559_v52, 0.0 }
 0x496   : > { %6542 = vmatmul.msk.f32.gmra.mxu3 %vm5648_vm1, %v9365_v51 }
 0x497   : > { %v5618_v58 = vmax.f32 %v5570_v22, 0.0 }
 0x498   : > { %v5299_v53 = vpop.f32.mrf.mxu2  ;;  %v5328_v62 = vpop.f32.mrf.mxu3 }
 0x499   : > { %v5329_v41 = vadd.f32 %v5328_v62, %v5299_v53 }
 0x49a   : > { %v5273_v16 = vpop.f32.mrf.mxu1 }
 0x49b   : > { %v5274_v57 = vadd.f32 %v5273_v16, %v5244_v28  ;;  %v5571_v43 = vadd.f32 %v9216_v13, %v5329_v41 }
 0x49d   : > { %v5582_v38 = vadd.f32 %v9078_v19, %v5274_v57  ;;  %v5619_v0 = vmax.f32 %v5571_v43, 0.0 }
 0x49f   : > { %v5630_v5 = vmax.f32 %v5582_v38, 0.0 }
 0x4a0   : > { %v5302_v32 = vpop.f32.mrf.mxu2  ;;  %v5331_v42 = vpop.f32.mrf.mxu3 }
 0x4a1   : > { %5851 = vmatpush.msrb.mxu0 %v5630_v5  ;;  %v5332_v9 = vadd.f32 %v5331_v42, %v5302_v32 }
 0x4a3   : > { %5852 = vmatpush.msrb.mxu0 %v5618_v58  ;;  %v5583_v39 = vadd.f32 %v9078_v19, %v5332_v9 }
 0x4a5   : > { %5853 = vmatpush.msrb.mxu0 %v5606_v3  ;;  %v5631_v56 = vmax.f32 %v5583_v39, 0.0 }
 0x4a7   : > { %5854 = vmatpush.msrb.mxu0 %v5594_v34  ;;  %5874 = vmatpush.msrb.mxu1 %v5631_v56 }
 0x4a8   : > { %v5351_v63 = vpop.f32.mrf.mxu0  ;;  %6543 = vmatmul.msk.f32.vlgmr.msrb.gmra.mxu0 %vm5648_vm1, %v9333_v50 }
 0x4a9   : > { %5875 = vmatpush.msrb.mxu1 %v5619_v0 }
 0x4ab   : > { %5876 = vmatpush.msrb.mxu1 %v5607_v29 }
 0x4ad   : > { %5877 = vmatpush.msrb.mxu1 %v5595_v35 }
 0x4ae   : > { %6545 = vmatmul.msk.f32.vlgmr.msrb.gmra.mxu1 %vm5648_vm1, %v9333_v50 }
 0x4b0   : > { %v5354_v8 = vpop.f32.mrf.mxu0  ;;  %6544 = vmatmul.msk.f32.gmra.mxu0 %vm5648_vm1, %v9365_v51 }
 0x4b1   : > { %v5409_v10 = vpop.f32.mrf.mxu2 }
 0x4b6   : > { %6546 = vmatmul.msk.f32.gmra.mxu1 %vm5648_vm1, %v9365_v51 }
 0x4b8   : > { %v5357_v24 = vpop.f32.mrf.mxu0 }
 0x4b9   : > { %v5412_v37 = vpop.f32.mrf.mxu2 }
 0x4be   : > { %v5380_v31 = vpop.f32.mrf.mxu1 }
 0x4bf   : > { %v5381_v16 = vadd.f32 %v5380_v31, %v5351_v63 }
 0x4c0   : > { %v5360_v21 = vpop.f32.mrf.mxu0 }
 0x4c1   : > { %v5548_v48 = vadd.f32 %v9106_v23, %v5381_v16 }
 0x4c2   : > { %v5415_v20 = vpop.f32.mrf.mxu2 }
 0x4c3   : > { %v5596_v3 = vmax.f32 %v5548_v48, 0.0 }
 0x4c6   : > { %v5383_v61 = vpop.f32.mrf.mxu1 }
 0x4c7   : > { %v5438_v7 = vpop.f32.mrf.mxu3  ;;  %v5384_v53 = vadd.f32 %v5383_v61, %v5354_v8 }
 0x4c8   : > { %v5672_v60 = vpop.f32.mrf.mxu0  ;;  %v5439_v39 = vadd.f32 %v5438_v7, %v5409_v10 }
 0x4c9   : > { %v5673_v2 = vadd.f32 %v5672_v60, %v9489_v40  ;;  %v5560_v22 = vadd.f32 %v9136_v47, %v5384_v53 }
 0x4ca   : > { %v5418_v4 = vpop.f32.mrf.mxu2  ;;  %v5549_v0 = vadd.f32 %v9106_v23, %v5439_v39 }
 0x4cb   : > { %v5931_v55 = vmax.f32 %v5673_v2, 0.0  ;;  %v5608_v32 = vmax.f32 %v5560_v22, 0.0 }
 0x4ce   : > { %v5386_v1 = vpop.f32.mrf.mxu1 }
 0x4cf   : > { %v5441_v44 = vpop.f32.mrf.mxu3  ;;  %v5387_v17 = vadd.f32 %v5386_v1, %v5357_v24 }
 0x4d0   : > { %v5675_v26 = vpop.f32.mrf.mxu0  ;;  %v5442_v59 = vadd.f32 %v5441_v44, %v5412_v37  ;;  %v5597_v37 = vmax.f32 %v5549_v0, 0.0 }
 0x4d1   : > { %v5676_v33 = vadd.f32 %v5675_v26, %v9487_v11  ;;  %v5572_v46 = vadd.f32 %v9216_v13, %v5387_v17 }
 0x4d2   : > { %v5718_v6 = vpop.f32.mrf.mxu2  ;;  %v5561_v63 = vadd.f32 %v9136_v47, %v5442_v59 }
 0x4d3   : > { %v5943_v14 = vmax.f32 %v5676_v33, 0.0  ;;  %v5620_v5 = vmax.f32 %v5572_v46, 0.0  ;;  %v5719_v12 = vadd.f32 %v5718_v6, %v9489_v40 }
 0x4d4   : > { %v5609_v24 = vmax.f32 %v5561_v63, 0.0  ;;  %v10259_v63 = vld [vmem:[#allocation13_spill] sm:$0xff] }
 0x4d5   : > { %5980 = vmatpush.msra.mxu0 %v5943_v14  ;;  %v5933_v27 = vmax.f32 %v5719_v12, 0.0  ;;  %vm513_vm14 = vcmp.gt.f32.partialorder %v10259_v63, 0.0 }
 0x4d6   : > { %v5389_v49 = vpop.f32.mrf.mxu1 }
 0x4d7   : > { %v5444_v62 = vpop.f32.mrf.mxu3  ;;  %v5390_v28 = vadd.f32 %v5389_v49, %v5360_v21  ;;  %5981 = vmatpush.msra.mxu0 %v5931_v55 }
 0x4d8   : > { %6551 = vmatmul.msk.f32.vlgmr.msra.gmra.mxu0 %vm5962_vm10, %v9496_v45  ;;  %v5445_v36 = vadd.f32 %v5444_v62, %v5415_v20 }
 0x4d9   : > { %v5584_v57 = vadd.f32 %v9078_v19, %v5390_v28 }
 0x4da   : > { %v5721_v15 = vpop.f32.mrf.mxu2  ;;  %v5573_v34 = vadd.f32 %v9216_v13, %v5445_v36 }
 0x4db   : > { %v5632_v38 = vmax.f32 %v5584_v57, 0.0  ;;  %v5722_v41 = vadd.f32 %v5721_v15, %v9487_v11 }
 0x4dc   : > { %v5621_v29 = vmax.f32 %v5573_v34, 0.0  ;;  %v10257_v34 = vld [vmem:[#allocation24_spill] sm:$0xff] }
 0x4dd   : > { %5897 = vmatpush.msrb.mxu2 %v5632_v38  ;;  %v5945_v43 = vmax.f32 %v5722_v41, 0.0  ;;  %vm759_vm15 = vcmp.le.f32.partialorder %v10257_v34, 15.0 }
 0x4de   : > { %v5695_v58 = vpop.f32.mrf.mxu1 }
 0x4df   : > { %v5447_v42 = vpop.f32.mrf.mxu3  ;;  %5898 = vmatpush.msrb.mxu2 %v5620_v5  ;;  %v5696_v8 = vadd.f32 %v5695_v58, %v9489_v40 }
 0x4e0   : > { %v5448_v9 = vadd.f32 %v5447_v42, %v5418_v4 }
 0x4e1   : > { %5899 = vmatpush.msrb.mxu2 %v5608_v32  ;;  %v5932_v31 = vmax.f32 %v5696_v8, 0.0 }
 0x4e2   : > { %v5585_v52 = vadd.f32 %v9078_v19, %v5448_v9 }
 0x4e3   : > { %5900 = vmatpush.msrb.mxu2 %v5596_v3 }
 0x4e4   : > { %v5633_v56 = vmax.f32 %v5585_v52, 0.0  ;;  %6547 = vmatmul.msk.f32.vlgmr.msrb.gmra.mxu2 %vm5648_vm1, %v9333_v50  ;;  %v10258_v52 = vld [vmem:[#allocation9_spill] sm:$0xff] }
 0x4e5   : > { %6020 = vmatpush.msra.mxu2 %v5945_v43  ;;  %v5764_v19 = vpop.f32.mrf.mxu0  ;;  %vm509_vm12 = vcmp.gt.f32.partialorder %v10258_v52, 0.0 }
 0x4e6   : > { %5920 = vmatpush.msrb.mxu3 %v5633_v56  ;;  %v5698_v35 = vpop.f32.mrf.mxu1  ;;  %v5765_v4 = vadd.f32 %v5764_v19, %v9489_v40  ;;  %v779_v8 = vsel %vm509_vm12, 1, %v10245_v30 }
 0x4e7   : > { %v5699_v13 = vadd.f32 %v5698_v35, %v9487_v11  ;;  %v5741_v10 = vpop.f32.mrf.mxu3  ;;  %6021 = vmatpush.msra.mxu2 %v5933_v27 }
 0x4e8   : > { %5921 = vmatpush.msrb.mxu3 %v5621_v29  ;;  %v5742_v61 = vadd.f32 %v5741_v10, %v9489_v40  ;;  %v763_v10 = vsel %vm759_vm15, 1, %v10245_v30 }
 0x4e9   : > { %v5944_v47 = vmax.f32 %v5699_v13, 0.0  ;;  %v783_v13 = vsel %vm513_vm14, 1, %v10245_v30 }
 0x4ea   : > { %5922 = vmatpush.msrb.mxu3 %v5609_v24  ;;  %v5934_v26 = vmax.f32 %v5742_v61, 0.0  ;;  %v10262_v61 = vld [vmem:[#allocation10_spill] sm:$0xff] }
 0x4eb   : > { %6000 = vmatpush.msra.mxu1 %v5944_v47  ;;  %v10260_v47 = vld [vmem:[#allocation23_spill] sm:$0xff]  ;;  %vm510_vm4 = vcmp.gt.f32.partialorder %v10262_v61, 0.0 }
 0x4ec   : > { %5923 = vmatpush.msrb.mxu3 %v5597_v37  ;;  %6548 = vmatmul.msk.f32.gmra.mxu2 %vm5648_vm1, %v9365_v51  ;;  %vm727_vm0 = vcmp.ge.f32.partialorder %v10260_v47, 0.0  ;;  %vm731_vm2 = vcmp.le.f32.partialorder %v10260_v47, 15.0  ;;  %v10261_v37 = vld [vmem:[#allocation32_spill] sm:$0xff] }
 0x4ed   : > { %6549 = vmatmul.msk.f32.vlgmr.msrb.gmra.mxu3 %vm5648_vm1, %v9333_v50  ;;  %6001 = vmatpush.msra.mxu1 %v5932_v31  ;;  %v5767_v20 = vpop.f32.mrf.mxu0  ;;  %v5935_v50 = vmax.f32 %v5765_v4, 0.0  ;;  %vm740_vm3 = vcmp.ge.f32.partialorder %v10261_v37, 0.0  ;;  %v787_v31 = vrot.slane %v779_v8, 6  ;;  %vm9567_vm6 = vmand %vm727_vm0, %vm731_vm2  ;;  %vm760_vm7 = vcmp.le.f32.partialorder %v10261_v37, 15.0 }
 0x4ee   : > { %6552 = vmatmul.msk.f32.vlgmr.msra.gmra.mxu1 %vm5962_vm10, %v9496_v45  ;;  %v5787_v23 = vpop.f32.mrf.mxu1  ;;  %v5768_v60 = vadd.f32 %v5767_v20, %v9487_v11 }
 0x4ef   : > { %v5744_v21 = vpop.f32.mrf.mxu3  ;;  %v5788_v33 = vadd.f32 %v5787_v23, %v9489_v40  ;;  %v788_v23 = vrot.slane %v783_v13, 6 }
 0x4f0   : > { %v5745_v7 = vadd.f32 %v5744_v21, %v9487_v11  ;;  %v5947_v44 = vmax.f32 %v5768_v60, 0.0  ;;  %v767_v21 = vrot.slane %v763_v10, 3 }
 0x4f1   : > { %v5936_v17 = vmax.f32 %v5788_v33, 0.0 }
 0x4f2   : > { %v5946_v1 = vmax.f32 %v5745_v7, 0.0  ;;  %6060 = vmatpush.msrb.mxu0 %v5947_v44  ;;  %v10263_v7 = vld [vmem:[#allocation16_spill] sm:$0xff]  ;;  %v780_v44 = vsel %vm510_vm4, 1, %v10245_v30  ;;  %vm771_vm11 = vcmp.ne.s32.totalorder %v767_v21, 0 }
 0x4f3   : > { %vm514_vm5 = vcmp.gt.f32.partialorder %v10263_v7, 0.0 }
 0x4f4   : > { %6553 = vmatmul.msk.f32.vlgmr.msra.gmra.mxu2 %vm5962_vm10, %v9496_v45  ;;  %6040 = vmatpush.msra.mxu3 %v5946_v1  ;;  %v744_v1 = vsel %vm740_vm3, 1, %v10245_v30 }
 0x4f5   : > { %6550 = vmatmul.msk.f32.gmra.mxu3 %vm5648_vm1, %v9365_v51  ;;  %6061 = vmatpush.msrb.mxu0 %v5935_v50  ;;  %vm739_vm1 = vcmp.ge.f32.partialorder %v10257_v34, 0.0  ;;  %v784_v50 = vsel %vm514_vm5, 1, %v10245_v30  ;;  %v748_v33 = vrot.slane %v744_v1, 3  ;;  %v9598_v34 = vpop.permute.xlu1 %5959 }
 0x4f6   : > { %6041 = vmatpush.msra.mxu3 %v5934_v26  ;;  %v5790_v2 = vpop.f32.mrf.mxu1  ;;  %6555 = vmatmul.msk.f32.vlgmr.msrb.gmra.mxu0 %vm5962_vm10, %v9496_v45  ;;  %v743_v56 = vsel %vm739_vm1, 1, %v10245_v30  ;;  %v789_v26 = vsel %vm669_vm13, %v787_v31, %v788_v23 }
 0x4f7   : > { %v5791_v6 = vadd.f32 %v5790_v2, %v9487_v11  ;;  %v747_v19 = vrot.slane %v743_v56, 3  ;;  %vm799_vm15 = vcmp.ne.s32.totalorder %v789_v26, 0  ;;  %vm752_vm3 = vcmp.ne.s32.totalorder %v748_v33, 0 }
 0x4f9   : > { %v5948_v14 = vmax.f32 %v5791_v6, 0.0  ;;  %vm9571_vm8 = vcmp.ne.s32.totalorder %v747_v19, 0  ;;  %v764_v6 = vsel %vm760_vm7, 1, %v10245_v30 }
 0x4fa   : > { %vm755_vm1 = vmand %vm9567_vm6, %vm9571_vm8 }
 0x4fb   : > { %6080 = vmatpush.msrb.mxu1 %v5948_v14  ;;  %vm775_vm0 = vmand %vm755_vm1, %vm771_vm11 }
 0x4fc   : > { %vm803_vm4 = vmand %vm775_vm0, %vm799_vm15 }
 0x4fd   : > { %6554 = vmatmul.msk.f32.vlgmr.msra.gmra.mxu3 %vm5962_vm10, %v9496_v45  ;;  %6081 = vmatpush.msrb.mxu1 %v5936_v17 }
 0x4fe   : > { %6556 = vmatmul.msk.f32.vlgmr.msrb.gmra.mxu1 %vm5962_vm10, %v9496_v45 }
 0x50b   : > { %v5810_v51 = vpop.f32.mrf.mxu2 }
 0x50c   : > { %v5811_v53 = vadd.f32 %v5810_v51, %v9489_v40  ;;  %v10268_v51 = vld [vmem:[#allocation31_spill] sm:$0xff] }
 0x50d   : > { %vm728_vm12 = vcmp.ge.f32.partialorder %v10268_v51, 0.0  ;;  %vm732_vm14 = vcmp.le.f32.partialorder %v10268_v51, 15.0 }
 0x50e   : > { %v5937_v16 = vmax.f32 %v5811_v53, 0.0  ;;  %v791_v53 = vrot.slane %v784_v50, 6  ;;  %vm736_vm2 = vmand %vm728_vm12, %vm732_vm14 }
 0x50f   : > { %vm756_vm5 = vmand %vm736_vm2, %vm752_vm3 }
 0x511   : > { %v5833_v55 = vpop.f32.mrf.mxu3 }
 0x512   : > { %v5834_v57 = vadd.f32 %v5833_v55, %v9489_v40 }
 0x513   : > { %v5813_v49 = vpop.f32.mrf.mxu2 }
 0x514   : > { %v5814_v62 = vadd.f32 %v5813_v49, %v9487_v11  ;;  %v5938_v38 = vmax.f32 %v5834_v57, 0.0  ;;  %v790_v49 = vrot.slane %v780_v44, 6 }
 0x516   : > { %v5949_v28 = vmax.f32 %v5814_v62, 0.0  ;;  %v768_v62 = vrot.slane %v764_v6, 3  ;;  %v792_v30 = vsel %vm669_vm13, %v790_v49, %v791_v53 }
 0x517   : > { %vm800_vm8 = vcmp.ne.s32.totalorder %v792_v30, 0 }
 0x518   : > { %6100 = vmatpush.msrb.mxu2 %v5949_v28  ;;  %vm772_vm6 = vcmp.ne.s32.totalorder %v768_v62, 0 }
 0x519   : > { %v5836_v46 = vpop.f32.mrf.mxu3  ;;  %vm776_vm7 = vmand %vm756_vm5, %vm772_vm6 }
 0x51a   : > { %6101 = vmatpush.msrb.mxu2 %v5937_v16  ;;  %v5837_v15 = vadd.f32 %v5836_v46, %v9487_v11  ;;  %vm804_vm11 = vmand %vm776_vm7, %vm800_vm8 }
 0x51b   : > { %6557 = vmatmul.msk.f32.vlgmr.msrb.gmra.mxu2 %vm5962_vm10, %v9496_v45  ;;  %v6476_v46 = vsel %vm804_vm11, 1.0, %v6753_v25 }
 0x51c   : > { %v5950_v22 = vmax.f32 %v5837_v15, 0.0  ;;  %v6214_v15 = vsel %vm6206_vm9, %v6476_v46, 0.0 }
 0x51e   : > { %6120 = vmatpush.msrb.mxu3 %v5950_v22  ;;  %v6215_v22 = vrot.slane %v6214_v15, 4 }
 0x520   : > { %6121 = vmatpush.msrb.mxu3 %v5938_v38 }
 0x521   : > { %6558 = vmatmul.msk.f32.vlgmr.msrb.gmra.mxu3 %vm5962_vm10, %v9496_v45 }
 0x525   : > { %v5856_v48 = vpop.f32.mrf.mxu0 }
 0x526   : > { %v5857_v36 = vadd.f32 %v5856_v48, %v9489_v40  ;;  %v6216_v48 = vadd.f32 %v6215_v22, %v6214_v15 }
 0x528   : > { %v5939_v42 = vmax.f32 %v5857_v36, 0.0 }
 0x52b   : > { %v5879_v5 = vpop.f32.mrf.mxu1 }
 0x52c   : > { %v5880_v9 = vadd.f32 %v5879_v5, %v9489_v40 }
 0x52d   : > { %v5859_v41 = vpop.f32.mrf.mxu0 }
 0x52e   : > { %v5860_v58 = vadd.f32 %v5859_v41, %v9487_v11  ;;  %v5940_v43 = vmax.f32 %v5880_v9, 0.0  ;;  %v6217_v41 = vrot.slane %v6216_v48, 2 }
 0x530   : > { %v5951_v32 = vmax.f32 %v5860_v58, 0.0 }
 0x532   : > { %6140 = vmatpush.msra.mxu0 %v5951_v32 }
 0x533   : > { %v5882_v59 = vpop.f32.mrf.mxu1 }
 0x534   : > { %6141 = vmatpush.msra.mxu0 %v5939_v42  ;;  %v5883_v3 = vadd.f32 %v5882_v59, %v9487_v11 }
 0x535   : > { %6559 = vmatmul.msk.f32.vlgmr.msra.gmra.mxu0 %vm5962_vm10, %v9496_v45 }
 0x536   : > { %v5952_v12 = vmax.f32 %v5883_v3, 0.0 }
 0x538   : > { %6160 = vmatpush.msra.mxu1 %v5952_v12 }
 0x53a   : > { %6161 = vmatpush.msra.mxu1 %v5940_v43 }
 0x53b   : > { %6560 = vmatmul.msk.f32.vlgmr.msra.gmra.mxu1 %vm5962_vm10, %v9496_v45 }
 0x555   : > { %v5983_v9 = vpop.f32.mrf.mxu0 }
 0x556   : > { %v5984_v56 = vadd.f32 %v5983_v9, %v9598_v34  ;;  %v6249_v9 = vperm.slane %v9446_v54, 0 }
 0x567   : > { %v5902_v39 = vpop.f32.mrf.mxu2 }
 0x568   : > { %v5903_v0 = vadd.f32 %v5902_v39, %v9489_v40 }
 0x56a   : > { %v5941_v20 = vmax.f32 %v5903_v0, 0.0 }
 0x56f   : > { %v5905_v27 = vpop.f32.mrf.mxu2 }
 0x570   : > { %v5925_v29 = vpop.f32.mrf.mxu3  ;;  %v5906_v35 = vadd.f32 %v5905_v27, %v9487_v11 }
 0x571   : > { %v5926_v14 = vadd.f32 %v5925_v29, %v9489_v40 }
 0x572   : > { %v5953_v24 = vmax.f32 %v5906_v35, 0.0 }
 0x573   : > { %v5942_v28 = vmax.f32 %v5926_v14, 0.0  ;;  %v6063_v43 = vpop.f32.mrf.mxu0 }
 0x574   : > { %6180 = vmatpush.msra.mxu2 %v5953_v24  ;;  %v6064_v52 = vadd.f32 %v6063_v43, %v9598_v34 }
 0x576   : > { %6181 = vmatpush.msra.mxu2 %v5941_v20 }
 0x577   : > { %6561 = vmatmul.msk.f32.vlgmr.msra.gmra.mxu2 %vm5962_vm10, %v9496_v45 }
 0x578   : > { %v5928_v2 = vpop.f32.mrf.mxu3 }
 0x579   : > { %v5929_v17 = vadd.f32 %v5928_v2, %v9487_v11  ;;  %v6475_v11 = vsel %vm803_vm4, 1.0, %v6753_v25  ;;  %v6003_v25 = vpop.f32.mrf.mxu1 }
 0x57a   : > { %v6207_v40 = vsel %vm6206_vm9, %v6475_v11, 0.0  ;;  %v6004_v23 = vadd.f32 %v6003_v25, %v9598_v34 }
 0x57b   : > { %v5954_v55 = vmax.f32 %v5929_v17, 0.0  ;;  %v6208_v16 = vrot.slane %v6207_v40, 4 }
 0x57d   : > { %6200 = vmatpush.msra.mxu3 %v5954_v55  ;;  %v6209_v57 = vadd.f32 %v6208_v16, %v6207_v40 }
 0x57f   : > { %6201 = vmatpush.msra.mxu3 %v5942_v28  ;;  %v6210_v38 = vrot.slane %v6209_v57, 2 }
 0x580   : > { %6562 = vmatmul.msk.f32.vlgmr.msra.gmra.mxu3 %vm5962_vm10, %v9496_v45  ;;  %v6218_v45 = vadd.f32 %v6217_v41, %v6216_v48 }
 0x581   : > { %v6211_v5 = vadd.f32 %v6210_v38, %v6209_v57  ;;  %v6083_v35 = vpop.f32.mrf.mxu1 }
 0x582   : > { %v6219_v32 = vrot.slane %v6218_v45, 1  ;;  %v6084_v47 = vadd.f32 %v6083_v35, %v9598_v34  ;;  %v6258_v35 = vperm.slane %v9443_v18, 1 }
 0x583   : > { %v6212_v36 = vrot.slane %v6211_v5, 1 }
 0x584   : > { %v6220_v59 = vadd.f32 %v6219_v32, %v6218_v45 }
 0x585   : > { %v6213_v58 = vadd.f32 %v6212_v36, %v6211_v5  ;;  %v6023_v36 = vpop.f32.mrf.mxu2 }
 0x586   : > { %v6236_v3 = vadd.f32 1e-08, %v6220_v59  ;;  %v6257_v59 = vperm.slane %v9446_v54, 1 }
 0x587   : > { %v6235_v42 = vadd.f32 1e-08, %v6213_v58  ;;  %v6043_v58 = vpop.f32.mrf.mxu3 }
 0x589   : > { %6653 = vrcp.f32 %v6235_v42  ;;  %v6024_v42 = vadd.f32 %v6023_v36, %v9598_v34 }
 0x58a   : > { %6655 = vrcp.f32 %v6236_v3 }
 0x58b   : > { %v6253_v25 = vmul.f32 %v6249_v9, %v6024_v42 }
 0x58f   : > { %v6654_v12 = vpop.eup %6653 }
 0x590   : > { %v6243_v39 = vmul.f32 %v6654_v12, %v6475_v11  ;;  %v6656_v63 = vpop.eup %6655 }
 0x591   : > { %v6244_v8 = vmul.f32 %v6656_v63, %v6476_v46 }
 0x592   : > { %v6255_v27 = vperm.slane %v6243_v39, 1  ;;  %v6247_v0 = vperm.slane %v6243_v39, 0  ;;  %v6267_v24 = vperm.slane %v6243_v39, 2 }
 0x593   : > { %v6256_v21 = vperm.slane %v6244_v8, 1  ;;  %v6248_v61 = vperm.slane %v6244_v8, 0  ;;  %v6268_v2 = vperm.slane %v6244_v8, 2 }
 0x594   : > { %v6259_v29 = vmul.f32 %v6255_v27, %v6064_v52  ;;  %v6251_v10 = vmul.f32 %v6247_v0, %v5984_v56 }
 0x595   : > { %v6260_v7 = vmul.f32 %v6256_v21, %v6084_v47  ;;  %v6252_v26 = vmul.f32 %v6248_v61, %v6004_v23 }
 0x596   : > { %v6263_v37 = vadd.f32 %v6259_v29, %v6251_v10  ;;  %v6044_v29 = vadd.f32 %v6043_v58, %v9598_v34 }
 0x597   : > { %v6264_v17 = vadd.f32 %v6260_v7, %v6252_v26 }
 0x59e   : > { %v6103_v45 = vpop.f32.mrf.mxu2 }
 0x59f   : > { %v6104_v32 = vadd.f32 %v6103_v45, %v9598_v34 }
 0x5a1   : > { %v6261_v3 = vmul.f32 %v6257_v59, %v6104_v32 }
 0x5a3   : > { %v6265_v63 = vadd.f32 %v6261_v3, %v6253_v25 }
 0x5a4   : > { %v6123_v43 = vpop.f32.mrf.mxu3 }
 0x5b2   : > { %v6143_v13 = vpop.f32.mrf.mxu0 }
 0x5b3   : > { %v6144_v19 = vadd.f32 %v6143_v13, %v9598_v34 }
 0x5b5   : > { %v6271_v31 = vmul.f32 %v6267_v24, %v6144_v19 }
 0x5b7   : > { %v6275_v20 = vadd.f32 %v6271_v31, %v6263_v37 }
 0x5b8   : > { %v6163_v44 = vpop.f32.mrf.mxu1 }
 0x5b9   : > { %v6279_v60 = vsub.f32 %v5984_v56, %v6275_v20  ;;  %v6295_v4 = vsub.f32 %v6064_v52, %v6275_v20  ;;  %v6311_v1 = vsub.f32 %v6144_v19, %v6275_v20  ;;  %6327 = vst [vmem:[%s9608_s24] sm:$0xff] %v6275_v20  ;;  %v6164_v50 = vadd.f32 %v6163_v44, %v9598_v34 }
 0x5ba   : > { %v6269_v52 = vperm.slane %v9446_v54, 2  ;;  %v6250_v19 = vperm.slane %v9443_v18, 0  ;;  %v6270_v20 = vperm.slane %v9443_v18, 2 }
 0x5bb   : > { %v6283_v33 = vmul.f32 %v6279_v60, %v6279_v60  ;;  %v6299_v6 = vmul.f32 %v6295_v4, %v6295_v4  ;;  %v6315_v14 = vmul.f32 %v6311_v1, %v6311_v1  ;;  %v6272_v51 = vmul.f32 %v6268_v2, %v6164_v50 }
 0x5bd   : > { %v6287_v55 = vmul.f32 %v6283_v33, %v6247_v0  ;;  %v6303_v49 = vmul.f32 %v6299_v6, %v6255_v27  ;;  %v6276_v53 = vadd.f32 %v6272_v51, %v6264_v17  ;;  %v6319_v28 = vmul.f32 %v6315_v14, %v6267_v24 }
 0x5be   : > { %v6124_v27 = vadd.f32 %v6123_v43, %v9598_v34 }
 0x5bf   : > { %v6307_v62 = vadd.f32 %v6303_v49, %v6287_v55  ;;  %v6280_v30 = vsub.f32 %v6004_v23, %v6276_v53  ;;  %v6296_v11 = vsub.f32 %v6084_v47, %v6276_v53  ;;  %v6312_v40 = vsub.f32 %v6164_v50, %v6276_v53  ;;  %6328 = vst [vmem:[%s9608_s24 + $0x8] sm:$0xff] %v6276_v53 }
 0x5c0   : > { %v6262_v24 = vmul.f32 %v6258_v35, %v6124_v27  ;;  %v6254_v23 = vmul.f32 %v6250_v19, %v6044_v29 }
 0x5c1   : > { %v6323_v16 = vadd.f32 %v6319_v28, %v6307_v62  ;;  %v6284_v46 = vmul.f32 %v6280_v30, %v6280_v30  ;;  %v6300_v57 = vmul.f32 %v6296_v11, %v6296_v11  ;;  %v6316_v15 = vmul.f32 %v6312_v40, %v6312_v40 }
 0x5c2   : > { %v6266_v60 = vadd.f32 %v6262_v24, %v6254_v23 }
 0x5c3   : > { %6331 = vst [vmem:[%s9608_s24 + $0x20] sm:$0xff] %v6323_v16  ;;  %v6288_v22 = vmul.f32 %v6284_v46, %v6248_v61  ;;  %v6304_v38 = vmul.f32 %v6300_v57, %v6256_v21  ;;  %v6320_v5 = vmul.f32 %v6316_v15, %v6268_v2 }
 0x5c5   : > { %v6308_v48 = vadd.f32 %v6304_v38, %v6288_v22 }
 0x5c7   : > { %v6324_v41 = vadd.f32 %v6320_v5, %v6308_v48 }
 0x5c9   : > { %6332 = vst [vmem:[%s9608_s24 + $0x28] sm:$0xff] %v6324_v41 }
 0x5fa   : > { %v6183_v12 = vpop.f32.mrf.mxu2 }
 0x5fb   : > { %v6184_v39 = vadd.f32 %v6183_v12, %v9598_v34 }
 0x5fd   : > { %v6273_v56 = vmul.f32 %v6269_v52, %v6184_v39 }
 0x5ff   : > { %v6277_v0 = vadd.f32 %v6273_v56, %v6265_v63 }
 0x601   : > { %v6281_v8 = vsub.f32 %v6024_v42, %v6277_v0  ;;  %v6297_v13 = vsub.f32 %v6104_v32, %v6277_v0  ;;  %v6313_v10 = vsub.f32 %v6184_v39, %v6277_v0  ;;  %6329 = vst [vmem:[%s9608_s24 + $0x10] sm:$0xff] %v6277_v0 }
 0x603   : > { %v6285_v47 = vmul.f32 %v6281_v8, %v6281_v8  ;;  %v6301_v37 = vmul.f32 %v6297_v13, %v6297_v13  ;;  %v6317_v54 = vmul.f32 %v6313_v10, %v6313_v10  ;;  %v6203_v31 = vpop.f32.mrf.mxu3 }
 0x604   : > { %v6204_v21 = vadd.f32 %v6203_v31, %v9598_v34 }
 0x605   : > { %v6289_v61 = vmul.f32 %v6285_v47, %v6249_v9  ;;  %v6305_v7 = vmul.f32 %v6301_v37, %v6257_v59  ;;  %v6321_v44 = vmul.f32 %v6317_v54, %v6269_v52 }
 0x606   : > { %v6274_v4 = vmul.f32 %v6270_v20, %v6204_v21 }
 0x607   : > { %v6309_v1 = vadd.f32 %v6305_v7, %v6289_v61 }
 0x608   : > { %v6278_v26 = vadd.f32 %v6274_v4, %v6266_v60 }
 0x609   : > { %v6325_v50 = vadd.f32 %v6321_v44, %v6309_v1 }
 0x60a   : > { %v6282_v2 = vsub.f32 %v6044_v29, %v6278_v26  ;;  %v6298_v33 = vsub.f32 %v6124_v27, %v6278_v26  ;;  %v6314_v6 = vsub.f32 %v6204_v21, %v6278_v26  ;;  %6330 = vst [vmem:[%s9608_s24 + $0x18] sm:$0xff] %v6278_v26 }
 0x60b   : > { %6333 = vst [vmem:[%s9608_s24 + $0x30] sm:$0xff] %v6325_v50 }
 0x60c   : > { %v6286_v34 = vmul.f32 %v6282_v2, %v6282_v2  ;;  %v6302_v14 = vmul.f32 %v6298_v33, %v6298_v33  ;;  %v6318_v18 = vmul.f32 %v6314_v6, %v6314_v6 }
 0x60e   : > { %v6290_v17 = vmul.f32 %v6286_v34, %v6250_v19  ;;  %v6306_v51 = vmul.f32 %v6302_v14, %v6258_v35  ;;  %v6322_v49 = vmul.f32 %v6318_v18, %v6270_v20 }
 0x610   : > { %v6310_v55 = vadd.f32 %v6306_v51, %v6290_v17 }
 0x612   : > { %v6326_v53 = vadd.f32 %v6322_v49, %v6310_v55 }
 0x614   : > { %6334 = vst [vmem:[%s9608_s24 + $0x38] sm:$0xff] %v6326_v53 }
 0x615   : > { %6699 = shalt.err (!%p6696_p5)
}
 0x616   : > { %s6754_s23 = smov 512   ;;  %s6755_s24 = smov 32  }
 0x617   : > { %6571 = dma.vmem_to_hbm [thread:$0]  (%p6846_p4), %s6351_s29, 1024, %s6353_s15, %s6336_s12, %s6754_s23, %s6754_s23, %s6755_s24  }
 0x618 PF: > { %p6577_p6 = scmp.ge.s32.totalorder %s6750_s14, 2  ;;  %s6367_s26 = sand.u32 1, %s6730_s30  }
 0x619   : > { %s6368_s20 = scalar_lea.sflag [#allocation4], %s6367_s26 }
 0x61a   : > { %p6574_p7 = pnand %p6577_p6, %p6853_p8 }
 0x61c   : > { %p6575_p9 = pneg %p6574_p7 }
 0x61e   : > { %6725 = dma.done.wait (%p6575_p9), %s6368_s20, 1024  }
 0x61f   : > { %6727 = vsyncadd (%p6575_p9), %s6368_s20, 4294966272  ;;  %s22_s14 = sadd.s32 1, %s6750_s14   ;;  %s10269_s30 = smov %s6734_s10 }
 0x620   : > { %p19_p10 = scmp.ge.s32.totalorder %s22_s14, 4   ;;  %s10270_s10 = smov %s6738_s11 }
 0x621   : > { %s10271_s11 = smov %s6859_s22  ;;  %s10272_s12 = smov %s6746_s13 }
 0x622   : > { %s10273_s13 = smov %s10275_s17  ;;  %21 = sbr.rel (!%p19_p10) target bundleno = 4 (0x4), region = 101 }
 0x627   :  { %6374 = vsyncpa [#allocation4], 1 }
 0x628   :  { %6376 = vsyncpa [#allocation4 + $0x1], 1 }

</bundles_post_ra>
